<compile_context>
chip_gen: v7x
topology: tpu7x:2x2x1
jax: 0.10.0
libtpu: 0.0.40
codegen_flags: <defaults>
</compile_context>

<pallas_src>
import functools

import jax
import jax.numpy as jnp
from jax import lax
from jax.experimental import pallas as pl
from jax.experimental.pallas import tpu as pltpu

LN_EPS = 1e-5
_VMEM_BUDGET_BYTES = 26 * 1024 * 1024   # per-step working-set target
_MAX_ROWS = 1024                        # output voxels per grid step
_MIN_STEPS = 8                          # >= 4 steps per TensorCore on v7x


def _downsample_kernel(x00_ref, x01_ref, x10_ref, x11_ref, w_ref, b_ref,
                       o_ref, *, c, mxu_dtype):
    """One grid step: fused LayerNorm + 2x2x2 patch-merge conv.

    x??_ref : (tb, th, Wo, 2C) input window for tap (kd, kh); last dim holds
              the kw=0 channels then the kw=1 channels of each output voxel.
    w_ref   : (8, C, 2C) bf16  flattened conv weight, tap index kd*4+kh*2+kw,
              with LayerNorm gamma folded into its rows.
    b_ref   : (1, 2C) f32      conv bias with LayerNorm beta folded in.
    o_ref   : (tb, th, Wo, 2C) output window.
    """
    f32 = jnp.float32
    tb, th, wo, c2 = x00_ref.shape
    rows = tb * th * wo
    f = o_ref.shape[-1]

    acc = jnp.zeros((rows, f), f32)
    for t, tap_ref in enumerate((x00_ref, x01_ref, x10_ref, x11_ref)):
        # t = kd*2 + kh.  Collapse leading dims to one lane-dense row block.
        v = tap_ref[...].astype(f32).reshape(rows, c2)            # (rows, 2C)
        for kw in range(2):
            xv = v[:, kw * c:(kw + 1) * c]                        # (rows, C)
            # LayerNorm stats: lane reductions (XLU), no MXU, all f32.
            mean = jnp.mean(xv, axis=-1, keepdims=True)
            var = jnp.mean(xv * xv, axis=-1, keepdims=True) - mean * mean
            rstd = lax.rsqrt(jnp.maximum(var, 0.0) + LN_EPS)
            xn = ((xv - mean) * rstd).astype(mxu_dtype)
            # One (rows, C) x (C, 2C) MXU matmul per tap, f32 accumulation.
            acc = acc + jnp.dot(xn, w_ref[2 * t + kw],
                                preferred_element_type=f32)
    y = acc + b_ref[...]
    o_ref[...] = y.reshape(tb, th, wo, f).astype(o_ref.dtype)


def _divisors(n):
    return [d for d in range(1, n + 1) if n % d == 0]


def downsample_conv(x, gamma, beta, conv_w, conv_b, *, mxu_dtype=jnp.bfloat16):
    """x: (B, D, H, W, C) -> (B, D//2, H//2, W//2, 2C)."""
    B, D, H, W, C = x.shape
    assert D % 2 == 0 and H % 2 == 0 and W % 2 == 0
    Do, Ho, Wo = D // 2, H // 2, W // 2
    BD = B * Do
    F = 2 * C
    out_dtype = x.dtype
    item = jnp.dtype(x.dtype).itemsize

    # ---- block-size selection (VMEM-aware, keeps >= _MIN_STEPS grid steps) --
    def vmem_bytes(rows):
        return (4 * 2 * rows * F * item        # 4 tap streams, double-buffered
                + 2 * rows * F * item          # output double buffer
                + 8 * C * F * 2 + 4 * F        # resident bf16 weight + bias
                + 4 * rows * F * 4             # f32 temporaries (tile, xn, ...)
                + rows * F * 4)                # f32 accumulator

    best = None
    for th in _divisors(Ho):
        for tb in _divisors(BD):
            rows = tb * th * Wo
            feasible = (rows <= _MAX_ROWS
                        and vmem_bytes(rows) <= _VMEM_BUDGET_BYTES)
            if not feasible and (tb, th) != (1, 1):
                continue
            steps = (BD // tb) * (Ho // th)
            key = (feasible, steps >= _MIN_STEPS, rows, th)
            if best is None or key > best[0]:
                best = (key, tb, th)
    _, tbd, th = best
    rows = tbd * th * Wo
    grid = (BD // tbd, Ho // th)

    # ---- free view + parameter folding (layout plumbing only) --------------
    # (B,D,H,W,C) -> (B*Do, 2, Ho, 2, Wo, 2C): splits D/H/W into (out, tap)
    # pairs and merges (kw, C) -> 2C; no transpose, hence no data movement.
    xv = x.reshape(BD, 2, Ho, 2, Wo, 2 * C)

    # Conv weight (2C, C, 2, 2, 2) -> (kd, kh, kw, C_in, 2C) -> (8, C, 2C).
    w_taps = jnp.transpose(conv_w, (2, 3, 4, 1, 0)).reshape(8, C, F)
    w_taps = w_taps.astype(jnp.float32)
    # Fold LayerNorm affine into the conv:  (xn*gamma + beta) @ W
    #   = xn @ (gamma[:,None]*W)  +  beta @ sum_taps(W).
    bias = (conv_b.astype(jnp.float32)
            + beta.astype(jnp.float32) @ jnp.sum(w_taps, axis=0))
    w_taps = (w_taps * gamma.astype(jnp.float32)[None, :, None]).astype(mxu_dtype)
    bias = bias.reshape(1, F)

    kernel = functools.partial(_downsample_kernel, c=C, mxu_dtype=mxu_dtype)

    def tap_spec(kd, kh):
        return pl.BlockSpec(
            (tbd, None, th, None, Wo, 2 * C),
            lambda i, j, kd=kd, kh=kh: (i, kd, j, kh, 0, 0))

    vmem_limit = int(min(max(2 * vmem_bytes(rows), 20 * 1024 * 1024),
                         40 * 1024 * 1024))

    out = pl.pallas_call(
        kernel,
        out_shape=jax.ShapeDtypeStruct((BD, Ho, Wo, F), out_dtype),
        grid_spec=pltpu.PrefetchScalarGridSpec(
            num_scalar_prefetch=0,
            grid=grid,
            in_specs=[
                tap_spec(0, 0), tap_spec(0, 1), tap_spec(1, 0), tap_spec(1, 1),
                pl.BlockSpec((8, C, F), lambda i, j: (0, 0, 0)),   # weight
                pl.BlockSpec((1, F), lambda i, j: (0, 0)),         # bias
            ],
            out_specs=pl.BlockSpec((tbd, th, Wo, F),
                                   lambda i, j: (i, j, 0, 0)),
        ),
        compiler_params=pltpu.CompilerParams(
            dimension_semantics=("parallel", "parallel"),
            vmem_limit_bytes=vmem_limit),
    )(xv, xv, xv, xv, w_taps, bias)

    return out.reshape(B, Do, Ho, Wo, F)


def downsample_conv_ref(x, gamma, beta, conv_w, conv_b):
    """Pure-JAX f32 reference matching the PyTorch module."""
    mean = jnp.mean(x, axis=-1, keepdims=True)
    var = jnp.mean((x - mean) ** 2, axis=-1, keepdims=True)
    xn = (x - mean) / jnp.sqrt(var + LN_EPS) * gamma + beta
    xc = jnp.transpose(xn, (0, 4, 1, 2, 3))                        # b c d h w
    y = lax.conv_general_dilated(
        xc, conv_w, window_strides=(2, 2, 2), padding="VALID",
        dimension_numbers=("NCDHW", "OIDHW", "NCDHW"),
        precision=lax.Precision.HIGHEST)
    y = y + conv_b[None, :, None, None, None]
    return jnp.transpose(y, (0, 2, 3, 4, 1))                       # b d h w c


if __name__ == "__main__":
    key = jax.random.PRNGKey(0)
    # Small but layout-friendly: C=64 -> 2C = 128 (lane-dense output), and
    # Wo = W//2 = 8 so every in-kernel reshape is a free layout no-op.
    B, D, H, W, C = 2, 32, 16, 16, 64

    k_x, k_g, k_bt, k_w, k_b = jax.random.split(key, 5)
    x = jax.random.normal(k_x, (B, D, H, W, C), dtype=jnp.float32)
    gamma = 1.0 + 0.1 * jax.random.normal(k_g, (C,), dtype=jnp.float32)
    beta = 0.1 * jax.random.normal(k_bt, (C,), dtype=jnp.float32)

    fan_in = C * 2 * 2 * 2
    conv_w = jax.random.normal(k_w, (2 * C, C, 2, 2, 2),
                               dtype=jnp.float32) / jnp.sqrt(fan_in)
    conv_b = 0.01 * jax.random.normal(k_b, (2 * C,), dtype=jnp.float32)

    fn = jax.jit(downsample_conv)
    out = jax.block_until_ready(fn(x, gamma, beta, conv_w, conv_b))
    ref = jax.block_until_ready(downsample_conv_ref(x, gamma, beta, conv_w, conv_b))

    assert out.shape == (B, D // 2, H // 2, W // 2, 2 * C), out.shape
    assert bool(jnp.isfinite(out).all())

    # MXU inputs are bf16 (f32 accumulation); LN stats are f32 -> compare at
    # bf16-level tolerance.
    diff = (out - ref).astype(jnp.float32)
    max_abs = float(jnp.max(jnp.abs(diff)))
    rel = float(jnp.linalg.norm(diff) /
                jnp.linalg.norm(ref.astype(jnp.float32)))
    assert max_abs < 5e-2 and rel < 2e-2, (max_abs, rel)
    print("KERNEL_OK")
</pallas_src>

<mosaic_0001>
module attributes {stable_mosaic.version = 11 : i64} {
  func.func @_downsample_kernel(%arg0: i32, %arg1: i32, %arg2: memref<4x1x8x1x8x128xf32, #tpu.memory_space<vmem>>, %arg3: memref<4x1x8x1x8x128xf32, #tpu.memory_space<vmem>>, %arg4: memref<4x1x8x1x8x128xf32, #tpu.memory_space<vmem>>, %arg5: memref<4x1x8x1x8x128xf32, #tpu.memory_space<vmem>>, %arg6: memref<8x64x128xbf16, #tpu.memory_space<vmem>>, %arg7: memref<1x128xf32, #tpu.memory_space<vmem>>, %arg8: memref<4x8x8x128xf32, #tpu.memory_space<vmem>>) attributes {dimension_semantics = [#tpu.dimension_semantics<parallel>, #tpu.dimension_semantics<parallel>], iteration_bounds = array<i64: 8, 1>, scalar_prefetch = 0 : i64, scratch_operands = 0 : i64, tpu.core_type = #tpu.core_type<tc>, window_params = [{transform_indices = @transform_0, window_bounds = array<i64: 4, 1, 8, 1, 8, 128>}, {transform_indices = @transform_1, window_bounds = array<i64: 4, 1, 8, 1, 8, 128>}, {transform_indices = @transform_2, window_bounds = array<i64: 4, 1, 8, 1, 8, 128>}, {transform_indices = @transform_3, window_bounds = array<i64: 4, 1, 8, 1, 8, 128>}, {pipeline_mode = #tpu.pipeline_mode<synchronous>, transform_indices = @transform_4, window_bounds = array<i64: 8, 64, 128>}, {pipeline_mode = #tpu.pipeline_mode<synchronous>, transform_indices = @transform_5, window_bounds = array<i64: 1, 128>}, {transform_indices = @transform_6, window_bounds = array<i64: 4, 8, 8, 128>}]} {
    %cst = arith.constant 0.000000e+00 : f32
    %0 = vector.broadcast %cst : f32 to vector<256x128xf32>
    %c0 = arith.constant 0 : index
    %c0_0 = arith.constant 0 : index
    %c0_1 = arith.constant 0 : index
    %c0_2 = arith.constant 0 : index
    %c0_3 = arith.constant 0 : index
    %c0_4 = arith.constant 0 : index
    %1 = vector.load %arg2[%c0, %c0_0, %c0_1, %c0_2, %c0_3, %c0_4] : memref<4x1x8x1x8x128xf32, #tpu.memory_space<vmem>>, vector<4x1x8x1x8x128xf32>
    %2 = vector.shape_cast %1 : vector<4x1x8x1x8x128xf32> to vector<4x8x8x128xf32>
    %3 = vector.shape_cast %2 : vector<4x8x8x128xf32> to vector<256x128xf32>
    %4 = vector.extract_strided_slice %3 {offsets = [0, 0], sizes = [256, 64], strides = [1, 1]} : vector<256x128xf32> to vector<256x64xf32>
    %cst_5 = arith.constant dense<0.000000e+00> : vector<256xf32>
    %5 = vector.multi_reduction <add>, %4, %cst_5 [1] : vector<256x64xf32> to vector<256xf32>
    %6 = vector.shape_cast %5 : vector<256xf32> to vector<256x1xf32>
    %cst_6 = arith.constant 6.400000e+01 : f32
    %7 = vector.broadcast %cst_6 : f32 to vector<256x1xf32>
    %8 = arith.divf %6, %7 : vector<256x1xf32>
    %9 = arith.mulf %4, %4 : vector<256x64xf32>
    %cst_7 = arith.constant dense<0.000000e+00> : vector<256xf32>
    %10 = vector.multi_reduction <add>, %9, %cst_7 [1] : vector<256x64xf32> to vector<256xf32>
    %11 = vector.shape_cast %10 : vector<256xf32> to vector<256x1xf32>
    %cst_8 = arith.constant 6.400000e+01 : f32
    %12 = vector.broadcast %cst_8 : f32 to vector<256x1xf32>
    %13 = arith.divf %11, %12 : vector<256x1xf32>
    %14 = arith.mulf %8, %8 : vector<256x1xf32>
    %15 = arith.subf %13, %14 : vector<256x1xf32>
    %cst_9 = arith.constant 0.000000e+00 : f32
    %16 = vector.broadcast %cst_9 : f32 to vector<256x1xf32>
    %17 = arith.maximumf %15, %16 : vector<256x1xf32>
    %cst_10 = arith.constant 9.99999974E-6 : f32
    %18 = vector.broadcast %cst_10 : f32 to vector<256x1xf32>
    %19 = arith.addf %17, %18 : vector<256x1xf32>
    %20 = math.rsqrt %19 : vector<256x1xf32>
    %21 = vector.broadcast %8 : vector<256x1xf32> to vector<256x64xf32>
    %22 = arith.subf %4, %21 : vector<256x64xf32>
    %23 = vector.broadcast %20 : vector<256x1xf32> to vector<256x64xf32>
    %24 = arith.mulf %22, %23 : vector<256x64xf32>
    %25 = arith.truncf %24 : vector<256x64xf32> to vector<256x64xbf16>
    %c0_11 = arith.constant 0 : index
    %c0_12 = arith.constant 0 : index
    %c0_13 = arith.constant 0 : index
    %26 = vector.load %arg6[%c0_11, %c0_12, %c0_13] : memref<8x64x128xbf16, #tpu.memory_space<vmem>>, vector<1x64x128xbf16>
    %27 = vector.shape_cast %26 : vector<1x64x128xbf16> to vector<64x128xbf16>
    %cst_14 = arith.constant dense<0.000000e+00> : vector<256x128xf32>
    %28 = tpu.matmul %25, %27, %cst_14 {dimension_numbers = #tpu.dot_dimension_numbers<[1], [0], [0], [1], [0, 0, 1, 1], [], []>} : vector<256x64xbf16>, vector<64x128xbf16>, vector<256x128xf32> -> vector<256x128xf32>
    %29 = arith.addf %0, %28 : vector<256x128xf32>
    %30 = vector.extract_strided_slice %3 {offsets = [0, 64], sizes = [256, 64], strides = [1, 1]} : vector<256x128xf32> to vector<256x64xf32>
    %cst_15 = arith.constant dense<0.000000e+00> : vector<256xf32>
    %31 = vector.multi_reduction <add>, %30, %cst_15 [1] : vector<256x64xf32> to vector<256xf32>
    %32 = vector.shape_cast %31 : vector<256xf32> to vector<256x1xf32>
    %cst_16 = arith.constant 6.400000e+01 : f32
    %33 = vector.broadcast %cst_16 : f32 to vector<256x1xf32>
    %34 = arith.divf %32, %33 : vector<256x1xf32>
    %35 = arith.mulf %30, %30 : vector<256x64xf32>
    %cst_17 = arith.constant dense<0.000000e+00> : vector<256xf32>
    %36 = vector.multi_reduction <add>, %35, %cst_17 [1] : vector<256x64xf32> to vector<256xf32>
    %37 = vector.shape_cast %36 : vector<256xf32> to vector<256x1xf32>
    %cst_18 = arith.constant 6.400000e+01 : f32
    %38 = vector.broadcast %cst_18 : f32 to vector<256x1xf32>
    %39 = arith.divf %37, %38 : vector<256x1xf32>
    %40 = arith.mulf %34, %34 : vector<256x1xf32>
    %41 = arith.subf %39, %40 : vector<256x1xf32>
    %cst_19 = arith.constant 0.000000e+00 : f32
    %42 = vector.broadcast %cst_19 : f32 to vector<256x1xf32>
    %43 = arith.maximumf %41, %42 : vector<256x1xf32>
    %cst_20 = arith.constant 9.99999974E-6 : f32
    %44 = vector.broadcast %cst_20 : f32 to vector<256x1xf32>
    %45 = arith.addf %43, %44 : vector<256x1xf32>
    %46 = math.rsqrt %45 : vector<256x1xf32>
    %47 = vector.broadcast %34 : vector<256x1xf32> to vector<256x64xf32>
    %48 = arith.subf %30, %47 : vector<256x64xf32>
    %49 = vector.broadcast %46 : vector<256x1xf32> to vector<256x64xf32>
    %50 = arith.mulf %48, %49 : vector<256x64xf32>
    %51 = arith.truncf %50 : vector<256x64xf32> to vector<256x64xbf16>
    %c1 = arith.constant 1 : index
    %c0_21 = arith.constant 0 : index
    %c0_22 = arith.constant 0 : index
    %52 = vector.load %arg6[%c1, %c0_21, %c0_22] : memref<8x64x128xbf16, #tpu.memory_space<vmem>>, vector<1x64x128xbf16>
    %53 = vector.shape_cast %52 : vector<1x64x128xbf16> to vector<64x128xbf16>
    %cst_23 = arith.constant dense<0.000000e+00> : vector<256x128xf32>
    %54 = tpu.matmul %51, %53, %cst_23 {dimension_numbers = #tpu.dot_dimension_numbers<[1], [0], [0], [1], [0, 0, 1, 1], [], []>} : vector<256x64xbf16>, vector<64x128xbf16>, vector<256x128xf32> -> vector<256x128xf32>
    %55 = arith.addf %29, %54 : vector<256x128xf32>
    %c0_24 = arith.constant 0 : index
    %c0_25 = arith.constant 0 : index
    %c0_26 = arith.constant 0 : index
    %c0_27 = arith.constant 0 : index
    %c0_28 = arith.constant 0 : index
    %c0_29 = arith.constant 0 : index
    %56 = vector.load %arg3[%c0_24, %c0_25, %c0_26, %c0_27, %c0_28, %c0_29] : memref<4x1x8x1x8x128xf32, #tpu.memory_space<vmem>>, vector<4x1x8x1x8x128xf32>
    %57 = vector.shape_cast %56 : vector<4x1x8x1x8x128xf32> to vector<4x8x8x128xf32>
    %58 = vector.shape_cast %57 : vector<4x8x8x128xf32> to vector<256x128xf32>
    %59 = vector.extract_strided_slice %58 {offsets = [0, 0], sizes = [256, 64], strides = [1, 1]} : vector<256x128xf32> to vector<256x64xf32>
    %cst_30 = arith.constant dense<0.000000e+00> : vector<256xf32>
    %60 = vector.multi_reduction <add>, %59, %cst_30 [1] : vector<256x64xf32> to vector<256xf32>
    %61 = vector.shape_cast %60 : vector<256xf32> to vector<256x1xf32>
    %cst_31 = arith.constant 6.400000e+01 : f32
    %62 = vector.broadcast %cst_31 : f32 to vector<256x1xf32>
    %63 = arith.divf %61, %62 : vector<256x1xf32>
    %64 = arith.mulf %59, %59 : vector<256x64xf32>
    %cst_32 = arith.constant dense<0.000000e+00> : vector<256xf32>
    %65 = vector.multi_reduction <add>, %64, %cst_32 [1] : vector<256x64xf32> to vector<256xf32>
    %66 = vector.shape_cast %65 : vector<256xf32> to vector<256x1xf32>
    %cst_33 = arith.constant 6.400000e+01 : f32
    %67 = vector.broadcast %cst_33 : f32 to vector<256x1xf32>
    %68 = arith.divf %66, %67 : vector<256x1xf32>
    %69 = arith.mulf %63, %63 : vector<256x1xf32>
    %70 = arith.subf %68, %69 : vector<256x1xf32>
    %cst_34 = arith.constant 0.000000e+00 : f32
    %71 = vector.broadcast %cst_34 : f32 to vector<256x1xf32>
    %72 = arith.maximumf %70, %71 : vector<256x1xf32>
    %cst_35 = arith.constant 9.99999974E-6 : f32
    %73 = vector.broadcast %cst_35 : f32 to vector<256x1xf32>
    %74 = arith.addf %72, %73 : vector<256x1xf32>
    %75 = math.rsqrt %74 : vector<256x1xf32>
    %76 = vector.broadcast %63 : vector<256x1xf32> to vector<256x64xf32>
    %77 = arith.subf %59, %76 : vector<256x64xf32>
    %78 = vector.broadcast %75 : vector<256x1xf32> to vector<256x64xf32>
    %79 = arith.mulf %77, %78 : vector<256x64xf32>
    %80 = arith.truncf %79 : vector<256x64xf32> to vector<256x64xbf16>
    %c2 = arith.constant 2 : index
    %c0_36 = arith.constant 0 : index
    %c0_37 = arith.constant 0 : index
    %81 = vector.load %arg6[%c2, %c0_36, %c0_37] : memref<8x64x128xbf16, #tpu.memory_space<vmem>>, vector<1x64x128xbf16>
    %82 = vector.shape_cast %81 : vector<1x64x128xbf16> to vector<64x128xbf16>
    %cst_38 = arith.constant dense<0.000000e+00> : vector<256x128xf32>
    %83 = tpu.matmul %80, %82, %cst_38 {dimension_numbers = #tpu.dot_dimension_numbers<[1], [0], [0], [1], [0, 0, 1, 1], [], []>} : vector<256x64xbf16>, vector<64x128xbf16>, vector<256x128xf32> -> vector<256x128xf32>
    %84 = arith.addf %55, %83 : vector<256x128xf32>
    %85 = vector.extract_strided_slice %58 {offsets = [0, 64], sizes = [256, 64], strides = [1, 1]} : vector<256x128xf32> to vector<256x64xf32>
    %cst_39 = arith.constant dense<0.000000e+00> : vector<256xf32>
    %86 = vector.multi_reduction <add>, %85, %cst_39 [1] : vector<256x64xf32> to vector<256xf32>
    %87 = vector.shape_cast %86 : vector<256xf32> to vector<256x1xf32>
    %cst_40 = arith.constant 6.400000e+01 : f32
    %88 = vector.broadcast %cst_40 : f32 to vector<256x1xf32>
    %89 = arith.divf %87, %88 : vector<256x1xf32>
    %90 = arith.mulf %85, %85 : vector<256x64xf32>
    %cst_41 = arith.constant dense<0.000000e+00> : vector<256xf32>
    %91 = vector.multi_reduction <add>, %90, %cst_41 [1] : vector<256x64xf32> to vector<256xf32>
    %92 = vector.shape_cast %91 : vector<256xf32> to vector<256x1xf32>
    %cst_42 = arith.constant 6.400000e+01 : f32
    %93 = vector.broadcast %cst_42 : f32 to vector<256x1xf32>
    %94 = arith.divf %92, %93 : vector<256x1xf32>
    %95 = arith.mulf %89, %89 : vector<256x1xf32>
    %96 = arith.subf %94, %95 : vector<256x1xf32>
    %cst_43 = arith.constant 0.000000e+00 : f32
    %97 = vector.broadcast %cst_43 : f32 to vector<256x1xf32>
    %98 = arith.maximumf %96, %97 : vector<256x1xf32>
    %cst_44 = arith.constant 9.99999974E-6 : f32
    %99 = vector.broadcast %cst_44 : f32 to vector<256x1xf32>
    %100 = arith.addf %98, %99 : vector<256x1xf32>
    %101 = math.rsqrt %100 : vector<256x1xf32>
    %102 = vector.broadcast %89 : vector<256x1xf32> to vector<256x64xf32>
    %103 = arith.subf %85, %102 : vector<256x64xf32>
    %104 = vector.broadcast %101 : vector<256x1xf32> to vector<256x64xf32>
    %105 = arith.mulf %103, %104 : vector<256x64xf32>
    %106 = arith.truncf %105 : vector<256x64xf32> to vector<256x64xbf16>
    %c3 = arith.constant 3 : index
    %c0_45 = arith.constant 0 : index
    %c0_46 = arith.constant 0 : index
    %107 = vector.load %arg6[%c3, %c0_45, %c0_46] : memref<8x64x128xbf16, #tpu.memory_space<vmem>>, vector<1x64x128xbf16>
    %108 = vector.shape_cast %107 : vector<1x64x128xbf16> to vector<64x128xbf16>
    %cst_47 = arith.constant dense<0.000000e+00> : vector<256x128xf32>
    %109 = tpu.matmul %106, %108, %cst_47 {dimension_numbers = #tpu.dot_dimension_numbers<[1], [0], [0], [1], [0, 0, 1, 1], [], []>} : vector<256x64xbf16>, vector<64x128xbf16>, vector<256x128xf32> -> vector<256x128xf32>
    %110 = arith.addf %84, %109 : vector<256x128xf32>
    %c0_48 = arith.constant 0 : index
    %c0_49 = arith.constant 0 : index
    %c0_50 = arith.constant 0 : index
    %c0_51 = arith.constant 0 : index
    %c0_52 = arith.constant 0 : index
    %c0_53 = arith.constant 0 : index
    %111 = vector.load %arg4[%c0_48, %c0_49, %c0_50, %c0_51, %c0_52, %c0_53] : memref<4x1x8x1x8x128xf32, #tpu.memory_space<vmem>>, vector<4x1x8x1x8x128xf32>
    %112 = vector.shape_cast %111 : vector<4x1x8x1x8x128xf32> to vector<4x8x8x128xf32>
    %113 = vector.shape_cast %112 : vector<4x8x8x128xf32> to vector<256x128xf32>
    %114 = vector.extract_strided_slice %113 {offsets = [0, 0], sizes = [256, 64], strides = [1, 1]} : vector<256x128xf32> to vector<256x64xf32>
    %cst_54 = arith.constant dense<0.000000e+00> : vector<256xf32>
    %115 = vector.multi_reduction <add>, %114, %cst_54 [1] : vector<256x64xf32> to vector<256xf32>
    %116 = vector.shape_cast %115 : vector<256xf32> to vector<256x1xf32>
    %cst_55 = arith.constant 6.400000e+01 : f32
    %117 = vector.broadcast %cst_55 : f32 to vector<256x1xf32>
    %118 = arith.divf %116, %117 : vector<256x1xf32>
    %119 = arith.mulf %114, %114 : vector<256x64xf32>
    %cst_56 = arith.constant dense<0.000000e+00> : vector<256xf32>
    %120 = vector.multi_reduction <add>, %119, %cst_56 [1] : vector<256x64xf32> to vector<256xf32>
    %121 = vector.shape_cast %120 : vector<256xf32> to vector<256x1xf32>
    %cst_57 = arith.constant 6.400000e+01 : f32
    %122 = vector.broadcast %cst_57 : f32 to vector<256x1xf32>
    %123 = arith.divf %121, %122 : vector<256x1xf32>
    %124 = arith.mulf %118, %118 : vector<256x1xf32>
    %125 = arith.subf %123, %124 : vector<256x1xf32>
    %cst_58 = arith.constant 0.000000e+00 : f32
    %126 = vector.broadcast %cst_58 : f32 to vector<256x1xf32>
    %127 = arith.maximumf %125, %126 : vector<256x1xf32>
    %cst_59 = arith.constant 9.99999974E-6 : f32
    %128 = vector.broadcast %cst_59 : f32 to vector<256x1xf32>
    %129 = arith.addf %127, %128 : vector<256x1xf32>
    %130 = math.rsqrt %129 : vector<256x1xf32>
    %131 = vector.broadcast %118 : vector<256x1xf32> to vector<256x64xf32>
    %132 = arith.subf %114, %131 : vector<256x64xf32>
    %133 = vector.broadcast %130 : vector<256x1xf32> to vector<256x64xf32>
    %134 = arith.mulf %132, %133 : vector<256x64xf32>
    %135 = arith.truncf %134 : vector<256x64xf32> to vector<256x64xbf16>
    %c4 = arith.constant 4 : index
    %c0_60 = arith.constant 0 : index
    %c0_61 = arith.constant 0 : index
    %136 = vector.load %arg6[%c4, %c0_60, %c0_61] : memref<8x64x128xbf16, #tpu.memory_space<vmem>>, vector<1x64x128xbf16>
    %137 = vector.shape_cast %136 : vector<1x64x128xbf16> to vector<64x128xbf16>
    %cst_62 = arith.constant dense<0.000000e+00> : vector<256x128xf32>
    %138 = tpu.matmul %135, %137, %cst_62 {dimension_numbers = #tpu.dot_dimension_numbers<[1], [0], [0], [1], [0, 0, 1, 1], [], []>} : vector<256x64xbf16>, vector<64x128xbf16>, vector<256x128xf32> -> vector<256x128xf32>
    %139 = arith.addf %110, %138 : vector<256x128xf32>
    %140 = vector.extract_strided_slice %113 {offsets = [0, 64], sizes = [256, 64], strides = [1, 1]} : vector<256x128xf32> to vector<256x64xf32>
    %cst_63 = arith.constant dense<0.000000e+00> : vector<256xf32>
    %141 = vector.multi_reduction <add>, %140, %cst_63 [1] : vector<256x64xf32> to vector<256xf32>
    %142 = vector.shape_cast %141 : vector<256xf32> to vector<256x1xf32>
    %cst_64 = arith.constant 6.400000e+01 : f32
    %143 = vector.broadcast %cst_64 : f32 to vector<256x1xf32>
    %144 = arith.divf %142, %143 : vector<256x1xf32>
    %145 = arith.mulf %140, %140 : vector<256x64xf32>
    %cst_65 = arith.constant dense<0.000000e+00> : vector<256xf32>
    %146 = vector.multi_reduction <add>, %145, %cst_65 [1] : vector<256x64xf32> to vector<256xf32>
    %147 = vector.shape_cast %146 : vector<256xf32> to vector<256x1xf32>
    %cst_66 = arith.constant 6.400000e+01 : f32
    %148 = vector.broadcast %cst_66 : f32 to vector<256x1xf32>
    %149 = arith.divf %147, %148 : vector<256x1xf32>
    %150 = arith.mulf %144, %144 : vector<256x1xf32>
    %151 = arith.subf %149, %150 : vector<256x1xf32>
    %cst_67 = arith.constant 0.000000e+00 : f32
    %152 = vector.broadcast %cst_67 : f32 to vector<256x1xf32>
    %153 = arith.maximumf %151, %152 : vector<256x1xf32>
    %cst_68 = arith.constant 9.99999974E-6 : f32
    %154 = vector.broadcast %cst_68 : f32 to vector<256x1xf32>
    %155 = arith.addf %153, %154 : vector<256x1xf32>
    %156 = math.rsqrt %155 : vector<256x1xf32>
    %157 = vector.broadcast %144 : vector<256x1xf32> to vector<256x64xf32>
    %158 = arith.subf %140, %157 : vector<256x64xf32>
    %159 = vector.broadcast %156 : vector<256x1xf32> to vector<256x64xf32>
    %160 = arith.mulf %158, %159 : vector<256x64xf32>
    %161 = arith.truncf %160 : vector<256x64xf32> to vector<256x64xbf16>
    %c5 = arith.constant 5 : index
    %c0_69 = arith.constant 0 : index
    %c0_70 = arith.constant 0 : index
    %162 = vector.load %arg6[%c5, %c0_69, %c0_70] : memref<8x64x128xbf16, #tpu.memory_space<vmem>>, vector<1x64x128xbf16>
    %163 = vector.shape_cast %162 : vector<1x64x128xbf16> to vector<64x128xbf16>
    %cst_71 = arith.constant dense<0.000000e+00> : vector<256x128xf32>
    %164 = tpu.matmul %161, %163, %cst_71 {dimension_numbers = #tpu.dot_dimension_numbers<[1], [0], [0], [1], [0, 0, 1, 1], [], []>} : vector<256x64xbf16>, vector<64x128xbf16>, vector<256x128xf32> -> vector<256x128xf32>
    %165 = arith.addf %139, %164 : vector<256x128xf32>
    %c0_72 = arith.constant 0 : index
    %c0_73 = arith.constant 0 : index
    %c0_74 = arith.constant 0 : index
    %c0_75 = arith.constant 0 : index
    %c0_76 = arith.constant 0 : index
    %c0_77 = arith.constant 0 : index
    %166 = vector.load %arg5[%c0_72, %c0_73, %c0_74, %c0_75, %c0_76, %c0_77] : memref<4x1x8x1x8x128xf32, #tpu.memory_space<vmem>>, vector<4x1x8x1x8x128xf32>
    %167 = vector.shape_cast %166 : vector<4x1x8x1x8x128xf32> to vector<4x8x8x128xf32>
    %168 = vector.shape_cast %167 : vector<4x8x8x128xf32> to vector<256x128xf32>
    %169 = vector.extract_strided_slice %168 {offsets = [0, 0], sizes = [256, 64], strides = [1, 1]} : vector<256x128xf32> to vector<256x64xf32>
    %cst_78 = arith.constant dense<0.000000e+00> : vector<256xf32>
    %170 = vector.multi_reduction <add>, %169, %cst_78 [1] : vector<256x64xf32> to vector<256xf32>
    %171 = vector.shape_cast %170 : vector<256xf32> to vector<256x1xf32>
    %cst_79 = arith.constant 6.400000e+01 : f32
    %172 = vector.broadcast %cst_79 : f32 to vector<256x1xf32>
    %173 = arith.divf %171, %172 : vector<256x1xf32>
    %174 = arith.mulf %169, %169 : vector<256x64xf32>
    %cst_80 = arith.constant dense<0.000000e+00> : vector<256xf32>
    %175 = vector.multi_reduction <add>, %174, %cst_80 [1] : vector<256x64xf32> to vector<256xf32>
    %176 = vector.shape_cast %175 : vector<256xf32> to vector<256x1xf32>
    %cst_81 = arith.constant 6.400000e+01 : f32
    %177 = vector.broadcast %cst_81 : f32 to vector<256x1xf32>
    %178 = arith.divf %176, %177 : vector<256x1xf32>
    %179 = arith.mulf %173, %173 : vector<256x1xf32>
    %180 = arith.subf %178, %179 : vector<256x1xf32>
    %cst_82 = arith.constant 0.000000e+00 : f32
    %181 = vector.broadcast %cst_82 : f32 to vector<256x1xf32>
    %182 = arith.maximumf %180, %181 : vector<256x1xf32>
    %cst_83 = arith.constant 9.99999974E-6 : f32
    %183 = vector.broadcast %cst_83 : f32 to vector<256x1xf32>
    %184 = arith.addf %182, %183 : vector<256x1xf32>
    %185 = math.rsqrt %184 : vector<256x1xf32>
    %186 = vector.broadcast %173 : vector<256x1xf32> to vector<256x64xf32>
    %187 = arith.subf %169, %186 : vector<256x64xf32>
    %188 = vector.broadcast %185 : vector<256x1xf32> to vector<256x64xf32>
    %189 = arith.mulf %187, %188 : vector<256x64xf32>
    %190 = arith.truncf %189 : vector<256x64xf32> to vector<256x64xbf16>
    %c6 = arith.constant 6 : index
    %c0_84 = arith.constant 0 : index
    %c0_85 = arith.constant 0 : index
    %191 = vector.load %arg6[%c6, %c0_84, %c0_85] : memref<8x64x128xbf16, #tpu.memory_space<vmem>>, vector<1x64x128xbf16>
    %192 = vector.shape_cast %191 : vector<1x64x128xbf16> to vector<64x128xbf16>
    %cst_86 = arith.constant dense<0.000000e+00> : vector<256x128xf32>
    %193 = tpu.matmul %190, %192, %cst_86 {dimension_numbers = #tpu.dot_dimension_numbers<[1], [0], [0], [1], [0, 0, 1, 1], [], []>} : vector<256x64xbf16>, vector<64x128xbf16>, vector<256x128xf32> -> vector<256x128xf32>
    %194 = arith.addf %165, %193 : vector<256x128xf32>
    %195 = vector.extract_strided_slice %168 {offsets = [0, 64], sizes = [256, 64], strides = [1, 1]} : vector<256x128xf32> to vector<256x64xf32>
    %cst_87 = arith.constant dense<0.000000e+00> : vector<256xf32>
    %196 = vector.multi_reduction <add>, %195, %cst_87 [1] : vector<256x64xf32> to vector<256xf32>
    %197 = vector.shape_cast %196 : vector<256xf32> to vector<256x1xf32>
    %cst_88 = arith.constant 6.400000e+01 : f32
    %198 = vector.broadcast %cst_88 : f32 to vector<256x1xf32>
    %199 = arith.divf %197, %198 : vector<256x1xf32>
    %200 = arith.mulf %195, %195 : vector<256x64xf32>
    %cst_89 = arith.constant dense<0.000000e+00> : vector<256xf32>
    %201 = vector.multi_reduction <add>, %200, %cst_89 [1] : vector<256x64xf32> to vector<256xf32>
    %202 = vector.shape_cast %201 : vector<256xf32> to vector<256x1xf32>
    %cst_90 = arith.constant 6.400000e+01 : f32
    %203 = vector.broadcast %cst_90 : f32 to vector<256x1xf32>
    %204 = arith.divf %202, %203 : vector<256x1xf32>
    %205 = arith.mulf %199, %199 : vector<256x1xf32>
    %206 = arith.subf %204, %205 : vector<256x1xf32>
    %cst_91 = arith.constant 0.000000e+00 : f32
    %207 = vector.broadcast %cst_91 : f32 to vector<256x1xf32>
    %208 = arith.maximumf %206, %207 : vector<256x1xf32>
    %cst_92 = arith.constant 9.99999974E-6 : f32
    %209 = vector.broadcast %cst_92 : f32 to vector<256x1xf32>
    %210 = arith.addf %208, %209 : vector<256x1xf32>
    %211 = math.rsqrt %210 : vector<256x1xf32>
    %212 = vector.broadcast %199 : vector<256x1xf32> to vector<256x64xf32>
    %213 = arith.subf %195, %212 : vector<256x64xf32>
    %214 = vector.broadcast %211 : vector<256x1xf32> to vector<256x64xf32>
    %215 = arith.mulf %213, %214 : vector<256x64xf32>
    %216 = arith.truncf %215 : vector<256x64xf32> to vector<256x64xbf16>
    %c7 = arith.constant 7 : index
    %c0_93 = arith.constant 0 : index
    %c0_94 = arith.constant 0 : index
    %217 = vector.load %arg6[%c7, %c0_93, %c0_94] : memref<8x64x128xbf16, #tpu.memory_space<vmem>>, vector<1x64x128xbf16>
    %218 = vector.shape_cast %217 : vector<1x64x128xbf16> to vector<64x128xbf16>
    %cst_95 = arith.constant dense<0.000000e+00> : vector<256x128xf32>
    %219 = tpu.matmul %216, %218, %cst_95 {dimension_numbers = #tpu.dot_dimension_numbers<[1], [0], [0], [1], [0, 0, 1, 1], [], []>} : vector<256x64xbf16>, vector<64x128xbf16>, vector<256x128xf32> -> vector<256x128xf32>
    %220 = arith.addf %194, %219 : vector<256x128xf32>
    %c0_96 = arith.constant 0 : index
    %c0_97 = arith.constant 0 : index
    %221 = vector.load %arg7[%c0_96, %c0_97] : memref<1x128xf32, #tpu.memory_space<vmem>>, vector<1x128xf32>
    %222 = vector.broadcast %221 : vector<1x128xf32> to vector<256x128xf32>
    %223 = arith.addf %220, %222 : vector<256x128xf32>
    %224 = vector.shape_cast %223 : vector<256x128xf32> to vector<4x8x8x128xf32>
    %c0_98 = arith.constant 0 : index
    %c0_99 = arith.constant 0 : index
    %c0_100 = arith.constant 0 : index
    %c0_101 = arith.constant 0 : index
    %225 = vector.load %arg8[%c0_98, %c0_99, %c0_100, %c0_101] : memref<4x8x8x128xf32, #tpu.memory_space<vmem>>, vector<4x8x8x128xf32>
    tpu.vector_store %arg8[%c0_98, %c0_99, %c0_100, %c0_101], %224 {strides = array<i32>} : memref<4x8x8x128xf32, #tpu.memory_space<vmem>>, vector<4x8x8x128xf32>,
    return
  }
  func.func @transform_0(%arg0: i32, %arg1: i32) -> (i32, i32, i32, i32, i32, i32) {
    %c0_i32 = arith.constant 0 : i32
    %c0_i32_0 = arith.constant 0 : i32
    %c0_i32_1 = arith.constant 0 : i32
    %c0_i32_2 = arith.constant 0 : i32
    %c0_i32_3 = arith.constant 0 : i32
    return %arg0, %c0_i32, %arg1, %c0_i32_0, %c0_i32_1, %c0_i32_2 : i32, i32, i32, i32, i32, i32
  }
  func.func @transform_1(%arg0: i32, %arg1: i32) -> (i32, i32, i32, i32, i32, i32) {
    %c0_i32 = arith.constant 0 : i32
    %c1_i32 = arith.constant 1 : i32
    %c0_i32_0 = arith.constant 0 : i32
    %c0_i32_1 = arith.constant 0 : i32
    %c0_i32_2 = arith.constant 0 : i32
    return %arg0, %c0_i32, %arg1, %c1_i32, %c0_i32_0, %c0_i32_1 : i32, i32, i32, i32, i32, i32
  }
  func.func @transform_2(%arg0: i32, %arg1: i32) -> (i32, i32, i32, i32, i32, i32) {
    %c1_i32 = arith.constant 1 : i32
    %c0_i32 = arith.constant 0 : i32
    %c0_i32_0 = arith.constant 0 : i32
    %c0_i32_1 = arith.constant 0 : i32
    %c0_i32_2 = arith.constant 0 : i32
    return %arg0, %c1_i32, %arg1, %c0_i32, %c0_i32_0, %c0_i32_1 : i32, i32, i32, i32, i32, i32
  }
  func.func @transform_3(%arg0: i32, %arg1: i32) -> (i32, i32, i32, i32, i32, i32) {
    %c1_i32 = arith.constant 1 : i32
    %c1_i32_0 = arith.constant 1 : i32
    %c0_i32 = arith.constant 0 : i32
    %c0_i32_1 = arith.constant 0 : i32
    %c0_i32_2 = arith.constant 0 : i32
    return %arg0, %c1_i32, %arg1, %c1_i32_0, %c0_i32, %c0_i32_1 : i32, i32, i32, i32, i32, i32
  }
  func.func @transform_4(%arg0: i32, %arg1: i32) -> (i32, i32, i32) {
    %c0_i32 = arith.constant 0 : i32
    %c0_i32_0 = arith.constant 0 : i32
    %c0_i32_1 = arith.constant 0 : i32
    %c0_i32_2 = arith.constant 0 : i32
    return %c0_i32, %c0_i32_0, %c0_i32_1 : i32, i32, i32
  }
  func.func @transform_5(%arg0: i32, %arg1: i32) -> (i32, i32) {
    %c0_i32 = arith.constant 0 : i32
    %c0_i32_0 = arith.constant 0 : i32
    %c0_i32_1 = arith.constant 0 : i32
    return %c0_i32, %c0_i32_0 : i32, i32
  }
  func.func @transform_6(%arg0: i32, %arg1: i32) -> (i32, i32, i32, i32) {
    %c0_i32 = arith.constant 0 : i32
    %c0_i32_0 = arith.constant 0 : i32
    %c0_i32_1 = arith.constant 0 : i32
    return %arg0, %arg1, %c0_i32, %c0_i32_0 : i32, i32, i32, i32
  }
}

</mosaic_0001>

<bundles_post_ra>
// kernel: downsample_conv.1
= control target key start
LH: loop header
LB: loop body
LE: loop exit
PB: predicated region body
PF: predicated region fallthrough
CT: control target
= control target key end

     0   :  { %11 = vsyncpa [#allocation7], 0  ;;  %s17425_s0 = inlined_call_operand.vmem [shape: f32[32,2,8,2,8,128], index: 0, kind: input, shape index: {}, may-alias: {0,1,2,3}]   ;;  %s17426_s1 = inlined_call_operand.vmem [shape: f32[32,2,8,2,8,128], index: 1, kind: input, shape index: {}, may-alias: {0,1,2,3}]   ;;  %s17427_s2 = inlined_call_operand.vmem [shape: f32[32,2,8,2,8,128], index: 2, kind: input, shape index: {}, may-alias: {0,1,2,3}]   ;;  %s17428_s3 = inlined_call_operand.vmem [shape: f32[32,2,8,2,8,128], index: 3, kind: input, shape index: {}, may-alias: {0,1,2,3}]   ;;  %s17429_s4 = inlined_call_operand.vmem [shape: bf16[8,64,128], index: 4, kind: input, shape index: {}]   ;;  %s17430_s5 = inlined_call_operand.vmem [shape: f32[1,128], index: 5, kind: input, shape index: {}]   ;;  %s17431_s6 = inlined_call_operand.hbm [shape: f32[32,8,8,128], index: 6, kind: output, shape index: {}]  }
   0x1   :  { %13 = vsyncpa [#allocation7 + $0x1], 0  ;;  %s10763_s21 = smov 0   ;;  %s10765_s22 = smov 0  }
   0x2   :  { %s10767_s23 = smov 0   ;;  %s10769_s24 = smov 0  }
   0x3   :  { %s10771_s25 = smov 0   ;;  %s10773_s26 = smov 0  }
   0x4 LB: > { %s8804_s27 = sadd.s32 4294967295, %s10722_s26   ;;  %s8805_s28 = sadd.s32 4294967294, %s10722_s26   ;;  %s10722_s26 = sphi %s10773_s26, %s19_s26   ;;  %s10718_s25 = sphi %s10771_s25, %s18415_s25   ;;  %s10714_s24 = sphi %s10769_s24, %s18414_s24   ;;  %s10710_s23 = sphi %s10767_s23, %s18413_s23   ;;  %s10706_s22 = sphi %s10765_s22, %s18412_s22   ;;  %s10702_s21 = sphi %s10763_s21, %s18411_s21  }
   0x5   : > { %s31_s29 = sadd.s32 1, %s10718_s25  ;;  %s40_s30 = sadd.s32 1, %s10710_s23 }
   0x6   : > { %p33_p0 = scmp.ge.s32.totalorder %s31_s29, 8  ;;  %p47_p1 = scmp.ne.s32.totalorder %s10710_s23, %s10706_s22 }
   0x7   : > { %p48_p2 = scmp.eq.s32.totalorder %s10722_s26, 0  ;;  %p205_p3 = scmp.eq.s32.totalorder %s8804_s27, 7 }
   0x8   : > { %s18417_s29 = smov (%p33_p0, %s31_s29), 0  ;;  %p210_p6 = scmp.ne.s32.totalorder %s10706_s22, %s10702_s21 }
   0x9   : > { %p10802_p4 = por %p48_p2, %p47_p1  ;;  %p10806_p5 = por %p205_p3, %p47_p1 }
   0xa   : > { %s35_s9 = ssub.s32 %s10718_s25, %s18417_s29  ;;  %p211_p8 = scmp.eq.s32.totalorder %s8805_s28, 7 }
   0xb   : > { %p38_p7 = scmp.eq.s32.totalorder %s35_s9, 0  ;;  %p8807_p10 = scmp.ge.s32.totalorder %s10722_s26, 8 }
   0xc   : > { %p10817_p9 = por %p211_p8, %p210_p6 }
   0xd   : > { %s10815_s10 = scalar_select %p38_p7, %s10710_s23, %s40_s30  }
   0xe   : > { %233 = sbr.rel (%p8807_p10) target bundleno = 101 (0x65), region = 24 }
  0x15   : > { %236 = sbr.rel (!%p10802_p4) target bundleno = 41 (0x29), region = 28  ;;  %s238_s12 = sand.u32 (%p10802_p4), 1, %s10710_s23  }
  0x16   : > { %s9147_s13 = sshll.u32 (%p10802_p4), %s10718_s25, 10  ;;  %s8808_s14 = sshll.u32 (%p10802_p4), %s238_s12, 8 }
  0x17   : > { %s10829_s17 = scalar_lea.vmem (%p10802_p4), %s17425_s0, %s9147_s13  ;;  %s10834_s18 = scalar_lea.vmem (%p10802_p4), [#allocation2], %s8808_s14 }
  0x18   : > { %v337_v0 = vld [vmem:[%s10829_s17] sm:$0xff] (%p10802_p4)  ;;  %v339_v1 = vld [vmem:[%s10829_s17 + $0x10] sm:$0xff] (%p10802_p4) }
  0x19   : > { %v341_v2 = vld [vmem:[%s10829_s17 + $0x20] sm:$0xff] (%p10802_p4)  ;;  %338 = vst [vmem:[%s10834_s18] sm:$0xff] (%p10802_p4), %v337_v0  ;;  %340 = vst [vmem:[%s10834_s18 + $0x8] sm:$0xff] (%p10802_p4), %v339_v1  ;;  %v343_v3 = vld [vmem:[%s10829_s17 + $0x30] sm:$0xff] (%p10802_p4) }
  0x1a   : > { %342 = vst [vmem:[%s10834_s18 + $0x10] sm:$0xff] (%p10802_p4), %v341_v2  ;;  %v345_v4 = vld [vmem:[%s10829_s17 + $0x40] sm:$0xff] (%p10802_p4)  ;;  %v347_v5 = vld [vmem:[%s10829_s17 + $0x50] sm:$0xff] (%p10802_p4)  ;;  %344 = vst [vmem:[%s10834_s18 + $0x18] sm:$0xff] (%p10802_p4), %v343_v3 }
  0x1b   : > { %346 = vst [vmem:[%s10834_s18 + $0x20] sm:$0xff] (%p10802_p4), %v345_v4  ;;  %348 = vst [vmem:[%s10834_s18 + $0x28] sm:$0xff] (%p10802_p4), %v347_v5  ;;  %v349_v6 = vld [vmem:[%s10829_s17 + $0x60] sm:$0xff] (%p10802_p4)  ;;  %v351_v7 = vld [vmem:[%s10829_s17 + $0x70] sm:$0xff] (%p10802_p4) }
  0x1c   : > { %v353_v8 = vld [vmem:[%s10829_s17 + $0x100] sm:$0xff]  ;;  %350 = vst [vmem:[%s10834_s18 + $0x30] sm:$0xff] %v349_v6  ;;  %352 = vst [vmem:[%s10834_s18 + $0x38] sm:$0xff] %v351_v7  ;;  %v355_v9 = vld [vmem:[%s10829_s17 + $0x110] sm:$0xff] }
  0x1d   : > { %354 = vst [vmem:[%s10834_s18 + $0x40] sm:$0xff] %v353_v8  ;;  %v357_v10 = vld [vmem:[%s10829_s17 + $0x120] sm:$0xff]  ;;  %v359_v11 = vld [vmem:[%s10829_s17 + $0x130] sm:$0xff]  ;;  %356 = vst [vmem:[%s10834_s18 + $0x48] sm:$0xff] %v355_v9 }
  0x1e   : > { %358 = vst [vmem:[%s10834_s18 + $0x50] sm:$0xff] %v357_v10  ;;  %360 = vst [vmem:[%s10834_s18 + $0x58] sm:$0xff] %v359_v11  ;;  %v361_v12 = vld [vmem:[%s10829_s17 + $0x140] sm:$0xff]  ;;  %v363_v13 = vld [vmem:[%s10829_s17 + $0x150] sm:$0xff] }
  0x1f   : > { %v365_v14 = vld [vmem:[%s10829_s17 + $0x160] sm:$0xff]  ;;  %362 = vst [vmem:[%s10834_s18 + $0x60] sm:$0xff] %v361_v12  ;;  %364 = vst [vmem:[%s10834_s18 + $0x68] sm:$0xff] %v363_v13  ;;  %v367_v15 = vld [vmem:[%s10829_s17 + $0x170] sm:$0xff] }
  0x20   : > { %366 = vst [vmem:[%s10834_s18 + $0x70] sm:$0xff] %v365_v14  ;;  %v369_v16 = vld [vmem:[%s10829_s17 + $0x200] sm:$0xff]  ;;  %v371_v17 = vld [vmem:[%s10829_s17 + $0x210] sm:$0xff]  ;;  %368 = vst [vmem:[%s10834_s18 + $0x78] sm:$0xff] %v367_v15 }
  0x21   : > { %370 = vst [vmem:[%s10834_s18 + $0x80] sm:$0xff] %v369_v16  ;;  %372 = vst [vmem:[%s10834_s18 + $0x88] sm:$0xff] %v371_v17  ;;  %v373_v18 = vld [vmem:[%s10829_s17 + $0x220] sm:$0xff]  ;;  %v375_v19 = vld [vmem:[%s10829_s17 + $0x230] sm:$0xff] }
  0x22   : > { %v377_v20 = vld [vmem:[%s10829_s17 + $0x240] sm:$0xff]  ;;  %374 = vst [vmem:[%s10834_s18 + $0x90] sm:$0xff] %v373_v18  ;;  %376 = vst [vmem:[%s10834_s18 + $0x98] sm:$0xff] %v375_v19  ;;  %v379_v21 = vld [vmem:[%s10829_s17 + $0x250] sm:$0xff] }
  0x23   : > { %378 = vst [vmem:[%s10834_s18 + $0xa0] sm:$0xff] %v377_v20  ;;  %v381_v22 = vld [vmem:[%s10829_s17 + $0x260] sm:$0xff]  ;;  %v383_v23 = vld [vmem:[%s10829_s17 + $0x270] sm:$0xff]  ;;  %380 = vst [vmem:[%s10834_s18 + $0xa8] sm:$0xff] %v379_v21 }
  0x24   : > { %382 = vst [vmem:[%s10834_s18 + $0xb0] sm:$0xff] %v381_v22  ;;  %384 = vst [vmem:[%s10834_s18 + $0xb8] sm:$0xff] %v383_v23  ;;  %v385_v24 = vld [vmem:[%s10829_s17 + $0x300] sm:$0xff]  ;;  %v387_v25 = vld [vmem:[%s10829_s17 + $0x310] sm:$0xff] }
  0x25   : > { %v389_v26 = vld [vmem:[%s10829_s17 + $0x320] sm:$0xff]  ;;  %386 = vst [vmem:[%s10834_s18 + $0xc0] sm:$0xff] %v385_v24  ;;  %388 = vst [vmem:[%s10834_s18 + $0xc8] sm:$0xff] %v387_v25  ;;  %v391_v27 = vld [vmem:[%s10829_s17 + $0x330] sm:$0xff] }
  0x26   : > { %390 = vst [vmem:[%s10834_s18 + $0xd0] sm:$0xff] %v389_v26  ;;  %v393_v28 = vld [vmem:[%s10829_s17 + $0x340] sm:$0xff]  ;;  %v395_v29 = vld [vmem:[%s10829_s17 + $0x350] sm:$0xff]  ;;  %392 = vst [vmem:[%s10834_s18 + $0xd8] sm:$0xff] %v391_v27 }
  0x27   : > { %394 = vst [vmem:[%s10834_s18 + $0xe0] sm:$0xff] %v393_v28  ;;  %396 = vst [vmem:[%s10834_s18 + $0xe8] sm:$0xff] %v395_v29  ;;  %v397_v30 = vld [vmem:[%s10829_s17 + $0x360] sm:$0xff]  ;;  %v399_v31 = vld [vmem:[%s10829_s17 + $0x370] sm:$0xff] }
  0x28   : > { %398 = vst [vmem:[%s10834_s18 + $0xf0] sm:$0xff] %v397_v30  ;;  %400 = vst [vmem:[%s10834_s18 + $0xf8] sm:$0xff] %v399_v31 }
  0x29 PF: > { %406 = sbr.rel (!%p10802_p4) target bundleno = 61 (0x3d), region = 66  ;;  %s408_s19 = sand.u32 (%p10802_p4), 1, %s10710_s23  }
  0x2a   : > { %s9148_s20 = sshll.u32 (%p10802_p4), %s10718_s25, 10  ;;  %s8812_s27 = sshll.u32 (%p10802_p4), %s408_s19, 8 }
  0x2b   : > { %s10904_s9 = scalar_lea.vmem (%p10802_p4), %s17426_s1, %s9148_s20  ;;  %s10909_s12 = scalar_lea.vmem (%p10802_p4), [#allocation3], %s8812_s27 }
  0x2c   : > { %v8815_v32 = vld [vmem:[%s10904_s9 + $0x8] sm:$0xff] (%p10802_p4)  ;;  %v8816_v33 = vld [vmem:[%s10904_s9 + $0x18] sm:$0xff] (%p10802_p4) }
  0x2d   : > { %v8817_v34 = vld [vmem:[%s10904_s9 + $0x28] sm:$0xff] (%p10802_p4)  ;;  %509 = vst [vmem:[%s10909_s12] sm:$0xff] (%p10802_p4), %v8815_v32  ;;  %511 = vst [vmem:[%s10909_s12 + $0x8] sm:$0xff] (%p10802_p4), %v8816_v33  ;;  %v8818_v35 = vld [vmem:[%s10904_s9 + $0x38] sm:$0xff] (%p10802_p4) }
  0x2e   : > { %513 = vst [vmem:[%s10909_s12 + $0x10] sm:$0xff] (%p10802_p4), %v8817_v34  ;;  %v8819_v36 = vld [vmem:[%s10904_s9 + $0x48] sm:$0xff] (%p10802_p4)  ;;  %v8820_v37 = vld [vmem:[%s10904_s9 + $0x58] sm:$0xff] (%p10802_p4)  ;;  %515 = vst [vmem:[%s10909_s12 + $0x18] sm:$0xff] (%p10802_p4), %v8818_v35 }
  0x2f   : > { %517 = vst [vmem:[%s10909_s12 + $0x20] sm:$0xff] (%p10802_p4), %v8819_v36  ;;  %519 = vst [vmem:[%s10909_s12 + $0x28] sm:$0xff] (%p10802_p4), %v8820_v37  ;;  %v8821_v38 = vld [vmem:[%s10904_s9 + $0x68] sm:$0xff] (%p10802_p4)  ;;  %v8822_v39 = vld [vmem:[%s10904_s9 + $0x78] sm:$0xff] (%p10802_p4) }
  0x30   : > { %v8823_v40 = vld [vmem:[%s10904_s9 + $0x108] sm:$0xff]  ;;  %521 = vst [vmem:[%s10909_s12 + $0x30] sm:$0xff] %v8821_v38  ;;  %523 = vst [vmem:[%s10909_s12 + $0x38] sm:$0xff] %v8822_v39  ;;  %v8824_v41 = vld [vmem:[%s10904_s9 + $0x118] sm:$0xff] }
  0x31   : > { %525 = vst [vmem:[%s10909_s12 + $0x40] sm:$0xff] %v8823_v40  ;;  %v8825_v42 = vld [vmem:[%s10904_s9 + $0x128] sm:$0xff]  ;;  %v8826_v43 = vld [vmem:[%s10904_s9 + $0x138] sm:$0xff]  ;;  %527 = vst [vmem:[%s10909_s12 + $0x48] sm:$0xff] %v8824_v41 }
  0x32   : > { %529 = vst [vmem:[%s10909_s12 + $0x50] sm:$0xff] %v8825_v42  ;;  %531 = vst [vmem:[%s10909_s12 + $0x58] sm:$0xff] %v8826_v43  ;;  %v8827_v44 = vld [vmem:[%s10904_s9 + $0x148] sm:$0xff]  ;;  %v8828_v45 = vld [vmem:[%s10904_s9 + $0x158] sm:$0xff] }
  0x33   : > { %v8829_v46 = vld [vmem:[%s10904_s9 + $0x168] sm:$0xff]  ;;  %533 = vst [vmem:[%s10909_s12 + $0x60] sm:$0xff] %v8827_v44  ;;  %535 = vst [vmem:[%s10909_s12 + $0x68] sm:$0xff] %v8828_v45  ;;  %v8830_v47 = vld [vmem:[%s10904_s9 + $0x178] sm:$0xff] }
  0x34   : > { %537 = vst [vmem:[%s10909_s12 + $0x70] sm:$0xff] %v8829_v46  ;;  %v8831_v48 = vld [vmem:[%s10904_s9 + $0x208] sm:$0xff]  ;;  %v8832_v49 = vld [vmem:[%s10904_s9 + $0x218] sm:$0xff]  ;;  %539 = vst [vmem:[%s10909_s12 + $0x78] sm:$0xff] %v8830_v47 }
  0x35   : > { %541 = vst [vmem:[%s10909_s12 + $0x80] sm:$0xff] %v8831_v48  ;;  %543 = vst [vmem:[%s10909_s12 + $0x88] sm:$0xff] %v8832_v49  ;;  %v8833_v50 = vld [vmem:[%s10904_s9 + $0x228] sm:$0xff]  ;;  %v8834_v51 = vld [vmem:[%s10904_s9 + $0x238] sm:$0xff] }
  0x36   : > { %v8835_v52 = vld [vmem:[%s10904_s9 + $0x248] sm:$0xff]  ;;  %545 = vst [vmem:[%s10909_s12 + $0x90] sm:$0xff] %v8833_v50  ;;  %547 = vst [vmem:[%s10909_s12 + $0x98] sm:$0xff] %v8834_v51  ;;  %v8836_v53 = vld [vmem:[%s10904_s9 + $0x258] sm:$0xff] }
  0x37   : > { %549 = vst [vmem:[%s10909_s12 + $0xa0] sm:$0xff] %v8835_v52  ;;  %v8837_v54 = vld [vmem:[%s10904_s9 + $0x268] sm:$0xff]  ;;  %v8838_v55 = vld [vmem:[%s10904_s9 + $0x278] sm:$0xff]  ;;  %551 = vst [vmem:[%s10909_s12 + $0xa8] sm:$0xff] %v8836_v53 }
  0x38   : > { %553 = vst [vmem:[%s10909_s12 + $0xb0] sm:$0xff] %v8837_v54  ;;  %555 = vst [vmem:[%s10909_s12 + $0xb8] sm:$0xff] %v8838_v55  ;;  %v8839_v56 = vld [vmem:[%s10904_s9 + $0x308] sm:$0xff]  ;;  %v8840_v57 = vld [vmem:[%s10904_s9 + $0x318] sm:$0xff] }
  0x39   : > { %v8841_v58 = vld [vmem:[%s10904_s9 + $0x328] sm:$0xff]  ;;  %557 = vst [vmem:[%s10909_s12 + $0xc0] sm:$0xff] %v8839_v56  ;;  %559 = vst [vmem:[%s10909_s12 + $0xc8] sm:$0xff] %v8840_v57  ;;  %v8842_v59 = vld [vmem:[%s10904_s9 + $0x338] sm:$0xff] }
  0x3a   : > { %561 = vst [vmem:[%s10909_s12 + $0xd0] sm:$0xff] %v8841_v58  ;;  %v8843_v60 = vld [vmem:[%s10904_s9 + $0x348] sm:$0xff]  ;;  %v8844_v61 = vld [vmem:[%s10904_s9 + $0x358] sm:$0xff]  ;;  %563 = vst [vmem:[%s10909_s12 + $0xd8] sm:$0xff] %v8842_v59 }
  0x3b   : > { %565 = vst [vmem:[%s10909_s12 + $0xe0] sm:$0xff] %v8843_v60  ;;  %567 = vst [vmem:[%s10909_s12 + $0xe8] sm:$0xff] %v8844_v61  ;;  %v8845_v62 = vld [vmem:[%s10904_s9 + $0x368] sm:$0xff]  ;;  %v8846_v63 = vld [vmem:[%s10904_s9 + $0x378] sm:$0xff] }
  0x3c   : > { %569 = vst [vmem:[%s10909_s12 + $0xf0] sm:$0xff] %v8845_v62  ;;  %571 = vst [vmem:[%s10909_s12 + $0xf8] sm:$0xff] %v8846_v63 }
  0x3d PF: > { %577 = sbr.rel (!%p10802_p4) target bundleno = 81 (0x51), region = 104  ;;  %s579_s13 = sand.u32 (%p10802_p4), 1, %s10710_s23  }
  0x3e   : > { %s9149_s14 = sshll.u32 (%p10802_p4), %s10718_s25, 10  ;;  %s8847_s15 = sshll.u32 (%p10802_p4), %s579_s13, 8 }
  0x3f   : > { %s10979_s18 = scalar_lea.vmem (%p10802_p4), %s17427_s2, %s9149_s14  ;;  %s10984_s19 = scalar_lea.vmem (%p10802_p4), [#allocation4], %s8847_s15 }
  0x40   : > { %v8850_v0 = vld [vmem:[%s10979_s18 + $0x80] sm:$0xff] (%p10802_p4)  ;;  %v8851_v1 = vld [vmem:[%s10979_s18 + $0x90] sm:$0xff] (%p10802_p4) }
  0x41   : > { %v8852_v2 = vld [vmem:[%s10979_s18 + $0xa0] sm:$0xff] (%p10802_p4)  ;;  %680 = vst [vmem:[%s10984_s19] sm:$0xff] (%p10802_p4), %v8850_v0  ;;  %682 = vst [vmem:[%s10984_s19 + $0x8] sm:$0xff] (%p10802_p4), %v8851_v1  ;;  %v8853_v3 = vld [vmem:[%s10979_s18 + $0xb0] sm:$0xff] (%p10802_p4) }
  0x42   : > { %684 = vst [vmem:[%s10984_s19 + $0x10] sm:$0xff] (%p10802_p4), %v8852_v2  ;;  %v8854_v4 = vld [vmem:[%s10979_s18 + $0xc0] sm:$0xff] (%p10802_p4)  ;;  %v8855_v5 = vld [vmem:[%s10979_s18 + $0xd0] sm:$0xff] (%p10802_p4)  ;;  %686 = vst [vmem:[%s10984_s19 + $0x18] sm:$0xff] (%p10802_p4), %v8853_v3 }
  0x43   : > { %688 = vst [vmem:[%s10984_s19 + $0x20] sm:$0xff] (%p10802_p4), %v8854_v4  ;;  %690 = vst [vmem:[%s10984_s19 + $0x28] sm:$0xff] (%p10802_p4), %v8855_v5  ;;  %v8856_v6 = vld [vmem:[%s10979_s18 + $0xe0] sm:$0xff] (%p10802_p4)  ;;  %v8857_v7 = vld [vmem:[%s10979_s18 + $0xf0] sm:$0xff] (%p10802_p4) }
  0x44   : > { %v8858_v8 = vld [vmem:[%s10979_s18 + $0x180] sm:$0xff]  ;;  %692 = vst [vmem:[%s10984_s19 + $0x30] sm:$0xff] %v8856_v6  ;;  %694 = vst [vmem:[%s10984_s19 + $0x38] sm:$0xff] %v8857_v7  ;;  %v8859_v9 = vld [vmem:[%s10979_s18 + $0x190] sm:$0xff] }
  0x45   : > { %696 = vst [vmem:[%s10984_s19 + $0x40] sm:$0xff] %v8858_v8  ;;  %v8860_v10 = vld [vmem:[%s10979_s18 + $0x1a0] sm:$0xff]  ;;  %v8861_v11 = vld [vmem:[%s10979_s18 + $0x1b0] sm:$0xff]  ;;  %698 = vst [vmem:[%s10984_s19 + $0x48] sm:$0xff] %v8859_v9 }
  0x46   : > { %700 = vst [vmem:[%s10984_s19 + $0x50] sm:$0xff] %v8860_v10  ;;  %702 = vst [vmem:[%s10984_s19 + $0x58] sm:$0xff] %v8861_v11  ;;  %v8862_v12 = vld [vmem:[%s10979_s18 + $0x1c0] sm:$0xff]  ;;  %v8863_v13 = vld [vmem:[%s10979_s18 + $0x1d0] sm:$0xff] }
  0x47   : > { %v8864_v14 = vld [vmem:[%s10979_s18 + $0x1e0] sm:$0xff]  ;;  %704 = vst [vmem:[%s10984_s19 + $0x60] sm:$0xff] %v8862_v12  ;;  %706 = vst [vmem:[%s10984_s19 + $0x68] sm:$0xff] %v8863_v13  ;;  %v8865_v15 = vld [vmem:[%s10979_s18 + $0x1f0] sm:$0xff] }
  0x48   : > { %708 = vst [vmem:[%s10984_s19 + $0x70] sm:$0xff] %v8864_v14  ;;  %v8866_v16 = vld [vmem:[%s10979_s18 + $0x280] sm:$0xff]  ;;  %v8867_v17 = vld [vmem:[%s10979_s18 + $0x290] sm:$0xff]  ;;  %710 = vst [vmem:[%s10984_s19 + $0x78] sm:$0xff] %v8865_v15 }
  0x49   : > { %712 = vst [vmem:[%s10984_s19 + $0x80] sm:$0xff] %v8866_v16  ;;  %714 = vst [vmem:[%s10984_s19 + $0x88] sm:$0xff] %v8867_v17  ;;  %v8868_v18 = vld [vmem:[%s10979_s18 + $0x2a0] sm:$0xff]  ;;  %v8869_v19 = vld [vmem:[%s10979_s18 + $0x2b0] sm:$0xff] }
  0x4a   : > { %v8870_v20 = vld [vmem:[%s10979_s18 + $0x2c0] sm:$0xff]  ;;  %716 = vst [vmem:[%s10984_s19 + $0x90] sm:$0xff] %v8868_v18  ;;  %718 = vst [vmem:[%s10984_s19 + $0x98] sm:$0xff] %v8869_v19  ;;  %v8871_v21 = vld [vmem:[%s10979_s18 + $0x2d0] sm:$0xff] }
  0x4b   : > { %720 = vst [vmem:[%s10984_s19 + $0xa0] sm:$0xff] %v8870_v20  ;;  %v8872_v22 = vld [vmem:[%s10979_s18 + $0x2e0] sm:$0xff]  ;;  %v8873_v23 = vld [vmem:[%s10979_s18 + $0x2f0] sm:$0xff]  ;;  %722 = vst [vmem:[%s10984_s19 + $0xa8] sm:$0xff] %v8871_v21 }
  0x4c   : > { %724 = vst [vmem:[%s10984_s19 + $0xb0] sm:$0xff] %v8872_v22  ;;  %726 = vst [vmem:[%s10984_s19 + $0xb8] sm:$0xff] %v8873_v23  ;;  %v8874_v24 = vld [vmem:[%s10979_s18 + $0x380] sm:$0xff]  ;;  %v8875_v25 = vld [vmem:[%s10979_s18 + $0x390] sm:$0xff] }
  0x4d   : > { %v8876_v26 = vld [vmem:[%s10979_s18 + $0x3a0] sm:$0xff]  ;;  %728 = vst [vmem:[%s10984_s19 + $0xc0] sm:$0xff] %v8874_v24  ;;  %730 = vst [vmem:[%s10984_s19 + $0xc8] sm:$0xff] %v8875_v25  ;;  %v8877_v27 = vld [vmem:[%s10979_s18 + $0x3b0] sm:$0xff] }
  0x4e   : > { %732 = vst [vmem:[%s10984_s19 + $0xd0] sm:$0xff] %v8876_v26  ;;  %v8878_v28 = vld [vmem:[%s10979_s18 + $0x3c0] sm:$0xff]  ;;  %v8879_v29 = vld [vmem:[%s10979_s18 + $0x3d0] sm:$0xff]  ;;  %734 = vst [vmem:[%s10984_s19 + $0xd8] sm:$0xff] %v8877_v27 }
  0x4f   : > { %736 = vst [vmem:[%s10984_s19 + $0xe0] sm:$0xff] %v8878_v28  ;;  %738 = vst [vmem:[%s10984_s19 + $0xe8] sm:$0xff] %v8879_v29  ;;  %v8880_v30 = vld [vmem:[%s10979_s18 + $0x3e0] sm:$0xff]  ;;  %v8881_v31 = vld [vmem:[%s10979_s18 + $0x3f0] sm:$0xff] }
  0x50   : > { %740 = vst [vmem:[%s10984_s19 + $0xf0] sm:$0xff] %v8880_v30  ;;  %742 = vst [vmem:[%s10984_s19 + $0xf8] sm:$0xff] %v8881_v31 }
  0x51 PF: > { %748 = sbr.rel (!%p10802_p4) target bundleno = 101 (0x65), region = 142  ;;  %s750_s20 = sand.u32 (%p10802_p4), 1, %s10710_s23  }
  0x52   : > { %s9150_s27 = sshll.u32 (%p10802_p4), %s10718_s25, 10  ;;  %s8882_s28 = sshll.u32 (%p10802_p4), %s750_s20, 8 }
  0x53   : > { %s11054_s12 = scalar_lea.vmem (%p10802_p4), %s17428_s3, %s9150_s27  ;;  %s11059_s7 = scalar_lea.vmem (%p10802_p4), [#allocation5], %s8882_s28 }
  0x54   : > { %v8885_v32 = vld [vmem:[%s11054_s12 + $0x88] sm:$0xff] (%p10802_p4)  ;;  %v8886_v33 = vld [vmem:[%s11054_s12 + $0x98] sm:$0xff] (%p10802_p4) }
  0x55   : > { %v8887_v34 = vld [vmem:[%s11054_s12 + $0xa8] sm:$0xff] (%p10802_p4)  ;;  %852 = vst [vmem:[%s11059_s7] sm:$0xff] (%p10802_p4), %v8885_v32  ;;  %854 = vst [vmem:[%s11059_s7 + $0x8] sm:$0xff] (%p10802_p4), %v8886_v33  ;;  %v8888_v35 = vld [vmem:[%s11054_s12 + $0xb8] sm:$0xff] (%p10802_p4) }
  0x56   : > { %856 = vst [vmem:[%s11059_s7 + $0x10] sm:$0xff] (%p10802_p4), %v8887_v34  ;;  %v8889_v36 = vld [vmem:[%s11054_s12 + $0xc8] sm:$0xff] (%p10802_p4)  ;;  %v8890_v37 = vld [vmem:[%s11054_s12 + $0xd8] sm:$0xff] (%p10802_p4)  ;;  %858 = vst [vmem:[%s11059_s7 + $0x18] sm:$0xff] (%p10802_p4), %v8888_v35 }
  0x57   : > { %860 = vst [vmem:[%s11059_s7 + $0x20] sm:$0xff] (%p10802_p4), %v8889_v36  ;;  %862 = vst [vmem:[%s11059_s7 + $0x28] sm:$0xff] (%p10802_p4), %v8890_v37  ;;  %v8891_v38 = vld [vmem:[%s11054_s12 + $0xe8] sm:$0xff] (%p10802_p4)  ;;  %v8892_v39 = vld [vmem:[%s11054_s12 + $0xf8] sm:$0xff] (%p10802_p4) }
  0x58   : > { %v8893_v40 = vld [vmem:[%s11054_s12 + $0x188] sm:$0xff]  ;;  %864 = vst [vmem:[%s11059_s7 + $0x30] sm:$0xff] %v8891_v38  ;;  %866 = vst [vmem:[%s11059_s7 + $0x38] sm:$0xff] %v8892_v39  ;;  %v8894_v41 = vld [vmem:[%s11054_s12 + $0x198] sm:$0xff] }
  0x59   : > { %868 = vst [vmem:[%s11059_s7 + $0x40] sm:$0xff] %v8893_v40  ;;  %v8895_v42 = vld [vmem:[%s11054_s12 + $0x1a8] sm:$0xff]  ;;  %v8896_v43 = vld [vmem:[%s11054_s12 + $0x1b8] sm:$0xff]  ;;  %870 = vst [vmem:[%s11059_s7 + $0x48] sm:$0xff] %v8894_v41 }
  0x5a   : > { %872 = vst [vmem:[%s11059_s7 + $0x50] sm:$0xff] %v8895_v42  ;;  %874 = vst [vmem:[%s11059_s7 + $0x58] sm:$0xff] %v8896_v43  ;;  %v8897_v44 = vld [vmem:[%s11054_s12 + $0x1c8] sm:$0xff]  ;;  %v8898_v45 = vld [vmem:[%s11054_s12 + $0x1d8] sm:$0xff] }
  0x5b   : > { %v8899_v46 = vld [vmem:[%s11054_s12 + $0x1e8] sm:$0xff]  ;;  %876 = vst [vmem:[%s11059_s7 + $0x60] sm:$0xff] %v8897_v44  ;;  %878 = vst [vmem:[%s11059_s7 + $0x68] sm:$0xff] %v8898_v45  ;;  %v8900_v47 = vld [vmem:[%s11054_s12 + $0x1f8] sm:$0xff] }
  0x5c   : > { %880 = vst [vmem:[%s11059_s7 + $0x70] sm:$0xff] %v8899_v46  ;;  %v8901_v48 = vld [vmem:[%s11054_s12 + $0x288] sm:$0xff]  ;;  %v8902_v49 = vld [vmem:[%s11054_s12 + $0x298] sm:$0xff]  ;;  %882 = vst [vmem:[%s11059_s7 + $0x78] sm:$0xff] %v8900_v47 }
  0x5d   : > { %884 = vst [vmem:[%s11059_s7 + $0x80] sm:$0xff] %v8901_v48  ;;  %886 = vst [vmem:[%s11059_s7 + $0x88] sm:$0xff] %v8902_v49  ;;  %v8903_v50 = vld [vmem:[%s11054_s12 + $0x2a8] sm:$0xff]  ;;  %v8904_v51 = vld [vmem:[%s11054_s12 + $0x2b8] sm:$0xff] }
  0x5e   : > { %v8905_v52 = vld [vmem:[%s11054_s12 + $0x2c8] sm:$0xff]  ;;  %888 = vst [vmem:[%s11059_s7 + $0x90] sm:$0xff] %v8903_v50  ;;  %890 = vst [vmem:[%s11059_s7 + $0x98] sm:$0xff] %v8904_v51  ;;  %v8906_v53 = vld [vmem:[%s11054_s12 + $0x2d8] sm:$0xff] }
  0x5f   : > { %892 = vst [vmem:[%s11059_s7 + $0xa0] sm:$0xff] %v8905_v52  ;;  %v8907_v54 = vld [vmem:[%s11054_s12 + $0x2e8] sm:$0xff]  ;;  %v8908_v55 = vld [vmem:[%s11054_s12 + $0x2f8] sm:$0xff]  ;;  %894 = vst [vmem:[%s11059_s7 + $0xa8] sm:$0xff] %v8906_v53 }
  0x60   : > { %896 = vst [vmem:[%s11059_s7 + $0xb0] sm:$0xff] %v8907_v54  ;;  %898 = vst [vmem:[%s11059_s7 + $0xb8] sm:$0xff] %v8908_v55  ;;  %v8909_v56 = vld [vmem:[%s11054_s12 + $0x388] sm:$0xff]  ;;  %v8910_v57 = vld [vmem:[%s11054_s12 + $0x398] sm:$0xff] }
  0x61   : > { %v8911_v58 = vld [vmem:[%s11054_s12 + $0x3a8] sm:$0xff]  ;;  %900 = vst [vmem:[%s11059_s7 + $0xc0] sm:$0xff] %v8909_v56  ;;  %902 = vst [vmem:[%s11059_s7 + $0xc8] sm:$0xff] %v8910_v57  ;;  %v8912_v59 = vld [vmem:[%s11054_s12 + $0x3b8] sm:$0xff] }
  0x62   : > { %904 = vst [vmem:[%s11059_s7 + $0xd0] sm:$0xff] %v8911_v58  ;;  %v8913_v60 = vld [vmem:[%s11054_s12 + $0x3c8] sm:$0xff]  ;;  %v8914_v61 = vld [vmem:[%s11054_s12 + $0x3d8] sm:$0xff]  ;;  %906 = vst [vmem:[%s11059_s7 + $0xd8] sm:$0xff] %v8912_v59 }
  0x63   : > { %908 = vst [vmem:[%s11059_s7 + $0xe0] sm:$0xff] %v8913_v60  ;;  %910 = vst [vmem:[%s11059_s7 + $0xe8] sm:$0xff] %v8914_v61  ;;  %v8915_v62 = vld [vmem:[%s11054_s12 + $0x3e8] sm:$0xff]  ;;  %v8916_v63 = vld [vmem:[%s11054_s12 + $0x3f8] sm:$0xff] }
  0x64   : > { %912 = vst [vmem:[%s11059_s7 + $0xf0] sm:$0xff] %v8915_v62  ;;  %914 = vst [vmem:[%s11059_s7 + $0xf8] sm:$0xff] %v8916_v63 }
  0x65 PF: > { %p8917_p11 = scmp.ge.s32.totalorder %s10722_s26, 1  ;;  %p919_p12 = scmp.lt.s32.totalorder %s10722_s26, 9 }
  0x67   : > { %p920_p13 = pnand %p8917_p11, %p919_p12 }
  0x69   : > { %923 = sbr.rel (%p920_p13) target bundleno = 3411 (0xd53), region = 180 }
  0x70   : > { %s926_s13 = sand.u32 1, %s10706_s22   ;;  %vm1031_vm0 = vcmask 523264   ;;  %s10724_s16 = smov 64  }
  0x71   : > { %s11127_s14 = sshll.u32 %s926_s13, 8  ;;  %s10725_s20 = smov [#allocation6]  }
  0x72   : > { %s11130_s15 = scalar_lea.vmem [#allocation2], %s11127_s14  ;;  %s12313_s17 = scalar_lea.vmem [#allocation3], %s11127_s14 }
  0x73   : > { %v11133_v0 = vld [vmem:[%s11130_s15 + $0x10] sm:$0xff]  ;;  %v11136_v1 = vld [vmem:[%s11130_s15] sm:$0xff]  ;;  %v11139_v2 = vld [vmem:[%s11130_s15 + $0x18] sm:$0xff]  ;;  %s14333_s27 = scalar_lea.vmem [#allocation4], %s11127_s14  ;;  %s15753_s7 = scalar_lea.vmem [#allocation5], %s11127_s14 }
  0x74   : > { %v1038_v3 = vsel %vm1031_vm0, %v11133_v0, 0.0  ;;  %v1032_v4 = vsel %vm1031_vm0, %v11136_v1, 0.0  ;;  %v11146_v5 = vld [vmem:[%s11130_s15 + $0x8] sm:$0xff]  ;;  %v1041_v6 = vsel %vm1031_vm0, %v11139_v2, 0.0  ;;  %v11156_v9 = vld [vmem:[%s11130_s15 + $0x20] sm:$0xff]  ;;  %v11163_v12 = vld [vmem:[%s11130_s15 + $0x38] sm:$0xff] }
  0x75   : > { %1039 = vadd.xlane.f32.xlu1 %v1038_v3  ;;  %1033 = vadd.xlane.f32.xlu0 %v1032_v4  ;;  %v1035_v7 = vsel %vm1031_vm0, %v11146_v5, 0.0  ;;  %v11153_v8 = vld [vmem:[%s11130_s15 + $0x28] sm:$0xff]  ;;  %v1044_v11 = vsel %vm1031_vm0, %v11156_v9, 0.0  ;;  %v11166_v13 = vld [vmem:[%s11130_s15 + $0x30] sm:$0xff]  ;;  %v1053_v15 = vsel %vm1031_vm0, %v11163_v12, 0.0  ;;  %v11176_v17 = vld [vmem:[%s11130_s15 + $0x40] sm:$0xff]  ;;  %v11294_v3 = vmul.f32 %v11146_v5, %v11146_v5 }
  0x76   : > { %v1047_v10 = vsel %vm1031_vm0, %v11153_v8, 0.0  ;;  %v11169_v14 = vld [vmem:[%s11130_s15 + $0x48] sm:$0xff]  ;;  %v1050_v16 = vsel %vm1031_vm0, %v11166_v13, 0.0  ;;  %v1056_v19 = vsel %vm1031_vm0, %v11176_v17, 0.0  ;;  %v11183_v20 = vld [vmem:[%s11130_s15 + $0x58] sm:$0xff]  ;;  %v11186_v21 = vld [vmem:[%s11130_s15 + $0x50] sm:$0xff]  ;;  %v11298_v4 = vmul.f32 %v11136_v1, %v11136_v1 }
  0x77   : > { %v1059_v18 = vsel %vm1031_vm0, %v11169_v14, 0.0  ;;  %v1065_v22 = vsel %vm1031_vm0, %v11183_v20, 0.0  ;;  %v11191_v23 = vld [vmem:[%s11130_s15 + $0x68] sm:$0xff]  ;;  %v1062_v24 = vsel %vm1031_vm0, %v11186_v21, 0.0  ;;  %v11196_v25 = vld [vmem:[%s11130_s15 + $0x60] sm:$0xff]  ;;  %v11199_v26 = vld [vmem:[%s11130_s15 + $0x78] sm:$0xff] }
  0x78   : > { %v11202_v27 = vld [vmem:[%s11130_s15 + $0x70] sm:$0xff]  ;;  %v11205_v28 = vld [vmem:[%s11130_s15 + $0x88] sm:$0xff]  ;;  %v11208_v29 = vld [vmem:[%s11130_s15 + $0x80] sm:$0xff]  ;;  %v1071_v30 = vsel %vm1031_vm0, %v11191_v23, 0.0  ;;  %v1068_v31 = vsel %vm1031_vm0, %v11196_v25, 0.0  ;;  %v1077_v32 = vsel %vm1031_vm0, %v11199_v26, 0.0 }
  0x79   : > { %1042 = vadd.xlane.f32.xlu1 %v1041_v6  ;;  %1036 = vadd.xlane.f32.xlu0 %v1035_v7  ;;  %v1074_v33 = vsel %vm1031_vm0, %v11202_v27, 0.0  ;;  %v1083_v34 = vsel %vm1031_vm0, %v11205_v28, 0.0  ;;  %v11221_v35 = vld [vmem:[%s11130_s15 + $0x98] sm:$0xff]  ;;  %v1080_v36 = vsel %vm1031_vm0, %v11208_v29, 0.0  ;;  %v11226_v37 = vld [vmem:[%s11130_s15 + $0x90] sm:$0xff]  ;;  %v11233_v40 = vld [vmem:[%s11130_s15 + $0xa8] sm:$0xff] }
  0x7a   : > { %v1089_v38 = vsel %vm1031_vm0, %v11221_v35, 0.0  ;;  %v1086_v39 = vsel %vm1031_vm0, %v11226_v37, 0.0  ;;  %v11236_v41 = vld [vmem:[%s11130_s15 + $0xa0] sm:$0xff]  ;;  %v1095_v42 = vsel %vm1031_vm0, %v11233_v40, 0.0  ;;  %v11243_v44 = vld [vmem:[%s11130_s15 + $0xb8] sm:$0xff]  ;;  %v11246_v45 = vld [vmem:[%s11130_s15 + $0xb0] sm:$0xff] }
  0x7b   : > { %v1092_v43 = vsel %vm1031_vm0, %v11236_v41, 0.0  ;;  %v1101_v46 = vsel %vm1031_vm0, %v11243_v44, 0.0  ;;  %v1098_v47 = vsel %vm1031_vm0, %v11246_v45, 0.0  ;;  %v11253_v48 = vld [vmem:[%s11130_s15 + $0xc8] sm:$0xff]  ;;  %v11256_v49 = vld [vmem:[%s11130_s15 + $0xc0] sm:$0xff]  ;;  %v11263_v52 = vld [vmem:[%s11130_s15 + $0xd8] sm:$0xff] }
  0x7c   : > { %v1107_v50 = vsel %vm1031_vm0, %v11253_v48, 0.0  ;;  %v1104_v51 = vsel %vm1031_vm0, %v11256_v49, 0.0  ;;  %v11266_v53 = vld [vmem:[%s11130_s15 + $0xd0] sm:$0xff]  ;;  %v1113_v54 = vsel %vm1031_vm0, %v11263_v52, 0.0  ;;  %v11273_v56 = vld [vmem:[%s11130_s15 + $0xe8] sm:$0xff]  ;;  %v11276_v57 = vld [vmem:[%s11130_s15 + $0xe0] sm:$0xff] }
  0x7d   : > { %1048 = vadd.xlane.f32.xlu1 %v1047_v10  ;;  %1045 = vadd.xlane.f32.xlu0 %v1044_v11  ;;  %v1110_v55 = vsel %vm1031_vm0, %v11266_v53, 0.0  ;;  %v1119_v58 = vsel %vm1031_vm0, %v11273_v56, 0.0  ;;  %v1116_v59 = vsel %vm1031_vm0, %v11276_v57, 0.0  ;;  %v11283_v60 = vld [vmem:[%s11130_s15 + $0xf8] sm:$0xff]  ;;  %v11286_v61 = vld [vmem:[%s11130_s15 + $0xf0] sm:$0xff]  ;;  %v1196_v6 = vsel %vm1031_vm0, %v11294_v3, 0.0 }
  0x7e   : > { %v1125_v62 = vsel %vm1031_vm0, %v11283_v60, 0.0  ;;  %v1122_v63 = vsel %vm1031_vm0, %v11286_v61, 0.0  ;;  %v1193_v7 = vsel %vm1031_vm0, %v11298_v4, 0.0  ;;  %v11306_v10 = vmul.f32 %v11139_v2, %v11139_v2  ;;  %s17276_s30 = scalar_lea.vmem [#allocation6], %s11127_s14  ;;  %s9152_s14 = sshll.u32 %s10714_s24, 12 }
  0x7f   : > { %v11310_v11 = vmul.f32 %v11133_v0, %v11133_v0  ;;  %s8656_s9 = sshll.u32 %s17276_s30, 4  ;;  %s17369_s18 = scalar_lea.hbm %s17431_s6, %s9152_s14  ;;  %s17371_s9 = int_to_ptr.vmem [resolvable:$true] %s8656_s9 }
  0x80   : > { %s17379_s24 = scalar_lea.sflag [#allocation7], %s926_s13  ;;  %s10644_s19 = scalar_lea.vmem %s17371_s9, 4096 }
  0x81   : > { %1054 = vadd.xlane.f32.xlu1 %v1053_v15  ;;  %1051 = vadd.xlane.f32.xlu0 %v1050_v16  ;;  %v1202_v15 = vsel %vm1031_vm0, %v11306_v10, 0.0  ;;  %v1199_v16 = vsel %vm1031_vm0, %v11310_v11, 0.0  ;;  %p10645_p0 = scmp.ne.s32.totalorder %s17371_s9, %s10644_s19 }
  0x83   : > { %p10646_p1 = pnand %p10645_p0, %p10806_p5 }
  0x85   : > { %1060 = vadd.xlane.f32.xlu1 %v1059_v18  ;;  %1057 = vadd.xlane.f32.xlu0 %v1056_v19  ;;  %v11318_v18 = vmul.f32 %v11153_v8, %v11153_v8  ;;  %v11322_v19 = vmul.f32 %v11156_v9, %v11156_v9  ;;  %p10647_p2 = pneg %p10646_p1 }
  0x89   : > { %1066 = vadd.xlane.f32.xlu1 %v1065_v22  ;;  %1063 = vadd.xlane.f32.xlu0 %v1062_v24  ;;  %v1208_v22 = vsel %vm1031_vm0, %v11318_v18, 0.0  ;;  %v1205_v24 = vsel %vm1031_vm0, %v11322_v19, 0.0 }
  0x8d   : > { %1072 = vadd.xlane.f32.xlu1 %v1071_v30  ;;  %1069 = vadd.xlane.f32.xlu0 %v1068_v31  ;;  %v11330_v30 = vmul.f32 %v11163_v12, %v11163_v12  ;;  %v11334_v31 = vmul.f32 %v11166_v13, %v11166_v13 }
  0x91   : > { %1078 = vadd.xlane.f32.xlu1 %v1077_v32  ;;  %1075 = vadd.xlane.f32.xlu0 %v1074_v33  ;;  %v1214_v32 = vsel %vm1031_vm0, %v11330_v30, 0.0  ;;  %v1211_v33 = vsel %vm1031_vm0, %v11334_v31, 0.0 }
  0x95   : > { %1084 = vadd.xlane.f32.xlu1 %v1083_v34  ;;  %1081 = vadd.xlane.f32.xlu0 %v1080_v36  ;;  %v11342_v34 = vmul.f32 %v11169_v14, %v11169_v14  ;;  %v11346_v36 = vmul.f32 %v11176_v17, %v11176_v17 }
  0x99   : > { %1090 = vadd.xlane.f32.xlu1 %v1089_v38  ;;  %1087 = vadd.xlane.f32.xlu0 %v1086_v39  ;;  %v1220_v38 = vsel %vm1031_vm0, %v11342_v34, 0.0  ;;  %v1217_v39 = vsel %vm1031_vm0, %v11346_v36, 0.0 }
  0x9d   : > { %1096 = vadd.xlane.f32.xlu1 %v1095_v42  ;;  %1093 = vadd.xlane.f32.xlu0 %v1092_v43  ;;  %v11354_v42 = vmul.f32 %v11183_v20, %v11183_v20  ;;  %v11358_v43 = vmul.f32 %v11186_v21, %v11186_v21 }
  0xa1   : > { %1102 = vadd.xlane.f32.xlu1 %v1101_v46  ;;  %1099 = vadd.xlane.f32.xlu0 %v1098_v47  ;;  %v1226_v46 = vsel %vm1031_vm0, %v11354_v42, 0.0  ;;  %v1223_v47 = vsel %vm1031_vm0, %v11358_v43, 0.0 }
  0xa5   : > { %1108 = vadd.xlane.f32.xlu1 %v1107_v50  ;;  %1105 = vadd.xlane.f32.xlu0 %v1104_v51  ;;  %v11366_v50 = vmul.f32 %v11191_v23, %v11191_v23  ;;  %v11370_v51 = vmul.f32 %v11196_v25, %v11196_v25 }
  0xa9   : > { %1114 = vadd.xlane.f32.xlu1 %v1113_v54  ;;  %1111 = vadd.xlane.f32.xlu0 %v1110_v55  ;;  %v1232_v54 = vsel %vm1031_vm0, %v11366_v50, 0.0  ;;  %v1229_v55 = vsel %vm1031_vm0, %v11370_v51, 0.0 }
  0xad   : > { %1120 = vadd.xlane.f32.xlu1 %v1119_v58  ;;  %1117 = vadd.xlane.f32.xlu0 %v1116_v59  ;;  %v11378_v58 = vmul.f32 %v11199_v26, %v11199_v26  ;;  %v11382_v59 = vmul.f32 %v11202_v27, %v11202_v27 }
  0xb1   : > { %1126 = vadd.xlane.f32.xlu1 %v1125_v62  ;;  %1123 = vadd.xlane.f32.xlu0 %v1122_v63  ;;  %v1238_v62 = vsel %vm1031_vm0, %v11378_v58, 0.0  ;;  %v1235_v63 = vsel %vm1031_vm0, %v11382_v59, 0.0 }
  0xb5   : > { %1197 = vadd.xlane.f32.xlu1 %v1196_v6  ;;  %1194 = vadd.xlane.f32.xlu0 %v1193_v7  ;;  %v11390_v6 = vmul.f32 %v11205_v28, %v11205_v28  ;;  %v11394_v7 = vmul.f32 %v11208_v29, %v11208_v29 }
  0xb9   : > { %1203 = vadd.xlane.f32.xlu1 %v1202_v15  ;;  %1200 = vadd.xlane.f32.xlu0 %v1199_v16  ;;  %v1244_v15 = vsel %vm1031_vm0, %v11390_v6, 0.0  ;;  %v1241_v16 = vsel %vm1031_vm0, %v11394_v7, 0.0 }
  0xbd   : > { %1209 = vadd.xlane.f32.xlu1 %v1208_v22  ;;  %1206 = vadd.xlane.f32.xlu0 %v1205_v24  ;;  %v11402_v22 = vmul.f32 %v11221_v35, %v11221_v35  ;;  %v11406_v24 = vmul.f32 %v11226_v37, %v11226_v37 }
  0xc1   : > { %1215 = vadd.xlane.f32.xlu1 %v1214_v32  ;;  %1212 = vadd.xlane.f32.xlu0 %v1211_v33  ;;  %v1250_v32 = vsel %vm1031_vm0, %v11402_v22, 0.0  ;;  %v1247_v33 = vsel %vm1031_vm0, %v11406_v24, 0.0 }
  0xc5   : > { %1221 = vadd.xlane.f32.xlu1 %v1220_v38  ;;  %1218 = vadd.xlane.f32.xlu0 %v1217_v39  ;;  %v11414_v38 = vmul.f32 %v11233_v40, %v11233_v40  ;;  %v11418_v39 = vmul.f32 %v11236_v41, %v11236_v41 }
  0xc9   : > { %1227 = vadd.xlane.f32.xlu1 %v1226_v46  ;;  %1224 = vadd.xlane.f32.xlu0 %v1223_v47  ;;  %v1256_v46 = vsel %vm1031_vm0, %v11414_v38, 0.0  ;;  %v1253_v47 = vsel %vm1031_vm0, %v11418_v39, 0.0 }
  0xcd   : > { %1233 = vadd.xlane.f32.xlu1 %v1232_v54  ;;  %1230 = vadd.xlane.f32.xlu0 %v1229_v55  ;;  %v11426_v54 = vmul.f32 %v11243_v44, %v11243_v44  ;;  %v11430_v55 = vmul.f32 %v11246_v45, %v11246_v45 }
  0xcf   : > { %17633 = vst [vmem:[#allocation9_spill] sm:$0xff] %v11426_v54 }
  0xd1   : > { %1239 = vadd.xlane.f32.xlu1 %v1238_v62  ;;  %1236 = vadd.xlane.f32.xlu0 %v1235_v63  ;;  %v1262_v62 = vsel %vm1031_vm0, %v11426_v54, 0.0  ;;  %v1259_v63 = vsel %vm1031_vm0, %v11430_v55, 0.0 }
  0xd5   : > { %1245 = vadd.xlane.f32.xlu1 %v1244_v15  ;;  %1242 = vadd.xlane.f32.xlu0 %v1241_v16  ;;  %v11438_v15 = vmul.f32 %v11253_v48, %v11253_v48  ;;  %v11442_v16 = vmul.f32 %v11256_v49, %v11256_v49 }
  0xd7   : > { %17634 = vst [vmem:[#allocation10_spill] sm:$0xff] %v11438_v15  ;;  %17635 = vst [vmem:[#allocation11_spill] sm:$0xff] %v11442_v16 }
  0xd9   : > { %1251 = vadd.xlane.f32.xlu1 %v1250_v32  ;;  %1248 = vadd.xlane.f32.xlu0 %v1247_v33  ;;  %v1268_v32 = vsel %vm1031_vm0, %v11438_v15, 0.0  ;;  %v1265_v33 = vsel %vm1031_vm0, %v11442_v16, 0.0  ;;  %v11462_v15 = vmul.f32 %v11273_v56, %v11273_v56  ;;  %v11466_v16 = vmul.f32 %v11276_v57, %v11276_v57 }
  0xdb   : > { %17638 = vst [vmem:[#allocation14_spill] sm:$0xff] %v11462_v15  ;;  %17639 = vst [vmem:[#allocation15_spill] sm:$0xff] %v11466_v16 }
  0xdd   : > { %1257 = vadd.xlane.f32.xlu1 %v1256_v46  ;;  %1254 = vadd.xlane.f32.xlu0 %v1253_v47  ;;  %v11450_v46 = vmul.f32 %v11263_v52, %v11263_v52  ;;  %v11454_v47 = vmul.f32 %v11266_v53, %v11266_v53 }
  0xdf   : > { %17636 = vst [vmem:[#allocation12_spill] sm:$0xff] %v11450_v46  ;;  %17637 = vst [vmem:[#allocation13_spill] sm:$0xff] %v11454_v47 }
  0xe1   : > { %1263 = vadd.xlane.f32.xlu1 %v1262_v62  ;;  %1260 = vadd.xlane.f32.xlu0 %v1259_v63  ;;  %v1274_v62 = vsel %vm1031_vm0, %v11450_v46, 0.0  ;;  %v1271_v63 = vsel %vm1031_vm0, %v11454_v47, 0.0  ;;  %v11474_v46 = vmul.f32 %v11283_v60, %v11283_v60  ;;  %v11478_v47 = vmul.f32 %v11286_v61, %v11286_v61 }
  0xe5   : > { %1269 = vadd.xlane.f32.xlu1 %v1268_v32  ;;  %1266 = vadd.xlane.f32.xlu0 %v1265_v33  ;;  %v1280_v32 = vsel %vm1031_vm0, %v11462_v15, 0.0  ;;  %v1277_v33 = vsel %vm1031_vm0, %v11466_v16, 0.0 }
  0xe9   : > { %1275 = vadd.xlane.f32.xlu1 %v1274_v62  ;;  %1272 = vadd.xlane.f32.xlu0 %v1271_v63  ;;  %v1286_v62 = vsel %vm1031_vm0, %v11474_v46, 0.0  ;;  %v1283_v63 = vsel %vm1031_vm0, %v11478_v47, 0.0 }
  0xed   : > { %1281 = vadd.xlane.f32.xlu1 %v1280_v32  ;;  %1278 = vadd.xlane.f32.xlu0 %v1277_v33 }
  0xf1   : > { %1287 = vadd.xlane.f32.xlu1 %v1286_v62  ;;  %1284 = vadd.xlane.f32.xlu0 %v1283_v63 }
 0x102   : > { %v11484_v15 = vpop.xlane.xlu1 %1039  ;;  %v11486_v16 = vpop.xlane.xlu0 %1033  ;;  %1603 = vrot.lane.b32.xlu1 %v11146_v5, %s10724_s16 }
 0x103   : > { %17640 = vst [vmem:[#allocation16_spill] sm:$0xff] %v11484_v15  ;;  %17641 = vst [vmem:[#allocation17_spill] sm:$0xff] %v11486_v16 }
 0x106   : > { %v11490_v54 = vpop.xlane.xlu1 %1042  ;;  %v11492_v32 = vpop.xlane.xlu0 %1036  ;;  %1605 = vrot.lane.b32.xlu1 %v11133_v0, %s10724_s16 }
 0x107   : > { %17642 = vst [vmem:[#allocation18_spill] sm:$0xff] %v11490_v54  ;;  %17643 = vst [vmem:[#allocation19_spill] sm:$0xff] %v11492_v32  ;;  %1601 = vrot.lane.b32.xlu0 %v11136_v1, %s10724_s16 }
 0x10a   : > { %v11498_v33 = vpop.xlane.xlu1 %1048  ;;  %v11500_v62 = vpop.xlane.xlu0 %1045  ;;  %1607 = vrot.lane.b32.xlu1 %v11139_v2, %s10724_s16 }
 0x10b   : > { %17644 = vst [vmem:[#allocation20_spill] sm:$0xff] %v11498_v33  ;;  %17645 = vst [vmem:[#allocation21_spill] sm:$0xff] %v11500_v62  ;;  %1609 = vrot.lane.b32.xlu0 %v11156_v9, %s10724_s16  ;;  %v12006_v62 = vld [vmem:[%s11130_s15 + $0x58] sm:$0xff] }
 0x10c   : > { %17725 = vst [vmem:[#allocation87_spill] sm:$0xff] %v12006_v62 }
 0x10e   : > { %v11506_v5 = vpop.xlane.xlu1 %1054  ;;  %v11508_v63 = vpop.xlane.xlu0 %1051  ;;  %1611 = vrot.lane.b32.xlu1 %v11153_v8, %s10724_s16 }
 0x10f   : > { %17646 = vst [vmem:[#allocation22_spill] sm:$0xff] %v11506_v5  ;;  %17647 = vst [vmem:[#allocation23_spill] sm:$0xff] %v11508_v63  ;;  %1613 = vrot.lane.b32.xlu0 %v11166_v13, %s10724_s16 }
 0x112   : > { %v11514_v0 = vpop.xlane.xlu1 %1060  ;;  %v11516_v1 = vpop.xlane.xlu0 %1057  ;;  %1615 = vrot.lane.b32.xlu1 %v11163_v12, %s10724_s16 }
 0x113   : > { %17648 = vst [vmem:[#allocation24_spill] sm:$0xff] %v11514_v0  ;;  %17649 = vst [vmem:[#allocation25_spill] sm:$0xff] %v11516_v1  ;;  %1617 = vrot.lane.b32.xlu0 %v11176_v17, %s10724_s16 }
 0x116   : > { %v11522_v2 = vpop.xlane.xlu1 %1066  ;;  %v11524_v9 = vpop.xlane.xlu0 %1063  ;;  %1619 = vrot.lane.b32.xlu1 %v11169_v14, %s10724_s16 }
 0x117   : > { %17650 = vst [vmem:[#allocation26_spill] sm:$0xff] %v11522_v2  ;;  %17651 = vst [vmem:[#allocation27_spill] sm:$0xff] %v11524_v9  ;;  %1621 = vrot.lane.b32.xlu0 %v11186_v21, %s10724_s16  ;;  %v11955_v2 = vld [vmem:[%s11130_s15 + $0x38] sm:$0xff] }
 0x118   : > { %17719 = vst [vmem:[#allocation81_spill] sm:$0xff] %v11955_v2 }
 0x11a   : > { %v11530_v8 = vpop.xlane.xlu1 %1072  ;;  %v11532_v13 = vpop.xlane.xlu0 %1069  ;;  %1623 = vrot.lane.b32.xlu1 %v11183_v20, %s10724_s16 }
 0x11b   : > { %17652 = vst [vmem:[#allocation28_spill] sm:$0xff] %v11530_v8  ;;  %17653 = vst [vmem:[#allocation29_spill] sm:$0xff] %v11532_v13  ;;  %1625 = vrot.lane.b32.xlu0 %v11196_v25, %s10724_s16 }
 0x11e   : > { %v11538_v12 = vpop.xlane.xlu1 %1078  ;;  %v11540_v17 = vpop.xlane.xlu0 %1075  ;;  %1627 = vrot.lane.b32.xlu1 %v11191_v23, %s10724_s16 }
 0x11f   : > { %17654 = vst [vmem:[#allocation30_spill] sm:$0xff] %v11538_v12  ;;  %17655 = vst [vmem:[#allocation31_spill] sm:$0xff] %v11540_v17  ;;  %1629 = vrot.lane.b32.xlu0 %v11202_v27, %s10724_s16  ;;  %v11916_v17 = vld [vmem:[%s11130_s15 + $0x18] sm:$0xff] }
 0x122   : > { %v11546_v14 = vpop.xlane.xlu1 %1084  ;;  %v11548_v21 = vpop.xlane.xlu0 %1081  ;;  %1631 = vrot.lane.b32.xlu1 %v11199_v26, %s10724_s16 }
 0x123   : > { %17656 = vst [vmem:[#allocation32_spill] sm:$0xff] %v11546_v14  ;;  %17657 = vst [vmem:[#allocation33_spill] sm:$0xff] %v11548_v21  ;;  %1633 = vrot.lane.b32.xlu0 %v11208_v29, %s10724_s16 }
 0x126   : > { %v11554_v20 = vpop.xlane.xlu1 %1090  ;;  %v11556_v25 = vpop.xlane.xlu0 %1087  ;;  %1635 = vrot.lane.b32.xlu1 %v11205_v28, %s10724_s16 }
 0x127   : > { %17658 = vst [vmem:[#allocation34_spill] sm:$0xff] %v11554_v20  ;;  %17659 = vst [vmem:[#allocation35_spill] sm:$0xff] %v11556_v25  ;;  %1637 = vrot.lane.b32.xlu0 %v11226_v37, %s10724_s16 }
 0x12a   : > { %v11562_v23 = vpop.xlane.xlu1 %1096  ;;  %v11564_v27 = vpop.xlane.xlu0 %1093  ;;  %1639 = vrot.lane.b32.xlu1 %v11221_v35, %s10724_s16 }
 0x12b   : > { %17660 = vst [vmem:[#allocation36_spill] sm:$0xff] %v11562_v23  ;;  %17661 = vst [vmem:[#allocation37_spill] sm:$0xff] %v11564_v27  ;;  %1641 = vrot.lane.b32.xlu0 %v11236_v41, %s10724_s16 }
 0x12e   : > { %v11570_v26 = vpop.xlane.xlu1 %1102  ;;  %v11572_v29 = vpop.xlane.xlu0 %1099  ;;  %1643 = vrot.lane.b32.xlu1 %v11233_v40, %s10724_s16 }
 0x12f   : > { %17662 = vst [vmem:[#allocation38_spill] sm:$0xff] %v11570_v26  ;;  %17663 = vst [vmem:[#allocation39_spill] sm:$0xff] %v11572_v29  ;;  %1645 = vrot.lane.b32.xlu0 %v11246_v45, %s10724_s16 }
 0x132   : > { %v11578_v28 = vpop.xlane.xlu1 %1108  ;;  %v11580_v37 = vpop.xlane.xlu0 %1105  ;;  %1647 = vrot.lane.b32.xlu1 %v11243_v44, %s10724_s16 }
 0x133   : > { %17664 = vst [vmem:[#allocation40_spill] sm:$0xff] %v11578_v28  ;;  %17665 = vst [vmem:[#allocation41_spill] sm:$0xff] %v11580_v37  ;;  %1649 = vrot.lane.b32.xlu0 %v11256_v49, %s10724_s16 }
 0x136   : > { %v11586_v35 = vpop.xlane.xlu1 %1114  ;;  %v11588_v41 = vpop.xlane.xlu0 %1111  ;;  %1651 = vrot.lane.b32.xlu1 %v11253_v48, %s10724_s16 }
 0x137   : > { %17666 = vst [vmem:[#allocation42_spill] sm:$0xff] %v11586_v35  ;;  %17667 = vst [vmem:[#allocation43_spill] sm:$0xff] %v11588_v41  ;;  %1653 = vrot.lane.b32.xlu0 %v11266_v53, %s10724_s16 }
 0x13a   : > { %v11594_v40 = vpop.xlane.xlu1 %1120  ;;  %v11596_v45 = vpop.xlane.xlu0 %1117  ;;  %1655 = vrot.lane.b32.xlu1 %v11263_v52, %s10724_s16 }
 0x13b   : > { %17668 = vst [vmem:[#allocation44_spill] sm:$0xff] %v11594_v40  ;;  %17669 = vst [vmem:[#allocation45_spill] sm:$0xff] %v11596_v45  ;;  %1657 = vrot.lane.b32.xlu0 %v11276_v57, %s10724_s16 }
 0x13e   : > { %v11602_v44 = vpop.xlane.xlu1 %1126  ;;  %v11604_v49 = vpop.xlane.xlu0 %1123  ;;  %1659 = vrot.lane.b32.xlu1 %v11273_v56, %s10724_s16 }
 0x13f   : > { %17670 = vst [vmem:[#allocation46_spill] sm:$0xff] %v11602_v44  ;;  %17671 = vst [vmem:[#allocation47_spill] sm:$0xff] %v11604_v49  ;;  %1661 = vrot.lane.b32.xlu0 %v11286_v61, %s10724_s16 }
 0x142   : > { %v11610_v48 = vpop.xlane.xlu1 %1197  ;;  %v11612_v53 = vpop.xlane.xlu0 %1194  ;;  %1663 = vrot.lane.b32.xlu1 %v11283_v60, %s10724_s16 }
 0x143   : > { %17672 = vst [vmem:[#allocation48_spill] sm:$0xff] %v11610_v48  ;;  %17673 = vst [vmem:[#allocation49_spill] sm:$0xff] %v11612_v53 }
 0x146   : > { %v11616_v52 = vpop.xlane.xlu1 %1203  ;;  %v11618_v57 = vpop.xlane.xlu0 %1200 }
 0x147   : > { %17674 = vst [vmem:[#allocation50_spill] sm:$0xff] %v11616_v52  ;;  %17675 = vst [vmem:[#allocation51_spill] sm:$0xff] %v11618_v57 }
 0x14a   : > { %v11620_v44 = vpop.xlane.xlu1 %1209  ;;  %v11622_v49 = vpop.xlane.xlu0 %1206 }
 0x14b   : > { %17676 = vst [vmem:[#allocation52_spill] sm:$0xff] %v11620_v44  ;;  %17677 = vst [vmem:[#allocation53_spill] sm:$0xff] %v11622_v49 }
 0x14e   : > { %v11624_v45 = vpop.xlane.xlu1 %1215  ;;  %v11626_v56 = vpop.xlane.xlu0 %1212 }
 0x14f   : > { %17678 = vst [vmem:[#allocation54_spill] sm:$0xff] %v11624_v45  ;;  %17679 = vst [vmem:[#allocation55_spill] sm:$0xff] %v11626_v56 }
 0x152   : > { %v11628_v61 = vpop.xlane.xlu1 %1221  ;;  %v11630_v40 = vpop.xlane.xlu0 %1218 }
 0x153   : > { %17680 = vst [vmem:[#allocation56_spill] sm:$0xff] %v11628_v61  ;;  %17681 = vst [vmem:[#allocation57_spill] sm:$0xff] %v11630_v40 }
 0x156   : > { %v11632_v41 = vpop.xlane.xlu1 %1227  ;;  %v11634_v35 = vpop.xlane.xlu0 %1224 }
 0x157   : > { %17682 = vst [vmem:[#allocation58_spill] sm:$0xff] %v11632_v41  ;;  %17683 = vst [vmem:[#allocation59_spill] sm:$0xff] %v11634_v35 }
 0x15a   : > { %v11636_v60 = vpop.xlane.xlu1 %1233  ;;  %v11638_v37 = vpop.xlane.xlu0 %1230 }
 0x15b   : > { %17684 = vst [vmem:[#allocation60_spill] sm:$0xff] %v11636_v60  ;;  %17685 = vst [vmem:[#allocation61_spill] sm:$0xff] %v11638_v37 }
 0x15e   : > { %v11640_v28 = vpop.xlane.xlu1 %1239  ;;  %v11642_v29 = vpop.xlane.xlu0 %1236 }
 0x15f   : > { %17686 = vst [vmem:[#allocation62_spill] sm:$0xff] %v11640_v28  ;;  %17687 = vst [vmem:[#allocation63_spill] sm:$0xff] %v11642_v29 }
 0x162   : > { %v11644_v26 = vpop.xlane.xlu1 %1245  ;;  %v11646_v45 = vpop.xlane.xlu0 %1242 }
 0x163   : > { %17688 = vst [vmem:[#allocation64_spill] sm:$0xff] %v11644_v26  ;;  %17689 = vst [vmem:[#allocation65_spill] sm:$0xff] %v11646_v45 }
 0x166   : > { %v11648_v56 = vpop.xlane.xlu1 %1251  ;;  %v11650_v61 = vpop.xlane.xlu0 %1248 }
 0x167   : > { %17690 = vst [vmem:[#allocation66_spill] sm:$0xff] %v11648_v56  ;;  %17691 = vst [vmem:[#allocation67_spill] sm:$0xff] %v11650_v61 }
 0x16a   : > { %v11652_v40 = vpop.xlane.xlu1 %1257  ;;  %v11654_v41 = vpop.xlane.xlu0 %1254 }
 0x16b   : > { %17692 = vst [vmem:[#allocation68_spill] sm:$0xff] %v11652_v40  ;;  %17693 = vst [vmem:[#allocation69_spill] sm:$0xff] %v11654_v41 }
 0x16e   : > { %v11656_v35 = vpop.xlane.xlu1 %1263  ;;  %v11658_v60 = vpop.xlane.xlu0 %1260 }
 0x16f   : > { %17694 = vst [vmem:[#allocation70_spill] sm:$0xff] %v11656_v35  ;;  %17695 = vst [vmem:[#allocation71_spill] sm:$0xff] %v11658_v60 }
 0x172   : > { %v11660_v37 = vpop.xlane.xlu1 %1269  ;;  %v11662_v28 = vpop.xlane.xlu0 %1266 }
 0x173   : > { %17696 = vst [vmem:[#allocation72_spill] sm:$0xff] %v11660_v37  ;;  %17697 = vst [vmem:[#allocation73_spill] sm:$0xff] %v11662_v28 }
 0x176   : > { %v11664_v29 = vpop.xlane.xlu1 %1275  ;;  %v11666_v26 = vpop.xlane.xlu0 %1272 }
 0x177   : > { %17698 = vst [vmem:[#allocation74_spill] sm:$0xff] %v11664_v29  ;;  %17699 = vst [vmem:[#allocation75_spill] sm:$0xff] %v11666_v26 }
 0x17a   : > { %v11668_v45 = vpop.xlane.xlu1 %1281  ;;  %v11670_v56 = vpop.xlane.xlu0 %1278 }
 0x17b   : > { %17700 = vst [vmem:[#allocation76_spill] sm:$0xff] %v11668_v45  ;;  %17701 = vst [vmem:[#allocation77_spill] sm:$0xff] %v11670_v56 }
 0x17e   : > { %v11672_v61 = vpop.xlane.xlu1 %1287  ;;  %v11674_v40 = vpop.xlane.xlu0 %1284 }
 0x17f   : > { %17702 = vst [vmem:[#allocation78_spill] sm:$0xff] %v11672_v61  ;;  %17703 = vst [vmem:[#allocation79_spill] sm:$0xff] %v11674_v40 }
 0x182   : > { %v1604_v41 = vpop.permute.xlu1 %1603  ;;  %v1602_v35 = vpop.permute.xlu0 %1601 }
 0x183   : > { %v1700_v60 = vsel %vm1031_vm0, %v1604_v41, 0.0  ;;  %v1697_v37 = vsel %vm1031_vm0, %v1602_v35, 0.0 }
 0x184   : > { %1701 = vadd.xlane.f32.xlu1 %v1700_v60  ;;  %1698 = vadd.xlane.f32.xlu0 %v1697_v37 }
 0x186   : > { %v1606_v28 = vpop.permute.xlu1 %1605  ;;  %v1610_v29 = vpop.permute.xlu0 %1609 }
 0x187   : > { %v1703_v26 = vsel %vm1031_vm0, %v1606_v28, 0.0  ;;  %v1709_v40 = vsel %vm1031_vm0, %v1610_v29, 0.0 }
 0x188   : > { %1704 = vadd.xlane.f32.xlu0 %v1703_v26 }
 0x18a   : > { %v1608_v45 = vpop.permute.xlu1 %1607  ;;  %v1614_v49 = vpop.permute.xlu0 %1613 }
 0x18b   : > { %v1706_v56 = vsel %vm1031_vm0, %v1608_v45, 0.0  ;;  %v1715_v37 = vsel %vm1031_vm0, %v1614_v49, 0.0 }
 0x18c   : > { %1707 = vadd.xlane.f32.xlu0 %v1706_v56 }
 0x18e   : > { %v1612_v61 = vpop.permute.xlu1 %1611  ;;  %v1618_v44 = vpop.permute.xlu0 %1617 }
 0x18f   : > { %v1712_v41 = vsel %vm1031_vm0, %v1612_v61, 0.0  ;;  %v1721_v45 = vsel %vm1031_vm0, %v1618_v44, 0.0 }
 0x190   : > { %1713 = vadd.xlane.f32.xlu1 %v1712_v41  ;;  %1710 = vadd.xlane.f32.xlu0 %v1709_v40 }
 0x192   : > { %v1616_v35 = vpop.permute.xlu1 %1615  ;;  %v1622_v60 = vpop.permute.xlu0 %1621 }
 0x193   : > { %v1718_v28 = vsel %vm1031_vm0, %v1616_v35, 0.0  ;;  %v1727_v61 = vsel %vm1031_vm0, %v1622_v60, 0.0 }
 0x194   : > { %1719 = vadd.xlane.f32.xlu1 %v1718_v28  ;;  %1716 = vadd.xlane.f32.xlu0 %v1715_v37 }
 0x196   : > { %v1620_v26 = vpop.permute.xlu1 %1619  ;;  %v1626_v56 = vpop.permute.xlu0 %1625 }
 0x197   : > { %v1724_v27 = vsel %vm1031_vm0, %v1620_v26, 0.0  ;;  %v1733_v35 = vsel %vm1031_vm0, %v1626_v56, 0.0 }
 0x198   : > { %1725 = vadd.xlane.f32.xlu1 %v1724_v27  ;;  %1722 = vadd.xlane.f32.xlu0 %v1721_v45 }
 0x19a   : > { %v1624_v29 = vpop.permute.xlu1 %1623  ;;  %v1630_v40 = vpop.permute.xlu0 %1629 }
 0x19b   : > { %v1730_v41 = vsel %vm1031_vm0, %v1624_v29, 0.0  ;;  %v1739_v27 = vsel %vm1031_vm0, %v1630_v40, 0.0 }
 0x19c   : > { %1731 = vadd.xlane.f32.xlu1 %v1730_v41  ;;  %1728 = vadd.xlane.f32.xlu0 %v1727_v61 }
 0x19e   : > { %v1628_v49 = vpop.permute.xlu1 %1627  ;;  %v1634_v37 = vpop.permute.xlu0 %1633 }
 0x19f   : > { %v1736_v28 = vsel %vm1031_vm0, %v1628_v49, 0.0  ;;  %v1745_v29 = vsel %vm1031_vm0, %v1634_v37, 0.0 }
 0x1a0   : > { %1737 = vadd.xlane.f32.xlu1 %v1736_v28  ;;  %1734 = vadd.xlane.f32.xlu0 %v1733_v35 }
 0x1a2   : > { %v1632_v44 = vpop.permute.xlu1 %1631  ;;  %v1638_v26 = vpop.permute.xlu0 %1637 }
 0x1a3   : > { %v1742_v45 = vsel %vm1031_vm0, %v1632_v44, 0.0  ;;  %v1751_v49 = vsel %vm1031_vm0, %v1638_v26, 0.0 }
 0x1a4   : > { %1743 = vadd.xlane.f32.xlu1 %v1742_v45  ;;  %1740 = vadd.xlane.f32.xlu0 %v1739_v27 }
 0x1a6   : > { %v1636_v60 = vpop.permute.xlu1 %1635  ;;  %v1642_v61 = vpop.permute.xlu0 %1641 }
 0x1a7   : > { %v1748_v41 = vsel %vm1031_vm0, %v1636_v60, 0.0  ;;  %v1757_v44 = vsel %vm1031_vm0, %v1642_v61, 0.0 }
 0x1a8   : > { %1749 = vadd.xlane.f32.xlu1 %v1748_v41  ;;  %1746 = vadd.xlane.f32.xlu0 %v1745_v29 }
 0x1aa   : > { %v1640_v56 = vpop.permute.xlu1 %1639  ;;  %v1646_v35 = vpop.permute.xlu0 %1645 }
 0x1ab   : > { %v1754_v28 = vsel %vm1031_vm0, %v1640_v56, 0.0  ;;  %v1763_v60 = vsel %vm1031_vm0, %v1646_v35, 0.0 }
 0x1ac   : > { %1755 = vadd.xlane.f32.xlu1 %v1754_v28  ;;  %1752 = vadd.xlane.f32.xlu0 %v1751_v49 }
 0x1ae   : > { %v1644_v40 = vpop.permute.xlu1 %1643  ;;  %v1650_v27 = vpop.permute.xlu0 %1649 }
 0x1af   : > { %v1760_v45 = vsel %vm1031_vm0, %v1644_v40, 0.0  ;;  %v1769_v56 = vsel %vm1031_vm0, %v1650_v27, 0.0 }
 0x1b0   : > { %1761 = vadd.xlane.f32.xlu1 %v1760_v45  ;;  %1758 = vadd.xlane.f32.xlu0 %v1757_v44 }
 0x1b2   : > { %v1648_v37 = vpop.permute.xlu1 %1647  ;;  %v1654_v41 = vpop.permute.xlu0 %1653 }
 0x1b3   : > { %v1766_v29 = vsel %vm1031_vm0, %v1648_v37, 0.0  ;;  %v1775_v40 = vsel %vm1031_vm0, %v1654_v41, 0.0 }
 0x1b4   : > { %1767 = vadd.xlane.f32.xlu1 %v1766_v29  ;;  %1764 = vadd.xlane.f32.xlu0 %v1763_v60 }
 0x1b6   : > { %v1652_v26 = vpop.permute.xlu1 %1651  ;;  %v1658_v61 = vpop.permute.xlu0 %1657 }
 0x1b7   : > { %v1772_v49 = vsel %vm1031_vm0, %v1652_v26, 0.0  ;;  %v1781_v45 = vsel %vm1031_vm0, %v1658_v61, 0.0 }
 0x1b8   : > { %1773 = vadd.xlane.f32.xlu1 %v1772_v49  ;;  %1770 = vadd.xlane.f32.xlu0 %v1769_v56 }
 0x1ba   : > { %v1656_v28 = vpop.permute.xlu1 %1655  ;;  %v1662_v60 = vpop.permute.xlu0 %1661 }
 0x1bb   : > { %v1778_v44 = vsel %vm1031_vm0, %v1656_v28, 0.0  ;;  %v1787_v29 = vsel %vm1031_vm0, %v1662_v60, 0.0 }
 0x1bc   : > { %1779 = vadd.xlane.f32.xlu1 %v1778_v44  ;;  %1776 = vadd.xlane.f32.xlu0 %v1775_v40 }
 0x1be   : > { %v1660_v35 = vpop.permute.xlu1 %1659 }
 0x1bf   : > { %v1784_v37 = vsel %vm1031_vm0, %v1660_v35, 0.0 }
 0x1c0   : > { %1785 = vadd.xlane.f32.xlu1 %v1784_v37  ;;  %1782 = vadd.xlane.f32.xlu0 %v1781_v45 }
 0x1c2   : > { %v1664_v27 = vpop.permute.xlu1 %1663 }
 0x1c3   : > { %v1790_v26 = vsel %vm1031_vm0, %v1664_v27, 0.0 }
 0x1c4   : > { %1791 = vadd.xlane.f32.xlu1 %v1790_v26  ;;  %1788 = vadd.xlane.f32.xlu0 %v1787_v29 }
 0x1d5   : > { %1859 = vrot.lane.b32.xlu1 %v11294_v3, %s10724_s16  ;;  %v17704_v3 = vld [vmem:[#allocation9_spill] sm:$0xff] }
 0x1d9   : > { %1861 = vrot.lane.b32.xlu1 %v11310_v11, %s10724_s16  ;;  %v17707_v11 = vld [vmem:[#allocation13_spill] sm:$0xff] }
 0x1da   : > { %1857 = vrot.lane.b32.xlu0 %v11298_v4, %s10724_s16  ;;  %v17705_v4 = vld [vmem:[#allocation11_spill] sm:$0xff] }
 0x1dd   : > { %1863 = vrot.lane.b32.xlu1 %v11306_v10, %s10724_s16  ;;  %v17706_v10 = vld [vmem:[#allocation10_spill] sm:$0xff] }
 0x1de   : > { %1865 = vrot.lane.b32.xlu0 %v11322_v19, %s10724_s16  ;;  %v17709_v19 = vld [vmem:[#allocation15_spill] sm:$0xff] }
 0x1e1   : > { %1867 = vrot.lane.b32.xlu1 %v11318_v18, %s10724_s16  ;;  %v17708_v18 = vld [vmem:[#allocation12_spill] sm:$0xff] }
 0x1e2   : > { %1869 = vrot.lane.b32.xlu0 %v11334_v31, %s10724_s16 }
 0x1e5   : > { %1871 = vrot.lane.b32.xlu1 %v11330_v30, %s10724_s16  ;;  %v17710_v30 = vld [vmem:[#allocation14_spill] sm:$0xff] }
 0x1e6   : > { %1873 = vrot.lane.b32.xlu0 %v11346_v36, %s10724_s16 }
 0x1e9   : > { %1875 = vrot.lane.b32.xlu1 %v11342_v34, %s10724_s16 }
 0x1ea   : > { %1877 = vrot.lane.b32.xlu0 %v11358_v43, %s10724_s16 }
 0x1ed   : > { %1879 = vrot.lane.b32.xlu1 %v11354_v42, %s10724_s16 }
 0x1ee   : > { %1881 = vrot.lane.b32.xlu0 %v11370_v51, %s10724_s16 }
 0x1f1   : > { %1883 = vrot.lane.b32.xlu1 %v11366_v50, %s10724_s16 }
 0x1f2   : > { %1885 = vrot.lane.b32.xlu0 %v11382_v59, %s10724_s16 }
 0x1f5   : > { %1887 = vrot.lane.b32.xlu1 %v11378_v58, %s10724_s16 }
 0x1f6   : > { %1889 = vrot.lane.b32.xlu0 %v11394_v7, %s10724_s16 }
 0x1f9   : > { %1891 = vrot.lane.b32.xlu1 %v11390_v6, %s10724_s16 }
 0x1fa   : > { %1893 = vrot.lane.b32.xlu0 %v11406_v24, %s10724_s16 }
 0x1fd   : > { %1895 = vrot.lane.b32.xlu1 %v11402_v22, %s10724_s16 }
 0x1fe   : > { %1897 = vrot.lane.b32.xlu0 %v11418_v39, %s10724_s16 }
 0x201   : > { %1899 = vrot.lane.b32.xlu1 %v11414_v38, %s10724_s16 }
 0x202   : > { %1901 = vrot.lane.b32.xlu0 %v11430_v55, %s10724_s16 }
 0x205   : > { %1903 = vrot.lane.b32.xlu1 %v17704_v3, %s10724_s16 }
 0x206   : > { %1905 = vrot.lane.b32.xlu0 %v17705_v4, %s10724_s16 }
 0x209   : > { %1907 = vrot.lane.b32.xlu1 %v17706_v10, %s10724_s16 }
 0x20a   : > { %1909 = vrot.lane.b32.xlu0 %v17707_v11, %s10724_s16 }
 0x20d   : > { %1911 = vrot.lane.b32.xlu1 %v17708_v18, %s10724_s16 }
 0x20e   : > { %1913 = vrot.lane.b32.xlu0 %v17709_v19, %s10724_s16 }
 0x211   : > { %1915 = vrot.lane.b32.xlu1 %v17710_v30, %s10724_s16  ;;  %v11768_v31 = vpop.xlane.xlu0 %1698  ;;  %v11776_v36 = vpop.xlane.xlu1 %1701 }
 0x212   : > { %1917 = vrot.lane.b32.xlu0 %v11478_v47, %s10724_s16 }
 0x215   : > { %1919 = vrot.lane.b32.xlu1 %v11474_v46, %s10724_s16  ;;  %v11774_v34 = vpop.xlane.xlu0 %1704 }
 0x219   : > { %v11778_v42 = vpop.xlane.xlu0 %1707 }
 0x21d   : > { %v11780_v43 = vpop.xlane.xlu1 %1713  ;;  %v11782_v50 = vpop.xlane.xlu0 %1710 }
 0x221   : > { %v11784_v51 = vpop.xlane.xlu1 %1719  ;;  %v11786_v58 = vpop.xlane.xlu0 %1716 }
 0x225   : > { %v11788_v59 = vpop.xlane.xlu1 %1725  ;;  %v11790_v6 = vpop.xlane.xlu0 %1722 }
 0x226   : > { %v11952_v8 = vmul.f32 0.015625, %v11790_v6  ;;  %v11967_v6 = vld [vmem:[%s11130_s15 + $0x30] sm:$0xff] }
 0x227   : > { %17720 = vst [vmem:[#allocation82_spill] sm:$0xff] %v11967_v6 }
 0x229   : > { %v11792_v7 = vpop.xlane.xlu1 %1731  ;;  %v11794_v22 = vpop.xlane.xlu0 %1728 }
 0x22a   : > { %v11972_v0 = vmul.f32 0.015625, %v11794_v22  ;;  %v11991_v22 = vld [vmem:[%s11130_s15 + $0x40] sm:$0xff] }
 0x22b   : > { %17723 = vst [vmem:[#allocation85_spill] sm:$0xff] %v11991_v22 }
 0x22c   : > { %v12012_v33 = vmul.f32 %v11972_v0, %v11972_v0 }
 0x22d   : > { %v11796_v24 = vpop.xlane.xlu1 %1737  ;;  %v11798_v38 = vpop.xlane.xlu0 %1734 }
 0x231   : > { %v11800_v39 = vpop.xlane.xlu1 %1743  ;;  %v11802_v55 = vpop.xlane.xlu0 %1740 }
 0x232   : > { %v12015_v32 = vmul.f32 0.015625, %v11800_v39 }
 0x234   : > { %17726 = vst [vmem:[#allocation88_spill] sm:$0xff] %v12015_v32 }
 0x235   : > { %v11804_v46 = vpop.xlane.xlu1 %1749  ;;  %v11806_v47 = vpop.xlane.xlu0 %1746 }
 0x239   : > { %v11808_v41 = vpop.xlane.xlu1 %1755  ;;  %v11810_v56 = vpop.xlane.xlu0 %1752 }
 0x23d   : > { %v11812_v49 = vpop.xlane.xlu1 %1761  ;;  %v11814_v61 = vpop.xlane.xlu0 %1758 }
 0x241   : > { %v11816_v28 = vpop.xlane.xlu1 %1767  ;;  %v11818_v40 = vpop.xlane.xlu0 %1764 }
 0x245   : > { %v11820_v44 = vpop.xlane.xlu1 %1773  ;;  %v11822_v35 = vpop.xlane.xlu0 %1770 }
 0x249   : > { %v11824_v45 = vpop.xlane.xlu1 %1779  ;;  %v11826_v37 = vpop.xlane.xlu0 %1776 }
 0x24a   : > { %17711 = vst [vmem:[#allocation9_spill] sm:$0xff] %v11826_v37 }
 0x24d   : > { %v11828_v60 = vpop.xlane.xlu1 %1785  ;;  %v11830_v27 = vpop.xlane.xlu0 %1782 }
 0x24e   : > { %17712 = vst [vmem:[#allocation11_spill] sm:$0xff] %v11828_v60  ;;  %17713 = vst [vmem:[#allocation10_spill] sm:$0xff] %v11830_v27 }
 0x251   : > { %v11832_v29 = vpop.xlane.xlu1 %1791  ;;  %v11834_v26 = vpop.xlane.xlu0 %1788 }
 0x252   : > { %17714 = vst [vmem:[#allocation13_spill] sm:$0xff] %v11832_v29  ;;  %17715 = vst [vmem:[#allocation12_spill] sm:$0xff] %v11834_v26  ;;  %v12035_v26 = vmul.f32 0.015625, %v11802_v55  ;;  %v12050_v55 = vmul.f32 %v12015_v32, %v12015_v32 }
 0x255   : > { %v1860_v3 = vpop.permute.xlu1 %1859  ;;  %v1858_v4 = vpop.permute.xlu0 %1857 }
 0x256   : > { %v1956_v10 = vsel %vm1031_vm0, %v1860_v3, 0.0  ;;  %v1953_v11 = vsel %vm1031_vm0, %v1858_v4, 0.0 }
 0x257   : > { %1957 = vadd.xlane.f32.xlu1 %v1956_v10  ;;  %1954 = vadd.xlane.f32.xlu0 %v1953_v11 }
 0x259   : > { %v1862_v18 = vpop.permute.xlu1 %1861  ;;  %v1866_v30 = vpop.permute.xlu0 %1865 }
 0x25a   : > { %v1959_v19 = vsel %vm1031_vm0, %v1862_v18, 0.0  ;;  %v1965_v21 = vsel %vm1031_vm0, %v1866_v30, 0.0 }
 0x25b   : > { %1960 = vadd.xlane.f32.xlu0 %v1959_v19 }
 0x25d   : > { %v1864_v23 = vpop.permute.xlu1 %1863  ;;  %v1870_v20 = vpop.permute.xlu0 %1869 }
 0x25e   : > { %v1962_v25 = vsel %vm1031_vm0, %v1864_v23, 0.0  ;;  %v1971_v10 = vsel %vm1031_vm0, %v1870_v20, 0.0 }
 0x25f   : > { %1963 = vadd.xlane.f32.xlu0 %v1962_v25 }
 0x261   : > { %v1868_v57 = vpop.permute.xlu1 %1867  ;;  %v1874_v3 = vpop.permute.xlu0 %1873 }
 0x262   : > { %v1968_v52 = vsel %vm1031_vm0, %v1868_v57, 0.0  ;;  %v1977_v23 = vsel %vm1031_vm0, %v1874_v3, 0.0 }
 0x263   : > { %1969 = vadd.xlane.f32.xlu1 %v1968_v52  ;;  %1966 = vadd.xlane.f32.xlu0 %v1965_v21 }
 0x265   : > { %v1872_v4 = vpop.permute.xlu1 %1871  ;;  %v1878_v18 = vpop.permute.xlu0 %1877 }
 0x266   : > { %v1974_v11 = vsel %vm1031_vm0, %v1872_v4, 0.0  ;;  %v1983_v52 = vsel %vm1031_vm0, %v1878_v18, 0.0 }
 0x267   : > { %1975 = vadd.xlane.f32.xlu1 %v1974_v11  ;;  %1972 = vadd.xlane.f32.xlu0 %v1971_v10 }
 0x269   : > { %v1876_v19 = vpop.permute.xlu1 %1875  ;;  %v1882_v14 = vpop.permute.xlu0 %1881 }
 0x26a   : > { %v1980_v25 = vsel %vm1031_vm0, %v1876_v19, 0.0  ;;  %v1989_v4 = vsel %vm1031_vm0, %v1882_v14, 0.0 }
 0x26b   : > { %1981 = vadd.xlane.f32.xlu1 %v1980_v25  ;;  %1978 = vadd.xlane.f32.xlu0 %v1977_v23 }
 0x26d   : > { %v1880_v57 = vpop.permute.xlu1 %1879  ;;  %v1886_v30 = vpop.permute.xlu0 %1885 }
 0x26e   : > { %v1986_v21 = vsel %vm1031_vm0, %v1880_v57, 0.0  ;;  %v1995_v19 = vsel %vm1031_vm0, %v1886_v30, 0.0 }
 0x26f   : > { %1987 = vadd.xlane.f32.xlu1 %v1986_v21  ;;  %1984 = vadd.xlane.f32.xlu0 %v1983_v52 }
 0x271   : > { %v1884_v20 = vpop.permute.xlu1 %1883  ;;  %v1890_v11 = vpop.permute.xlu0 %1889 }
 0x272   : > { %v1992_v10 = vsel %vm1031_vm0, %v1884_v20, 0.0  ;;  %v2001_v57 = vsel %vm1031_vm0, %v1890_v11, 0.0 }
 0x273   : > { %1993 = vadd.xlane.f32.xlu1 %v1992_v10  ;;  %1990 = vadd.xlane.f32.xlu0 %v1989_v4 }
 0x275   : > { %v1888_v3 = vpop.permute.xlu1 %1887  ;;  %v1894_v25 = vpop.permute.xlu0 %1893 }
 0x276   : > { %v1998_v23 = vsel %vm1031_vm0, %v1888_v3, 0.0  ;;  %v2007_v20 = vsel %vm1031_vm0, %v1894_v25, 0.0 }
 0x277   : > { %1999 = vadd.xlane.f32.xlu1 %v1998_v23  ;;  %1996 = vadd.xlane.f32.xlu0 %v1995_v19 }
 0x279   : > { %v1892_v18 = vpop.permute.xlu1 %1891  ;;  %v1898_v21 = vpop.permute.xlu0 %1897 }
 0x27a   : > { %v2004_v52 = vsel %vm1031_vm0, %v1892_v18, 0.0  ;;  %v2013_v3 = vsel %vm1031_vm0, %v1898_v21, 0.0 }
 0x27b   : > { %2005 = vadd.xlane.f32.xlu1 %v2004_v52  ;;  %2002 = vadd.xlane.f32.xlu0 %v2001_v57 }
 0x27d   : > { %v1896_v14 = vpop.permute.xlu1 %1895  ;;  %v1902_v10 = vpop.permute.xlu0 %1901 }
 0x27e   : > { %v2010_v4 = vsel %vm1031_vm0, %v1896_v14, 0.0  ;;  %v2019_v18 = vsel %vm1031_vm0, %v1902_v10, 0.0 }
 0x27f   : > { %2011 = vadd.xlane.f32.xlu1 %v2010_v4  ;;  %2008 = vadd.xlane.f32.xlu0 %v2007_v20 }
 0x281   : > { %v1900_v30 = vpop.permute.xlu1 %1899  ;;  %v1906_v23 = vpop.permute.xlu0 %1905 }
 0x282   : > { %v2016_v19 = vsel %vm1031_vm0, %v1900_v30, 0.0  ;;  %v2025_v14 = vsel %vm1031_vm0, %v1906_v23, 0.0 }
 0x283   : > { %2017 = vadd.xlane.f32.xlu1 %v2016_v19  ;;  %2014 = vadd.xlane.f32.xlu0 %v2013_v3 }
 0x285   : > { %v1904_v11 = vpop.permute.xlu1 %1903  ;;  %v1910_v52 = vpop.permute.xlu0 %1909 }
 0x286   : > { %v2022_v57 = vsel %vm1031_vm0, %v1904_v11, 0.0  ;;  %v2031_v30 = vsel %vm1031_vm0, %v1910_v52, 0.0  ;;  %v11869_v52 = vmul.f32 0.015625, %v11776_v36 }
 0x287   : > { %2023 = vadd.xlane.f32.xlu1 %v2022_v57  ;;  %2020 = vadd.xlane.f32.xlu0 %v2019_v18 }
 0x289   : > { %v1908_v25 = vpop.permute.xlu1 %1907  ;;  %v1914_v21 = vpop.permute.xlu0 %1913 }
 0x28a   : > { %v2028_v20 = vsel %vm1031_vm0, %v1908_v25, 0.0  ;;  %v2037_v19 = vsel %vm1031_vm0, %v1914_v21, 0.0  ;;  %v11878_v21 = vmul.f32 0.015625, %v11778_v42  ;;  %v11909_v42 = vld [vmem:[%s11130_s15 + $0x10] sm:$0xff] }
 0x28b   : > { %2029 = vadd.xlane.f32.xlu1 %v2028_v20  ;;  %2026 = vadd.xlane.f32.xlu0 %v2025_v14  ;;  %v11872_v14 = vmul.f32 0.015625, %v11768_v31  ;;  %v11875_v20 = vmul.f32 0.015625, %v11774_v34  ;;  %v9915_v31 = vld [vmem:[%s17429_s4 + $0x20] sm:$0xff]   ;;  %v11889_v34 = vld [vmem:[%s11130_s15 + $0x8] sm:$0xff] }
 0x28c   : > { %17716 = vst [vmem:[#allocation15_spill] sm:$0xff] %v11889_v34  ;;  %9313 = vmatprep.subr.bf16.mxu1 %v9915_v31 }
 0x28d   : > { %v1912_v4 = vpop.permute.xlu1 %1911  ;;  %v1918_v18 = vpop.permute.xlu0 %1917  ;;  %9314 = vmatpush3.bf16.msra.mxu1 %v9915_v31 }
 0x28e   : > { %v2034_v3 = vsel %vm1031_vm0, %v1912_v4, 0.0  ;;  %v2043_v57 = vsel %vm1031_vm0, %v1918_v18, 0.0  ;;  %v11899_v18 = vld [vmem:[%s11130_s15] sm:$0xff] }
 0x28f   : > { %2035 = vadd.xlane.f32.xlu1 %v2034_v3  ;;  %2032 = vadd.xlane.f32.xlu0 %v2031_v30  ;;  %v2082_v30 = vmul.f32 %v11869_v52, %v11869_v52  ;;  %v11883_v3 = vmul.f32 0.015625, %v11780_v43 }
 0x291   : > { %v1916_v10 = vpop.permute.xlu1 %1915 }
 0x292   : > { %v2040_v11 = vsel %vm1031_vm0, %v1916_v10, 0.0 }
 0x293   : > { %2041 = vadd.xlane.f32.xlu1 %v2040_v11  ;;  %2038 = vadd.xlane.f32.xlu0 %v2037_v19  ;;  %v2081_v19 = vmul.f32 %v11872_v14, %v11872_v14  ;;  %v11896_v11 = vmul.f32 0.015625, %v11782_v50  ;;  %v11930_v50 = vmul.f32 0.015625, %v11786_v58 }
 0x295   : > { %v1920_v23 = vpop.permute.xlu1 %1919  ;;  %v11937_v31 = vmul.f32 %v11896_v11, %v11896_v11 }
 0x296   : > { %v2046_v25 = vsel %vm1031_vm0, %v1920_v23, 0.0 }
 0x297   : > { %2047 = vadd.xlane.f32.xlu1 %v2046_v25  ;;  %2044 = vadd.xlane.f32.xlu0 %v2043_v57  ;;  %v2083_v57 = vmul.f32 %v11875_v20, %v11875_v20  ;;  %v11906_v25 = vmul.f32 0.015625, %v11784_v51  ;;  %v11922_v51 = vmul.f32 %v11883_v3, %v11883_v3 }
 0x299   : > { %v11946_v58 = vmul.f32 %v11906_v25, %v11906_v25 }
 0x2e4   : > { %v1958_v4 = vpop.xlane.xlu1 %1957  ;;  %v1955_v36 = vpop.xlane.xlu0 %1954 }
 0x2e5   : > { %v2050_v10 = vmul.f32 0.015625, %v1958_v4  ;;  %v2049_v43 = vmul.f32 0.015625, %v1955_v36  ;;  %v2084_v36 = vmul.f32 %v11878_v21, %v11878_v21 }
 0x2e7   : > { %v2114_v4 = vsub.f32 %v2050_v10, %v2082_v30  ;;  %v2113_v53 = vsub.f32 %v2049_v43, %v2081_v19  ;;  %v11925_v30 = vld [vmem:[%s11130_s15 + $0x28] sm:$0xff]  ;;  %v11940_v43 = vld [vmem:[%s11130_s15 + $0x20] sm:$0xff] }
 0x2e8   : > { %17717 = vst [vmem:[#allocation14_spill] sm:$0xff] %v11925_v30  ;;  %v1961_v48 = vpop.xlane.xlu0 %1960  ;;  %v9916_v19 = vld [vmem:[%s17429_s4 + $0x28] sm:$0xff]   ;;  %17718 = vst [vmem:[#allocation80_spill] sm:$0xff] %v11940_v43 }
 0x2e9   : > { %v2146_v12 = vmax.f32 %v2114_v4, 0.0  ;;  %v2145_v10 = vmax.f32 %v2113_v53, 0.0  ;;  %v2051_v13 = vmul.f32 0.015625, %v1961_v48  ;;  %v11949_v4 = vmul.f32 0.015625, %v11788_v59  ;;  %9315 = vmatprep.subr.bf16.mxu1 %v9916_v19 }
 0x2ea   : > { %v11960_v48 = vmul.f32 0.015625, %v11792_v7  ;;  %9316 = vmatpush3.bf16.msra.mxu1 %v9916_v19  ;;  %v11964_v59 = vmul.f32 %v11930_v50, %v11930_v50  ;;  %v11975_v7 = vmul.f32 0.015625, %v11796_v24  ;;  %v11982_v19 = vld [vmem:[%s11130_s15 + $0x48] sm:$0xff] }
 0x2eb   : > { %v2178_v9 = vadd.f32 1e-05, %v2146_v12  ;;  %v2177_v53 = vadd.f32 1e-05, %v2145_v10  ;;  %v2115_v23 = vsub.f32 %v2051_v13, %v2083_v57  ;;  %v11979_v10 = vmul.f32 %v11949_v4, %v11949_v4  ;;  %17722 = vst [vmem:[#allocation84_spill] sm:$0xff] %v11982_v19 }
 0x2ec   : > { %v1964_v1 = vpop.xlane.xlu0 %1963  ;;  %17721 = vst [vmem:[#allocation83_spill] sm:$0xff] %v11975_v7 }
 0x2ed   : > { %9947 = vrsqrt.f32 %v2178_v9  ;;  %v2147_v13 = vmax.f32 %v2115_v23, 0.0  ;;  %v2052_v57 = vmul.f32 0.015625, %v1964_v1  ;;  %v11988_v9 = vmul.f32 %v11952_v8, %v11952_v8  ;;  %v9917_v1 = vld [vmem:[%s17429_s4 + $0x30] sm:$0xff]  }
 0x2ee   : > { %9949 = vrsqrt.f32 %v2177_v53  ;;  %v12000_v23 = vmul.f32 %v11960_v48, %v11960_v48  ;;  %v12003_v53 = vmul.f32 0.015625, %v11798_v38  ;;  %9317 = vmatprep.subr.bf16.mxu1 %v9917_v1  ;;  %v9918_v38 = vld [vmem:[%s17429_s4 + $0x38] sm:$0xff]  }
 0x2ef   : > { %v2179_v12 = vadd.f32 1e-05, %v2147_v13  ;;  %v2116_v63 = vsub.f32 %v2052_v57, %v2084_v36  ;;  %v12021_v36 = vld [vmem:[%s11130_s15 + $0x50] sm:$0xff]  ;;  %v12027_v57 = vmul.f32 %v11975_v7, %v11975_v7  ;;  %9318 = vmatpush3.bf16.msra.mxu1 %v9917_v1  ;;  %v12058_v7 = vmul.f32 0.015625, %v11804_v46 }
 0x2f0   : > { %17724 = vst [vmem:[#allocation86_spill] sm:$0xff] %v12003_v53  ;;  %v1970_v5 = vpop.xlane.xlu1 %1969  ;;  %v1967_v16 = vpop.xlane.xlu0 %1966  ;;  %17727 = vst [vmem:[#allocation89_spill] sm:$0xff] %v12021_v36  ;;  %9319 = vmatprep.subr.bf16.mxu1 %v9918_v38  ;;  %v12040_v13 = vmul.f32 %v12003_v53, %v12003_v53  ;;  %v12065_v53 = vld [vmem:[%s11130_s15 + $0x70] sm:$0xff]  ;;  %v12071_v46 = vmul.f32 0.015625, %v11806_v47 }
 0x2f1   : > { %v2054_v54 = vmul.f32 0.015625, %v1970_v5  ;;  %v2148_v24 = vmax.f32 %v2116_v63, 0.0  ;;  %v2053_v39 = vmul.f32 0.015625, %v1967_v16  ;;  %v12030_v5 = vld [vmem:[%s11130_s15 + $0x68] sm:$0xff]  ;;  %9951 = vrsqrt.f32 %v2179_v12  ;;  %v12043_v63 = vld [vmem:[%s11130_s15 + $0x60] sm:$0xff]  ;;  %17731 = vst [vmem:[#allocation93_spill] sm:$0xff] %v12065_v53 }
 0x2f2   : > { %17728 = vst [vmem:[#allocation90_spill] sm:$0xff] %v12030_v5  ;;  %17729 = vst [vmem:[#allocation91_spill] sm:$0xff] %v12043_v63  ;;  %v12082_v47 = vmul.f32 %v12058_v7, %v12058_v7 }
 0x2f3   : > { %v2118_v29 = vsub.f32 %v2054_v54, %v11922_v51  ;;  %v2180_v1 = vadd.f32 1e-05, %v2148_v24  ;;  %v2117_v15 = vsub.f32 %v2053_v39, %v11937_v31  ;;  %v12053_v54 = vld [vmem:[%s11130_s15 + $0x78] sm:$0xff]  ;;  %9320 = vmatpush3.bf16.msra.mxu1 %v9918_v38  ;;  %v12062_v39 = vmul.f32 %v12035_v26, %v12035_v26 }
 0x2f4   : > { %v1976_v27 = vpop.xlane.xlu1 %1975  ;;  %17730 = vst [vmem:[#allocation92_spill] sm:$0xff] %v12053_v54  ;;  %v1973_v37 = vpop.xlane.xlu0 %1972 }
 0x2f5   : > { %v2150_v12 = vmax.f32 %v2118_v29, 0.0  ;;  %v2056_v60 = vmul.f32 0.015625, %v1976_v27  ;;  %9953 = vrsqrt.f32 %v2180_v1  ;;  %v2149_v24 = vmax.f32 %v2117_v15, 0.0 }
 0x2f6   : > { %v2055_v16 = vmul.f32 0.015625, %v1973_v37  ;;  %v17732_v1 = vsub.f32 %v11889_v34, %v11869_v52 }
 0x2f7   : > { %v9948_v31 = vpop.eup %9947  ;;  %v2182_v29 = vadd.f32 1e-05, %v2150_v12  ;;  %v2120_v27 = vsub.f32 %v2056_v60, %v11946_v58  ;;  %v2181_v15 = vadd.f32 1e-05, %v2149_v24  ;;  %v17733_v60 = vsub.f32 %v11899_v18, %v11872_v14 }
 0x2f8   : > { %v9950_v32 = vpop.eup %9949  ;;  %v2119_v37 = vsub.f32 %v2055_v16, %v11964_v59  ;;  %v1982_v38 = vpop.xlane.xlu1 %1981  ;;  %v2274_v54 = vmul.f32 %v9948_v31, %v17732_v1  ;;  %v12085_v12 = vmul.f32 0.015625, %v11808_v41  ;;  %v12094_v14 = vmul.f32 0.015625, %v11810_v56 }
 0x2f9   : > { %9955 = vrsqrt.f32 %v2182_v29  ;;  %v2152_v63 = vmax.f32 %v2120_v27, 0.0  ;;  %v2058_v5 = vmul.f32 0.015625, %v1982_v38  ;;  %v1979_v51 = vpop.xlane.xlu0 %1978  ;;  %v2273_v58 = vmul.f32 %v9950_v32, %v17733_v60  ;;  %v12089_v29 = vld [vmem:[%s11130_s15 + $0x88] sm:$0xff]  ;;  %v12112_v60 = vld [vmem:[%s11130_s15 + $0x98] sm:$0xff] }
 0x2fa   : > { %9957 = vrsqrt.f32 %v2181_v15  ;;  %v2151_v59 = vmax.f32 %v2119_v37, 0.0  ;;  %v2057_v16 = vmul.f32 0.015625, %v1979_v51  ;;  %17734 = vst [vmem:[#allocation94_spill] sm:$0xff] %v12089_v29  ;;  %v12103_v37 = vld [vmem:[%s11130_s15 + $0x80] sm:$0xff]  ;;  %v12109_v1 = vmul.f32 %v12085_v12, %v12085_v12  ;;  %17735 = vst [vmem:[#allocation95_spill] sm:$0xff] %v12112_v60 }
 0x2fb   : > { %v2184_v52 = vadd.f32 1e-05, %v2152_v63  ;;  %v2122_v24 = vsub.f32 %v2058_v5, %v11979_v10  ;;  %v2305_v31 = vpack.c.bf16 %v2274_v54, %v2273_v58  ;;  %v9952_v41 = vpop.eup %9951  ;;  %v12099_v63 = vmul.f32 %v12071_v46, %v12071_v46 }
 0x2fc   : > { %v2183_v27 = vadd.f32 1e-05, %v2151_v59  ;;  %v2121_v51 = vsub.f32 %v2057_v16, %v11988_v9  ;;  %v1988_v15 = vpop.xlane.xlu1 %1987  ;;  %v12129_v32 = vmul.f32 0.015625, %v11812_v49 }
 0x2fd   : > { %9959 = vrsqrt.f32 %v2184_v52  ;;  %v2154_v10 = vmax.f32 %v2122_v24, 0.0  ;;  %v2060_v5 = vmul.f32 0.015625, %v1988_v15  ;;  %2346 = vrot.lane.b32.xlu0 %v2305_v31, %s10724_s16  ;;  %v1985_v54 = vpop.xlane.xlu0 %1984  ;;  %v12119_v24 = vmul.f32 %v12094_v14, %v12094_v14 }
 0x2fe   : > { %9961 = vrsqrt.f32 %v2183_v27  ;;  %v2153_v38 = vmax.f32 %v2121_v51, 0.0  ;;  %v2059_v9 = vmul.f32 0.015625, %v1985_v54  ;;  %v17736_v15 = vsub.f32 %v11909_v42, %v11875_v20 }
 0x2ff   : > { %v2186_v59 = vadd.f32 1e-05, %v2154_v10  ;;  %v2124_v16 = vsub.f32 %v2060_v5, %v12000_v23  ;;  %v9954_v52 = vpop.eup %9953  ;;  %v17737_v23 = vsub.f32 %v11916_v17, %v11878_v21  ;;  %v12138_v21 = vmul.f32 0.015625, %v11814_v61 }
 0x300   : > { %v2185_v31 = vadd.f32 1e-05, %v2153_v38  ;;  %v2123_v27 = vsub.f32 %v2059_v9, %v12012_v33  ;;  %v1994_v51 = vpop.xlane.xlu1 %1993  ;;  %v2275_v54 = vmul.f32 %v9952_v41, %v17736_v15  ;;  %v12132_v9 = vld [vmem:[%s11130_s15 + $0x90] sm:$0xff] }
 0x301   : > { %9963 = vrsqrt.f32 %v2186_v59  ;;  %v2156_v56 = vmax.f32 %v2124_v16, 0.0  ;;  %v2062_v58 = vmul.f32 0.015625, %v1994_v51  ;;  %v1991_v10 = vpop.xlane.xlu0 %1990  ;;  %v2276_v5 = vmul.f32 %v9954_v52, %v17737_v23  ;;  %17738 = vst [vmem:[#allocation96_spill] sm:$0xff] %v12132_v9 }
 0x302   : > { %9965 = vrsqrt.f32 %v2185_v31  ;;  %v2155_v38 = vmax.f32 %v2123_v27, 0.0  ;;  %v2061_v34 = vmul.f32 0.015625, %v1991_v10  ;;  %v2259_v20 = vsub.f32 %v12132_v9, %v12094_v14 }
 0x303   : > { %v9956_v33 = vpop.eup %9955  ;;  %v2188_v41 = vadd.f32 1e-05, %v2156_v56  ;;  %v2126_v59 = vsub.f32 %v2062_v58, %v12027_v57  ;;  %v2306_v16 = vpack.c.bf16 %v2276_v5, %v2275_v54  ;;  %v17739_v27 = vsub.f32 %v11925_v30, %v11883_v3  ;;  %v12153_v3 = vld [vmem:[%s11130_s15 + $0xa8] sm:$0xff] }
 0x304   : > { %v9958_v51 = vpop.eup %9957  ;;  %v2187_v49 = vadd.f32 1e-05, %v2155_v38  ;;  %v2125_v52 = vsub.f32 %v2061_v34, %v12040_v13  ;;  %v2000_v31 = vpop.xlane.xlu1 %1999  ;;  %v17740_v56 = vsub.f32 %v11940_v43, %v11896_v11  ;;  %v12150_v58 = vmul.f32 %v12129_v32, %v12129_v32 }
 0x305   : > { %v2278_v15 = vmul.f32 %v9956_v33, %v17739_v27  ;;  %9967 = vrsqrt.f32 %v2188_v41  ;;  %v2158_v10 = vmax.f32 %v2126_v59, 0.0  ;;  %v2064_v23 = vmul.f32 0.015625, %v2000_v31  ;;  %2348 = vrot.lane.b32.xlu1 %v2306_v16, %s10724_s16  ;;  %v1997_v57 = vpop.xlane.xlu0 %1996 }
 0x306   : > { %v2277_v61 = vmul.f32 %v9958_v51, %v17740_v56  ;;  %9969 = vrsqrt.f32 %v2187_v49  ;;  %v2157_v34 = vmax.f32 %v2125_v52, 0.0  ;;  %v2063_v13 = vmul.f32 0.015625, %v1997_v57 }
 0x307   : > { %v9960_v54 = vpop.eup %9959  ;;  %v2262_v5 = vsub.f32 %v12153_v3, %v12129_v32  ;;  %v2190_v38 = vadd.f32 1e-05, %v2158_v10  ;;  %v2128_v33 = vsub.f32 %v2064_v23, %v12050_v55  ;;  %v12160_v11 = vmul.f32 %v12138_v21, %v12138_v21  ;;  %v10482_v32 = vld [vmem:[%s11130_s15 + $0xb0] sm:$0xff] }
 0x308   : > { %v2307_v41 = vpack.c.bf16 %v2278_v15, %v2277_v61  ;;  %v9962_v59 = vpop.eup %9961  ;;  %v2189_v16 = vadd.f32 1e-05, %v2157_v34  ;;  %v2127_v51 = vsub.f32 %v2063_v13, %v12062_v39  ;;  %v2006_v49 = vpop.xlane.xlu1 %2005  ;;  %v17741_v52 = vsub.f32 %v11955_v2, %v11906_v25  ;;  %v12174_v34 = vld [vmem:[%s11130_s15 + $0xa0] sm:$0xff] }
 0x309   : > { %9971 = vrsqrt.f32 %v2190_v38  ;;  %v2160_v27 = vmax.f32 %v2128_v33, 0.0  ;;  %v2066_v10 = vmul.f32 0.015625, %v2006_v49  ;;  %v2003_v55 = vpop.xlane.xlu0 %2002  ;;  %v17742_v15 = vsub.f32 %v11967_v6, %v11930_v50  ;;  %v17803_v6 = vld [vmem:[#allocation30_spill] sm:$0xff] }
 0x30a   : > { %v2280_v31 = vmul.f32 %v9960_v54, %v17741_v52  ;;  %2350 = vrot.lane.b32.xlu1 %v2307_v41, %s10724_s16  ;;  %v12171_v57 = vmul.f32 0.015625, %v11816_v28  ;;  %9973 = vrsqrt.f32 %v2189_v16  ;;  %v2159_v39 = vmax.f32 %v2127_v51, 0.0 }
 0x30b   : > { %v2279_v23 = vmul.f32 %v9962_v59, %v17742_v15  ;;  %v2065_v56 = vmul.f32 0.015625, %v2003_v55  ;;  %v9964_v61 = vpop.eup %9963  ;;  %v2261_v25 = vsub.f32 %v12174_v34, %v12138_v21  ;;  %v2192_v13 = vadd.f32 1e-05, %v2160_v27  ;;  %v12287_v21 = vld [vmem:[%s17429_s4] sm:$0xff]  }
 0x30c   : > { %v2130_v54 = vsub.f32 %v2066_v10, %v12082_v47  ;;  %v9966_v33 = vpop.eup %9965  ;;  %v12180_v50 = vmul.f32 0.015625, %v11818_v40  ;;  %v2191_v41 = vadd.f32 1e-05, %v2159_v39  ;;  %v2012_v59 = vpop.xlane.xlu1 %2011  ;;  %v17743_v16 = vsub.f32 %v11982_v19, %v11949_v4  ;;  %9353 = vmatprep.subr.bf16.mxu1 %v12287_v21 }
 0x30d   : > { %v2308_v38 = vpack.c.bf16 %v2280_v31, %v2279_v23  ;;  %v2129_v28 = vsub.f32 %v2065_v56, %v12099_v63  ;;  %9975 = vrsqrt.f32 %v2192_v13  ;;  %v2068_v52 = vmul.f32 0.015625, %v2012_v59  ;;  %v2009_v27 = vpop.xlane.xlu0 %2008 }
 0x30e   : > { %v2282_v51 = vmul.f32 %v9964_v61, %v17743_v16  ;;  %v2162_v49 = vmax.f32 %v2130_v54, 0.0  ;;  %v17744_v47 = vsub.f32 %v11991_v22, %v11952_v8  ;;  %v2104_v40 = vmul.f32 %v12171_v57, %v12171_v57  ;;  %v17806_v22 = vld [vmem:[#allocation31_spill] sm:$0xff] }
 0x30f   : > { %2352 = vrot.lane.b32.xlu1 %v2308_v38, %s10724_s16  ;;  %9977 = vrsqrt.f32 %v2191_v41  ;;  %v2161_v63 = vmax.f32 %v2129_v28, 0.0  ;;  %v2067_v10 = vmul.f32 0.015625, %v2009_v27  ;;  %v9968_v55 = vpop.eup %9967  ;;  %v12193_v4 = vmul.f32 0.015625, %v11820_v44 }
 0x310   : > { %v2281_v31 = vmul.f32 %v9966_v33, %v17744_v47  ;;  %v2194_v15 = vadd.f32 1e-05, %v2162_v49  ;;  %v2132_v23 = vsub.f32 %v2068_v52, %v12109_v1  ;;  %v9970_v56 = vpop.eup %9969  ;;  %v2103_v61 = vmul.f32 %v12180_v50, %v12180_v50  ;;  %v2018_v54 = vpop.xlane.xlu1 %2017 }
 0x311   : > { %v2193_v8 = vadd.f32 1e-05, %v2161_v63  ;;  %v2131_v13 = vsub.f32 %v2067_v10, %v12119_v24  ;;  %v17745_v38 = vsub.f32 %v12006_v62, %v11960_v48  ;;  %v2070_v44 = vmul.f32 0.015625, %v2018_v54  ;;  %v2015_v28 = vpop.xlane.xlu0 %2014  ;;  %v17751_v54 = vld [vmem:[#allocation86_spill] sm:$0xff] }
 0x312   : > { %v2309_v39 = vpack.c.bf16 %v2282_v51, %v2281_v31  ;;  %9979 = vrsqrt.f32 %v2194_v15  ;;  %v2164_v41 = vmax.f32 %v2132_v23, 0.0  ;;  %v17746_v1 = vsub.f32 %v12021_v36, %v11972_v0  ;;  %v17748_v15 = vld [vmem:[#allocation83_spill] sm:$0xff]  ;;  %v17811_v36 = vld [vmem:[#allocation50_spill] sm:$0xff] }
 0x313   : > { %v2284_v33 = vmul.f32 %v9968_v55, %v17745_v38  ;;  %v12207_v16 = vmul.f32 0.015625, %v11822_v35  ;;  %9981 = vrsqrt.f32 %v2193_v8  ;;  %v2163_v24 = vmax.f32 %v2131_v13, 0.0  ;;  %v9972_v49 = vpop.eup %9971  ;;  %v17747_v55 = vld [vmem:[#allocation90_spill] sm:$0xff] }
 0x314   : > { %2354 = vrot.lane.b32.xlu0 %v2309_v39, %s10724_s16  ;;  %v2283_v59 = vmul.f32 %v9970_v56, %v17746_v1  ;;  %v2069_v51 = vmul.f32 0.015625, %v2015_v28  ;;  %v2106_v48 = vmul.f32 %v12193_v4, %v12193_v4  ;;  %v2196_v52 = vadd.f32 1e-05, %v2164_v41  ;;  %v9974_v31 = vpop.eup %9973  ;;  %v2024_v35 = vpop.xlane.xlu1 %2023  ;;  %v17753_v28 = vld [vmem:[#allocation9_spill] sm:$0xff] }
 0x315   : > { %v2134_v27 = vsub.f32 %v2070_v44, %v12150_v58  ;;  %v12213_v63 = vmul.f32 0.015625, %v11824_v45  ;;  %v2195_v0 = vadd.f32 1e-05, %v2163_v24  ;;  %v17749_v23 = vsub.f32 %v17747_v55, %v17748_v15  ;;  %v2021_v13 = vpop.xlane.xlu0 %2020  ;;  %v17750_v58 = vld [vmem:[#allocation91_spill] sm:$0xff]  ;;  %v17755_v15 = vld [vmem:[#allocation88_spill] sm:$0xff] }
 0x316   : > { %v2310_v47 = vpack.c.bf16 %v2284_v33, %v2283_v59  ;;  %v2133_v10 = vsub.f32 %v2069_v51, %v12160_v11  ;;  %9983 = vrsqrt.f32 %v2196_v52  ;;  %v2072_v8 = vmul.f32 0.015625, %v2024_v35  ;;  %v17754_v35 = vld [vmem:[#allocation92_spill] sm:$0xff] }
 0x317   : > { %v2286_v39 = vmul.f32 %v9972_v49, %v17749_v23  ;;  %v2166_v56 = vmax.f32 %v2134_v27, 0.0  ;;  %v17752_v38 = vsub.f32 %v17750_v58, %v17751_v54  ;;  %v2105_v45 = vmul.f32 %v12207_v16, %v12207_v16  ;;  %v9976_v44 = vpop.eup %9975 }
 0x318   : > { %2356 = vrot.lane.b32.xlu1 %v2310_v47, %s10724_s16  ;;  %9985 = vrsqrt.f32 %v2195_v0  ;;  %v2165_v11 = vmax.f32 %v2133_v10, 0.0  ;;  %v2071_v41 = vmul.f32 0.015625, %v2021_v13  ;;  %v12226_v1 = vmul.f32 0.015625, %v17753_v28 }
 0x319   : > { %v2285_v33 = vmul.f32 %v9974_v31, %v17752_v38  ;;  %v2198_v59 = vadd.f32 1e-05, %v2166_v56  ;;  %v2136_v24 = vsub.f32 %v2072_v8, %v2104_v40  ;;  %v9978_v49 = vpop.eup %9977  ;;  %v2108_v52 = vmul.f32 %v12213_v63, %v12213_v63  ;;  %v2030_v31 = vpop.xlane.xlu1 %2029  ;;  %v17758_v56 = vld [vmem:[#allocation11_spill] sm:$0xff] }
 0x31a   : > { %v2197_v27 = vadd.f32 1e-05, %v2165_v11  ;;  %v2135_v47 = vsub.f32 %v2071_v41, %v2103_v61  ;;  %v17756_v23 = vsub.f32 %v17754_v35, %v17755_v15  ;;  %v2074_v13 = vmul.f32 0.015625, %v2030_v31  ;;  %v2027_v54 = vpop.xlane.xlu0 %2026  ;;  %v17759_v11 = vld [vmem:[#allocation10_spill] sm:$0xff] }
 0x31b   : > { %v2311_v51 = vpack.c.bf16 %v2286_v39, %v2285_v33  ;;  %9987 = vrsqrt.f32 %v2198_v59  ;;  %v2168_v10 = vmax.f32 %v2136_v24, 0.0  ;;  %v17757_v40 = vsub.f32 %v12065_v53, %v12035_v26 }
 0x31c   : > { %v2288_v0 = vmul.f32 %v9976_v44, %v17756_v23  ;;  %v12238_v8 = vmul.f32 0.015625, %v17758_v56  ;;  %9989 = vrsqrt.f32 %v2197_v27  ;;  %v2167_v61 = vmax.f32 %v2135_v47, 0.0  ;;  %v9980_v33 = vpop.eup %9979 }
 0x31d   : > { %2358 = vrot.lane.b32.xlu0 %v2311_v51, %s10724_s16  ;;  %v2287_v39 = vmul.f32 %v9978_v49, %v17757_v40  ;;  %v2073_v38 = vmul.f32 0.015625, %v2027_v54  ;;  %v12241_v41 = vmul.f32 0.015625, %v17759_v11  ;;  %v2200_v44 = vadd.f32 1e-05, %v2168_v10  ;;  %v9982_v24 = vpop.eup %9981  ;;  %v2036_v49 = vpop.xlane.xlu1 %2035 }
 0x31e   : > { %v2138_v28 = vsub.f32 %v2074_v13, %v2106_v48  ;;  %v2107_v51 = vmul.f32 %v12226_v1, %v12226_v1  ;;  %v2199_v31 = vadd.f32 1e-05, %v2167_v61  ;;  %v17760_v15 = vsub.f32 %v12089_v29, %v12058_v7  ;;  %v2033_v54 = vpop.xlane.xlu0 %2032 }
 0x31f   : > { %v2312_v59 = vpack.c.bf16 %v2288_v0, %v2287_v39  ;;  %v2137_v26 = vsub.f32 %v2073_v38, %v2105_v45  ;;  %9991 = vrsqrt.f32 %v2200_v44  ;;  %v2076_v23 = vmul.f32 0.015625, %v2036_v49 }
 0x320   : > { %v2290_v27 = vmul.f32 %v9980_v33, %v17760_v15  ;;  %v2170_v47 = vmax.f32 %v2138_v28, 0.0  ;;  %v17761_v48 = vsub.f32 %v12103_v37, %v12071_v46  ;;  %v2110_v10 = vmul.f32 %v12238_v8, %v12238_v8  ;;  %v9984_v40 = vpop.eup %9983  ;;  %v17762_v33 = vld [vmem:[#allocation13_spill] sm:$0xff]  ;;  %v17764_v15 = vld [vmem:[#allocation12_spill] sm:$0xff] }
 0x321   : > { %2360 = vrot.lane.b32.xlu1 %v2312_v59, %s10724_s16  ;;  %9993 = vrsqrt.f32 %v2199_v31  ;;  %v2169_v45 = vmax.f32 %v2137_v26, 0.0  ;;  %v2075_v13 = vmul.f32 0.015625, %v2033_v54  ;;  %v2109_v7 = vmul.f32 %v12241_v41, %v12241_v41  ;;  %v2042_v28 = vpop.xlane.xlu1 %2041  ;;  %v10481_v54 = vld [vmem:[%s11130_s15 + $0xb8] sm:$0xff] }
 0x322   : > { %v2289_v0 = vmul.f32 %v9982_v24, %v17761_v48  ;;  %v2202_v39 = vadd.f32 1e-05, %v2170_v47  ;;  %v2140_v56 = vsub.f32 %v2076_v23, %v2108_v52  ;;  %v9986_v38 = vpop.eup %9985  ;;  %v12257_v11 = vmul.f32 0.015625, %v17762_v33  ;;  %v2039_v49 = vpop.xlane.xlu0 %2038 }
 0x323   : > { %v2201_v46 = vadd.f32 1e-05, %v2169_v45  ;;  %v2139_v44 = vsub.f32 %v2075_v13, %v2107_v51  ;;  %v17763_v59 = vsub.f32 %v12112_v60, %v12085_v12  ;;  %v2078_v26 = vmul.f32 0.015625, %v2042_v28  ;;  %v12687_v60 = vld [vmem:[%s12313_s17 + $0xf8] sm:$0xff] }
 0x324   : > { %v2313_v61 = vpack.c.bf16 %v2290_v27, %v2289_v0  ;;  %9995 = vrsqrt.f32 %v2202_v39  ;;  %v2172_v31 = vmax.f32 %v2140_v56, 0.0  ;;  %v2291_v52 = vmul.f32 %v9986_v38, %v2259_v20 }
 0x325   : > { %v2292_v24 = vmul.f32 %v9984_v40, %v17763_v59  ;;  %v12267_v27 = vmul.f32 0.015625, %v17764_v15  ;;  %9997 = vrsqrt.f32 %v2201_v46  ;;  %v2171_v51 = vmax.f32 %v2139_v44, 0.0  ;;  %v9988_v23 = vpop.eup %9987  ;;  %v2048_v39 = vpop.xlane.xlu1 %2047 }
 0x326   : > { %2362 = vrot.lane.b32.xlu0 %v2313_v61, %s10724_s16  ;;  %v2077_v47 = vmul.f32 0.015625, %v2039_v49  ;;  %v2264_v12 = vsub.f32 %v10481_v54, %v12171_v57  ;;  %v2204_v48 = vadd.f32 1e-05, %v2172_v31  ;;  %v2142_v0 = vsub.f32 %v2078_v26, %v2110_v10  ;;  %v9990_v13 = vpop.eup %9989  ;;  %v2045_v57 = vpop.xlane.xlu0 %2044 }
 0x327   : > { %v2314_v45 = vpack.c.bf16 %v2292_v24, %v2291_v52  ;;  %v2112_v40 = vmul.f32 %v12257_v11, %v12257_v11  ;;  %v2203_v14 = vadd.f32 1e-05, %v2171_v51  ;;  %v2294_v56 = vmul.f32 %v9988_v23, %v2262_v5 }
 0x328   : > { %v2141_v20 = vsub.f32 %v2077_v47, %v2109_v7  ;;  %9999 = vrsqrt.f32 %v2204_v48  ;;  %v2174_v61 = vmax.f32 %v2142_v0, 0.0  ;;  %v2080_v38 = vmul.f32 0.015625, %v2048_v39  ;;  %v10484_v47 = vld [vmem:[%s11130_s15 + $0xc0] sm:$0xff] }
 0x329   : > { %2364 = vrot.lane.b32.xlu1 %v2314_v45, %s10724_s16  ;;  %v2293_v10 = vmul.f32 %v9990_v13, %v2261_v25  ;;  %v2111_v33 = vmul.f32 %v12267_v27, %v12267_v27  ;;  %10001 = vrsqrt.f32 %v2203_v14  ;;  %v2079_v46 = vmul.f32 0.015625, %v2045_v57  ;;  %v9992_v44 = vpop.eup %9991  ;;  %v10487_v57 = vld [vmem:[%s11130_s15 + $0xe8] sm:$0xff] }
 0x32a   : > { %v2173_v7 = vmax.f32 %v2141_v20, 0.0  ;;  %v2263_v3 = vsub.f32 %v10482_v32, %v12180_v50  ;;  %v2206_v5 = vadd.f32 1e-05, %v2174_v61  ;;  %v2144_v28 = vsub.f32 %v2080_v38, %v2112_v40  ;;  %v10483_v50 = vld [vmem:[%s11130_s15 + $0xc8] sm:$0xff]  ;;  %v10485_v40 = vld [vmem:[%s11130_s15 + $0xd8] sm:$0xff]  ;;  %v10486_v20 = vld [vmem:[%s11130_s15 + $0xd0] sm:$0xff] }
 0x32b   : > { %v2315_v59 = vpack.c.bf16 %v2294_v56, %v2293_v10  ;;  %v9994_v34 = vpop.eup %9993  ;;  %v2143_v24 = vsub.f32 %v2079_v46, %v2111_v33  ;;  %v2296_v31 = vmul.f32 %v9992_v44, %v2264_v12  ;;  %v2266_v52 = vsub.f32 %v10483_v50, %v12193_v4  ;;  %v12326_v50 = vld [vmem:[%s12313_s17 + $0x18] sm:$0xff] }
 0x32c   : > { %v2205_v25 = vadd.f32 1e-05, %v2173_v7  ;;  %10003 = vrsqrt.f32 %v2206_v5  ;;  %v2176_v26 = vmax.f32 %v2144_v28, 0.0  ;;  %v2295_v49 = vmul.f32 %v9994_v34, %v2263_v3  ;;  %v10488_v7 = vld [vmem:[%s11130_s15 + $0xe0] sm:$0xff]  ;;  %v10489_v3 = vld [vmem:[%s11130_s15 + $0xf8] sm:$0xff] }
 0x32d   : > { %2366 = vrot.lane.b32.xlu0 %v2315_v59, %s10724_s16  ;;  %v2175_v15 = vmax.f32 %v2143_v24, 0.0  ;;  %v2265_v23 = vsub.f32 %v10484_v47, %v12207_v16  ;;  %v2268_v4 = vsub.f32 %v10485_v40, %v12213_v63  ;;  %v2267_v39 = vsub.f32 %v10486_v20, %v12226_v1  ;;  %v10490_v59 = vld [vmem:[%s11130_s15 + $0xf0] sm:$0xff]  ;;  %v12336_v47 = vld [vmem:[%s12313_s17 + $0x20] sm:$0xff] }
 0x32e   : > { %10005 = vrsqrt.f32 %v2205_v25  ;;  %v9996_v51 = vpop.eup %9995  ;;  %v2208_v54 = vadd.f32 1e-05, %v2176_v26  ;;  %v2316_v12 = vpack.c.bf16 %v2296_v31, %v2295_v49  ;;  %v2270_v10 = vsub.f32 %v10487_v57, %v12238_v8  ;;  %v12321_v26 = vld [vmem:[%s12313_s17 + $0x10] sm:$0xff]  ;;  %v12356_v40 = vld [vmem:[%s12313_s17 + $0x40] sm:$0xff] }
 0x32f   : > { %v9998_v48 = vpop.eup %9997  ;;  %v2207_v0 = vadd.f32 1e-05, %v2175_v15  ;;  %v2298_v45 = vmul.f32 %v9996_v51, %v2266_v52  ;;  %v2269_v63 = vsub.f32 %v10488_v7, %v12241_v41  ;;  %v2272_v5 = vsub.f32 %v10489_v3, %v12257_v11  ;;  %v12316_v11 = vld [vmem:[%s12313_s17] sm:$0xff]  ;;  %v12329_v52 = vld [vmem:[%s12313_s17 + $0x8] sm:$0xff] }
 0x330   : > { %10007 = vrsqrt.f32 %v2208_v54  ;;  %2368 = vrot.lane.b32.xlu1 %v2316_v12, %s10724_s16  ;;  %v2297_v13 = vmul.f32 %v9998_v48, %v2265_v23  ;;  %v2271_v34 = vsub.f32 %v10490_v59, %v12267_v27  ;;  %v2876_v27 = vsel %vm1031_vm0, %v12316_v11, 0.0  ;;  %v12339_v23 = vld [vmem:[%s12313_s17 + $0x28] sm:$0xff]  ;;  %v12346_v48 = vld [vmem:[%s12313_s17 + $0x30] sm:$0xff] }
 0x331   : > { %10009 = vrsqrt.f32 %v2207_v0  ;;  %v2882_v49 = vsel %vm1031_vm0, %v12321_v26, 0.0  ;;  %v2885_v15 = vsel %vm1031_vm0, %v12326_v50, 0.0  ;;  %v2879_v51 = vsel %vm1031_vm0, %v12329_v52, 0.0  ;;  %v12349_v0 = vld [vmem:[%s12313_s17 + $0x38] sm:$0xff]  ;;  %v9920_v3 = vld [vmem:[%s17429_s4 + $0x8] sm:$0xff]  }
 0x332   : > { %v10000_v14 = vpop.eup %9999  ;;  %v2317_v16 = vpack.c.bf16 %v2298_v45, %v2297_v13  ;;  %v2888_v54 = vsel %vm1031_vm0, %v12336_v47, 0.0  ;;  %v2891_v12 = vsel %vm1031_vm0, %v12339_v23, 0.0  ;;  %v2894_v45 = vsel %vm1031_vm0, %v12346_v48, 0.0 }
 0x333   : > { %v10002_v56 = vpop.eup %10001  ;;  %v2300_v61 = vmul.f32 %v10000_v14, %v2268_v4  ;;  %v2897_v13 = vsel %vm1031_vm0, %v12349_v0, 0.0  ;;  %v12359_v4 = vld [vmem:[%s12313_s17 + $0x48] sm:$0xff]  ;;  %v2900_v14 = vsel %vm1031_vm0, %v12356_v40, 0.0  ;;  %v12577_v30 = vmul.f32 0.015625, %v17806_v22 }
 0x334   : > { %2370 = vrot.lane.b32.xlu0 %v2317_v16, %s10724_s16  ;;  %v2299_v38 = vmul.f32 %v10002_v56, %v2267_v39  ;;  %v2903_v20 = vsel %vm1031_vm0, %v12359_v4, 0.0  ;;  %v12366_v39 = vld [vmem:[%s12313_s17 + $0x50] sm:$0xff]  ;;  %v12369_v16 = vld [vmem:[%s12313_s17 + $0x58] sm:$0xff]  ;;  %v12703_v9 = vmul.f32 %v12316_v11, %v12316_v11 }
 0x335   : > { %v2906_v56 = vsel %vm1031_vm0, %v12366_v39, 0.0 }
 0x336   : > { %v10004_v33 = vpop.eup %10003  ;;  %v2318_v46 = vpack.c.bf16 %v2300_v61, %v2299_v38  ;;  %v2909_v61 = vsel %vm1031_vm0, %v12369_v16, 0.0  ;;  %v12376_v38 = vld [vmem:[%s12313_s17 + $0x60] sm:$0xff] }
 0x337   : > { %v2302_v32 = vmul.f32 %v10004_v33, %v2270_v10  ;;  %v12379_v10 = vld [vmem:[%s12313_s17 + $0x68] sm:$0xff]  ;;  %v2912_v33 = vsel %vm1031_vm0, %v12376_v38, 0.0 }
 0x338   : > { %v10006_v44 = vpop.eup %10005  ;;  %2372 = vrot.lane.b32.xlu1 %v2318_v46, %s10724_s16  ;;  %v2915_v7 = vsel %vm1031_vm0, %v12379_v10, 0.0  ;;  %v12390_v46 = vld [vmem:[%s12313_s17 + $0x78] sm:$0xff] }
 0x339   : > { %v2301_v1 = vmul.f32 %v10006_v44, %v2269_v63  ;;  %v12387_v63 = vld [vmem:[%s12313_s17 + $0x70] sm:$0xff]  ;;  %17766 = vst [vmem:[#allocation91_spill] sm:$0xff] %v12390_v46 }
 0x33a   : > { %v10008_v28 = vpop.eup %10007  ;;  %17765 = vst [vmem:[#allocation83_spill] sm:$0xff] %v12387_v63  ;;  %v2918_v44 = vsel %vm1031_vm0, %v12387_v63, 0.0 }
 0x33b   : > { %v2319_v25 = vpack.c.bf16 %v2302_v32, %v2301_v1  ;;  %v10010_v8 = vpop.eup %10009  ;;  %v2304_v24 = vmul.f32 %v10008_v28, %v2272_v5  ;;  %v2921_v32 = vsel %vm1031_vm0, %v12390_v46, 0.0  ;;  %v12397_v1 = vld [vmem:[%s12313_s17 + $0x80] sm:$0xff]  ;;  %v12403_v28 = vld [vmem:[%s12313_s17 + $0x88] sm:$0xff]  ;;  %v17794_v46 = vld [vmem:[#allocation27_spill] sm:$0xff] }
 0x33c   : > { %v2303_v41 = vmul.f32 %v10010_v8, %v2271_v34  ;;  %17767 = vst [vmem:[#allocation86_spill] sm:$0xff] %v12397_v1  ;;  %17768 = vst [vmem:[#allocation9_spill] sm:$0xff] %v12403_v28  ;;  %v2924_v59 = vsel %vm1031_vm0, %v12397_v1, 0.0  ;;  %v2927_v34 = vsel %vm1031_vm0, %v12403_v28, 0.0  ;;  %v9921_v8 = vld [vmem:[%s17429_s4 + $0x10] sm:$0xff]   ;;  %v17792_v28 = vld [vmem:[#allocation26_spill] sm:$0xff] }
 0x33d   : > { %2374 = vrot.lane.b32.xlu0 %v2319_v25, %s10724_s16  ;;  %v12412_v25 = vld [vmem:[%s12313_s17 + $0x90] sm:$0xff]  ;;  %v12518_v1 = vmul.f32 0.015625, %v17792_v28  ;;  %v12528_v63 = vmul.f32 0.015625, %v17794_v46  ;;  %v12544_v46 = vld [vmem:[%s12313_s17 + $0xc0] sm:$0xff] }
 0x33e   : > { %v2320_v31 = vpack.c.bf16 %v2304_v24, %v2303_v41  ;;  %17769 = vst [vmem:[#allocation88_spill] sm:$0xff] %v12412_v25  ;;  %v17770_v24 = vld [vmem:[#allocation16_spill] sm:$0xff] }
 0x33f   : > { %v12418_v41 = vmul.f32 0.015625, %v17770_v24 }
 0x340   : > { %2376 = vrot.lane.b32.xlu1 %v2320_v31, %s10724_s16 }
 0x35c   : > { %2877 = vadd.xlane.f32.xlu0 %v2876_v27  ;;  %v12421_v27 = vld [vmem:[%s12313_s17 + $0x98] sm:$0xff] }
 0x35d   : > { %17771 = vst [vmem:[#allocation11_spill] sm:$0xff] %v12421_v27 }
 0x360   : > { %2883 = vadd.xlane.f32.xlu0 %v2882_v49  ;;  %v17772_v49 = vld [vmem:[#allocation17_spill] sm:$0xff] }
 0x364   : > { %2886 = vadd.xlane.f32.xlu0 %v2885_v15  ;;  %2880 = vadd.xlane.f32.xlu1 %v2879_v51  ;;  %v12424_v15 = vmul.f32 0.015625, %v17772_v49 }
 0x368   : > { %2889 = vadd.xlane.f32.xlu0 %v2888_v54  ;;  %2892 = vadd.xlane.f32.xlu1 %v2891_v12  ;;  %v2930_v54 = vsel %vm1031_vm0, %v12412_v25, 0.0  ;;  %v17774_v12 = vld [vmem:[#allocation19_spill] sm:$0xff] }
 0x36c   : > { %2895 = vadd.xlane.f32.xlu0 %v2894_v45  ;;  %2898 = vadd.xlane.f32.xlu1 %v2897_v13  ;;  %v12433_v45 = vmul.f32 0.015625, %v17774_v12  ;;  %v2933_v13 = vsel %vm1031_vm0, %v12421_v27, 0.0  ;;  %v12507_v27 = vld [vmem:[%s12313_s17 + $0xb8] sm:$0xff] }
 0x36f   : > { %v2347_v57 = vpop.permute.xlu0 %2346 }
 0x370   : > { %2901 = vadd.xlane.f32.xlu0 %v2900_v14  ;;  %2904 = vadd.xlane.f32.xlu1 %v2903_v20  ;;  %v12438_v14 = vld [vmem:[%s12313_s17 + $0xa0] sm:$0xff]  ;;  %v9922_v20 = vld [vmem:[%s17429_s4 + $0x18] sm:$0xff]  }
 0x371   : > { %9321 = vmatprep.mubr.msk.bf16.mxu1 %vm1031_vm0, %v2347_v57  ;;  %17775 = vst [vmem:[#allocation10_spill] sm:$0xff] %v12438_v14 }
 0x374   : > { %2907 = vadd.xlane.f32.xlu0 %v2906_v56  ;;  %2910 = vadd.xlane.f32.xlu1 %v2909_v61  ;;  %v12445_v56 = vmul.f32 %v12418_v41, %v12418_v41  ;;  %v17776_v61 = vld [vmem:[#allocation20_spill] sm:$0xff] }
 0x375   : > { %v12448_v57 = vmul.f32 0.015625, %v17776_v61  ;;  %v2936_v61 = vsel %vm1031_vm0, %v12438_v14, 0.0 }
 0x377   : > { %v2349_v5 = vpop.permute.xlu1 %2348  ;;  %17777 = vst [vmem:[#allocation13_spill] sm:$0xff] %v12448_v57 }
 0x378   : > { %2913 = vadd.xlane.f32.xlu0 %v2912_v33  ;;  %2916 = vadd.xlane.f32.xlu1 %v2915_v7  ;;  %v17778_v33 = vld [vmem:[#allocation21_spill] sm:$0xff] }
 0x379   : > { %9322 = vmatmul.mubr.msk.bf16.vlgmr.msra.gmra.mrb[0].mxu1 %vm1031_vm0, %v2349_v5  ;;  %v12451_v7 = vmul.f32 0.015625, %v17778_v33  ;;  %v12460_v5 = vmul.f32 %v12424_v15, %v12424_v15  ;;  %v17785_v33 = vld [vmem:[#allocation15_spill] sm:$0xff] }
 0x37a   : > { %9354 = vmatpush3.bf16.msra.mxu1 %v12287_v21  ;;  %v17773_v21 = vld [vmem:[#allocation18_spill] sm:$0xff]  ;;  %17795 = vst [vmem:[#allocation15_spill] sm:$0xff] %v12528_v63 }
 0x37b   : > { %9355 = vmatprep.subr.bf16.mxu1 %v9920_v3  ;;  %v12428_v51 = vmul.f32 0.015625, %v17773_v21  ;;  %17779 = vst [vmem:[#allocation12_spill] sm:$0xff] %v12451_v7  ;;  %v17783_v21 = vld [vmem:[#allocation23_spill] sm:$0xff] }
 0x37c   : > { %2919 = vadd.xlane.f32.xlu0 %v2918_v44  ;;  %2922 = vadd.xlane.f32.xlu1 %v2921_v32  ;;  %v2351_v31 = vpop.permute.xlu1 %2350  ;;  %v12454_v32 = vld [vmem:[%s12313_s17 + $0xa8] sm:$0xff]  ;;  %v12475_v12 = vmul.f32 0.015625, %v17783_v21  ;;  %v12491_v21 = vld [vmem:[%s12313_s17 + $0xb0] sm:$0xff]  ;;  %17793 = vst [vmem:[#allocation23_spill] sm:$0xff] %v12518_v1 }
 0x37d   : > { %9325 = vmatprep.mubr.msk.bf16.mxu1 %vm1031_vm0, %v2351_v31  ;;  %17780 = vst [vmem:[#allocation16_spill] sm:$0xff] %v12454_v32  ;;  %v12470_v31 = vmul.f32 %v12428_v51, %v12428_v51  ;;  %v2939_v49 = vsel %vm1031_vm0, %v12454_v32, 0.0  ;;  %17788 = vst [vmem:[#allocation20_spill] sm:$0xff] %v12491_v21  ;;  %v2945_v32 = vsel %vm1031_vm0, %v12507_v27, 0.0 }
 0x37e   : > { %9356 = vmatpush3.bf16.msra.mxu1 %v9920_v3  ;;  %17784 = vst [vmem:[#allocation18_spill] sm:$0xff] %v12475_v12 }
 0x37f   : > { %9357 = vmatprep.subr.bf16.mxu1 %v9921_v8 }
 0x380   : > { %2925 = vadd.xlane.f32.xlu0 %v2924_v59  ;;  %2928 = vadd.xlane.f32.xlu1 %v2927_v34  ;;  %v17781_v34 = vld [vmem:[#allocation22_spill] sm:$0xff]  ;;  %v12501_v59 = vmul.f32 %v12451_v7, %v12451_v7  ;;  %v17815_v7 = vld [vmem:[#allocation51_spill] sm:$0xff] }
 0x381   : > { %v2353_v44 = vpop.permute.xlu1 %2352  ;;  %v12465_v24 = vmul.f32 0.015625, %v17781_v34  ;;  %v17786_v34 = vld [vmem:[#allocation24_spill] sm:$0xff]  ;;  %17791 = vst [vmem:[#allocation22_spill] sm:$0xff] %v12507_v27  ;;  %v12561_v27 = vmul.f32 %v12518_v1, %v12518_v1  ;;  %v1292_v1 = vmul.f32 0.015625, %v17811_v36  ;;  %v1291_v43 = vmul.f32 0.015625, %v17815_v7  ;;  %v12639_v36 = vld [vmem:[%s12313_s17 + $0xe0] sm:$0xff] }
 0x382   : > { %9326 = vmatmul.mubr.msk.bf16.gmra.mrb[4].mxu1 %vm1031_vm0, %v2353_v44  ;;  %v12486_v3 = vmul.f32 0.015625, %v17786_v34  ;;  %v17789_v44 = vld [vmem:[#allocation25_spill] sm:$0xff] }
 0x383   : > { %17782 = vst [vmem:[#allocation17_spill] sm:$0xff] %v12465_v24  ;;  %9358 = vmatpush3.bf16.msra.mxu1 %v9921_v8  ;;  %v12504_v34 = vmul.f32 0.015625, %v17789_v44  ;;  %v12513_v25 = vmul.f32 %v12465_v24, %v12465_v24  ;;  %v12523_v44 = vmul.f32 %v12475_v12, %v12475_v12  ;;  %v2942_v8 = vsel %vm1031_vm0, %v12491_v21, 0.0  ;;  %17798 = vst [vmem:[#allocation25_spill] sm:$0xff] %v12544_v46  ;;  %v17799_v21 = vld [vmem:[#allocation29_spill] sm:$0xff]  ;;  %v17801_v12 = vld [vmem:[#allocation48_spill] sm:$0xff] }
 0x384   : > { %2931 = vadd.xlane.f32.xlu0 %v2930_v54  ;;  %2934 = vadd.xlane.f32.xlu1 %v2933_v13  ;;  %v12481_v54 = vmul.f32 %v12433_v45, %v12433_v45  ;;  %17787 = vst [vmem:[#allocation19_spill] sm:$0xff] %v12486_v3  ;;  %v12495_v13 = vmul.f32 %v12448_v57, %v12448_v57  ;;  %v12553_v2 = vmul.f32 0.015625, %v17799_v21  ;;  %v12566_v57 = vmul.f32 0.015625, %v17803_v6 }
 0x385   : > { %9359 = vmatprep.subr.bf16.mxu1 %v9922_v20  ;;  %17790 = vst [vmem:[#allocation21_spill] sm:$0xff] %v12504_v34  ;;  %v12534_v28 = vmul.f32 %v12486_v3, %v12486_v3  ;;  %17807 = vst [vmem:[#allocation29_spill] sm:$0xff] %v12577_v30  ;;  %v2948_v6 = vsel %vm1031_vm0, %v12544_v46, 0.0  ;;  %v1356_v7 = vsub.f32 %v1292_v1, %v12470_v31  ;;  %v12678_v1 = vld [vmem:[%s12313_s17 + $0xf0] sm:$0xff] }
 0x386   : > { %v2355_v14 = vpop.permute.xlu0 %2354  ;;  %17800 = vst [vmem:[#allocation26_spill] sm:$0xff] %v12553_v2  ;;  %v12597_v22 = vmul.f32 %v12553_v2, %v12553_v2 }
 0x387   : > { %9329 = vmatprep.mubr.msk.bf16.mxu1 %vm1031_vm0, %v2355_v14  ;;  %9360 = vmatpush3.bf16.msra.mxu1 %v9922_v20  ;;  %v1290_v14 = vmul.f32 0.015625, %v17801_v12  ;;  %v17805_v20 = vld [vmem:[#allocation49_spill] sm:$0xff]  ;;  %v12572_v12 = vmul.f32 %v12528_v63, %v12528_v63  ;;  %v12593_v63 = vld [vmem:[%s12313_s17 + $0xd0] sm:$0xff] }
 0x388   : > { %2937 = vadd.xlane.f32.xlu0 %v2936_v61  ;;  %2940 = vadd.xlane.f32.xlu1 %v2939_v49  ;;  %v17796_v61 = vld [vmem:[#allocation28_spill] sm:$0xff]  ;;  %v12548_v49 = vmul.f32 %v12504_v34, %v12504_v34  ;;  %v1289_v34 = vmul.f32 0.015625, %v17805_v20  ;;  %17810 = vst [vmem:[#allocation30_spill] sm:$0xff] %v12593_v63 }
 0x389   : > { %v12539_v24 = vmul.f32 0.015625, %v17796_v61  ;;  %v12557_v61 = vld [vmem:[%s12313_s17 + $0xc8] sm:$0xff]  ;;  %17804 = vst [vmem:[#allocation28_spill] sm:$0xff] %v12566_v57  ;;  %v17808_v20 = vld [vmem:[#allocation32_spill] sm:$0xff]  ;;  %v1354_v46 = vsub.f32 %v1290_v14, %v12481_v54  ;;  %v12620_v54 = vmul.f32 %v12577_v30, %v12577_v30 }
 0x38a   : > { %v2357_v3 = vpop.permute.xlu1 %2356  ;;  %17802 = vst [vmem:[#allocation27_spill] sm:$0xff] %v12557_v61  ;;  %v12588_v19 = vmul.f32 0.015625, %v17808_v20  ;;  %v2951_v21 = vsel %vm1031_vm0, %v12557_v61, 0.0  ;;  %v12608_v20 = vmul.f32 %v12566_v57, %v12566_v57  ;;  %v17813_v61 = vld [vmem:[#allocation33_spill] sm:$0xff]  ;;  %v1353_v62 = vsub.f32 %v1289_v34, %v12460_v5  ;;  %v17816_v14 = vld [vmem:[#allocation34_spill] sm:$0xff] }
 0x38b   : > { %17797 = vst [vmem:[#allocation24_spill] sm:$0xff] %v12539_v24  ;;  %9330 = vmatmul.mubr.msk.bf16.gmra.mrb[8].mxu1 %vm1031_vm0, %v2357_v3  ;;  %v12611_v55 = vmul.f32 0.015625, %v17813_v61  ;;  %v2954_v5 = vsel %vm1031_vm0, %v12593_v63, 0.0  ;;  %v17818_v61 = vld [vmem:[#allocation35_spill] sm:$0xff]  ;;  %17820 = vst [vmem:[#allocation33_spill] sm:$0xff] %v12639_v36  ;;  %v1386_v57 = vmax.f32 %v1354_v46, 0.0 }
 0x38c   : > { %2943 = vadd.xlane.f32.xlu0 %v2942_v8  ;;  %2946 = vadd.xlane.f32.xlu1 %v2945_v32  ;;  %v12583_v8 = vmul.f32 %v12539_v24, %v12539_v24  ;;  %17809 = vst [vmem:[#allocation48_spill] sm:$0xff] %v12588_v19  ;;  %v12604_v24 = vld [vmem:[%s12313_s17 + $0xd8] sm:$0xff]  ;;  %v12623_v32 = vmul.f32 0.015625, %v17816_v14  ;;  %v12631_v34 = vmul.f32 %v12588_v19, %v12588_v19  ;;  %v12648_v30 = vld [vmem:[%s12313_s17 + $0xe8] sm:$0xff]  ;;  %v1385_v2 = vmax.f32 %v1353_v62, 0.0 }
 0x38d   : > { %17812 = vst [vmem:[#allocation49_spill] sm:$0xff] %v12604_v24  ;;  %17814 = vst [vmem:[#allocation31_spill] sm:$0xff] %v12611_v55  ;;  %v17821_v14 = vld [vmem:[#allocation36_spill] sm:$0xff]  ;;  %v1388_v62 = vmax.f32 %v1356_v7, 0.0  ;;  %v17828_v19 = vld [vmem:[#allocation38_spill] sm:$0xff]  ;;  %v2966_v7 = vsel %vm1031_vm0, %v12678_v1, 0.0 }
 0x38e   : > { %17817 = vst [vmem:[#allocation32_spill] sm:$0xff] %v12623_v32  ;;  %v12644_v63 = vmul.f32 0.015625, %v17821_v14  ;;  %17822 = vst [vmem:[#allocation51_spill] sm:$0xff] %v12648_v30  ;;  %v12663_v31 = vmul.f32 %v12623_v32, %v12623_v32  ;;  %v17825_v46 = vld [vmem:[#allocation52_spill] sm:$0xff]  ;;  %v1417_v29 = vadd.f32 1e-05, %v1385_v2 }
 0x38f   : > { %v2359_v3 = vpop.permute.xlu0 %2358  ;;  %v1294_v14 = vmul.f32 0.015625, %v17825_v46  ;;  %17827 = vst [vmem:[#allocation35_spill] sm:$0xff] %v12687_v60  ;;  %17830 = vst [vmem:[#allocation36_spill] sm:$0xff] %v12703_v9  ;;  %v1420_v11 = vadd.f32 1e-05, %v1388_v62  ;;  %v12732_v62 = vmul.f32 %v12321_v26, %v12321_v26  ;;  %v17840_v26 = vld [vmem:[#allocation56_spill] sm:$0xff] }
 0x390   : > { %2949 = vadd.xlane.f32.xlu0 %v2948_v6  ;;  %9333 = vmatprep.mubr.msk.bf16.mxu1 %vm1031_vm0, %v2359_v3  ;;  %v12634_v6 = vmul.f32 0.015625, %v17818_v61  ;;  %v2957_v3 = vsel %vm1031_vm0, %v12604_v24, 0.0  ;;  %v12652_v61 = vmul.f32 %v12611_v55, %v12611_v55  ;;  %v17823_v24 = vld [vmem:[#allocation37_spill] sm:$0xff]  ;;  %v12684_v46 = vmul.f32 %v12644_v63, %v12644_v63 }
 0x391   : > { %2952 = vadd.xlane.f32.xlu1 %v2951_v21  ;;  %v12655_v53 = vmul.f32 0.015625, %v17823_v24  ;;  %v1355_v21 = vsub.f32 %v1291_v43, %v12445_v56  ;;  %v2960_v24 = vsel %vm1031_vm0, %v12639_v36, 0.0  ;;  %v1418_v36 = vadd.f32 1e-05, %v1386_v57  ;;  %17838 = vst [vmem:[#allocation38_spill] sm:$0xff] %v12732_v62 }
 0x392   : > { %17819 = vst [vmem:[#allocation50_spill] sm:$0xff] %v12634_v6  ;;  %v12672_v43 = vmul.f32 %v12634_v6, %v12634_v6  ;;  %v17829_v6 = vld [vmem:[#allocation54_spill] sm:$0xff] }
 0x393   : > { %v2361_v35 = vpop.permute.xlu1 %2360  ;;  %17824 = vst [vmem:[#allocation34_spill] sm:$0xff] %v12655_v53  ;;  %v1387_v55 = vmax.f32 %v1355_v21, 0.0  ;;  %v1296_v57 = vmul.f32 0.015625, %v17829_v6  ;;  %v2969_v21 = vsel %vm1031_vm0, %v12687_v60, 0.0  ;;  %10011 = vrsqrt.f32 %v1418_v36 }
 0x394   : > { %2955 = vadd.xlane.f32.xlu0 %v2954_v5  ;;  %9334 = vmatmul.mubr.msk.bf16.gmra.mrb[12].mxu1 %vm1031_vm0, %v2361_v35  ;;  %v17826_v35 = vld [vmem:[#allocation53_spill] sm:$0xff]  ;;  %v2963_v5 = vsel %vm1031_vm0, %v12648_v30, 0.0  ;;  %v12694_v30 = vmul.f32 0.015625, %v17828_v19  ;;  %10013 = vrsqrt.f32 %v1417_v29  ;;  %v3036_v36 = vsel %vm1031_vm0, %v12703_v9, 0.0 }
 0x395   : > { %2958 = vadd.xlane.f32.xlu1 %v2957_v3  ;;  %v1293_v56 = vmul.f32 0.015625, %v17826_v35  ;;  %v12691_v35 = vmul.f32 %v12655_v53, %v12655_v53  ;;  %v1358_v3 = vsub.f32 %v1294_v14, %v12495_v13  ;;  %v17831_v53 = vld [vmem:[#allocation55_spill] sm:$0xff]  ;;  %v12711_v13 = vmul.f32 %v12329_v52, %v12329_v52  ;;  %v17834_v14 = vld [vmem:[#allocation40_spill] sm:$0xff] }
 0x396   : > { %v1295_v2 = vmul.f32 0.015625, %v17831_v53  ;;  %v17836_v53 = vld [vmem:[#allocation41_spill] sm:$0xff]  ;;  %v1419_v60 = vadd.f32 1e-05, %v1387_v55  ;;  %v12739_v55 = vmul.f32 %v12326_v50, %v12326_v50  ;;  %10015 = vrsqrt.f32 %v1420_v11 }
 0x397   : > { %v1357_v19 = vsub.f32 %v1293_v56, %v12501_v59  ;;  %17832 = vst [vmem:[#allocation37_spill] sm:$0xff] %v12711_v13  ;;  %v12721_v59 = vmul.f32 %v12694_v30, %v12694_v30  ;;  %v12724_v56 = vmul.f32 0.015625, %v17836_v53  ;;  %v1390_v52 = vmax.f32 %v1358_v3, 0.0  ;;  %v17843_v50 = vld [vmem:[#allocation57_spill] sm:$0xff] }
 0x398   : > { %v2363_v32 = vpop.permute.xlu0 %2362  ;;  %2961 = vadd.xlane.f32.xlu0 %v2960_v24  ;;  %v12717_v24 = vmul.f32 0.015625, %v17834_v14  ;;  %v1359_v53 = vsub.f32 %v1295_v2, %v12523_v44  ;;  %v3039_v29 = vsel %vm1031_vm0, %v12711_v13, 0.0  ;;  %17839 = vst [vmem:[#allocation54_spill] sm:$0xff] %v12739_v55  ;;  %10017 = vrsqrt.f32 %v1419_v60 }
 0x399   : > { %9337 = vmatprep.mubr.msk.bf16.mxu1 %vm1031_vm0, %v2363_v32  ;;  %2964 = vadd.xlane.f32.xlu1 %v2963_v5  ;;  %v17833_v32 = vld [vmem:[#allocation39_spill] sm:$0xff]  ;;  %17837 = vst [vmem:[#allocation53_spill] sm:$0xff] %v12724_v56  ;;  %v1389_v14 = vmax.f32 %v1357_v19, 0.0  ;;  %v12752_v44 = vmul.f32 %v12724_v56, %v12724_v56  ;;  %v17841_v19 = vld [vmem:[#allocation42_spill] sm:$0xff]  ;;  %v3042_v11 = vsel %vm1031_vm0, %v12732_v62, 0.0  ;;  %v3045_v60 = vsel %vm1031_vm0, %v12739_v55, 0.0 }
 0x39a   : > { %v12714_v6 = vmul.f32 0.015625, %v17833_v32  ;;  %17835 = vst [vmem:[#allocation52_spill] sm:$0xff] %v12717_v24  ;;  %v1360_v32 = vsub.f32 %v1296_v57, %v12513_v25  ;;  %v12747_v3 = vmul.f32 %v12717_v24, %v12717_v24  ;;  %v1298_v57 = vmul.f32 0.015625, %v17840_v26  ;;  %v17852_v24 = vld [vmem:[#allocation59_spill] sm:$0xff] }
 0x39b   : > { %v2365_v5 = vpop.permute.xlu1 %2364  ;;  %v12755_v2 = vmul.f32 0.015625, %v17841_v19  ;;  %v12763_v26 = vmul.f32 %v12336_v47, %v12336_v47  ;;  %v1421_v13 = vadd.f32 1e-05, %v1389_v14  ;;  %v1391_v56 = vmax.f32 %v1359_v53, 0.0  ;;  %v17850_v53 = vld [vmem:[#allocation45_spill] sm:$0xff] }
 0x39c   : > { %2967 = vadd.xlane.f32.xlu0 %v2966_v7  ;;  %9338 = vmatmul.mubr.msk.bf16.gmra.mrb[16].mxu1 %vm1031_vm0, %v2365_v5  ;;  %v12743_v25 = vmul.f32 %v12714_v6, %v12714_v6  ;;  %v1422_v5 = vadd.f32 1e-05, %v1390_v52  ;;  %v1392_v9 = vmax.f32 %v1360_v32, 0.0  ;;  %v17847_v32 = vld [vmem:[#allocation44_spill] sm:$0xff]  ;;  %v1362_v19 = vsub.f32 %v1298_v57, %v12534_v28 }
 0x39d   : > { %2970 = vadd.xlane.f32.xlu1 %v2969_v21  ;;  %17842 = vst [vmem:[#allocation55_spill] sm:$0xff] %v12755_v2  ;;  %v1297_v21 = vmul.f32 0.015625, %v17843_v50  ;;  %17844 = vst [vmem:[#allocation39_spill] sm:$0xff] %v12763_v26  ;;  %v17849_v50 = vld [vmem:[#allocation58_spill] sm:$0xff]  ;;  %v12781_v14 = vmul.f32 %v12755_v2, %v12755_v2  ;;  %v12784_v55 = vmul.f32 0.015625, %v17850_v53  ;;  %v3048_v57 = vsel %vm1031_vm0, %v12763_v26, 0.0 }
 0x39e   : > { %v1300_v47 = vmul.f32 0.015625, %v17849_v50  ;;  %10019 = vrsqrt.f32 %v1422_v5  ;;  %v1424_v28 = vadd.f32 1e-05, %v1392_v9  ;;  %v12793_v50 = vmul.f32 %v12346_v48, %v12346_v48  ;;  %v17856_v26 = vld [vmem:[#allocation61_spill] sm:$0xff] }
 0x39f   : > { %v2367_v7 = vpop.permute.xlu0 %2366  ;;  %17851 = vst [vmem:[#allocation56_spill] sm:$0xff] %v12784_v55  ;;  %10021 = vrsqrt.f32 %v1421_v13  ;;  %v1423_v2 = vadd.f32 1e-05, %v1391_v56  ;;  %v1394_v48 = vmax.f32 %v1362_v19, 0.0  ;;  %v12812_v56 = vmul.f32 %v12784_v55, %v12784_v55 }
 0x3a0   : > { %3037 = vadd.xlane.f32.xlu0 %v3036_v36  ;;  %9341 = vmatprep.mubr.msk.bf16.mxu1 %vm1031_vm0, %v2367_v7  ;;  %v12769_v36 = vmul.f32 %v12339_v23, %v12339_v23  ;;  %v17846_v7 = vld [vmem:[#allocation43_spill] sm:$0xff]  ;;  %v1361_v23 = vsub.f32 %v1297_v21, %v12548_v49  ;;  %17853 = vst [vmem:[#allocation42_spill] sm:$0xff] %v12793_v50  ;;  %10023 = vrsqrt.f32 %v1424_v28 }
 0x3a1   : > { %3040 = vadd.xlane.f32.xlu1 %v3039_v29  ;;  %v12772_v52 = vmul.f32 0.015625, %v17846_v7  ;;  %v12775_v29 = vmul.f32 0.015625, %v17847_v32  ;;  %v1299_v7 = vmul.f32 0.015625, %v17852_v24  ;;  %v10012_v32 = vpop.eup %10011  ;;  %v12799_v24 = vmul.f32 %v12349_v0, %v12349_v0 }
 0x3a2   : > { %17845 = vst [vmem:[#allocation40_spill] sm:$0xff] %v12769_v36  ;;  %v2369_v62 = vpop.permute.xlu1 %2368  ;;  %v10014_v53 = vpop.eup %10013  ;;  %v3051_v49 = vsel %vm1031_vm0, %v12769_v36, 0.0  ;;  %v1364_v21 = vsub.f32 %v1300_v47, %v12561_v27  ;;  %v1393_v5 = vmax.f32 %v1361_v23, 0.0  ;;  %v3054_v27 = vsel %vm1031_vm0, %v12793_v50, 0.0  ;;  %v17858_v23 = vld [vmem:[#allocation46_spill] sm:$0xff] }
 0x3a3   : > { %17848 = vst [vmem:[#allocation41_spill] sm:$0xff] %v12775_v29  ;;  %17854 = vst [vmem:[#allocation57_spill] sm:$0xff] %v12799_v24  ;;  %v12803_v9 = vmul.f32 %v12772_v52, %v12772_v52  ;;  %v1363_v0 = vsub.f32 %v1299_v7, %v12572_v12  ;;  %v10016_v36 = vpop.eup %10015  ;;  %v12822_v19 = vmul.f32 %v12356_v40, %v12356_v40  ;;  %v12825_v12 = vmul.f32 0.015625, %v17858_v23 }
 0x3a4   : > { %3043 = vadd.xlane.f32.xlu0 %v3042_v11  ;;  %9342 = vmatmul.mubr.msk.bf16.gmra.mrb[20].mxu1 %vm1031_vm0, %v2369_v62  ;;  %v12807_v62 = vmul.f32 %v12775_v29, %v12775_v29  ;;  %v17855_v11 = vld [vmem:[#allocation60_spill] sm:$0xff]  ;;  %v1301_v29 = vmul.f32 0.015625, %v17856_v26  ;;  %v10018_v47 = vpop.eup %10017  ;;  %10025 = vrsqrt.f32 %v1423_v2  ;;  %v3057_v7 = vsel %vm1031_vm0, %v12799_v24, 0.0 }
 0x3a5   : > { %3046 = vadd.xlane.f32.xlu1 %v3045_v60  ;;  %v1302_v60 = vmul.f32 0.015625, %v17855_v11  ;;  %17857 = vst [vmem:[#allocation43_spill] sm:$0xff] %v12822_v19  ;;  %v12831_v28 = vmul.f32 %v12359_v4, %v12359_v4  ;;  %v1426_v26 = vadd.f32 1e-05, %v1394_v48  ;;  %v17861_v11 = vsub.f32 %v17785_v33, %v12433_v45  ;;  %v17865_v33 = vld [vmem:[#allocation47_spill] sm:$0xff] }
 0x3a6   : > { %v2371_v13 = vpop.permute.xlu0 %2370  ;;  %v17862_v2 = vsub.f32 %v11916_v17, %v12428_v51  ;;  %v1425_v24 = vadd.f32 1e-05, %v1393_v5  ;;  %v1395_v55 = vmax.f32 %v1363_v0, 0.0  ;;  %v1365_v45 = vsub.f32 %v1301_v29, %v12597_v22 }
 0x3a7   : > { %9345 = vmatprep.mubr.msk.bf16.mxu1 %vm1031_vm0, %v2371_v13  ;;  %17859 = vst [vmem:[#allocation44_spill] sm:$0xff] %v12831_v28  ;;  %v17860_v13 = vsub.f32 %v11899_v18, %v12424_v15  ;;  %v1514_v23 = vmul.f32 %v10012_v32, %v17861_v11  ;;  %v1366_v4 = vsub.f32 %v1302_v60, %v12583_v8  ;;  %v3060_v17 = vsel %vm1031_vm0, %v12822_v19, 0.0 }
 0x3a8   : > { %3049 = vadd.xlane.f32.xlu0 %v3048_v57  ;;  %v1396_v57 = vmax.f32 %v1364_v21, 0.0  ;;  %v12842_v50 = vmul.f32 %v10016_v36, %v17862_v2  ;;  %v17863_v18 = vsub.f32 %v11909_v42, %v12418_v41  ;;  %v12856_v51 = vmul.f32 %v12366_v39, %v12366_v39  ;;  %v17866_v36 = vld [vmem:[#allocation62_spill] sm:$0xff]  ;;  %v10020_v22 = vpop.eup %10019  ;;  %v17873_v2 = vld [vmem:[#allocation80_spill] sm:$0xff] }
 0x3a9   : > { %3052 = vadd.xlane.f32.xlu1 %v3051_v49  ;;  %v1513_v40 = vmul.f32 %v10014_v53, %v17860_v13  ;;  %v12859_v8 = vmul.f32 0.015625, %v17865_v33  ;;  %v1304_v32 = vmul.f32 0.015625, %v17866_v36  ;;  %v3063_v42 = vsel %vm1031_vm0, %v12831_v28, 0.0  ;;  %v17868_v53 = vld [vmem:[#allocation63_spill] sm:$0xff]  ;;  %v10022_v5 = vpop.eup %10021 }
 0x3aa   : > { %v2373_v49 = vpop.permute.xlu1 %2372  ;;  %v12849_v15 = vmul.f32 %v10018_v47, %v17863_v18  ;;  %17864 = vst [vmem:[#allocation58_spill] sm:$0xff] %v12856_v51  ;;  %v12866_v41 = vmul.f32 %v12369_v16, %v12369_v16  ;;  %10027 = vrsqrt.f32 %v1426_v26  ;;  %v1428_v29 = vadd.f32 1e-05, %v1396_v57  ;;  %v10024_v11 = vpop.eup %10023 }
 0x3ab   : > { %v1303_v48 = vmul.f32 0.015625, %v17868_v53  ;;  %v1545_v39 = vpack.c.bf16 %v1514_v23, %v1513_v40  ;;  %10029 = vrsqrt.f32 %v1425_v24  ;;  %v1427_v0 = vadd.f32 1e-05, %v1395_v55  ;;  %v17871_v24 = vld [vmem:[#allocation65_spill] sm:$0xff] }
 0x3ac   : > { %3055 = vadd.xlane.f32.xlu0 %v3054_v27  ;;  %9346 = vmatmul.mubr.msk.bf16.gmra.mrb[24].mxu1 %vm1031_vm0, %v2373_v49  ;;  %17867 = vst [vmem:[#allocation45_spill] sm:$0xff] %v12866_v41  ;;  %v1398_v60 = vmax.f32 %v1366_v4, 0.0  ;;  %v17869_v27 = vld [vmem:[#allocation64_spill] sm:$0xff]  ;;  %v3066_v16 = vsel %vm1031_vm0, %v12856_v51, 0.0  ;;  %v12875_v26 = vmul.f32 %v12376_v38, %v12376_v38  ;;  %v1546_v57 = vpack.c.bf16 %v12842_v50, %v12849_v15  ;;  %v17876_v15 = vld [vmem:[#allocation14_spill] sm:$0xff] }
 0x3ad   : > { %3058 = vadd.xlane.f32.xlu1 %v3057_v7  ;;  %v1306_v47 = vmul.f32 0.015625, %v17869_v27  ;;  %v1397_v7 = vmax.f32 %v1365_v45, 0.0  ;;  %v1368_v55 = vsub.f32 %v1304_v32, %v12608_v20  ;;  %v1305_v49 = vmul.f32 0.015625, %v17871_v24  ;;  %v17874_v4 = vld [vmem:[#allocation12_spill] sm:$0xff]  ;;  %v17877_v20 = vld [vmem:[#allocation13_spill] sm:$0xff]  ;;  %v17887_v24 = vld [vmem:[#allocation18_spill] sm:$0xff] }
 0x3ae   : > { %17870 = vst [vmem:[#allocation59_spill] sm:$0xff] %v12875_v26  ;;  %v3069_v13 = vsel %vm1031_vm0, %v12866_v41, 0.0  ;;  %v12885_v40 = vmul.f32 %v12379_v10, %v12379_v10  ;;  %10031 = vrsqrt.f32 %v1428_v29  ;;  %v1367_v23 = vsub.f32 %v1303_v48, %v12620_v54  ;;  %v10026_v33 = vpop.eup %10025  ;;  %v17879_v10 = vld [vmem:[#allocation66_spill] sm:$0xff]  ;;  %v17880_v29 = vld [vmem:[#allocation67_spill] sm:$0xff] }
 0x3af   : > { %v2375_v21 = vpop.permute.xlu0 %2374  ;;  %v17875_v18 = vsub.f32 %v17873_v2, %v17874_v4  ;;  %v17878_v45 = vsub.f32 %v17876_v15, %v17877_v20  ;;  %10033 = vrsqrt.f32 %v1427_v0  ;;  %v1430_v36 = vadd.f32 1e-05, %v1398_v60  ;;  %v17883_v60 = vld [vmem:[#allocation91_spill] sm:$0xff]  ;;  %v17889_v2 = vld [vmem:[#allocation81_spill] sm:$0xff] }
 0x3b0   : > { %3061 = vadd.xlane.f32.xlu0 %v3060_v17  ;;  %9349 = vmatprep.mubr.msk.bf16.mxu1 %vm1031_vm0, %v2375_v21  ;;  %17872 = vst [vmem:[#allocation60_spill] sm:$0xff] %v12885_v40  ;;  %v1370_v32 = vsub.f32 %v1306_v47, %v12631_v34  ;;  %v1429_v54 = vadd.f32 1e-05, %v1397_v7  ;;  %v1307_v53 = vmul.f32 0.015625, %v17880_v29  ;;  %v3072_v48 = vsel %vm1031_vm0, %v12875_v26, 0.0  ;;  %v17885_v7 = vld [vmem:[#allocation68_spill] sm:$0xff] }
 0x3b1   : > { %3064 = vadd.xlane.f32.xlu1 %v3063_v42  ;;  %v1517_v50 = vmul.f32 %v10022_v5, %v17875_v18  ;;  %v1518_v17 = vmul.f32 %v10020_v22, %v17878_v45  ;;  %v1308_v42 = vmul.f32 0.015625, %v17879_v10  ;;  %v17881_v22 = vld [vmem:[#allocation83_spill] sm:$0xff]  ;;  %v1400_v5 = vmax.f32 %v1368_v55, 0.0  ;;  %v17890_v4 = vld [vmem:[#allocation17_spill] sm:$0xff]  ;;  %v17893_v10 = vld [vmem:[#allocation86_spill] sm:$0xff] }
 0x3b2   : > { %v2377_v38 = vpop.permute.xlu1 %2376  ;;  %v12903_v21 = vmul.f32 %v17881_v22, %v17881_v22  ;;  %v1369_v34 = vsub.f32 %v1305_v49, %v12652_v61  ;;  %v3075_v0 = vsel %vm1031_vm0, %v12885_v40, 0.0  ;;  %v12910_v27 = vmul.f32 %v17883_v60, %v17883_v60  ;;  %v17892_v15 = vld [vmem:[#allocation69_spill] sm:$0xff]  ;;  %v13324_v26 = vld [vmem:[%s12313_s17 + $0xc8] sm:$0xff] }
 0x3b3   : > { %v1399_v47 = vmax.f32 %v1367_v23, 0.0  ;;  %v17891_v55 = vsub.f32 %v17889_v2, %v17890_v4  ;;  %10035 = vrsqrt.f32 %v1430_v36  ;;  %v1402_v61 = vmax.f32 %v1370_v32, 0.0  ;;  %v17900_v4 = vld [vmem:[#allocation70_spill] sm:$0xff] }
 0x3b4   : > { %3067 = vadd.xlane.f32.xlu0 %v3066_v16  ;;  %9350 = vmatmul.mubr.msk.bf16.gmra.mrb[28].mxu1 %vm1031_vm0, %v2377_v38  ;;  %17882 = vst [vmem:[#allocation61_spill] sm:$0xff] %v12903_v21  ;;  %17884 = vst [vmem:[#allocation46_spill] sm:$0xff] %v12910_v27  ;;  %v17886_v16 = vld [vmem:[#allocation82_spill] sm:$0xff]  ;;  %v1372_v49 = vsub.f32 %v1308_v42, %v12663_v31  ;;  %v1309_v20 = vmul.f32 0.015625, %v17892_v15  ;;  %v10028_v23 = vpop.eup %10027  ;;  %10037 = vrsqrt.f32 %v1429_v54  ;;  %v1432_v36 = vadd.f32 1e-05, %v1400_v5 }
 0x3b5   : > { %3070 = vadd.xlane.f32.xlu1 %v3069_v13  ;;  %9361 = vmatprep.mubr.msk.bf16.mxu1 %vm1031_vm0, %v1545_v39  ;;  %v1310_v39 = vmul.f32 0.015625, %v17885_v7  ;;  %v17888_v13 = vsub.f32 %v17886_v16, %v17887_v24  ;;  %v12921_v18 = vmul.f32 %v10024_v11, %v17891_v55  ;;  %v1371_v45 = vsub.f32 %v1307_v53, %v12672_v43  ;;  %v9923_v11 = vld [vmem:[%s17429_s4 + $0x40] sm:$0xff]   ;;  %v10030_v31 = vpop.eup %10029  ;;  %v17898_v16 = vld [vmem:[#allocation19_spill] sm:$0xff] }
 0x3b6   : > { %v12930_v29 = vmul.f32 %v17893_v10, %v17893_v10  ;;  %v1401_v32 = vmax.f32 %v1369_v34, 0.0  ;;  %v3081_v42 = vsel %vm1031_vm0, %v12910_v27, 0.0  ;;  %v17895_v54 = vld [vmem:[#allocation9_spill] sm:$0xff]  ;;  %v1431_v53 = vadd.f32 1e-05, %v1399_v47  ;;  %9393 = vmatprep.subr.bf16.mxu1 %v9923_v11  ;;  %v17897_v34 = vld [vmem:[#allocation84_spill] sm:$0xff] }
 0x3b7   : > { %v12916_v38 = vmul.f32 %v10026_v33, %v17888_v13  ;;  %v3078_v33 = vsel %vm1031_vm0, %v12903_v21, 0.0  ;;  %v12939_v43 = vmul.f32 %v17895_v54, %v17895_v54  ;;  %v1547_v22 = vpack.c.bf16 %v1518_v17, %v1517_v50  ;;  %v17901_v17 = vld [vmem:[#allocation88_spill] sm:$0xff]  ;;  %v17905_v15 = vld [vmem:[#allocation71_spill] sm:$0xff]  ;;  %v13315_v27 = vld [vmem:[%s12313_s17 + $0xc0] sm:$0xff] }
 0x3b8   : > { %3073 = vadd.xlane.f32.xlu0 %v3072_v48  ;;  %17894 = vst [vmem:[#allocation47_spill] sm:$0xff] %v12930_v29  ;;  %v1374_v48 = vsub.f32 %v1310_v39, %v12684_v46  ;;  %v1434_v60 = vadd.f32 1e-05, %v1402_v61  ;;  %v1404_v7 = vmax.f32 %v1372_v49, 0.0  ;;  %v1373_v5 = vsub.f32 %v1309_v20, %v12691_v35  ;;  %v10032_v2 = vpop.eup %10031 }
 0x3b9   : > { %3076 = vadd.xlane.f32.xlu1 %v3075_v0  ;;  %17896 = vst [vmem:[#allocation62_spill] sm:$0xff] %v12939_v43  ;;  %v1548_v0 = vpack.c.bf16 %v12921_v18, %v12916_v38  ;;  %v17899_v24 = vsub.f32 %v17897_v34, %v17898_v16  ;;  %v1403_v47 = vmax.f32 %v1371_v45, 0.0  ;;  %v1312_v46 = vmul.f32 0.015625, %v17900_v4  ;;  %v10034_v39 = vpop.eup %10033  ;;  %v17903_v18 = vld [vmem:[#allocation11_spill] sm:$0xff]  ;;  %v17907_v45 = vld [vmem:[#allocation21_spill] sm:$0xff] }
 0x3ba   : > { %v3084_v50 = vsel %vm1031_vm0, %v12930_v29, 0.0  ;;  %v12955_v35 = vmul.f32 %v17901_v17, %v17901_v17  ;;  %10039 = vrsqrt.f32 %v1432_v36  ;;  %v1433_v38 = vadd.f32 1e-05, %v1401_v32  ;;  %v17915_v17 = vld [vmem:[#allocation87_spill] sm:$0xff]  ;;  %v13310_v29 = vld [vmem:[%s12313_s17 + $0xb8] sm:$0xff]  ;;  %17983 = vst [vmem:[#allocation11_spill] sm:$0xff] %v13315_v27 }
 0x3bb   : > { %v1522_v13 = vmul.f32 %v10028_v23, %v17899_v24  ;;  %v3087_v55 = vsel %vm1031_vm0, %v12939_v43, 0.0  ;;  %v12964_v61 = vmul.f32 %v17903_v18, %v17903_v18  ;;  %10041 = vrsqrt.f32 %v1431_v53  ;;  %v17906_v23 = vld [vmem:[#allocation85_spill] sm:$0xff]  ;;  %v17910_v53 = vld [vmem:[#allocation10_spill] sm:$0xff]  ;;  %17982 = vst [vmem:[#allocation88_spill] sm:$0xff] %v13310_v29  ;;  %17986 = vst [vmem:[#allocation21_spill] sm:$0xff] %v13324_v26 }
 0x3bc   : > { %3079 = vadd.xlane.f32.xlu0 %v3078_v33  ;;  %9362 = vmatmul.mubr.msk.bf16.vlgmr.msra.gmra.mrb[0].mxu1 %vm1031_vm0, %v1546_v57  ;;  %17902 = vst [vmem:[#allocation63_spill] sm:$0xff] %v12955_v35  ;;  %v9924_v57 = vld [vmem:[%s17429_s4 + $0x48] sm:$0xff]   ;;  %v1406_v49 = vmax.f32 %v1374_v48, 0.0  ;;  %v1311_v20 = vmul.f32 0.015625, %v17905_v15  ;;  %v17908_v33 = vsub.f32 %v17906_v23, %v17907_v45  ;;  %10043 = vrsqrt.f32 %v1434_v60  ;;  %v17918_v45 = vld [vmem:[#allocation89_spill] sm:$0xff] }
 0x3bd   : > { %3082 = vadd.xlane.f32.xlu1 %v3081_v42  ;;  %9365 = vmatprep.mubr.msk.bf16.mxu1 %vm1031_vm0, %v1547_v22  ;;  %17904 = vst [vmem:[#allocation64_spill] sm:$0xff] %v12964_v61  ;;  %v1436_v36 = vadd.f32 1e-05, %v1404_v7  ;;  %v1405_v32 = vmax.f32 %v1373_v5, 0.0  ;;  %v17909_v42 = vld [vmem:[#allocation72_spill] sm:$0xff]  ;;  %v1376_v34 = vsub.f32 %v1312_v46, %v12721_v59  ;;  %v12976_v48 = vmul.f32 %v17910_v53, %v17910_v53  ;;  %v10036_v60 = vpop.eup %10035  ;;  %v17912_v7 = vld [vmem:[#allocation73_spill] sm:$0xff] }
 0x3be   : > { %9394 = vmatpush3.bf16.msra.mxu1 %v9923_v11  ;;  %v1521_v10 = vmul.f32 %v10030_v31, %v17908_v33  ;;  %v1314_v54 = vmul.f32 0.015625, %v17909_v42  ;;  %v1435_v22 = vadd.f32 1e-05, %v1403_v47  ;;  %v3090_v11 = vsel %vm1031_vm0, %v12955_v35, 0.0  ;;  %v9925_v31 = vld [vmem:[%s17429_s4 + $0x50] sm:$0xff]   ;;  %v17913_v59 = vld [vmem:[#allocation16_spill] sm:$0xff]  ;;  %v10038_v47 = vpop.eup %10037 }
 0x3bf   : > { %9395 = vmatprep.subr.bf16.mxu1 %v9924_v57  ;;  %17911 = vst [vmem:[#allocation65_spill] sm:$0xff] %v12976_v48  ;;  %10045 = vrsqrt.f32 %v1433_v38  ;;  %v1313_v5 = vmul.f32 0.015625, %v17912_v7  ;;  %v3093_v16 = vsel %vm1031_vm0, %v12964_v61, 0.0  ;;  %v12986_v24 = vmul.f32 %v17913_v59, %v17913_v59  ;;  %v17919_v33 = vld [vmem:[#allocation15_spill] sm:$0xff]  ;;  %v17928_v53 = vld [vmem:[#allocation90_spill] sm:$0xff]  ;;  %v17929_v7 = vld [vmem:[#allocation24_spill] sm:$0xff] }
 0x3c0   : > { %3085 = vadd.xlane.f32.xlu0 %v3084_v50  ;;  %v1438_v4 = vadd.f32 1e-05, %v1406_v49  ;;  %v1375_v46 = vsub.f32 %v1311_v20, %v12743_v25  ;;  %v1549_v50 = vpack.c.bf16 %v1522_v13, %v1521_v10  ;;  %10047 = vrsqrt.f32 %v1436_v36  ;;  %v17921_v13 = vld [vmem:[#allocation20_spill] sm:$0xff]  ;;  %v17923_v20 = vld [vmem:[#allocation22_spill] sm:$0xff]  ;;  %v13301_v61 = vld [vmem:[%s12313_s17 + $0xb0] sm:$0xff] }
 0x3c1   : > { %3088 = vadd.xlane.f32.xlu1 %v3087_v55  ;;  %17914 = vst [vmem:[#allocation80_spill] sm:$0xff] %v12986_v24  ;;  %v17916_v55 = vld [vmem:[#allocation23_spill] sm:$0xff]  ;;  %v1437_v38 = vadd.f32 1e-05, %v1405_v32  ;;  %v1378_v23 = vsub.f32 %v1314_v54, %v12747_v3  ;;  %10049 = vrsqrt.f32 %v1435_v22  ;;  %v1408_v49 = vmax.f32 %v1376_v34, 0.0  ;;  %v9926_v3 = vld [vmem:[%s17429_s4 + $0x58] sm:$0xff]  }
 0x3c2   : > { %9396 = vmatpush3.bf16.msra.mxu1 %v9924_v57  ;;  %v17917_v18 = vsub.f32 %v17915_v17, %v17916_v55  ;;  %v17920_v57 = vsub.f32 %v17918_v45, %v17919_v33  ;;  %v3096_v25 = vsel %vm1031_vm0, %v12976_v48, 0.0  ;;  %v13012_v10 = vmul.f32 %v17923_v20, %v17923_v20  ;;  %v17925_v36 = vld [vmem:[#allocation26_spill] sm:$0xff]  ;;  %17979 = vst [vmem:[#allocation84_spill] sm:$0xff] %v13301_v61 }
 0x3c3   : > { %9397 = vmatprep.subr.bf16.mxu1 %v9925_v31  ;;  %v17926_v32 = vsub.f32 %v17750_v58, %v17925_v36  ;;  %10051 = vrsqrt.f32 %v1438_v4  ;;  %v1407_v22 = vmax.f32 %v1375_v46, 0.0  ;;  %v17927_v34 = vld [vmem:[#allocation74_spill] sm:$0xff]  ;;  %v1410_v59 = vmax.f32 %v1378_v23, 0.0  ;;  %v17933_v46 = vld [vmem:[#allocation25_spill] sm:$0xff] }
 0x3c4   : > { %v1524_v15 = vmul.f32 %v10032_v2, %v17917_v18  ;;  %3091 = vadd.xlane.f32.xlu0 %v3090_v11  ;;  %9366 = vmatmul.mubr.msk.bf16.gmra.mrb[4].mxu1 %vm1031_vm0, %v1548_v0  ;;  %v1523_v42 = vmul.f32 %v10034_v39, %v17920_v57  ;;  %v13002_v2 = vmul.f32 %v17921_v13, %v17921_v13  ;;  %v3099_v39 = vsel %vm1031_vm0, %v12986_v24, 0.0  ;;  %v13296_v48 = vld [vmem:[%s12313_s17 + $0xa8] sm:$0xff] }
 0x3c5   : > { %3094 = vadd.xlane.f32.xlu1 %v3093_v16  ;;  %9369 = vmatprep.mubr.msk.bf16.mxu1 %vm1031_vm0, %v1549_v50  ;;  %v1377_v0 = vsub.f32 %v1313_v5, %v12752_v44  ;;  %17924 = vst [vmem:[#allocation14_spill] sm:$0xff] %v13012_v10  ;;  %v1525_v54 = vmul.f32 %v10038_v47, %v17926_v32  ;;  %v1316_v11 = vmul.f32 0.015625, %v17927_v34  ;;  %v10040_v5 = vpop.eup %10039  ;;  %10053 = vrsqrt.f32 %v1437_v38  ;;  %v17931_v50 = vld [vmem:[#allocation75_spill] sm:$0xff]  ;;  %v17932_v47 = vld [vmem:[#allocation76_spill] sm:$0xff]  ;;  %v17935_v38 = vld [vmem:[#allocation77_spill] sm:$0xff] }
 0x3c6   : > { %17922 = vst [vmem:[#allocation12_spill] sm:$0xff] %v13002_v2  ;;  %9398 = vmatpush3.bf16.msra.mxu1 %v9925_v31  ;;  %v17930_v16 = vsub.f32 %v17928_v53, %v17929_v7  ;;  %v1315_v17 = vmul.f32 0.015625, %v17931_v50  ;;  %v1550_v55 = vpack.c.bf16 %v1524_v15, %v1523_v42  ;;  %v10042_v18 = vpop.eup %10041  ;;  %v1440_v58 = vadd.f32 1e-05, %v1408_v49  ;;  %v17936_v15 = vld [vmem:[#allocation27_spill] sm:$0xff]  ;;  %v17938_v32 = vld [vmem:[#allocation93_spill] sm:$0xff] }
 0x3c7   : > { %9399 = vmatprep.subr.bf16.mxu1 %v9926_v3  ;;  %v1318_v31 = vmul.f32 0.015625, %v17932_v47  ;;  %v3102_v4 = vsel %vm1031_vm0, %v13002_v2, 0.0  ;;  %v13027_v45 = vmul.f32 %v17933_v46, %v17933_v46  ;;  %v1409_v33 = vmax.f32 %v1377_v0, 0.0  ;;  %v17939_v34 = vld [vmem:[#allocation29_spill] sm:$0xff]  ;;  %v17950_v46 = vld [vmem:[#allocation94_spill] sm:$0xff]  ;;  %17978 = vst [vmem:[#allocation9_spill] sm:$0xff] %v13296_v48 }
 0x3c8   : > { %v1526_v44 = vmul.f32 %v10036_v60, %v17930_v16  ;;  %3097 = vadd.xlane.f32.xlu0 %v3096_v25  ;;  %v10044_v60 = vpop.eup %10043  ;;  %v1317_v23 = vmul.f32 0.015625, %v17935_v38  ;;  %v3105_v57 = vsel %vm1031_vm0, %v13012_v10, 0.0  ;;  %v13034_v42 = vmul.f32 %v17936_v15, %v17936_v15  ;;  %v17942_v16 = vld [vmem:[#allocation28_spill] sm:$0xff]  ;;  %v13287_v10 = vld [vmem:[%s12313_s17 + $0xa0] sm:$0xff] }
 0x3c9   : > { %3100 = vadd.xlane.f32.xlu1 %v3099_v39  ;;  %17934 = vst [vmem:[#allocation13_spill] sm:$0xff] %v13027_v45  ;;  %v13038_v49 = vmul.f32 %v12825_v12, %v12825_v12  ;;  %v1439_v25 = vadd.f32 1e-05, %v1407_v22  ;;  %v1380_v13 = vsub.f32 %v1316_v11, %v12781_v14  ;;  %v10046_v20 = vpop.eup %10045  ;;  %v1442_v0 = vadd.f32 1e-05, %v1410_v59  ;;  %v17951_v38 = vld [vmem:[#allocation48_spill] sm:$0xff] }
 0x3ca   : > { %17937 = vst [vmem:[#allocation66_spill] sm:$0xff] %v13034_v42  ;;  %9400 = vmatpush3.bf16.msra.mxu1 %v9926_v3  ;;  %v1551_v39 = vpack.c.bf16 %v1526_v44, %v1525_v54  ;;  %v1379_v36 = vsub.f32 %v1315_v17, %v12803_v9  ;;  %v17940_v53 = vsub.f32 %v17938_v32, %v17939_v34  ;;  %v17941_v3 = vld [vmem:[#allocation92_spill] sm:$0xff]  ;;  %10055 = vrsqrt.f32 %v1440_v58  ;;  %v17944_v9 = vld [vmem:[#allocation30_spill] sm:$0xff]  ;;  %v10048_v11 = vpop.eup %10047  ;;  %v17946_v17 = vld [vmem:[#allocation49_spill] sm:$0xff] }
 0x3cb   : > { %v17943_v50 = vsub.f32 %v17941_v3, %v17942_v16  ;;  %v1382_v22 = vsub.f32 %v1318_v31, %v12807_v62  ;;  %v3108_v14 = vsel %vm1031_vm0, %v13027_v45, 0.0  ;;  %v13055_v54 = vmul.f32 %v17944_v9, %v17944_v9  ;;  %v17948_v58 = vld [vmem:[#allocation31_spill] sm:$0xff]  ;;  %v10491_v16 = vld [vmem:[%s11130_s15 + $0xa8] sm:$0xff]  ;;  %v13282_v45 = vld [vmem:[%s12313_s17 + $0x98] sm:$0xff] }
 0x3cc   : > { %3103 = vadd.xlane.f32.xlu0 %v3102_v4  ;;  %9370 = vmatmul.mubr.msk.bf16.gmra.mrb[8].mxu1 %vm1031_vm0, %v1550_v55  ;;  %v1527_v7 = vmul.f32 %v10042_v18, %v17940_v53  ;;  %v1441_v44 = vadd.f32 1e-05, %v1409_v33  ;;  %v1381_v59 = vsub.f32 %v1317_v23, %v12812_v56  ;;  %v13062_v62 = vmul.f32 %v17946_v17, %v17946_v17  ;;  %v10050_v55 = vpop.eup %10049  ;;  %v17953_v23 = vld [vmem:[#allocation78_spill] sm:$0xff] }
 0x3cd   : > { %v1528_v47 = vmul.f32 %v10040_v5, %v17943_v50  ;;  %3106 = vadd.xlane.f32.xlu1 %v3105_v57  ;;  %9373 = vmatprep.mubr.msk.bf16.mxu1 %vm1031_vm0, %v1551_v39  ;;  %17945 = vst [vmem:[#allocation67_spill] sm:$0xff] %v13055_v54  ;;  %v3111_v5 = vsel %vm1031_vm0, %v13034_v42, 0.0  ;;  %10057 = vrsqrt.f32 %v1439_v25  ;;  %v1412_v18 = vmax.f32 %v1380_v13, 0.0  ;;  %v10052_v32 = vpop.eup %10051  ;;  %v17954_v25 = vld [vmem:[#allocation79_spill] sm:$0xff] }
 0x3ce   : > { %17947 = vst [vmem:[#allocation83_spill] sm:$0xff] %v13062_v62  ;;  %v17949_v31 = vsub.f32 %v12103_v37, %v17948_v58  ;;  %v17952_v57 = vsub.f32 %v17950_v46, %v17951_v38  ;;  %10059 = vrsqrt.f32 %v1442_v0  ;;  %v1411_v56 = vmax.f32 %v1379_v36, 0.0  ;;  %v17959_v58 = vld [vmem:[#allocation34_spill] sm:$0xff]  ;;  %v17960_v46 = vld [vmem:[#allocation95_spill] sm:$0xff]  ;;  %v17961_v38 = vld [vmem:[#allocation32_spill] sm:$0xff] }
 0x3cf   : > { %v1320_v15 = vmul.f32 0.015625, %v17953_v23  ;;  %v1552_v39 = vpack.c.bf16 %v1528_v47, %v1527_v7  ;;  %v1414_v34 = vmax.f32 %v1382_v22, 0.0  ;;  %v1319_v13 = vmul.f32 0.015625, %v17954_v25  ;;  %v17957_v7 = vld [vmem:[#allocation51_spill] sm:$0xff] }
 0x3d0   : > { %v1529_v4 = vmul.f32 %v10046_v20, %v17949_v31  ;;  %v1530_v33 = vmul.f32 %v10044_v60, %v17952_v57  ;;  %3109 = vadd.xlane.f32.xlu0 %v3108_v14  ;;  %v3114_v37 = vsel %vm1031_vm0, %v13055_v54, 0.0  ;;  %v17955_v20 = vld [vmem:[#allocation33_spill] sm:$0xff]  ;;  %v10054_v60 = vpop.eup %10053  ;;  %10061 = vrsqrt.f32 %v1441_v44 }
 0x3d1   : > { %3112 = vadd.xlane.f32.xlu1 %v3111_v5  ;;  %v13076_v53 = vmul.f32 %v17955_v20, %v17955_v20  ;;  %v1413_v0 = vmax.f32 %v1381_v59, 0.0  ;;  %v3117_v36 = vsel %vm1031_vm0, %v13062_v62, 0.0  ;;  %v13082_v3 = vmul.f32 %v17957_v7, %v17957_v7  ;;  %v10492_v5 = vld [vmem:[%s11130_s15 + $0xa0] sm:$0xff]  ;;  %v13273_v62 = vld [vmem:[%s12313_s17 + $0x90] sm:$0xff] }
 0x3d2   : > { %v1502_v50 = vsub.f32 %v10491_v16, %v12644_v63  ;;  %v1351_v47 = vmul.f32 %v12859_v8, %v12859_v8  ;;  %v1444_v22 = vadd.f32 1e-05, %v1412_v18  ;;  %v1553_v14 = vpack.c.bf16 %v1530_v33, %v1529_v4 }
 0x3d3   : > { %17956 = vst [vmem:[#allocation91_spill] sm:$0xff] %v13076_v53  ;;  %17958 = vst [vmem:[#allocation68_spill] sm:$0xff] %v13082_v3  ;;  %v1501_v31 = vsub.f32 %v10492_v5, %v17959_v58  ;;  %v1443_v44 = vadd.f32 1e-05, %v1411_v56  ;;  %v1384_v59 = vsub.f32 %v1320_v15, %v13038_v49  ;;  %v17962_v57 = vsub.f32 %v17960_v46, %v17961_v38  ;;  %v17964_v56 = vld [vmem:[#allocation96_spill] sm:$0xff]  ;;  %v17965_v15 = vld [vmem:[#allocation50_spill] sm:$0xff] }
 0x3d4   : > { %3115 = vadd.xlane.f32.xlu0 %v3114_v37  ;;  %9374 = vmatmul.mubr.msk.bf16.gmra.mrb[12].mxu1 %vm1031_vm0, %v1552_v39  ;;  %v1446_v25 = vadd.f32 1e-05, %v1414_v34  ;;  %v1383_v63 = vsub.f32 %v1319_v13, %v1351_v47  ;;  %v3120_v18 = vsel %vm1031_vm0, %v13076_v53, 0.0  ;;  %v13100_v4 = vmul.f32 %v12678_v1, %v12678_v1  ;;  %v17967_v34 = vld [vmem:[#allocation35_spill] sm:$0xff]  ;;  %v10056_v37 = vpop.eup %10055  ;;  %v10495_v38 = vld [vmem:[%s11130_s15 + $0xc8] sm:$0xff] }
 0x3d5   : > { %v1532_v23 = vmul.f32 %v10048_v11, %v17962_v57  ;;  %3118 = vadd.xlane.f32.xlu1 %v3117_v36  ;;  %9377 = vmatprep.mubr.msk.bf16.mxu1 %vm1031_vm0, %v1553_v14  ;;  %v1445_v49 = vadd.f32 1e-05, %v1413_v0  ;;  %v3123_v33 = vsel %vm1031_vm0, %v13082_v3, 0.0  ;;  %v17966_v39 = vsub.f32 %v17964_v56, %v17965_v15  ;;  %v17969_v57 = vld [vmem:[#allocation52_spill] sm:$0xff]  ;;  %v13268_v53 = vld [vmem:[%s12313_s17 + $0x88] sm:$0xff] }
 0x3d6   : > { %17963 = vst [vmem:[#allocation82_spill] sm:$0xff] %v13100_v4  ;;  %v13109_v13 = vmul.f32 %v17967_v34, %v17967_v34  ;;  %10063 = vrsqrt.f32 %v1444_v22  ;;  %v1533_v36 = vmul.f32 %v10054_v60, %v1501_v31  ;;  %v1534_v16 = vmul.f32 %v10052_v32, %v1502_v50  ;;  %v10493_v22 = vld [vmem:[%s11130_s15 + $0xb8] sm:$0xff] }
 0x3d7   : > { %v1531_v11 = vmul.f32 %v10050_v55, %v17966_v39  ;;  %10065 = vrsqrt.f32 %v1443_v44  ;;  %v1416_v47 = vmax.f32 %v1384_v59, 0.0  ;;  %v10058_v0 = vpop.eup %10057  ;;  %v1415_v14 = vmax.f32 %v1383_v63, 0.0  ;;  %v10494_v44 = vld [vmem:[%s11130_s15 + $0xb0] sm:$0xff]  ;;  %v10496_v63 = vld [vmem:[%s11130_s15 + $0xc0] sm:$0xff] }
 0x3d8   : > { %17968 = vst [vmem:[#allocation18_spill] sm:$0xff] %v13109_v13  ;;  %3121 = vadd.xlane.f32.xlu0 %v3120_v18  ;;  %10067 = vrsqrt.f32 %v1446_v25  ;;  %v3126_v55 = vsel %vm1031_vm0, %v13100_v4, 0.0  ;;  %v10060_v5 = vpop.eup %10059  ;;  %v3129_v60 = vsel %vm1031_vm0, %v13109_v13, 0.0  ;;  %v1555_v32 = vpack.c.bf16 %v1534_v16, %v1533_v36  ;;  %v13259_v13 = vld [vmem:[%s12313_s17 + $0x80] sm:$0xff] }
 0x3d9   : > { %3124 = vadd.xlane.f32.xlu1 %v3123_v33  ;;  %10069 = vrsqrt.f32 %v1445_v49  ;;  %v1554_v58 = vpack.c.bf16 %v1532_v23, %v1531_v11  ;;  %v1504_v31 = vsub.f32 %v10493_v22, %v12694_v30  ;;  %v1503_v59 = vsub.f32 %v10494_v44, %v12714_v6  ;;  %v17970_v23 = vld [vmem:[#allocation53_spill] sm:$0xff]  ;;  %v17973_v22 = vld [vmem:[#allocation56_spill] sm:$0xff]  ;;  %17976 = vst [vmem:[#allocation69_spill] sm:$0xff] %v13259_v13 }
 0x3da   : > { %v10062_v50 = vpop.eup %10061  ;;  %v1448_v46 = vadd.f32 1e-05, %v1416_v47  ;;  %v1506_v25 = vsub.f32 %v10495_v38, %v17969_v57  ;;  %v1505_v18 = vsub.f32 %v10496_v63, %v17970_v23  ;;  %v1447_v49 = vadd.f32 1e-05, %v1415_v14  ;;  %v17971_v14 = vld [vmem:[#allocation55_spill] sm:$0xff] }
 0x3db   : > { %v1535_v30 = vmul.f32 %v10058_v0, %v1503_v59  ;;  %v1536_v33 = vmul.f32 %v10056_v37, %v1504_v31  ;;  %v10499_v37 = vld [vmem:[%s11130_s15 + $0xe8] sm:$0xff]  ;;  %v17972_v0 = vld [vmem:[#allocation41_spill] sm:$0xff] }
 0x3dc   : > { %3127 = vadd.xlane.f32.xlu0 %v3126_v55  ;;  %9378 = vmatmul.mubr.msk.bf16.gmra.mrb[16].mxu1 %vm1031_vm0, %v1554_v58  ;;  %v1537_v6 = vmul.f32 %v10062_v50, %v1505_v18  ;;  %v1538_v56 = vmul.f32 %v10060_v5, %v1506_v25  ;;  %10071 = vrsqrt.f32 %v1448_v46  ;;  %v10497_v55 = vld [vmem:[%s11130_s15 + $0xd8] sm:$0xff]  ;;  %v1510_v5 = vsub.f32 %v10499_v37, %v17972_v0  ;;  %v10500_v50 = vld [vmem:[%s11130_s15 + $0xe0] sm:$0xff]  ;;  %v13184_v37 = vld [vmem:[%s12313_s17 + $0x28] sm:$0xff] }
 0x3dd   : > { %3130 = vadd.xlane.f32.xlu1 %v3129_v60  ;;  %9381 = vmatprep.mubr.msk.bf16.mxu1 %vm1031_vm0, %v1555_v32  ;;  %10073 = vrsqrt.f32 %v1447_v49  ;;  %v1556_v11 = vpack.c.bf16 %v1536_v33, %v1535_v30  ;;  %v1508_v58 = vsub.f32 %v10497_v55, %v17971_v14  ;;  %v10498_v60 = vld [vmem:[%s11130_s15 + $0xd0] sm:$0xff]  ;;  %v1509_v31 = vsub.f32 %v10500_v50, %v17973_v22  ;;  %v10501_v18 = vld [vmem:[%s11130_s15 + $0xf8] sm:$0xff] }
 0x3de   : > { %v1557_v16 = vpack.c.bf16 %v1538_v56, %v1537_v6  ;;  %v1507_v32 = vsub.f32 %v10498_v60, %v12772_v52  ;;  %v1512_v49 = vsub.f32 %v10501_v18, %v12825_v12  ;;  %v10502_v30 = vld [vmem:[%s11130_s15 + $0xf0] sm:$0xff]  ;;  %v13170_v14 = vld [vmem:[%s12313_s17 + $0x18] sm:$0xff] }
 0x3df   : > { %v1511_v33 = vsub.f32 %v10502_v30, %v12859_v8  ;;  %v13189_v0 = vld [vmem:[%s12313_s17 + $0x30] sm:$0xff]  ;;  %v13198_v22 = vld [vmem:[%s12313_s17 + $0x38] sm:$0xff]  ;;  %v13240_v30 = vld [vmem:[%s12313_s17 + $0x68] sm:$0xff] }
 0x3e0   : > { %v10064_v15 = vpop.eup %10063 }
 0x3e1   : > { %v10066_v39 = vpop.eup %10065  ;;  %v1540_v59 = vmul.f32 %v10064_v15, %v1508_v58  ;;  %v13175_v58 = vld [vmem:[%s12313_s17 + $0x20] sm:$0xff] }
 0x3e2   : > { %v10068_v36 = vpop.eup %10067  ;;  %v1539_v44 = vmul.f32 %v10066_v39, %v1507_v32  ;;  %v13146_v39 = vld [vmem:[%s12313_s17 + $0x8] sm:$0xff] }
 0x3e3   : > { %v10070_v47 = vpop.eup %10069  ;;  %v1542_v38 = vmul.f32 %v10068_v36, %v1510_v5  ;;  %v13155_v36 = vld [vmem:[%s12313_s17] sm:$0xff] }
 0x3e4   : > { %9382 = vmatmul.mubr.msk.bf16.gmra.mrb[20].mxu1 %vm1031_vm0, %v1556_v11  ;;  %v1541_v46 = vmul.f32 %v10070_v47, %v1509_v31  ;;  %v1558_v25 = vpack.c.bf16 %v1540_v59, %v1539_v44  ;;  %v13203_v31 = vld [vmem:[%s12313_s17 + $0x40] sm:$0xff] }
 0x3e5   : > { %9385 = vmatprep.mubr.msk.bf16.mxu1 %vm1031_vm0, %v1557_v16  ;;  %v13160_v16 = vld [vmem:[%s12313_s17 + $0x10] sm:$0xff] }
 0x3e6   : > { %v10072_v52 = vpop.eup %10071  ;;  %v1559_v23 = vpack.c.bf16 %v1542_v38, %v1541_v46  ;;  %v13212_v46 = vld [vmem:[%s12313_s17 + $0x48] sm:$0xff]  ;;  %v13217_v38 = vld [vmem:[%s12313_s17 + $0x50] sm:$0xff] }
 0x3e7   : > { %v10074_v63 = vpop.eup %10073  ;;  %v1544_v15 = vmul.f32 %v10072_v52, %v1512_v49  ;;  %17974 = vst [vmem:[#allocation81_spill] sm:$0xff] %v13212_v46  ;;  %17975 = vst [vmem:[#allocation17_spill] sm:$0xff] %v13217_v38 }
 0x3e8   : > { %v1543_v56 = vmul.f32 %v10074_v63, %v1511_v33  ;;  %v13226_v63 = vld [vmem:[%s12313_s17 + $0x58] sm:$0xff]  ;;  %v13245_v33 = vld [vmem:[%s12313_s17 + $0x70] sm:$0xff] }
 0x3e9   : > { %v13135_v57 = vpop.xlane.xlu0 %2877 }
 0x3ea   : > { %v1560_v8 = vpack.c.bf16 %v1544_v15, %v1543_v56  ;;  %v13333_v51 = vmul.f32 0.015625, %v13135_v57 }
 0x3ec   : > { %9386 = vmatmul.mubr.msk.bf16.gmra.mrb[24].mxu1 %vm1031_vm0, %v1558_v25 }
 0x3ed   : > { %9389 = vmatprep.mubr.msk.bf16.mxu1 %vm1031_vm0, %v1559_v23  ;;  %v13143_v6 = vpop.xlane.xlu0 %2883  ;;  %v13231_v23 = vld [vmem:[%s12313_s17 + $0x60] sm:$0xff] }
 0x3ee   : > { %3712 = vrot.lane.b32.xlu1 %v13146_v39, %s10724_s16  ;;  %v13342_v19 = vmul.f32 0.015625, %v13143_v6 }
 0x3f1   : > { %v13150_v11 = vpop.xlane.xlu0 %2886  ;;  %v13152_v12 = vpop.xlane.xlu1 %2880 }
 0x3f2   : > { %3710 = vrot.lane.b32.xlu0 %v13155_v36, %s10724_s16  ;;  %3714 = vrot.lane.b32.xlu1 %v13160_v16, %s10724_s16 }
 0x3f4   : > { %9390 = vmatmul.mubr.msk.bf16.gmra.mrb[28].mxu1 %vm1031_vm0, %v1560_v8  ;;  %v13254_v8 = vld [vmem:[%s12313_s17 + $0x78] sm:$0xff] }
 0x3f5   : > { %v13165_v47 = vpop.xlane.xlu0 %2889  ;;  %v13167_v55 = vpop.xlane.xlu1 %2892 }
 0x3f6   : > { %3716 = vrot.lane.b32.xlu1 %v13170_v14, %s10724_s16  ;;  %3718 = vrot.lane.b32.xlu0 %v13175_v58, %s10724_s16  ;;  %v13351_v57 = vmul.f32 0.015625, %v13165_v47 }
 0x3f9   : > { %v13179_v60 = vpop.xlane.xlu0 %2895  ;;  %v13181_v32 = vpop.xlane.xlu1 %2898 }
 0x3fa   : > { %3720 = vrot.lane.b32.xlu1 %v13184_v37, %s10724_s16  ;;  %3722 = vrot.lane.b32.xlu0 %v13189_v0, %s10724_s16  ;;  %v13373_v47 = vmul.f32 0.015625, %v13179_v60  ;;  %v13382_v6 = vmul.f32 0.015625, %v13181_v32 }
 0x3fc   : > { %v13404_v60 = vmul.f32 %v13373_v47, %v13373_v47 }
 0x3fd   : > { %v13193_v5 = vpop.xlane.xlu0 %2901  ;;  %v13195_v50 = vpop.xlane.xlu1 %2904 }
 0x3fe   : > { %3724 = vrot.lane.b32.xlu1 %v13198_v22, %s10724_s16  ;;  %3726 = vrot.lane.b32.xlu0 %v13203_v31, %s10724_s16 }
 0x401   : > { %v13207_v44 = vpop.xlane.xlu0 %2907  ;;  %v13209_v59 = vpop.xlane.xlu1 %2910 }
 0x402   : > { %3728 = vrot.lane.b32.xlu1 %v13212_v46, %s10724_s16  ;;  %3730 = vrot.lane.b32.xlu0 %v13217_v38, %s10724_s16 }
 0x405   : > { %v13221_v52 = vpop.xlane.xlu0 %2913  ;;  %v13223_v25 = vpop.xlane.xlu1 %2916 }
 0x406   : > { %3732 = vrot.lane.b32.xlu1 %v13226_v63, %s10724_s16  ;;  %3734 = vrot.lane.b32.xlu0 %v13231_v23, %s10724_s16 }
 0x409   : > { %v13235_v18 = vpop.xlane.xlu0 %2919  ;;  %v13237_v49 = vpop.xlane.xlu1 %2922 }
 0x40a   : > { %3736 = vrot.lane.b32.xlu1 %v13240_v30, %s10724_s16  ;;  %3738 = vrot.lane.b32.xlu0 %v13245_v33, %s10724_s16 }
 0x40d   : > { %v13249_v56 = vpop.xlane.xlu0 %2925  ;;  %v13251_v15 = vpop.xlane.xlu1 %2928 }
 0x40e   : > { %3740 = vrot.lane.b32.xlu1 %v13254_v8, %s10724_s16  ;;  %3742 = vrot.lane.b32.xlu0 %v13259_v13, %s10724_s16 }
 0x411   : > { %v13263_v4 = vpop.xlane.xlu0 %2931  ;;  %v13265_v3 = vpop.xlane.xlu1 %2934 }
 0x412   : > { %3744 = vrot.lane.b32.xlu1 %v13268_v53, %s10724_s16  ;;  %3746 = vrot.lane.b32.xlu0 %v13273_v62, %s10724_s16 }
 0x415   : > { %v13277_v54 = vpop.xlane.xlu0 %2937  ;;  %v13279_v42 = vpop.xlane.xlu1 %2940 }
 0x416   : > { %3748 = vrot.lane.b32.xlu1 %v13282_v45, %s10724_s16  ;;  %3750 = vrot.lane.b32.xlu0 %v13287_v10, %s10724_s16 }
 0x419   : > { %v13291_v2 = vpop.xlane.xlu0 %2943  ;;  %v13293_v24 = vpop.xlane.xlu1 %2946 }
 0x41a   : > { %17977 = vst [vmem:[#allocation86_spill] sm:$0xff] %v13293_v24  ;;  %3752 = vrot.lane.b32.xlu1 %v13296_v48, %s10724_s16  ;;  %3754 = vrot.lane.b32.xlu0 %v13301_v61, %s10724_s16 }
 0x41d   : > { %v13305_v35 = vpop.xlane.xlu0 %2949 }
 0x41e   : > { %17980 = vst [vmem:[#allocation19_spill] sm:$0xff] %v13305_v35  ;;  %v13307_v43 = vpop.xlane.xlu1 %2952  ;;  %3756 = vrot.lane.b32.xlu1 %v13310_v29, %s10724_s16  ;;  %3758 = vrot.lane.b32.xlu0 %v13315_v27, %s10724_s16  ;;  %v13358_v29 = vmul.f32 0.015625, %v13167_v55 }
 0x41f   : > { %17981 = vst [vmem:[#allocation70_spill] sm:$0xff] %v13307_v43 }
 0x421   : > { %v13319_v21 = vpop.xlane.xlu0 %2955 }
 0x422   : > { %17984 = vst [vmem:[#allocation71_spill] sm:$0xff] %v13319_v21  ;;  %v13321_v40 = vpop.xlane.xlu1 %2958  ;;  %3760 = vrot.lane.b32.xlu1 %v13324_v26, %s10724_s16  ;;  %3762 = vrot.lane.b32.xlu0 %v17944_v9, %s10724_s16  ;;  %v13345_v26 = vmul.f32 0.015625, %v13150_v11  ;;  %v13348_v9 = vmul.f32 0.015625, %v13152_v12  ;;  %v3166_v11 = vmul.f32 %v13342_v19, %v13342_v19  ;;  %v3168_v12 = vmul.f32 %v13351_v57, %v13351_v57 }
 0x423   : > { %17985 = vst [vmem:[#allocation85_spill] sm:$0xff] %v13321_v40  ;;  %v13409_v40 = vmul.f32 0.015625, %v13207_v44 }
 0x424   : > { %v3167_v55 = vmul.f32 %v13345_v26, %v13345_v26 }
 0x425   : > { %v13330_v41 = vpop.xlane.xlu0 %2961  ;;  %17993 = vst [vmem:[#allocation89_spill] sm:$0xff] %v13409_v40  ;;  %v13437_v48 = vmul.f32 %v13409_v40, %v13409_v40 }
 0x426   : > { %17987 = vst [vmem:[#allocation72_spill] sm:$0xff] %v13330_v41  ;;  %v13335_v28 = vpop.xlane.xlu1 %2964  ;;  %3764 = vrot.lane.b32.xlu1 %v17946_v17, %s10724_s16  ;;  %3766 = vrot.lane.b32.xlu0 %v17955_v20, %s10724_s16  ;;  %v3164_v17 = vmul.f32 %v13333_v51, %v13333_v51 }
 0x427   : > { %17988 = vst [vmem:[#allocation10_spill] sm:$0xff] %v13335_v28  ;;  %v13398_v28 = vmul.f32 0.015625, %v13195_v50  ;;  %v13413_v50 = vmul.f32 %v13382_v6, %v13382_v6 }
 0x429   : > { %v13353_v27 = vpop.xlane.xlu0 %2967  ;;  %17992 = vst [vmem:[#allocation23_spill] sm:$0xff] %v13398_v28  ;;  %v13431_v24 = vmul.f32 %v13398_v28, %v13398_v28 }
 0x42a   : > { %17989 = vst [vmem:[#allocation73_spill] sm:$0xff] %v13353_v27  ;;  %v13360_v20 = vpop.xlane.xlu1 %2970  ;;  %3768 = vrot.lane.b32.xlu1 %v17957_v7, %s10724_s16  ;;  %3770 = vrot.lane.b32.xlu0 %v12678_v1, %s10724_s16  ;;  %v3165_v1 = vmul.f32 %v13348_v9, %v13348_v9  ;;  %v3169_v7 = vmul.f32 %v13358_v29, %v13358_v29 }
 0x42b   : > { %17990 = vst [vmem:[#allocation16_spill] sm:$0xff] %v13360_v20  ;;  %v13391_v20 = vmul.f32 0.015625, %v13193_v5 }
 0x42d   : > { %17991 = vst [vmem:[#allocation87_spill] sm:$0xff] %v13391_v20  ;;  %v3038_v27 = vpop.xlane.xlu0 %3037  ;;  %v13422_v43 = vmul.f32 %v13391_v20, %v13391_v20  ;;  %v13446_v20 = vmul.f32 0.015625, %v13223_v25 }
 0x42e   : > { %v3132_v61 = vmul.f32 0.015625, %v3038_v27  ;;  %v3041_v41 = vpop.xlane.xlu1 %3040  ;;  %3772 = vrot.lane.b32.xlu1 %v17967_v34, %s10724_s16  ;;  %v13418_v34 = vmul.f32 0.015625, %v13209_v59 }
 0x42f   : > { %v3133_v21 = vmul.f32 0.015625, %v3041_v41  ;;  %v13427_v41 = vmul.f32 0.015625, %v13221_v52 }
 0x430   : > { %v3196_v32 = vsub.f32 %v3132_v61, %v3164_v17 }
 0x431   : > { %v3197_v5 = vsub.f32 %v3133_v21, %v3165_v1  ;;  %v3044_v35 = vpop.xlane.xlu0 %3043  ;;  %v13443_v1 = vmul.f32 %v13418_v34, %v13418_v34  ;;  %v13452_v28 = vmul.f32 %v13427_v41, %v13427_v41 }
 0x432   : > { %v3228_v61 = vmax.f32 %v3196_v32, 0.0  ;;  %v3134_v17 = vmul.f32 0.015625, %v3044_v35  ;;  %v3047_v27 = vpop.xlane.xlu1 %3046  ;;  %v13461_v35 = vmul.f32 %v13446_v20, %v13446_v20 }
 0x433   : > { %v3229_v44 = vmax.f32 %v3197_v5, 0.0  ;;  %v3135_v21 = vmul.f32 0.015625, %v3047_v27  ;;  %v13455_v27 = vmul.f32 0.015625, %v13235_v18 }
 0x434   : > { %v3260_v59 = vadd.f32 1e-05, %v3228_v61  ;;  %v3198_v32 = vsub.f32 %v3134_v17, %v3166_v11 }
 0x435   : > { %v3261_v46 = vadd.f32 1e-05, %v3229_v44  ;;  %v3199_v52 = vsub.f32 %v3135_v21, %v3167_v55  ;;  %v3050_v5 = vpop.xlane.xlu0 %3049  ;;  %v13464_v55 = vmul.f32 0.015625, %v13237_v49  ;;  %v13469_v21 = vmul.f32 0.015625, %v13249_v56 }
 0x436   : > { %10075 = vrsqrt.f32 %v3260_v59  ;;  %v3230_v40 = vmax.f32 %v3198_v32, 0.0  ;;  %v3136_v38 = vmul.f32 0.015625, %v3050_v5  ;;  %v3053_v25 = vpop.xlane.xlu1 %3052 }
 0x437   : > { %10077 = vrsqrt.f32 %v3261_v46  ;;  %v3231_v61 = vmax.f32 %v3199_v52, 0.0  ;;  %v3137_v17 = vmul.f32 0.015625, %v3053_v25  ;;  %17994 = vst [vmem:[#allocation15_spill] sm:$0xff] %v13464_v55  ;;  %17995 = vst [vmem:[#allocation20_spill] sm:$0xff] %v13469_v21  ;;  %v13473_v52 = vmul.f32 %v13455_v27, %v13455_v27 }
 0x438   : > { %v3262_v44 = vadd.f32 1e-05, %v3230_v40  ;;  %v3200_v18 = vsub.f32 %v3136_v38, %v3168_v12  ;;  %v13479_v56 = vmul.f32 %v13464_v55, %v13464_v55 }
 0x439   : > { %v3263_v32 = vadd.f32 1e-05, %v3231_v61  ;;  %v3201_v5 = vsub.f32 %v3137_v17, %v3169_v7  ;;  %v3056_v46 = vpop.xlane.xlu0 %3055  ;;  %v13482_v7 = vmul.f32 0.015625, %v13251_v15 }
 0x43a   : > { %10079 = vrsqrt.f32 %v3262_v44  ;;  %v3232_v25 = vmax.f32 %v3200_v18, 0.0  ;;  %v3138_v11 = vmul.f32 0.015625, %v3056_v46  ;;  %v3059_v49 = vpop.xlane.xlu1 %3058  ;;  %v13489_v18 = vmul.f32 %v13469_v21, %v13469_v21 }
 0x43b   : > { %10081 = vrsqrt.f32 %v3263_v32  ;;  %v3233_v38 = vmax.f32 %v3201_v5, 0.0  ;;  %v3139_v12 = vmul.f32 0.015625, %v3059_v49 }
 0x43c   : > { %v3264_v61 = vadd.f32 1e-05, %v3232_v25  ;;  %v3202_v17 = vsub.f32 %v3138_v11, %v13404_v60  ;;  %v13495_v60 = vmul.f32 0.015625, %v13263_v4 }
 0x43d   : > { %v3265_v32 = vadd.f32 1e-05, %v3233_v38  ;;  %v3203_v5 = vsub.f32 %v3139_v12, %v13413_v50  ;;  %v3062_v46 = vpop.xlane.xlu0 %3061  ;;  %v13499_v38 = vmul.f32 %v13482_v7, %v13482_v7  ;;  %v3341_v50 = vsub.f32 %v13268_v53, %v13482_v7 }
 0x43e   : > { %10083 = vrsqrt.f32 %v3264_v61  ;;  %v3234_v15 = vmax.f32 %v3202_v17, 0.0  ;;  %v3140_v40 = vmul.f32 0.015625, %v3062_v46  ;;  %v3065_v25 = vpop.xlane.xlu1 %3064  ;;  %v13505_v46 = vmul.f32 0.015625, %v13265_v3 }
 0x43f   : > { %10085 = vrsqrt.f32 %v3265_v32  ;;  %v3235_v11 = vmax.f32 %v3203_v5, 0.0  ;;  %v3141_v44 = vmul.f32 0.015625, %v3065_v25  ;;  %v17996_v25 = vsub.f32 %v13155_v36, %v13333_v51 }
 0x440   : > { %v10076_v59 = vpop.eup %10075  ;;  %v3266_v12 = vadd.f32 1e-05, %v3234_v15  ;;  %v3204_v61 = vsub.f32 %v3140_v40, %v13422_v43  ;;  %v17997_v15 = vsub.f32 %v13146_v39, %v13348_v9  ;;  %v13516_v3 = vmul.f32 %v13495_v60, %v13495_v60 }
 0x441   : > { %v10078_v17 = vpop.eup %10077  ;;  %v3267_v4 = vadd.f32 1e-05, %v3235_v11  ;;  %v3205_v32 = vsub.f32 %v3141_v44, %v13431_v24  ;;  %v3068_v5 = vpop.xlane.xlu0 %3067  ;;  %v3356_v49 = vmul.f32 %v10076_v59, %v17996_v25  ;;  %v3342_v51 = vsub.f32 %v13273_v62, %v13495_v60  ;;  %v18031_v62 = vld [vmem:[#allocation84_spill] sm:$0xff] }
 0x442   : > { %10087 = vrsqrt.f32 %v3266_v12  ;;  %v3236_v21 = vmax.f32 %v3204_v61, 0.0  ;;  %v3142_v13 = vmul.f32 0.015625, %v3068_v5  ;;  %v3071_v55 = vpop.xlane.xlu1 %3070  ;;  %v3357_v43 = vmul.f32 %v10078_v17, %v17997_v15 }
 0x443   : > { %10089 = vrsqrt.f32 %v3267_v4  ;;  %v3237_v40 = vmax.f32 %v3205_v32, 0.0  ;;  %v3143_v24 = vmul.f32 0.015625, %v3071_v55  ;;  %v13523_v39 = vmul.f32 %v13505_v46, %v13505_v46 }
 0x444   : > { %v10080_v44 = vpop.eup %10079  ;;  %v3268_v36 = vadd.f32 1e-05, %v3236_v21  ;;  %v3206_v59 = vsub.f32 %v3142_v13, %v13437_v48  ;;  %v3388_v11 = vpack.c.bf16 %v3357_v43, %v3356_v49  ;;  %v17998_v9 = vsub.f32 %v13160_v16, %v13342_v19 }
 0x445   : > { %v10082_v12 = vpop.eup %10081  ;;  %v3269_v17 = vadd.f32 1e-05, %v3237_v40  ;;  %v3207_v55 = vsub.f32 %v3143_v24, %v13443_v1  ;;  %v3074_v4 = vpop.xlane.xlu0 %3073  ;;  %v17999_v32 = vsub.f32 %v13170_v14, %v13345_v26  ;;  %v13534_v5 = vmul.f32 0.015625, %v13277_v54 }
 0x446   : > { %v3358_v61 = vmul.f32 %v10080_v44, %v17998_v9  ;;  %10091 = vrsqrt.f32 %v3268_v36  ;;  %v3238_v48 = vmax.f32 %v3206_v59, 0.0  ;;  %v3144_v13 = vmul.f32 0.015625, %v3074_v4  ;;  %v3077_v49 = vpop.xlane.xlu1 %3076  ;;  %9401 = vmatprep.mubr.msk.bf16.mxu1 %vm1031_vm0, %v3388_v11 }
 0x447   : > { %v3359_v21 = vmul.f32 %v10082_v12, %v17999_v32  ;;  %10093 = vrsqrt.f32 %v3269_v17  ;;  %v3239_v19 = vmax.f32 %v3207_v55, 0.0  ;;  %v3145_v16 = vmul.f32 0.015625, %v3077_v49 }
 0x448   : > { %v10084_v25 = vpop.eup %10083  ;;  %v3343_v1 = vsub.f32 %v13282_v45, %v13505_v46  ;;  %v3270_v15 = vadd.f32 1e-05, %v3238_v48  ;;  %v3208_v26 = vsub.f32 %v3144_v13, %v13452_v28  ;;  %v13540_v40 = vmul.f32 0.015625, %v13279_v42 }
 0x449   : > { %v3389_v14 = vpack.c.bf16 %v3359_v21, %v3358_v61  ;;  %v10086_v43 = vpop.eup %10085  ;;  %v3271_v24 = vadd.f32 1e-05, %v3239_v19  ;;  %v3209_v44 = vsub.f32 %v3145_v16, %v13461_v35  ;;  %v3080_v54 = vpop.xlane.xlu0 %3079  ;;  %v18000_v36 = vsub.f32 %v13175_v58, %v13351_v57 }
 0x44a   : > { %10095 = vrsqrt.f32 %v3270_v15  ;;  %v3240_v11 = vmax.f32 %v3208_v26, 0.0  ;;  %v3146_v12 = vmul.f32 0.015625, %v3080_v54  ;;  %v3083_v9 = vpop.xlane.xlu1 %3082  ;;  %v18001_v28 = vsub.f32 %v13184_v37, %v13358_v29 }
 0x44b   : > { %v3360_v59 = vmul.f32 %v10084_v25, %v18000_v36  ;;  %9402 = vmatmul.mubr.msk.bf16.vlgmr.msra.gmra.mrb[0].mxu1 %vm1031_vm0, %v3389_v14  ;;  %v13552_v42 = vmul.f32 %v13534_v5, %v13534_v5  ;;  %10097 = vrsqrt.f32 %v3271_v24  ;;  %v3241_v35 = vmax.f32 %v3209_v44, 0.0 }
 0x44c   : > { %v3361_v61 = vmul.f32 %v10086_v43, %v18001_v28  ;;  %v3147_v17 = vmul.f32 0.015625, %v3083_v9  ;;  %v10088_v55 = vpop.eup %10087  ;;  %v3344_v58 = vsub.f32 %v13287_v10, %v13534_v5  ;;  %v3272_v57 = vadd.f32 1e-05, %v3240_v11  ;;  %v18005_v11 = vld [vmem:[#allocation86_spill] sm:$0xff]  ;;  %v18006_v9 = vld [vmem:[#allocation87_spill] sm:$0xff]  ;;  %v18032_v10 = vld [vmem:[#allocation88_spill] sm:$0xff] }
 0x44d   : > { %v3210_v4 = vsub.f32 %v3146_v12, %v13473_v52  ;;  %v10090_v21 = vpop.eup %10089  ;;  %v13559_v29 = vmul.f32 %v13540_v40, %v13540_v40  ;;  %v3273_v37 = vadd.f32 1e-05, %v3241_v35  ;;  %v3086_v13 = vpop.xlane.xlu0 %3085  ;;  %v18002_v49 = vsub.f32 %v13189_v0, %v13373_v47  ;;  %v18004_v0 = vld [vmem:[#allocation9_spill] sm:$0xff] }
 0x44e   : > { %v3390_v32 = vpack.c.bf16 %v3361_v61, %v3360_v59  ;;  %v3211_v48 = vsub.f32 %v3147_v17, %v13479_v56  ;;  %10099 = vrsqrt.f32 %v3272_v57  ;;  %v3148_v25 = vmul.f32 0.015625, %v3086_v13  ;;  %v3089_v15 = vpop.xlane.xlu1 %3088  ;;  %v18009_v57 = vld [vmem:[#allocation23_spill] sm:$0xff] }
 0x44f   : > { %v3362_v19 = vmul.f32 %v10088_v55, %v18002_v49  ;;  %v3242_v16 = vmax.f32 %v3210_v4, 0.0  ;;  %v18003_v52 = vsub.f32 %v13198_v22, %v13382_v6  ;;  %v13570_v14 = vmul.f32 0.015625, %v13291_v2  ;;  %v18011_v13 = vld [vmem:[#allocation19_spill] sm:$0xff] }
 0x450   : > { %9405 = vmatprep.mubr.msk.bf16.mxu1 %vm1031_vm0, %v3390_v32  ;;  %10101 = vrsqrt.f32 %v3273_v37  ;;  %v3243_v56 = vmax.f32 %v3211_v48, 0.0  ;;  %v3149_v43 = vmul.f32 0.015625, %v3089_v15  ;;  %v10092_v24 = vpop.eup %10091  ;;  %v3345_v47 = vsub.f32 %v18004_v0, %v13540_v40 }
 0x451   : > { %v3363_v26 = vmul.f32 %v10090_v21, %v18003_v52  ;;  %v3274_v44 = vadd.f32 1e-05, %v3242_v16  ;;  %v3212_v54 = vsub.f32 %v3148_v25, %v13489_v18  ;;  %v10094_v59 = vpop.eup %10093  ;;  %v13576_v12 = vmul.f32 0.015625, %v18005_v11  ;;  %v3092_v2 = vpop.xlane.xlu0 %3091  ;;  %v18008_v18 = vld [vmem:[#allocation81_spill] sm:$0xff] }
 0x452   : > { %v3275_v22 = vadd.f32 1e-05, %v3243_v56  ;;  %v3213_v6 = vsub.f32 %v3149_v43, %v13499_v38  ;;  %v18007_v28 = vsub.f32 %v13203_v31, %v18006_v9  ;;  %v3150_v17 = vmul.f32 0.015625, %v3092_v2  ;;  %v3095_v55 = vpop.xlane.xlu1 %3094  ;;  %v18012_v43 = vld [vmem:[#allocation17_spill] sm:$0xff] }
 0x453   : > { %v3391_v36 = vpack.c.bf16 %v3363_v26, %v3362_v19  ;;  %10103 = vrsqrt.f32 %v3274_v44  ;;  %v3244_v35 = vmax.f32 %v3212_v54, 0.0  ;;  %v18010_v4 = vsub.f32 %v18008_v18, %v18009_v57  ;;  %v18017_v57 = vld [vmem:[#allocation71_spill] sm:$0xff] }
 0x454   : > { %v3364_v61 = vmul.f32 %v10092_v24, %v18007_v28  ;;  %v3186_v21 = vmul.f32 %v13570_v14, %v13570_v14  ;;  %10105 = vrsqrt.f32 %v3275_v22  ;;  %v3245_v38 = vmax.f32 %v3213_v6, 0.0  ;;  %v10096_v48 = vpop.eup %10095  ;;  %v18013_v24 = vld [vmem:[#allocation89_spill] sm:$0xff]  ;;  %v18016_v6 = vld [vmem:[#allocation70_spill] sm:$0xff] }
 0x455   : > { %9406 = vmatmul.mubr.msk.bf16.gmra.mrb[4].mxu1 %vm1031_vm0, %v3391_v36  ;;  %v3365_v32 = vmul.f32 %v10094_v59, %v18010_v4  ;;  %v3151_v37 = vmul.f32 0.015625, %v3095_v55  ;;  %v13589_v31 = vmul.f32 0.015625, %v18011_v13  ;;  %v3276_v49 = vadd.f32 1e-05, %v3244_v35  ;;  %v10098_v25 = vpop.eup %10097  ;;  %v3098_v56 = vpop.xlane.xlu0 %3097 }
 0x456   : > { %v3214_v19 = vsub.f32 %v3150_v17, %v13516_v3  ;;  %v3187_v15 = vmul.f32 %v13576_v12, %v13576_v12  ;;  %v3277_v52 = vadd.f32 1e-05, %v3245_v38  ;;  %v18014_v44 = vsub.f32 %v18012_v43, %v18013_v24  ;;  %v3101_v11 = vpop.xlane.xlu1 %3100 }
 0x457   : > { %v3392_v16 = vpack.c.bf16 %v3365_v32, %v3364_v61  ;;  %v3215_v26 = vsub.f32 %v3151_v37, %v13523_v39  ;;  %10107 = vrsqrt.f32 %v3276_v49  ;;  %v3152_v59 = vmul.f32 0.015625, %v3098_v56 }
 0x458   : > { %v3366_v54 = vmul.f32 %v10096_v48, %v18014_v44  ;;  %v3246_v36 = vmax.f32 %v3214_v19, 0.0  ;;  %v18015_v3 = vsub.f32 %v13226_v63, %v13418_v34  ;;  %v13603_v2 = vmul.f32 0.015625, %v18016_v6  ;;  %v10100_v28 = vpop.eup %10099 }
 0x459   : > { %9409 = vmatprep.mubr.msk.bf16.mxu1 %vm1031_vm0, %v3392_v16  ;;  %10109 = vrsqrt.f32 %v3277_v52  ;;  %v3247_v39 = vmax.f32 %v3215_v26, 0.0  ;;  %v3153_v9 = vmul.f32 0.015625, %v3101_v11  ;;  %v3188_v61 = vmul.f32 %v13589_v31, %v13589_v31  ;;  %v3104_v32 = vpop.xlane.xlu0 %3103  ;;  %v18020_v26 = vld [vmem:[#allocation85_spill] sm:$0xff] }
 0x45a   : > { %v3367_v22 = vmul.f32 %v10098_v25, %v18015_v3  ;;  %v3278_v35 = vadd.f32 1e-05, %v3246_v36  ;;  %v3216_v17 = vsub.f32 %v3152_v59, %v13552_v42  ;;  %v10102_v18 = vpop.eup %10101  ;;  %v13609_v4 = vmul.f32 0.015625, %v18017_v57  ;;  %v3107_v49 = vpop.xlane.xlu1 %3106 }
 0x45b   : > { %v3279_v63 = vadd.f32 1e-05, %v3247_v39  ;;  %v3217_v34 = vsub.f32 %v3153_v9, %v13559_v29  ;;  %v18018_v38 = vsub.f32 %v13231_v23, %v13427_v41  ;;  %v3154_v13 = vmul.f32 0.015625, %v3104_v32  ;;  %v18024_v9 = vld [vmem:[#allocation72_spill] sm:$0xff] }
 0x45c   : > { %v3393_v55 = vpack.c.bf16 %v3367_v22, %v3366_v54  ;;  %10111 = vrsqrt.f32 %v3278_v35  ;;  %v3248_v48 = vmax.f32 %v3216_v17, 0.0  ;;  %v18019_v42 = vsub.f32 %v13240_v30, %v13446_v20 }
 0x45d   : > { %v3368_v37 = vmul.f32 %v10100_v28, %v18018_v38  ;;  %v3189_v16 = vmul.f32 %v13603_v2, %v13603_v2  ;;  %10113 = vrsqrt.f32 %v3279_v63  ;;  %v3249_v29 = vmax.f32 %v3217_v34, 0.0  ;;  %v10104_v52 = vpop.eup %10103  ;;  %v3110_v20 = vpop.xlane.xlu0 %3109 }
 0x45e   : > { %9410 = vmatmul.mubr.msk.bf16.gmra.mrb[8].mxu1 %vm1031_vm0, %v3393_v55  ;;  %v3369_v19 = vmul.f32 %v10102_v18, %v18019_v42  ;;  %v3155_v25 = vmul.f32 0.015625, %v3107_v49  ;;  %v13622_v23 = vmul.f32 0.015625, %v18020_v26  ;;  %v3280_v41 = vadd.f32 1e-05, %v3248_v48  ;;  %v10106_v24 = vpop.eup %10105  ;;  %v3113_v22 = vpop.xlane.xlu1 %3112  ;;  %v18025_v55 = vld [vmem:[#allocation10_spill] sm:$0xff]  ;;  %v18027_v48 = vld [vmem:[#allocation20_spill] sm:$0xff] }
 0x45f   : > { %v3218_v56 = vsub.f32 %v3154_v13, %v3186_v21  ;;  %v3190_v44 = vmul.f32 %v13609_v4, %v13609_v4  ;;  %v3281_v54 = vadd.f32 1e-05, %v3249_v29  ;;  %v18021_v36 = vsub.f32 %v13245_v33, %v13455_v27  ;;  %v18022_v21 = vld [vmem:[#allocation15_spill] sm:$0xff] }
 0x460   : > { %v3394_v43 = vpack.c.bf16 %v3369_v19, %v3368_v37  ;;  %v3219_v30 = vsub.f32 %v3155_v25, %v3187_v15  ;;  %10115 = vrsqrt.f32 %v3280_v41  ;;  %v3156_v3 = vmul.f32 0.015625, %v3110_v20  ;;  %v18026_v37 = vld [vmem:[#allocation69_spill] sm:$0xff] }
 0x461   : > { %v3370_v59 = vmul.f32 %v10104_v52, %v18021_v36  ;;  %v3250_v11 = vmax.f32 %v3218_v56, 0.0  ;;  %v18023_v6 = vsub.f32 %v13254_v8, %v18022_v21  ;;  %v13634_v28 = vmul.f32 0.015625, %v18024_v9  ;;  %v10108_v17 = vpop.eup %10107  ;;  %v3116_v38 = vpop.xlane.xlu0 %3115 }
 0x462   : > { %9413 = vmatprep.mubr.msk.bf16.mxu1 %vm1031_vm0, %v3394_v43  ;;  %10117 = vrsqrt.f32 %v3281_v54  ;;  %v3251_v15 = vmax.f32 %v3219_v30, 0.0  ;;  %v3157_v35 = vmul.f32 0.015625, %v3113_v22  ;;  %v13637_v33 = vmul.f32 0.015625, %v18025_v55  ;;  %v3119_v29 = vpop.xlane.xlu1 %3118  ;;  %v18029_v30 = vld [vmem:[#allocation73_spill] sm:$0xff]  ;;  %v18030_v22 = vld [vmem:[#allocation16_spill] sm:$0xff] }
 0x463   : > { %v3371_v39 = vmul.f32 %v10106_v24, %v18023_v6  ;;  %v3282_v27 = vadd.f32 1e-05, %v3250_v11  ;;  %v3220_v18 = vsub.f32 %v3156_v3, %v3188_v61  ;;  %v10110_v63 = vpop.eup %10109  ;;  %v3191_v34 = vmul.f32 %v13622_v23, %v13622_v23 }
 0x464   : > { %v3283_v32 = vadd.f32 1e-05, %v3251_v15  ;;  %v3221_v8 = vsub.f32 %v3157_v35, %v3189_v16  ;;  %v18028_v13 = vsub.f32 %v18026_v37, %v18027_v48  ;;  %v3158_v19 = vmul.f32 0.015625, %v3116_v38 }
 0x465   : > { %v3395_v57 = vpack.c.bf16 %v3371_v39, %v3370_v59  ;;  %10119 = vrsqrt.f32 %v3282_v27  ;;  %v3252_v42 = vmax.f32 %v3220_v18, 0.0  ;;  %v3373_v61 = vmul.f32 %v10110_v63, %v3341_v50  ;;  %v3122_v7 = vpop.xlane.xlu0 %3121 }
 0x466   : > { %v3372_v49 = vmul.f32 %v10108_v17, %v18028_v13  ;;  %v3192_v25 = vmul.f32 %v13634_v28, %v13634_v28  ;;  %10121 = vrsqrt.f32 %v3283_v32  ;;  %v3253_v16 = vmax.f32 %v3221_v8, 0.0  ;;  %v10112_v26 = vpop.eup %10111  ;;  %v3125_v3 = vpop.xlane.xlu1 %3124 }
 0x467   : > { %9414 = vmatmul.mubr.msk.bf16.gmra.mrb[12].mxu1 %vm1031_vm0, %v3395_v57  ;;  %v3159_v52 = vmul.f32 0.015625, %v3119_v29  ;;  %v3193_v41 = vmul.f32 %v13637_v33, %v13637_v33  ;;  %v3284_v56 = vadd.f32 1e-05, %v3252_v42  ;;  %v3222_v43 = vsub.f32 %v3158_v19, %v3190_v44  ;;  %v10114_v54 = vpop.eup %10113 }
 0x468   : > { %v3396_v24 = vpack.c.bf16 %v3373_v61, %v3372_v49  ;;  %v13653_v20 = vmul.f32 0.015625, %v18029_v30  ;;  %v3285_v36 = vadd.f32 1e-05, %v3253_v16  ;;  %v3374_v50 = vmul.f32 %v10112_v26, %v3342_v51 }
 0x469   : > { %v3223_v53 = vsub.f32 %v3159_v52, %v3191_v34  ;;  %10123 = vrsqrt.f32 %v3284_v56  ;;  %v3254_v59 = vmax.f32 %v3222_v43, 0.0  ;;  %v3160_v11 = vmul.f32 0.015625, %v3122_v7  ;;  %v3128_v46 = vpop.xlane.xlu0 %3127 }
 0x46a   : > { %9417 = vmatprep.mubr.msk.bf16.mxu1 %vm1031_vm0, %v3396_v24  ;;  %v3375_v44 = vmul.f32 %v10114_v54, %v3343_v1  ;;  %v13663_v21 = vmul.f32 0.015625, %v18030_v22  ;;  %10125 = vrsqrt.f32 %v3285_v36  ;;  %v3161_v39 = vmul.f32 0.015625, %v3125_v3  ;;  %v10116_v9 = vpop.eup %10115  ;;  %v3131_v63 = vpop.xlane.xlu1 %3130  ;;  %v10530_v3 = vld [vmem:[%s12313_s17 + $0xd8] sm:$0xff] }
 0x46b   : > { %v3255_v6 = vmax.f32 %v3223_v53, 0.0  ;;  %v3346_v60 = vsub.f32 %v18031_v62, %v13570_v14  ;;  %v3286_v51 = vadd.f32 1e-05, %v3254_v59  ;;  %v3224_v15 = vsub.f32 %v3160_v11, %v3192_v25  ;;  %v18033_v25 = vld [vmem:[#allocation11_spill] sm:$0xff] }
 0x46c   : > { %v3397_v35 = vpack.c.bf16 %v3375_v44, %v3374_v50  ;;  %v10118_v17 = vpop.eup %10117  ;;  %v3194_v55 = vmul.f32 %v13653_v20, %v13653_v20  ;;  %v3225_v45 = vsub.f32 %v3161_v39, %v3193_v41  ;;  %v3376_v1 = vmul.f32 %v10116_v9, %v3344_v58  ;;  %v18034_v41 = vld [vmem:[#allocation21_spill] sm:$0xff]  ;;  %v10529_v50 = vld [vmem:[%s12313_s17 + $0xd0] sm:$0xff] }
 0x46d   : > { %v3287_v27 = vadd.f32 1e-05, %v3255_v6  ;;  %10127 = vrsqrt.f32 %v3286_v51  ;;  %v3256_v18 = vmax.f32 %v3224_v15, 0.0  ;;  %v3162_v57 = vmul.f32 0.015625, %v3128_v46  ;;  %v3711_v19 = vpop.permute.xlu0 %3710  ;;  %v10531_v51 = vld [vmem:[%s12313_s17 + $0xe0] sm:$0xff] }
 0x46e   : > { %v3377_v14 = vmul.f32 %v10118_v17, %v3345_v47  ;;  %v3195_v34 = vmul.f32 %v13663_v21, %v13663_v21  ;;  %v3257_v32 = vmax.f32 %v3225_v45, 0.0  ;;  %v3163_v8 = vmul.f32 0.015625, %v3131_v63  ;;  %v3713_v0 = vpop.permute.xlu1 %3712  ;;  %v10532_v17 = vld [vmem:[%s12313_s17 + $0xe8] sm:$0xff]  ;;  %v10533_v63 = vld [vmem:[%s12313_s17 + $0xf0] sm:$0xff] }
 0x46f   : > { %9418 = vmatmul.mubr.msk.bf16.gmra.mrb[16].mxu1 %vm1031_vm0, %v3397_v35  ;;  %10129 = vrsqrt.f32 %v3287_v27  ;;  %v10120_v38 = vpop.eup %10119  ;;  %v3347_v5 = vsub.f32 %v18032_v10, %v13576_v12  ;;  %v3288_v58 = vadd.f32 1e-05, %v3256_v18  ;;  %v3226_v37 = vsub.f32 %v3162_v57, %v3194_v55 }
 0x470   : > { %v3398_v48 = vpack.c.bf16 %v3377_v14, %v3376_v1  ;;  %v10122_v13 = vpop.eup %10121  ;;  %v3289_v49 = vadd.f32 1e-05, %v3257_v32  ;;  %v3227_v42 = vsub.f32 %v3163_v8, %v3195_v34  ;;  %v3378_v29 = vmul.f32 %v10120_v38, %v3346_v60  ;;  %v10534_v32 = vld [vmem:[%s12313_s17 + $0xf8] sm:$0xff] }
 0x471   : > { %10131 = vrsqrt.f32 %v3288_v58  ;;  %v3258_v40 = vmax.f32 %v3226_v37, 0.0  ;;  %v3806_v47 = vsel %vm1031_vm0, %v3711_v19, 0.0  ;;  %v3379_v61 = vmul.f32 %v10122_v13, %v3347_v5  ;;  %v3719_v53 = vpop.permute.xlu0 %3718 }
 0x472   : > { %9421 = vmatprep.mubr.msk.bf16.mxu1 %vm1031_vm0, %v3398_v48  ;;  %v3348_v16 = vsub.f32 %v18033_v25, %v13589_v31  ;;  %10133 = vrsqrt.f32 %v3289_v49  ;;  %v3259_v12 = vmax.f32 %v3227_v42, 0.0  ;;  %v3809_v52 = vsel %vm1031_vm0, %v3713_v0, 0.0  ;;  %3807 = vadd.xlane.f32.xlu0 %v3806_v47  ;;  %v3715_v31 = vpop.permute.xlu1 %3714 }
 0x473   : > { %v10124_v26 = vpop.eup %10123  ;;  %v3349_v56 = vsub.f32 %v18034_v41, %v13603_v2  ;;  %v3290_v43 = vadd.f32 1e-05, %v3258_v40  ;;  %3810 = vadd.xlane.f32.xlu1 %v3809_v52  ;;  %v3399_v24 = vpack.c.bf16 %v3379_v61, %v3378_v29  ;;  %v3350_v59 = vsub.f32 %v10529_v50, %v13609_v4 }
 0x474   : > { %v10126_v54 = vpop.eup %10125  ;;  %v3291_v30 = vadd.f32 1e-05, %v3259_v12  ;;  %v3380_v36 = vmul.f32 %v10124_v26, %v3348_v16  ;;  %v3812_v2 = vsel %vm1031_vm0, %v3715_v31, 0.0  ;;  %v3351_v44 = vsub.f32 %v10530_v3, %v13622_v23 }
 0x475   : > { %10135 = vrsqrt.f32 %v3290_v43  ;;  %v3381_v7 = vmul.f32 %v10126_v54, %v3349_v56  ;;  %v3723_v9 = vpop.permute.xlu0 %3722  ;;  %v3352_v4 = vsub.f32 %v10531_v51, %v13634_v28  ;;  %v3353_v23 = vsub.f32 %v10532_v17, %v13637_v33 }
 0x476   : > { %10137 = vrsqrt.f32 %v3291_v30  ;;  %3813 = vadd.xlane.f32.xlu0 %v3812_v2  ;;  %v3717_v62 = vpop.permute.xlu1 %3716  ;;  %v3818_v45 = vsel %vm1031_vm0, %v3719_v53, 0.0  ;;  %v3354_v28 = vsub.f32 %v10533_v63, %v13653_v20  ;;  %v3355_v33 = vsub.f32 %v10534_v32, %v13663_v21  ;;  %v18038_v63 = vld [vmem:[#allocation54_spill] sm:$0xff]  ;;  %v18042_v32 = vld [vmem:[#allocation57_spill] sm:$0xff] }
 0x477   : > { %9422 = vmatmul.mubr.msk.bf16.gmra.mrb[20].mxu1 %vm1031_vm0, %v3399_v24  ;;  %v10128_v11 = vpop.eup %10127  ;;  %v3400_v22 = vpack.c.bf16 %v3381_v7, %v3380_v36  ;;  %v3815_v15 = vsel %vm1031_vm0, %v3717_v62, 0.0  ;;  %v3824_v10 = vsel %vm1031_vm0, %v3723_v9, 0.0 }
 0x478   : > { %v3382_v39 = vmul.f32 %v10128_v11, %v3350_v59 }
 0x479   : > { %v10130_v6 = vpop.eup %10129  ;;  %9425 = vmatprep.mubr.msk.bf16.mxu1 %vm1031_vm0, %v3400_v22  ;;  %v3727_v1 = vpop.permute.xlu0 %3726 }
 0x47a   : > { %v3383_v60 = vmul.f32 %v10130_v6, %v3351_v44  ;;  %3816 = vadd.xlane.f32.xlu0 %v3815_v15  ;;  %v3721_v18 = vpop.permute.xlu1 %3720  ;;  %v3830_v49 = vsel %vm1031_vm0, %v3727_v1, 0.0  ;;  %v18035_v1 = vld [vmem:[#allocation37_spill] sm:$0xff] }
 0x47b   : > { %v10132_v35 = vpop.eup %10131  ;;  %v3821_v14 = vsel %vm1031_vm0, %v3721_v18, 0.0  ;;  %v18036_v18 = vld [vmem:[#allocation38_spill] sm:$0xff] }
 0x47c   : > { %v3401_v55 = vpack.c.bf16 %v3383_v60, %v3382_v39  ;;  %v10134_v27 = vpop.eup %10133  ;;  %v3384_v46 = vmul.f32 %v10132_v35, %v3352_v4  ;;  %3822 = vadd.xlane.f32.xlu1 %v3821_v14  ;;  %v18040_v14 = vld [vmem:[#allocation40_spill] sm:$0xff] }
 0x47d   : > { %v3385_v57 = vmul.f32 %v10134_v27, %v3353_v23  ;;  %v3731_v58 = vpop.permute.xlu0 %3730 }
 0x47e   : > { %3819 = vadd.xlane.f32.xlu0 %v3818_v45  ;;  %v3725_v37 = vpop.permute.xlu1 %3724  ;;  %v3836_v29 = vsel %vm1031_vm0, %v3731_v58, 0.0  ;;  %v18048_v58 = vld [vmem:[#allocation60_spill] sm:$0xff] }
 0x47f   : > { %9426 = vmatmul.mubr.msk.bf16.gmra.mrb[24].mxu1 %vm1031_vm0, %v3401_v55  ;;  %v10136_v34 = vpop.eup %10135  ;;  %v3402_v8 = vpack.c.bf16 %v3385_v57, %v3384_v46  ;;  %v3827_v20 = vsel %vm1031_vm0, %v3725_v37, 0.0  ;;  %v18037_v57 = vld [vmem:[#allocation36_spill] sm:$0xff]  ;;  %v18049_v37 = vld [vmem:[#allocation61_spill] sm:$0xff] }
 0x480   : > { %v10138_v38 = vpop.eup %10137  ;;  %v3386_v5 = vmul.f32 %v10136_v34, %v3354_v28  ;;  %3828 = vadd.xlane.f32.xlu1 %v3827_v20  ;;  %v18039_v28 = vld [vmem:[#allocation39_spill] sm:$0xff]  ;;  %v18041_v34 = vld [vmem:[#allocation42_spill] sm:$0xff] }
 0x481   : > { %9429 = vmatprep.mubr.msk.bf16.mxu1 %vm1031_vm0, %v3402_v8  ;;  %v3387_v48 = vmul.f32 %v10138_v38, %v3355_v33  ;;  %v3735_v21 = vpop.permute.xlu0 %3734  ;;  %v18043_v33 = vld [vmem:[#allocation43_spill] sm:$0xff]  ;;  %v18044_v8 = vld [vmem:[#allocation44_spill] sm:$0xff]  ;;  %v18045_v38 = vld [vmem:[#allocation58_spill] sm:$0xff] }
 0x482   : > { %3825 = vadd.xlane.f32.xlu0 %v3824_v10  ;;  %v3729_v42 = vpop.permute.xlu1 %3728  ;;  %v3842_v61 = vsel %vm1031_vm0, %v3735_v21, 0.0  ;;  %v18046_v10 = vld [vmem:[#allocation45_spill] sm:$0xff]  ;;  %v18051_v20 = vld [vmem:[#allocation47_spill] sm:$0xff]  ;;  %v18054_v21 = vld [vmem:[#allocation64_spill] sm:$0xff] }
 0x483   : > { %v3403_v13 = vpack.c.bf16 %v3387_v48, %v3386_v5  ;;  %v3833_v19 = vsel %vm1031_vm0, %v3729_v42, 0.0  ;;  %v18047_v5 = vld [vmem:[#allocation59_spill] sm:$0xff]  ;;  %v18050_v48 = vld [vmem:[#allocation46_spill] sm:$0xff]  ;;  %v18055_v42 = vld [vmem:[#allocation65_spill] sm:$0xff] }
 0x484   : > { %3834 = vadd.xlane.f32.xlu1 %v3833_v19  ;;  %v18056_v19 = vld [vmem:[#allocation80_spill] sm:$0xff] }
 0x485   : > { %v3739_v40 = vpop.permute.xlu0 %3738 }
 0x486   : > { %3831 = vadd.xlane.f32.xlu0 %v3830_v49  ;;  %v3733_v0 = vpop.permute.xlu1 %3732  ;;  %v3848_v52 = vsel %vm1031_vm0, %v3739_v40, 0.0  ;;  %v18053_v49 = vld [vmem:[#allocation63_spill] sm:$0xff]  ;;  %v18058_v40 = vld [vmem:[#allocation14_spill] sm:$0xff] }
 0x487   : > { %9430 = vmatmul.mubr.msk.bf16.gmra.mrb[28].mxu1 %vm1031_vm0, %v3403_v13  ;;  %v3839_v47 = vsel %vm1031_vm0, %v3733_v0, 0.0  ;;  %v18052_v13 = vld [vmem:[#allocation62_spill] sm:$0xff]  ;;  %v18059_v0 = vld [vmem:[#allocation13_spill] sm:$0xff] }
 0x488   : > { %3840 = vadd.xlane.f32.xlu1 %v3839_v47  ;;  %v18060_v47 = vld [vmem:[#allocation66_spill] sm:$0xff] }
 0x489   : > { %v3743_v25 = vpop.permute.xlu0 %3742 }
 0x48a   : > { %3837 = vadd.xlane.f32.xlu0 %v3836_v29  ;;  %v3737_v16 = vpop.permute.xlu1 %3736  ;;  %v3854_v43 = vsel %vm1031_vm0, %v3743_v25, 0.0  ;;  %v18057_v29 = vld [vmem:[#allocation12_spill] sm:$0xff]  ;;  %v18062_v25 = vld [vmem:[#allocation83_spill] sm:$0xff] }
 0x48b   : > { %v3845_v12 = vsel %vm1031_vm0, %v3737_v16, 0.0  ;;  %v18063_v16 = vld [vmem:[#allocation91_spill] sm:$0xff] }
 0x48c   : > { %3846 = vadd.xlane.f32.xlu1 %v3845_v12 }
 0x48d   : > { %v3747_v26 = vpop.permute.xlu0 %3746 }
 0x48e   : > { %3843 = vadd.xlane.f32.xlu0 %v3842_v61  ;;  %v3741_v41 = vpop.permute.xlu1 %3740  ;;  %v3860_v36 = vsel %vm1031_vm0, %v3747_v26, 0.0  ;;  %v18061_v61 = vld [vmem:[#allocation67_spill] sm:$0xff]  ;;  %v18065_v26 = vld [vmem:[#allocation82_spill] sm:$0xff] }
 0x48f   : > { %v3851_v56 = vsel %vm1031_vm0, %v3741_v41, 0.0 }
 0x490   : > { %3852 = vadd.xlane.f32.xlu1 %v3851_v56  ;;  %v18066_v56 = vld [vmem:[#allocation18_spill] sm:$0xff] }
 0x491   : > { %v3751_v24 = vpop.permute.xlu0 %3750 }
 0x492   : > { %3849 = vadd.xlane.f32.xlu0 %v3848_v52  ;;  %v3745_v54 = vpop.permute.xlu1 %3744  ;;  %v3866_v50 = vsel %vm1031_vm0, %v3751_v24, 0.0  ;;  %v18064_v52 = vld [vmem:[#allocation68_spill] sm:$0xff] }
 0x493   : > { %v3857_v30 = vsel %vm1031_vm0, %v3745_v54, 0.0 }
 0x494   : > { %3858 = vadd.xlane.f32.xlu1 %v3857_v30 }
 0x495   : > { %v3755_v53 = vpop.permute.xlu0 %3754 }
 0x496   : > { %3855 = vadd.xlane.f32.xlu0 %v3854_v43  ;;  %v3749_v31 = vpop.permute.xlu1 %3748  ;;  %v3872_v3 = vsel %vm1031_vm0, %v3755_v53, 0.0 }
 0x497   : > { %v3863_v7 = vsel %vm1031_vm0, %v3749_v31, 0.0 }
 0x498   : > { %3864 = vadd.xlane.f32.xlu1 %v3863_v7 }
 0x499   : > { %v3759_v59 = vpop.permute.xlu0 %3758 }
 0x49a   : > { %3861 = vadd.xlane.f32.xlu0 %v3860_v36  ;;  %v3753_v2 = vpop.permute.xlu1 %3752  ;;  %v3878_v39 = vsel %vm1031_vm0, %v3759_v59, 0.0 }
 0x49b   : > { %v3869_v11 = vsel %vm1031_vm0, %v3753_v2, 0.0 }
 0x49c   : > { %3870 = vadd.xlane.f32.xlu1 %v3869_v11 }
 0x49d   : > { %v3763_v22 = vpop.permute.xlu0 %3762 }
 0x49e   : > { %3867 = vadd.xlane.f32.xlu0 %v3866_v50  ;;  %v3757_v44 = vpop.permute.xlu1 %3756  ;;  %v3884_v51 = vsel %vm1031_vm0, %v3763_v22, 0.0 }
 0x49f   : > { %v3875_v6 = vsel %vm1031_vm0, %v3757_v44, 0.0 }
 0x4a0   : > { %3876 = vadd.xlane.f32.xlu1 %v3875_v6 }
 0x4a1   : > { %v3767_v60 = vpop.permute.xlu0 %3766 }
 0x4a2   : > { %3873 = vadd.xlane.f32.xlu0 %v3872_v3  ;;  %v3761_v9 = vpop.permute.xlu1 %3760  ;;  %v3890_v35 = vsel %vm1031_vm0, %v3767_v60, 0.0 }
 0x4a3   : > { %v3881_v62 = vsel %vm1031_vm0, %v3761_v9, 0.0 }
 0x4a4   : > { %3882 = vadd.xlane.f32.xlu1 %v3881_v62 }
 0x4a5   : > { %v3771_v23 = vpop.permute.xlu0 %3770 }
 0x4a6   : > { %3879 = vadd.xlane.f32.xlu0 %v3878_v39  ;;  %v3765_v4 = vpop.permute.xlu1 %3764  ;;  %v3896_v27 = vsel %vm1031_vm0, %v3771_v23, 0.0 }
 0x4a7   : > { %v3887_v15 = vsel %vm1031_vm0, %v3765_v4, 0.0 }
 0x4a8   : > { %3888 = vadd.xlane.f32.xlu1 %v3887_v15 }
 0x4aa   : > { %3885 = vadd.xlane.f32.xlu0 %v3884_v51  ;;  %v3769_v17 = vpop.permute.xlu1 %3768 }
 0x4ab   : > { %v3893_v55 = vsel %vm1031_vm0, %v3769_v17, 0.0 }
 0x4ac   : > { %3894 = vadd.xlane.f32.xlu1 %v3893_v55 }
 0x4ae   : > { %3891 = vadd.xlane.f32.xlu0 %v3890_v35  ;;  %v3773_v45 = vpop.permute.xlu1 %3772 }
 0x4af   : > { %v3899_v46 = vsel %vm1031_vm0, %v3773_v45, 0.0 }
 0x4b0   : > { %3900 = vadd.xlane.f32.xlu1 %v3899_v46 }
 0x4b2   : > { %3897 = vadd.xlane.f32.xlu0 %v3896_v27 }
 0x4c1   : > { %3968 = vrot.lane.b32.xlu1 %v18035_v1, %s10724_s16 }
 0x4c5   : > { %3970 = vrot.lane.b32.xlu1 %v18036_v18, %s10724_s16 }
 0x4c8   : > { %3966 = vrot.lane.b32.xlu0 %v18037_v57, %s10724_s16 }
 0x4c9   : > { %3972 = vrot.lane.b32.xlu1 %v18038_v63, %s10724_s16 }
 0x4cc   : > { %3974 = vrot.lane.b32.xlu0 %v18039_v28, %s10724_s16 }
 0x4cd   : > { %3976 = vrot.lane.b32.xlu1 %v18040_v14, %s10724_s16 }
 0x4d0   : > { %3978 = vrot.lane.b32.xlu0 %v18041_v34, %s10724_s16 }
 0x4d1   : > { %3980 = vrot.lane.b32.xlu1 %v18042_v32, %s10724_s16 }
 0x4d4   : > { %3982 = vrot.lane.b32.xlu0 %v18043_v33, %s10724_s16 }
 0x4d5   : > { %3984 = vrot.lane.b32.xlu1 %v18044_v8, %s10724_s16 }
 0x4d8   : > { %3986 = vrot.lane.b32.xlu0 %v18045_v38, %s10724_s16 }
 0x4d9   : > { %3988 = vrot.lane.b32.xlu1 %v18046_v10, %s10724_s16 }
 0x4dc   : > { %3990 = vrot.lane.b32.xlu0 %v18047_v5, %s10724_s16 }
 0x4dd   : > { %3992 = vrot.lane.b32.xlu1 %v18048_v58, %s10724_s16 }
 0x4e0   : > { %3994 = vrot.lane.b32.xlu0 %v18049_v37, %s10724_s16 }
 0x4e1   : > { %3996 = vrot.lane.b32.xlu1 %v18050_v48, %s10724_s16 }
 0x4e4   : > { %3998 = vrot.lane.b32.xlu0 %v18051_v20, %s10724_s16 }
 0x4e5   : > { %4000 = vrot.lane.b32.xlu1 %v18052_v13, %s10724_s16 }
 0x4e8   : > { %4002 = vrot.lane.b32.xlu0 %v18053_v49, %s10724_s16 }
 0x4e9   : > { %4004 = vrot.lane.b32.xlu1 %v18054_v21, %s10724_s16 }
 0x4ec   : > { %4006 = vrot.lane.b32.xlu0 %v18055_v42, %s10724_s16 }
 0x4ed   : > { %4008 = vrot.lane.b32.xlu1 %v18056_v19, %s10724_s16 }
 0x4f0   : > { %4010 = vrot.lane.b32.xlu0 %v18057_v29, %s10724_s16 }
 0x4f1   : > { %4012 = vrot.lane.b32.xlu1 %v18058_v40, %s10724_s16 }
 0x4f4   : > { %4014 = vrot.lane.b32.xlu0 %v18059_v0, %s10724_s16 }
 0x4f5   : > { %4016 = vrot.lane.b32.xlu1 %v18060_v47, %s10724_s16 }
 0x4f8   : > { %4018 = vrot.lane.b32.xlu0 %v18061_v61, %s10724_s16 }
 0x4f9   : > { %4020 = vrot.lane.b32.xlu1 %v18062_v25, %s10724_s16 }
 0x4fc   : > { %4022 = vrot.lane.b32.xlu0 %v18063_v16, %s10724_s16 }
 0x4fd   : > { %4024 = vrot.lane.b32.xlu1 %v18064_v52, %s10724_s16 }
 0x4ff   : > { %v13792_v12 = vpop.xlane.xlu0 %3807 }
 0x500   : > { %4026 = vrot.lane.b32.xlu0 %v18065_v26, %s10724_s16  ;;  %v13802_v43 = vpop.xlane.xlu1 %3810 }
 0x501   : > { %4028 = vrot.lane.b32.xlu1 %v18066_v56, %s10724_s16 }
 0x503   : > { %v13798_v41 = vpop.xlane.xlu0 %3813 }
 0x507   : > { %v13804_v24 = vpop.xlane.xlu0 %3816 }
 0x509   : > { %v13806_v54 = vpop.xlane.xlu1 %3822 }
 0x50b   : > { %v13808_v30 = vpop.xlane.xlu0 %3819 }
 0x50d   : > { %v13810_v36 = vpop.xlane.xlu1 %3828 }
 0x50f   : > { %v13812_v53 = vpop.xlane.xlu0 %3825 }
 0x511   : > { %v13814_v31 = vpop.xlane.xlu1 %3834 }
 0x513   : > { %v13816_v7 = vpop.xlane.xlu0 %3831 }
 0x515   : > { %v13818_v50 = vpop.xlane.xlu1 %3840 }
 0x517   : > { %v13820_v59 = vpop.xlane.xlu0 %3837 }
 0x519   : > { %v13822_v2 = vpop.xlane.xlu1 %3846 }
 0x51b   : > { %v13824_v11 = vpop.xlane.xlu0 %3843 }
 0x51d   : > { %v13826_v3 = vpop.xlane.xlu1 %3852 }
 0x51f   : > { %v13828_v44 = vpop.xlane.xlu0 %3849 }
 0x521   : > { %v13830_v22 = vpop.xlane.xlu1 %3858 }
 0x523   : > { %v13832_v6 = vpop.xlane.xlu0 %3855 }
 0x525   : > { %v13834_v39 = vpop.xlane.xlu1 %3864 }
 0x527   : > { %v13836_v9 = vpop.xlane.xlu0 %3861 }
 0x529   : > { %v13838_v62 = vpop.xlane.xlu1 %3870 }
 0x52b   : > { %v13840_v60 = vpop.xlane.xlu0 %3867 }
 0x52d   : > { %v13842_v51 = vpop.xlane.xlu1 %3876 }
 0x52f   : > { %v13844_v4 = vpop.xlane.xlu0 %3873 }
 0x531   : > { %v13846_v15 = vpop.xlane.xlu1 %3882 }
 0x533   : > { %v13848_v35 = vpop.xlane.xlu0 %3879 }
 0x535   : > { %v13850_v17 = vpop.xlane.xlu1 %3888 }
 0x537   : > { %v13852_v23 = vpop.xlane.xlu0 %3885 }
 0x538   : > { %18067 = vst [vmem:[#allocation22_spill] sm:$0xff] %v13852_v23 }
 0x539   : > { %v13854_v55 = vpop.xlane.xlu1 %3894 }
 0x53a   : > { %18068 = vst [vmem:[#allocation26_spill] sm:$0xff] %v13854_v55  ;;  %v14084_v55 = vmul.f32 0.015625, %v13830_v22  ;;  %v14097_v22 = vmul.f32 0.015625, %v13832_v6 }
 0x53b   : > { %v13856_v27 = vpop.xlane.xlu0 %3891 }
 0x53c   : > { %18069 = vst [vmem:[#allocation74_spill] sm:$0xff] %v13856_v27  ;;  %v14111_v27 = vmul.f32 0.015625, %v13834_v39 }
 0x53d   : > { %v13858_v45 = vpop.xlane.xlu1 %3900 }
 0x53e   : > { %18070 = vst [vmem:[#allocation90_spill] sm:$0xff] %v13858_v45 }
 0x53f   : > { %v13860_v46 = vpop.xlane.xlu0 %3897 }
 0x540   : > { %18071 = vst [vmem:[#allocation24_spill] sm:$0xff] %v13860_v46 }
 0x541   : > { %v3969_v1 = vpop.permute.xlu1 %3968 }
 0x542   : > { %v4065_v57 = vsel %vm1031_vm0, %v3969_v1, 0.0 }
 0x543   : > { %v3967_v18 = vpop.permute.xlu0 %3966  ;;  %4066 = vadd.xlane.f32.xlu1 %v4065_v57 }
 0x544   : > { %v4062_v63 = vsel %vm1031_vm0, %v3967_v18, 0.0 }
 0x545   : > { %4063 = vadd.xlane.f32.xlu0 %v4062_v63  ;;  %v3971_v28 = vpop.permute.xlu1 %3970 }
 0x546   : > { %v4068_v34 = vsel %vm1031_vm0, %v3971_v28, 0.0 }
 0x547   : > { %v3975_v14 = vpop.permute.xlu0 %3974 }
 0x548   : > { %v4074_v38 = vsel %vm1031_vm0, %v3975_v14, 0.0 }
 0x549   : > { %4069 = vadd.xlane.f32.xlu0 %v4068_v34  ;;  %v3973_v32 = vpop.permute.xlu1 %3972 }
 0x54a   : > { %v4071_v8 = vsel %vm1031_vm0, %v3973_v32, 0.0 }
 0x54b   : > { %v3979_v33 = vpop.permute.xlu0 %3978 }
 0x54c   : > { %v4080_v37 = vsel %vm1031_vm0, %v3979_v33, 0.0 }
 0x54d   : > { %4072 = vadd.xlane.f32.xlu0 %v4071_v8  ;;  %v3977_v10 = vpop.permute.xlu1 %3976 }
 0x54e   : > { %v4077_v58 = vsel %vm1031_vm0, %v3977_v10, 0.0 }
 0x54f   : > { %v3983_v5 = vpop.permute.xlu0 %3982  ;;  %4078 = vadd.xlane.f32.xlu1 %v4077_v58 }
 0x550   : > { %v4086_v49 = vsel %vm1031_vm0, %v3983_v5, 0.0 }
 0x551   : > { %4075 = vadd.xlane.f32.xlu0 %v4074_v38  ;;  %v3981_v48 = vpop.permute.xlu1 %3980 }
 0x552   : > { %v4083_v13 = vsel %vm1031_vm0, %v3981_v48, 0.0 }
 0x553   : > { %v3987_v20 = vpop.permute.xlu0 %3986  ;;  %4084 = vadd.xlane.f32.xlu1 %v4083_v13 }
 0x554   : > { %v4092_v29 = vsel %vm1031_vm0, %v3987_v20, 0.0 }
 0x555   : > { %4081 = vadd.xlane.f32.xlu0 %v4080_v37  ;;  %v3985_v21 = vpop.permute.xlu1 %3984 }
 0x556   : > { %v4089_v19 = vsel %vm1031_vm0, %v3985_v21, 0.0 }
 0x557   : > { %v3991_v42 = vpop.permute.xlu0 %3990  ;;  %4090 = vadd.xlane.f32.xlu1 %v4089_v19 }
 0x558   : > { %v4098_v61 = vsel %vm1031_vm0, %v3991_v42, 0.0 }
 0x559   : > { %4087 = vadd.xlane.f32.xlu0 %v4086_v49  ;;  %v3989_v40 = vpop.permute.xlu1 %3988 }
 0x55a   : > { %v4095_v47 = vsel %vm1031_vm0, %v3989_v40, 0.0 }
 0x55b   : > { %v3995_v0 = vpop.permute.xlu0 %3994  ;;  %4096 = vadd.xlane.f32.xlu1 %v4095_v47 }
 0x55c   : > { %v4104_v26 = vsel %vm1031_vm0, %v3995_v0, 0.0 }
 0x55d   : > { %4093 = vadd.xlane.f32.xlu0 %v4092_v29  ;;  %v3993_v25 = vpop.permute.xlu1 %3992 }
 0x55e   : > { %v4101_v52 = vsel %vm1031_vm0, %v3993_v25, 0.0 }
 0x55f   : > { %v3999_v16 = vpop.permute.xlu0 %3998  ;;  %4102 = vadd.xlane.f32.xlu1 %v4101_v52 }
 0x560   : > { %v4110_v57 = vsel %vm1031_vm0, %v3999_v16, 0.0 }
 0x561   : > { %4099 = vadd.xlane.f32.xlu0 %v4098_v61  ;;  %v3997_v56 = vpop.permute.xlu1 %3996 }
 0x562   : > { %v4107_v18 = vsel %vm1031_vm0, %v3997_v56, 0.0 }
 0x563   : > { %v4003_v1 = vpop.permute.xlu0 %4002  ;;  %4108 = vadd.xlane.f32.xlu1 %v4107_v18  ;;  %v13898_v18 = vmul.f32 0.015625, %v13792_v12  ;;  %v9927_v12 = vld [vmem:[%s17429_s4 + $0x60] sm:$0xff]  }
 0x564   : > { %v4116_v34 = vsel %vm1031_vm0, %v4003_v1, 0.0  ;;  %v13895_v1 = vmul.f32 0.015625, %v13802_v43  ;;  %9433 = vmatprep.subr.bf16.mxu1 %v9927_v12 }
 0x565   : > { %4105 = vadd.xlane.f32.xlu0 %v4104_v26  ;;  %v4001_v63 = vpop.permute.xlu1 %4000  ;;  %9434 = vmatpush3.bf16.msra.mxu1 %v9927_v12 }
 0x566   : > { %v4113_v14 = vsel %vm1031_vm0, %v4001_v63, 0.0  ;;  %v13904_v63 = vmul.f32 0.015625, %v13804_v24  ;;  %v14061_v24 = vld [vmem:[%s12313_s17 + $0x68] sm:$0xff] }
 0x567   : > { %v4007_v28 = vpop.permute.xlu0 %4006  ;;  %4114 = vadd.xlane.f32.xlu1 %v4113_v14 }
 0x568   : > { %v4122_v38 = vsel %vm1031_vm0, %v4007_v28, 0.0 }
 0x569   : > { %4111 = vadd.xlane.f32.xlu0 %v4110_v57  ;;  %v4005_v32 = vpop.permute.xlu1 %4004  ;;  %v13901_v57 = vmul.f32 0.015625, %v13798_v41  ;;  %v13914_v41 = vld [vmem:[%s12313_s17] sm:$0xff] }
 0x56a   : > { %v4119_v8 = vsel %vm1031_vm0, %v4005_v32, 0.0  ;;  %v4190_v32 = vmul.f32 %v13898_v18, %v13898_v18 }
 0x56b   : > { %v4011_v33 = vpop.permute.xlu0 %4010  ;;  %4120 = vadd.xlane.f32.xlu1 %v4119_v8  ;;  %v13919_v8 = vmul.f32 0.015625, %v13806_v54  ;;  %v14044_v54 = vld [vmem:[%s12313_s17 + $0x50] sm:$0xff] }
 0x56c   : > { %v4128_v37 = vsel %vm1031_vm0, %v4011_v33, 0.0 }
 0x56d   : > { %4117 = vadd.xlane.f32.xlu0 %v4116_v34  ;;  %v4009_v10 = vpop.permute.xlu1 %4008  ;;  %v4191_v34 = vmul.f32 %v13895_v1, %v13895_v1 }
 0x56e   : > { %v4125_v58 = vsel %vm1031_vm0, %v4009_v10, 0.0  ;;  %v13925_v10 = vld [vmem:[%s12313_s17 + $0x8] sm:$0xff] }
 0x56f   : > { %v4015_v5 = vpop.permute.xlu0 %4014  ;;  %4126 = vadd.xlane.f32.xlu1 %v4125_v58  ;;  %v4192_v58 = vmul.f32 %v13901_v57, %v13901_v57 }
 0x570   : > { %v4134_v49 = vsel %vm1031_vm0, %v4015_v5, 0.0 }
 0x571   : > { %4123 = vadd.xlane.f32.xlu0 %v4122_v38  ;;  %v4013_v48 = vpop.permute.xlu1 %4012  ;;  %v13922_v38 = vmul.f32 0.015625, %v13808_v30  ;;  %v4193_v30 = vmul.f32 %v13904_v63, %v13904_v63 }
 0x572   : > { %v4131_v13 = vsel %vm1031_vm0, %v4013_v48, 0.0 }
 0x573   : > { %v4019_v20 = vpop.permute.xlu0 %4018  ;;  %4132 = vadd.xlane.f32.xlu1 %v4131_v13  ;;  %v13939_v13 = vld [vmem:[%s12313_s17 + $0x18] sm:$0xff] }
 0x574   : > { %v4140_v29 = vsel %vm1031_vm0, %v4019_v20, 0.0  ;;  %v13932_v20 = vld [vmem:[%s12313_s17 + $0x10] sm:$0xff] }
 0x575   : > { %4129 = vadd.xlane.f32.xlu0 %v4128_v37  ;;  %v4017_v21 = vpop.permute.xlu1 %4016 }
 0x576   : > { %v4137_v42 = vsel %vm1031_vm0, %v4017_v21, 0.0  ;;  %v13944_v21 = vmul.f32 0.015625, %v13810_v36  ;;  %v13957_v36 = vld [vmem:[%s12313_s17 + $0x28] sm:$0xff] }
 0x577   : > { %4138 = vadd.xlane.f32.xlu1 %v4137_v42  ;;  %v4023_v19 = vpop.permute.xlu0 %4022 }
 0x578   : > { %v4146_v47 = vsel %vm1031_vm0, %v4023_v19, 0.0  ;;  %v13947_v19 = vmul.f32 0.015625, %v13812_v53  ;;  %v13963_v53 = vmul.f32 %v13922_v38, %v13922_v38 }
 0x579   : > { %4135 = vadd.xlane.f32.xlu0 %v4134_v49  ;;  %v4021_v40 = vpop.permute.xlu1 %4020 }
 0x57a   : > { %v4143_v0 = vsel %vm1031_vm0, %v4021_v40, 0.0  ;;  %v13990_v12 = vmul.f32 %v13947_v19, %v13947_v19 }
 0x57b   : > { %4144 = vadd.xlane.f32.xlu1 %v4143_v0  ;;  %v4027_v25 = vpop.permute.xlu0 %4026 }
 0x57c   : > { %v4152_v52 = vsel %vm1031_vm0, %v4027_v25, 0.0 }
 0x57d   : > { %4141 = vadd.xlane.f32.xlu0 %v4140_v29  ;;  %v4025_v61 = vpop.permute.xlu1 %4024 }
 0x57e   : > { %v4149_v16 = vsel %vm1031_vm0, %v4025_v61, 0.0  ;;  %v13954_v61 = vmul.f32 %v13919_v8, %v13919_v8 }
 0x57f   : > { %4150 = vadd.xlane.f32.xlu1 %v4149_v16  ;;  %v13966_v16 = vmul.f32 0.015625, %v13814_v31  ;;  %v13981_v31 = vld [vmem:[%s12313_s17 + $0x38] sm:$0xff] }
 0x581   : > { %4147 = vadd.xlane.f32.xlu0 %v4146_v47  ;;  %v4029_v26 = vpop.permute.xlu1 %4028  ;;  %v9928_v47 = vld [vmem:[%s17429_s4 + $0x68] sm:$0xff]  }
 0x582   : > { %v4155_v56 = vsel %vm1031_vm0, %v4029_v26, 0.0  ;;  %9435 = vmatprep.subr.bf16.mxu1 %v9928_v47 }
 0x583   : > { %4156 = vadd.xlane.f32.xlu1 %v4155_v56  ;;  %9436 = vmatpush3.bf16.msra.mxu1 %v9928_v47 }
 0x585   : > { %4153 = vadd.xlane.f32.xlu0 %v4152_v52  ;;  %v13969_v52 = vmul.f32 0.015625, %v13816_v7  ;;  %v14032_v7 = vld [vmem:[%s12313_s17 + $0x58] sm:$0xff] }
 0x587   : > { %v14011_v47 = vmul.f32 %v13969_v52, %v13969_v52 }
 0x5d0   : > { %v4067_v28 = vpop.xlane.xlu1 %4066 }
 0x5d1   : > { %v4159_v43 = vmul.f32 0.015625, %v4067_v28 }
 0x5d2   : > { %v4064_v14 = vpop.xlane.xlu0 %4063 }
 0x5d3   : > { %v4158_v33 = vmul.f32 0.015625, %v4064_v14  ;;  %v4223_v37 = vsub.f32 %v4159_v43, %v4191_v34  ;;  %v13972_v14 = vld [vmem:[%s12313_s17 + $0x20] sm:$0xff]  ;;  %v13986_v43 = vmul.f32 0.015625, %v13818_v50  ;;  %v14002_v50 = vmul.f32 0.015625, %v13820_v59 }
 0x5d5   : > { %v4222_v48 = vsub.f32 %v4158_v33, %v4190_v32  ;;  %v4255_v29 = vmax.f32 %v4223_v37, 0.0  ;;  %v13978_v32 = vmul.f32 %v13944_v21, %v13944_v21 }
 0x5d6   : > { %v4070_v42 = vpop.xlane.xlu0 %4069 }
 0x5d7   : > { %v4254_v40 = vmax.f32 %v4222_v48, 0.0  ;;  %v4160_v0 = vmul.f32 0.015625, %v4070_v42  ;;  %v4287_v26 = vadd.f32 1e-05, %v4255_v29  ;;  %v13993_v48 = vld [vmem:[%s12313_s17 + $0x30] sm:$0xff]  ;;  %v13999_v29 = vmul.f32 %v13966_v16, %v13966_v16  ;;  %v14017_v42 = vld [vmem:[%s12313_s17 + $0x40] sm:$0xff] }
 0x5d9   : > { %v4286_v56 = vadd.f32 1e-05, %v4254_v40  ;;  %v4224_v28 = vsub.f32 %v4160_v0, %v4192_v58  ;;  %10139 = vrsqrt.f32 %v4287_v26  ;;  %v14005_v40 = vld [vmem:[%s12313_s17 + $0x48] sm:$0xff]  ;;  %v14026_v0 = vmul.f32 0.015625, %v13822_v2  ;;  %v9930_v2 = vld [vmem:[%s17429_s4 + $0x78] sm:$0xff]  }
 0x5da   : > { %v4073_v33 = vpop.xlane.xlu0 %4072 }
 0x5db   : > { %v4256_v58 = vmax.f32 %v4224_v28, 0.0  ;;  %v4161_v37 = vmul.f32 0.015625, %v4073_v33  ;;  %10141 = vrsqrt.f32 %v4286_v56  ;;  %v9929_v33 = vld [vmem:[%s17429_s4 + $0x70] sm:$0xff]   ;;  %v14023_v56 = vmul.f32 %v13986_v43, %v13986_v43  ;;  %18072 = vst [vmem:[#allocation75_spill] sm:$0xff] %v14026_v0 }
 0x5dc   : > { %9437 = vmatprep.subr.bf16.mxu1 %v9929_v33  ;;  %v14058_v46 = vmul.f32 %v14026_v0, %v14026_v0  ;;  %v14105_v0 = vmul.f32 %v14084_v55, %v14084_v55 }
 0x5dd   : > { %v4288_v26 = vadd.f32 1e-05, %v4256_v58  ;;  %v4225_v28 = vsub.f32 %v4161_v37, %v4193_v30  ;;  %v14029_v58 = vmul.f32 0.015625, %v13824_v11  ;;  %v4079_v30 = vpop.xlane.xlu1 %4078  ;;  %v14041_v11 = vmul.f32 %v14002_v50, %v14002_v50  ;;  %9438 = vmatpush3.bf16.msra.mxu1 %v9929_v33 }
 0x5de   : > { %v4076_v37 = vpop.xlane.xlu0 %4075  ;;  %v4163_v49 = vmul.f32 0.015625, %v4079_v30  ;;  %v14052_v30 = vmul.f32 0.015625, %v13828_v44  ;;  %9439 = vmatprep.subr.bf16.mxu1 %v9930_v2 }
 0x5df   : > { %18073 = vst [vmem:[#allocation76_spill] sm:$0xff] %v14029_v58  ;;  %v4257_v25 = vmax.f32 %v4225_v28, 0.0  ;;  %v4162_v59 = vmul.f32 0.015625, %v4076_v37  ;;  %v14049_v28 = vmul.f32 0.015625, %v13826_v3  ;;  %10143 = vrsqrt.f32 %v4288_v26  ;;  %v14079_v3 = vld [vmem:[%s12313_s17 + $0x78] sm:$0xff] }
 0x5e0   : > { %v4227_v34 = vsub.f32 %v4163_v49, %v13954_v61  ;;  %v14067_v44 = vmul.f32 %v14029_v58, %v14029_v58  ;;  %18076 = vst [vmem:[#allocation27_spill] sm:$0xff] %v14079_v3 }
 0x5e1   : > { %18074 = vst [vmem:[#allocation25_spill] sm:$0xff] %v14049_v28  ;;  %v4289_v37 = vadd.f32 1e-05, %v4257_v25  ;;  %v4226_v5 = vsub.f32 %v4162_v59, %v13963_v53  ;;  %v14070_v25 = vld [vmem:[%s12313_s17 + $0x60] sm:$0xff]  ;;  %v4085_v61 = vpop.xlane.xlu1 %4084  ;;  %v14076_v45 = vmul.f32 %v14049_v28, %v14049_v28  ;;  %9440 = vmatpush3.bf16.msra.mxu1 %v9930_v2 }
 0x5e2   : > { %18075 = vst [vmem:[#allocation77_spill] sm:$0xff] %v14070_v25  ;;  %v4082_v53 = vpop.xlane.xlu0 %4081  ;;  %v4259_v26 = vmax.f32 %v4227_v34, 0.0  ;;  %v4165_v59 = vmul.f32 0.015625, %v4085_v61  ;;  %v14088_v34 = vmul.f32 %v14052_v30, %v14052_v30  ;;  %v14092_v25 = vld [vmem:[%s12313_s17 + $0x70] sm:$0xff] }
 0x5e3   : > { %10145 = vrsqrt.f32 %v4289_v37  ;;  %v4258_v33 = vmax.f32 %v4226_v5, 0.0  ;;  %v4164_v49 = vmul.f32 0.015625, %v4082_v53  ;;  %v10140_v23 = vpop.eup %10139 }
 0x5e4   : > { %v4291_v5 = vadd.f32 1e-05, %v4259_v26  ;;  %v4229_v61 = vsub.f32 %v4165_v59, %v13978_v32  ;;  %v18077_v26 = vsub.f32 %v13925_v10, %v13895_v1 }
 0x5e5   : > { %v4290_v37 = vadd.f32 1e-05, %v4258_v33  ;;  %v10142_v58 = vpop.eup %10141  ;;  %v4228_v2 = vsub.f32 %v4164_v49, %v13990_v12  ;;  %v4091_v53 = vpop.xlane.xlu1 %4090  ;;  %v18078_v12 = vsub.f32 %v13914_v41, %v13898_v18 }
 0x5e6   : > { %v4088_v28 = vpop.xlane.xlu0 %4087  ;;  %v4383_v33 = vmul.f32 %v10140_v23, %v18077_v26  ;;  %10147 = vrsqrt.f32 %v4291_v5  ;;  %v4261_v32 = vmax.f32 %v4229_v61, 0.0  ;;  %v4167_v59 = vmul.f32 0.015625, %v4091_v53 }
 0x5e7   : > { %v4166_v3 = vmul.f32 0.015625, %v4088_v28  ;;  %10149 = vrsqrt.f32 %v4290_v37  ;;  %v4260_v6 = vmax.f32 %v4228_v2, 0.0  ;;  %v4382_v49 = vmul.f32 %v10142_v58, %v18078_v12  ;;  %v14116_v28 = vld [vmem:[%s12313_s17 + $0x88] sm:$0xff] }
 0x5e8   : > { %v4293_v1 = vadd.f32 1e-05, %v4261_v32  ;;  %v4231_v23 = vsub.f32 %v4167_v59, %v13999_v29  ;;  %v4367_v5 = vsub.f32 %v14116_v28, %v14084_v55  ;;  %v14122_v37 = vmul.f32 %v14097_v22, %v14097_v22 }
 0x5e9   : > { %v4230_v10 = vsub.f32 %v4166_v3, %v14011_v47  ;;  %v4292_v18 = vadd.f32 1e-05, %v4260_v6  ;;  %v4097_v41 = vpop.xlane.xlu1 %4096  ;;  %v4414_v58 = vpack.c.bf16 %v4383_v33, %v4382_v49  ;;  %v10144_v61 = vpop.eup %10143  ;;  %v14125_v47 = vld [vmem:[%s12313_s17 + $0x80] sm:$0xff]  ;;  %v14130_v26 = vmul.f32 0.015625, %v13836_v9 }
 0x5ea   : > { %v4094_v39 = vpop.xlane.xlu0 %4093  ;;  %10151 = vrsqrt.f32 %v4293_v1  ;;  %v4263_v2 = vmax.f32 %v4231_v23, 0.0  ;;  %v4169_v53 = vmul.f32 0.015625, %v4097_v41  ;;  %v14135_v59 = vmul.f32 %v14111_v27, %v14111_v27  ;;  %v14139_v1 = vld [vmem:[%s12313_s17 + $0x98] sm:$0xff] }
 0x5eb   : > { %v4262_v29 = vmax.f32 %v4230_v10, 0.0  ;;  %10153 = vrsqrt.f32 %v4292_v18  ;;  %4455 = vrot.lane.b32.xlu0 %v4414_v58, %s10724_s16  ;;  %v4168_v32 = vmul.f32 0.015625, %v4094_v39  ;;  %v18079_v41 = vsub.f32 %v13932_v20, %v13901_v57 }
 0x5ec   : > { %v4295_v6 = vadd.f32 1e-05, %v4263_v2  ;;  %v4233_v49 = vsub.f32 %v4169_v53, %v14023_v56  ;;  %v18080_v39 = vsub.f32 %v13939_v13, %v13904_v63  ;;  %v14151_v3 = vmul.f32 0.015625, %v13838_v62 }
 0x5ed   : > { %v10146_v33 = vpop.eup %10145  ;;  %v4294_v12 = vadd.f32 1e-05, %v4262_v29  ;;  %v4232_v9 = vsub.f32 %v4168_v32, %v14041_v11  ;;  %v4103_v10 = vpop.xlane.xlu1 %4102  ;;  %v4384_v58 = vmul.f32 %v10144_v61, %v18079_v41  ;;  %v14155_v57 = vmul.f32 %v14130_v26, %v14130_v26 }
 0x5ee   : > { %v4100_v18 = vpop.xlane.xlu0 %4099  ;;  %v4385_v2 = vmul.f32 %v10146_v33, %v18080_v39  ;;  %10155 = vrsqrt.f32 %v4295_v6  ;;  %v4265_v56 = vmax.f32 %v4233_v49, 0.0  ;;  %v4171_v29 = vmul.f32 0.015625, %v4103_v10  ;;  %v14160_v33 = vld [vmem:[%s12313_s17 + $0x90] sm:$0xff] }
 0x5ef   : > { %v4170_v53 = vmul.f32 0.015625, %v4100_v18  ;;  %10157 = vrsqrt.f32 %v4294_v12  ;;  %v4264_v11 = vmax.f32 %v4232_v9, 0.0  ;;  %v4368_v62 = vsub.f32 %v14160_v33, %v14130_v26 }
 0x5f0   : > { %v4415_v32 = vpack.c.bf16 %v4385_v2, %v4384_v58  ;;  %v10148_v23 = vpop.eup %10147  ;;  %v4297_v20 = vadd.f32 1e-05, %v4265_v56  ;;  %v4235_v63 = vsub.f32 %v4171_v29, %v14058_v46  ;;  %v14165_v6 = vmul.f32 0.015625, %v13840_v60  ;;  %v14179_v29 = vld [vmem:[%s12313_s17 + $0xa8] sm:$0xff] }
 0x5f1   : > { %v4234_v13 = vsub.f32 %v4170_v53, %v14067_v44  ;;  %v10150_v61 = vpop.eup %10149  ;;  %v4296_v12 = vadd.f32 1e-05, %v4264_v11  ;;  %v4109_v49 = vpop.xlane.xlu1 %4108  ;;  %v18081_v46 = vsub.f32 %v13957_v36, %v13919_v8  ;;  %v14173_v58 = vmul.f32 %v14151_v3, %v14151_v3 }
 0x5f2   : > { %4457 = vrot.lane.b32.xlu1 %v4415_v32, %s10724_s16  ;;  %v4106_v9 = vpop.xlane.xlu0 %4105  ;;  %10159 = vrsqrt.f32 %v4297_v20  ;;  %v4267_v44 = vmax.f32 %v4235_v63, 0.0  ;;  %v4173_v41 = vmul.f32 0.015625, %v4109_v49  ;;  %v18082_v39 = vsub.f32 %v13972_v14, %v13922_v38 }
 0x5f3   : > { %v4387_v10 = vmul.f32 %v10148_v23, %v18081_v46  ;;  %v4266_v18 = vmax.f32 %v4234_v13, 0.0  ;;  %10161 = vrsqrt.f32 %v4296_v12  ;;  %v4172_v60 = vmul.f32 0.015625, %v4106_v9 }
 0x5f4   : > { %v4386_v2 = vmul.f32 %v10150_v61, %v18082_v39  ;;  %v10152_v56 = vpop.eup %10151  ;;  %v4371_v8 = vsub.f32 %v14179_v29, %v14151_v3  ;;  %v4299_v36 = vadd.f32 1e-05, %v4267_v44  ;;  %v4237_v53 = vsub.f32 %v4173_v41, %v14076_v45 }
 0x5f5   : > { %v4298_v23 = vadd.f32 1e-05, %v4266_v18  ;;  %v10154_v11 = vpop.eup %10153  ;;  %v14186_v32 = vmul.f32 %v14165_v6, %v14165_v6  ;;  %v4236_v20 = vsub.f32 %v4172_v60, %v14088_v34  ;;  %v4115_v38 = vpop.xlane.xlu1 %4114  ;;  %v18083_v13 = vsub.f32 %v13981_v31, %v13944_v21  ;;  %v14200_v18 = vld [vmem:[%s12313_s17 + $0xa0] sm:$0xff] }
 0x5f6   : > { %v4416_v14 = vpack.c.bf16 %v4387_v10, %v4386_v2  ;;  %v4112_v63 = vpop.xlane.xlu0 %4111  ;;  %10163 = vrsqrt.f32 %v4299_v36  ;;  %v4269_v12 = vmax.f32 %v4237_v53, 0.0  ;;  %v4175_v49 = vmul.f32 0.015625, %v4115_v38 }
 0x5f7   : > { %v4389_v61 = vmul.f32 %v10152_v56, %v18083_v13  ;;  %v4174_v9 = vmul.f32 0.015625, %v4112_v63  ;;  %v14193_v45 = vmul.f32 0.015625, %v13842_v51  ;;  %10165 = vrsqrt.f32 %v4298_v23 }
 0x5f8   : > { %v4268_v46 = vmax.f32 %v4236_v20, 0.0  ;;  %4459 = vrot.lane.b32.xlu1 %v4416_v14, %s10724_s16  ;;  %v18084_v34 = vsub.f32 %v13993_v48, %v13947_v19  ;;  %v10156_v44 = vpop.eup %10155  ;;  %v4370_v21 = vsub.f32 %v14200_v18, %v14165_v6  ;;  %v4301_v31 = vadd.f32 1e-05, %v4269_v12 }
 0x5f9   : > { %v4239_v41 = vsub.f32 %v4175_v49, %v14105_v0  ;;  %v4238_v51 = vsub.f32 %v4174_v9, %v14122_v37  ;;  %v10158_v60 = vpop.eup %10157  ;;  %v14207_v39 = vmul.f32 0.015625, %v13844_v4  ;;  %v4121_v56 = vpop.xlane.xlu1 %4120  ;;  %v18085_v48 = vsub.f32 %v14005_v40, %v13966_v16 }
 0x5fa   : > { %v4388_v10 = vmul.f32 %v10154_v11, %v18084_v34  ;;  %v4300_v2 = vadd.f32 1e-05, %v4268_v46  ;;  %v4118_v19 = vpop.xlane.xlu0 %4117  ;;  %10167 = vrsqrt.f32 %v4301_v31  ;;  %v4177_v20 = vmul.f32 0.015625, %v4121_v56 }
 0x5fb   : > { %v4391_v23 = vmul.f32 %v10156_v44, %v18085_v48  ;;  %v4271_v53 = vmax.f32 %v4239_v41, 0.0  ;;  %v4270_v11 = vmax.f32 %v4238_v51, 0.0  ;;  %v4213_v0 = vmul.f32 %v14193_v45, %v14193_v45 }
 0x5fc   : > { %v4417_v36 = vpack.c.bf16 %v4389_v61, %v4388_v10  ;;  %10169 = vrsqrt.f32 %v4300_v2  ;;  %v4176_v4 = vmul.f32 0.015625, %v4118_v19  ;;  %v18086_v37 = vsub.f32 %v14017_v42, %v13969_v52  ;;  %v10160_v14 = vpop.eup %10159 }
 0x5fd   : > { %v14219_v63 = vmul.f32 0.015625, %v13846_v15  ;;  %v4303_v16 = vadd.f32 1e-05, %v4271_v53  ;;  %v4302_v40 = vadd.f32 1e-05, %v4270_v11  ;;  %v4241_v13 = vsub.f32 %v4177_v20, %v14135_v59  ;;  %v10162_v61 = vpop.eup %10161  ;;  %v4127_v9 = vpop.xlane.xlu1 %4126 }
 0x5fe   : > { %4461 = vrot.lane.b32.xlu1 %v4417_v36, %s10724_s16  ;;  %v4390_v38 = vmul.f32 %v10158_v60, %v18086_v37  ;;  %v4212_v12 = vmul.f32 %v14207_v39, %v14207_v39  ;;  %v4240_v49 = vsub.f32 %v4176_v4, %v14155_v57  ;;  %v4124_v34 = vpop.xlane.xlu0 %4123  ;;  %v18087_v52 = vsub.f32 %v14032_v7, %v13986_v43  ;;  %v18092_v37 = vld [vmem:[#allocation76_spill] sm:$0xff] }
 0x5ff   : > { %10171 = vrsqrt.f32 %v4303_v16  ;;  %v4273_v15 = vmax.f32 %v4241_v13, 0.0  ;;  %v4179_v10 = vmul.f32 0.015625, %v4127_v9  ;;  %v4178_v44 = vmul.f32 0.015625, %v4124_v34 }
 0x600   : > { %v4418_v46 = vpack.c.bf16 %v4391_v23, %v4390_v38  ;;  %v4393_v42 = vmul.f32 %v10160_v14, %v18087_v52  ;;  %v14229_v31 = vmul.f32 0.015625, %v13848_v35  ;;  %10173 = vrsqrt.f32 %v4302_v40  ;;  %v10164_v51 = vpop.eup %10163  ;;  %v18094_v40 = vld [vmem:[#allocation22_spill] sm:$0xff] }
 0x601   : > { %v4272_v59 = vmax.f32 %v4240_v49, 0.0  ;;  %v18088_v57 = vsub.f32 %v14044_v54, %v14002_v50  ;;  %v4215_v7 = vmul.f32 %v14219_v63, %v14219_v63  ;;  %v4305_v43 = vadd.f32 1e-05, %v4273_v15  ;;  %v10166_v56 = vpop.eup %10165  ;;  %v4133_v19 = vpop.xlane.xlu1 %4132  ;;  %v18089_v54 = vld [vmem:[#allocation75_spill] sm:$0xff] }
 0x602   : > { %4463 = vrot.lane.b32.xlu0 %v4418_v46, %s10724_s16  ;;  %v4243_v60 = vsub.f32 %v4179_v10, %v14173_v58  ;;  %v4242_v2 = vsub.f32 %v4178_v44, %v14186_v32  ;;  %v14240_v35 = vmul.f32 0.015625, %v13850_v17  ;;  %v4130_v23 = vpop.xlane.xlu0 %4129  ;;  %v18090_v50 = vsub.f32 %v14061_v24, %v18089_v54  ;;  %v18091_v32 = vld [vmem:[#allocation77_spill] sm:$0xff]  ;;  %v18095_v10 = vld [vmem:[#allocation27_spill] sm:$0xff] }
 0x603   : > { %v4392_v41 = vmul.f32 %v10162_v61, %v18088_v57  ;;  %v4304_v36 = vadd.f32 1e-05, %v4272_v59  ;;  %10175 = vrsqrt.f32 %v4305_v43  ;;  %v4181_v4 = vmul.f32 0.015625, %v4133_v19  ;;  %v18096_v44 = vld [vmem:[#allocation25_spill] sm:$0xff]  ;;  %v18100_v19 = vld [vmem:[#allocation74_spill] sm:$0xff] }
 0x604   : > { %v4395_v53 = vmul.f32 %v10164_v51, %v18090_v50  ;;  %v4275_v11 = vmax.f32 %v4243_v60, 0.0  ;;  %v4274_v20 = vmax.f32 %v4242_v2, 0.0  ;;  %v4214_v58 = vmul.f32 %v14229_v31, %v14229_v31  ;;  %v10168_v16 = vpop.eup %10167  ;;  %v18098_v60 = vld [vmem:[#allocation26_spill] sm:$0xff] }
 0x605   : > { %v4419_v48 = vpack.c.bf16 %v4393_v42, %v4392_v41  ;;  %10177 = vrsqrt.f32 %v4304_v36  ;;  %v4180_v17 = vmul.f32 0.015625, %v4130_v23  ;;  %v18093_v38 = vsub.f32 %v18091_v32, %v18092_v37  ;;  %v4139_v52 = vpop.xlane.xlu1 %4138 }
 0x606   : > { %v14252_v13 = vmul.f32 0.015625, %v18094_v40  ;;  %v4307_v24 = vadd.f32 1e-05, %v4275_v11  ;;  %v4306_v61 = vadd.f32 1e-05, %v4274_v20  ;;  %v4245_v49 = vsub.f32 %v4181_v4, %v4213_v0  ;;  %v10170_v9 = vpop.eup %10169  ;;  %v4136_v15 = vpop.xlane.xlu0 %4135 }
 0x607   : > { %4465 = vrot.lane.b32.xlu1 %v4419_v48, %s10724_s16  ;;  %v4394_v14 = vmul.f32 %v10166_v56, %v18093_v38  ;;  %v4217_v46 = vmul.f32 %v14240_v35, %v14240_v35  ;;  %v4244_v34 = vsub.f32 %v4180_v17, %v4212_v12  ;;  %v18097_v59 = vsub.f32 %v18095_v10, %v18096_v44 }
 0x608   : > { %10179 = vrsqrt.f32 %v4307_v24  ;;  %v4277_v41 = vmax.f32 %v4245_v49, 0.0  ;;  %v4183_v51 = vmul.f32 0.015625, %v4139_v52  ;;  %v4182_v43 = vmul.f32 0.015625, %v4136_v15  ;;  %v18102_v49 = vld [vmem:[#allocation90_spill] sm:$0xff] }
 0x609   : > { %v4420_v42 = vpack.c.bf16 %v4395_v53, %v4394_v14  ;;  %v4397_v57 = vmul.f32 %v10168_v16, %v18097_v59  ;;  %v14260_v2 = vmul.f32 0.015625, %v18098_v60  ;;  %10181 = vrsqrt.f32 %v4306_v61  ;;  %v10172_v36 = vpop.eup %10171  ;;  %v4145_v4 = vpop.xlane.xlu1 %4144  ;;  %v10557_v60 = vld [vmem:[%s12313_s17 + $0xb8] sm:$0xff] }
 0x60a   : > { %v4276_v0 = vmax.f32 %v4244_v34, 0.0  ;;  %v18099_v12 = vsub.f32 %v14092_v25, %v14052_v30  ;;  %v14267_v48 = vmul.f32 0.015625, %v18100_v19  ;;  %v4309_v23 = vadd.f32 1e-05, %v4277_v41  ;;  %v10174_v53 = vpop.eup %10173  ;;  %v4142_v32 = vpop.xlane.xlu0 %4141 }
 0x60b   : > { %4467 = vrot.lane.b32.xlu0 %v4420_v42, %s10724_s16  ;;  %v4247_v54 = vsub.f32 %v4183_v51, %v4215_v7  ;;  %v4246_v50 = vsub.f32 %v4182_v43, %v4214_v58  ;;  %v4216_v11 = vmul.f32 %v14252_v13, %v14252_v13  ;;  %v4399_v30 = vmul.f32 %v10172_v36, %v4367_v5 }
 0x60c   : > { %v4396_v56 = vmul.f32 %v10170_v9, %v18099_v12  ;;  %v4308_v20 = vadd.f32 1e-05, %v4276_v0  ;;  %10183 = vrsqrt.f32 %v4309_v23  ;;  %v4185_v38 = vmul.f32 0.015625, %v4145_v4 }
 0x60d   : > { %v4279_v25 = vmax.f32 %v4247_v54, 0.0  ;;  %v4278_v37 = vmax.f32 %v4246_v50, 0.0  ;;  %v4219_v7 = vmul.f32 %v14260_v2, %v14260_v2  ;;  %v4184_v58 = vmul.f32 0.015625, %v4142_v32  ;;  %v10176_v40 = vpop.eup %10175  ;;  %v4151_v52 = vpop.xlane.xlu1 %4150 }
 0x60e   : > { %v4421_v17 = vpack.c.bf16 %v4397_v57, %v4396_v56  ;;  %10185 = vrsqrt.f32 %v4308_v20  ;;  %v18101_v14 = vsub.f32 %v14125_v47, %v14097_v22  ;;  %v4218_v55 = vmul.f32 %v14267_v48, %v14267_v48  ;;  %v4148_v15 = vpop.xlane.xlu0 %4147  ;;  %v18104_v57 = vld [vmem:[#allocation24_spill] sm:$0xff] }
 0x60f   : > { %v4311_v28 = vadd.f32 1e-05, %v4279_v25  ;;  %v4310_v5 = vadd.f32 1e-05, %v4278_v37  ;;  %v4249_v24 = vsub.f32 %v4185_v38, %v4217_v46  ;;  %v10178_v61 = vpop.eup %10177  ;;  %v14283_v9 = vmul.f32 0.015625, %v18102_v49 }
 0x610   : > { %4469 = vrot.lane.b32.xlu1 %v4421_v17, %s10724_s16  ;;  %v4398_v16 = vmul.f32 %v10174_v53, %v18101_v14  ;;  %v4248_v34 = vsub.f32 %v4184_v58, %v4216_v11  ;;  %v18103_v22 = vsub.f32 %v14139_v1, %v14111_v27  ;;  %v4187_v44 = vmul.f32 0.015625, %v4151_v52  ;;  %v10558_v17 = vld [vmem:[%s12313_s17 + $0xb0] sm:$0xff]  ;;  %v10559_v14 = vld [vmem:[%s12313_s17 + $0xc8] sm:$0xff] }
 0x611   : > { %10187 = vrsqrt.f32 %v4311_v28  ;;  %v4281_v10 = vmax.f32 %v4249_v24, 0.0  ;;  %v4186_v59 = vmul.f32 0.015625, %v4148_v15  ;;  %v14289_v41 = vmul.f32 0.015625, %v18104_v57  ;;  %v4157_v23 = vpop.xlane.xlu1 %4156  ;;  %v10562_v52 = vld [vmem:[%s12313_s17 + $0xd0] sm:$0xff]  ;;  %v10564_v57 = vld [vmem:[%s12313_s17 + $0xe0] sm:$0xff] }
 0x612   : > { %v4422_v42 = vpack.c.bf16 %v4399_v30, %v4398_v16  ;;  %v4401_v47 = vmul.f32 %v10176_v40, %v18103_v22  ;;  %10189 = vrsqrt.f32 %v4310_v5  ;;  %v4280_v46 = vmax.f32 %v4248_v34, 0.0  ;;  %v10180_v43 = vpop.eup %10179  ;;  %v4154_v50 = vpop.xlane.xlu0 %4153 }
 0x613   : > { %v4400_v51 = vmul.f32 %v10178_v61, %v4368_v62  ;;  %v4373_v27 = vsub.f32 %v10557_v60, %v14193_v45  ;;  %v4313_v1 = vadd.f32 1e-05, %v4281_v10  ;;  %v4251_v0 = vsub.f32 %v4187_v44, %v4219_v7  ;;  %v10182_v56 = vpop.eup %10181  ;;  %v10561_v61 = vld [vmem:[%s12313_s17 + $0xd8] sm:$0xff]  ;;  %v10563_v10 = vld [vmem:[%s12313_s17 + $0xe8] sm:$0xff] }
 0x614   : > { %4471 = vrot.lane.b32.xlu0 %v4422_v42, %s10724_s16  ;;  %v4250_v12 = vsub.f32 %v4186_v59, %v4218_v55  ;;  %v4221_v36 = vmul.f32 %v14283_v9, %v14283_v9  ;;  %v4312_v19 = vadd.f32 1e-05, %v4280_v46  ;;  %v4403_v26 = vmul.f32 %v10180_v43, %v4371_v8  ;;  %v10565_v60 = vld [vmem:[%s12313_s17 + $0xf8] sm:$0xff] }
 0x615   : > { %v4423_v54 = vpack.c.bf16 %v4401_v47, %v4400_v51  ;;  %10191 = vrsqrt.f32 %v4313_v1  ;;  %v4283_v33 = vmax.f32 %v4251_v0, 0.0  ;;  %v4189_v45 = vmul.f32 0.015625, %v4157_v23  ;;  %v10566_v0 = vld [vmem:[%s12313_s17 + $0xf0] sm:$0xff] }
 0x616   : > { %v4282_v62 = vmax.f32 %v4250_v12, 0.0  ;;  %v4220_v53 = vmul.f32 %v14289_v41, %v14289_v41  ;;  %10193 = vrsqrt.f32 %v4312_v19  ;;  %v4188_v11 = vmul.f32 0.015625, %v4154_v50  ;;  %v10184_v4 = vpop.eup %10183  ;;  %v14341_v23 = vld [vmem:[%s14333_s27 + $0x10] sm:$0xff]  ;;  %v14346_v50 = vld [vmem:[%s14333_s27 + $0x18] sm:$0xff] }
 0x617   : > { %4473 = vrot.lane.b32.xlu1 %v4423_v54, %s10724_s16  ;;  %v4402_v20 = vmul.f32 %v10182_v56, %v4370_v21  ;;  %v4372_v3 = vsub.f32 %v10558_v17, %v14207_v39  ;;  %v4315_v29 = vadd.f32 1e-05, %v4283_v33  ;;  %v4253_v32 = vsub.f32 %v4189_v45, %v4221_v36  ;;  %v10560_v39 = vld [vmem:[%s12313_s17 + $0xc0] sm:$0xff]  ;;  %v14369_v17 = vld [vmem:[%s14333_s27 + $0x38] sm:$0xff]  ;;  %s10648_s17 = sshll.u32 %s10725_s20, 4  ;;  %s10649_s17 = int_to_ptr.vmem [resolvable:$false] %s10648_s17 }
 0x618   : > { %v4314_v8 = vadd.f32 1e-05, %v4282_v62  ;;  %v10186_v30 = vpop.eup %10185  ;;  %v4252_v25 = vsub.f32 %v4188_v11, %v4220_v53  ;;  %v4405_v38 = vmul.f32 %v10184_v4, %v4373_v27  ;;  %v4375_v6 = vsub.f32 %v10559_v14, %v14219_v63  ;;  %v14356_v45 = vld [vmem:[%s14333_s27 + $0x20] sm:$0xff]  ;;  %v14359_v53 = vld [vmem:[%s14333_s27 + $0x28] sm:$0xff]  ;;  %v14366_v4 = vld [vmem:[%s14333_s27 + $0x30] sm:$0xff]  ;;  %s10650_s28 = scalar_lea.vmem %s10649_s17, 8192  ;;  %p10651_p3 = scmp.lt.s32.totalorder %s17371_s9, %s10649_s17 }
 0x619   : > { %v4424_v37 = vpack.c.bf16 %v4403_v26, %v4402_v20  ;;  %10195 = vrsqrt.f32 %v4315_v29  ;;  %v4285_v7 = vmax.f32 %v4253_v32, 0.0  ;;  %v4404_v58 = vmul.f32 %v10186_v30, %v4372_v3  ;;  %v14349_v26 = vld [vmem:[%s14333_s27 + $0x8] sm:$0xff]  ;;  %v14396_v14 = vld [vmem:[%s14333_s27 + $0x60] sm:$0xff]  ;;  %p10652_p4 = scmp.lt.s32.totalorder %s10650_s28, %s10644_s19 }
 0x61a   : > { %10197 = vrsqrt.f32 %v4314_v8  ;;  %v4284_v18 = vmax.f32 %v4252_v25, 0.0  ;;  %v4374_v16 = vsub.f32 %v10560_v39, %v14229_v31  ;;  %v4377_v49 = vsub.f32 %v10561_v61, %v14240_v35  ;;  %v14376_v8 = vld [vmem:[%s14333_s27 + $0x40] sm:$0xff]  ;;  %v14379_v32 = vld [vmem:[%s14333_s27 + $0x48] sm:$0xff] }
 0x61b   : > { %4475 = vrot.lane.b32.xlu0 %v4424_v37, %s10724_s16  ;;  %v10188_v21 = vpop.eup %10187  ;;  %v4317_v40 = vadd.f32 1e-05, %v4285_v7  ;;  %v4425_v55 = vpack.c.bf16 %v4405_v38, %v4404_v58  ;;  %v4376_v42 = vsub.f32 %v10562_v52, %v14252_v13  ;;  %v4379_v44 = vsub.f32 %v10563_v10, %v14260_v2  ;;  %18105 = vst [vmem:[#allocation93_spill] sm:$0xff] %v14379_v32  ;;  %v14386_v37 = vld [vmem:[%s14333_s27 + $0x50] sm:$0xff]  ;;  %v14389_v38 = vld [vmem:[%s14333_s27 + $0x58] sm:$0xff]  ;;  %p10653_p6 = por %p10652_p4, %p10651_p3 }
 0x61c   : > { %v10190_v28 = vpop.eup %10189  ;;  %v4316_v5 = vadd.f32 1e-05, %v4284_v18  ;;  %v4407_v24 = vmul.f32 %v10188_v21, %v4375_v6  ;;  %v4378_v35 = vsub.f32 %v10564_v57, %v14267_v48  ;;  %v4381_v27 = vsub.f32 %v10565_v60, %v14283_v9  ;;  %v14336_v9 = vld [vmem:[%s14333_s27] sm:$0xff]  ;;  %18106 = vst [vmem:[#allocation29_spill] sm:$0xff] %v14386_v37  ;;  %v14399_v6 = vld [vmem:[%s14333_s27 + $0x68] sm:$0xff]  ;;  %v14431_v52 = vld [vmem:[%s14333_s27 + $0x98] sm:$0xff] }
 0x61d   : > { %10199 = vrsqrt.f32 %v4317_v40  ;;  %4477 = vrot.lane.b32.xlu1 %v4425_v55, %s10724_s16  ;;  %v4406_v63 = vmul.f32 %v10190_v28, %v4374_v16  ;;  %v4380_v12 = vsub.f32 %v10566_v0, %v14289_v41  ;;  %v4784_v41 = vsel %vm1031_vm0, %v14336_v9, 0.0  ;;  %v14407_v16 = vld [vmem:[%s14333_s27 + $0x70] sm:$0xff]  ;;  %v14410_v40 = vld [vmem:[%s14333_s27 + $0x78] sm:$0xff]  ;;  %v14464_v60 = vld [vmem:[%s14333_s27 + $0xc8] sm:$0xff]  ;;  %p10654_p7 = pnand %p10653_p6, %p10647_p2 }
 0x61e   : > { %10201 = vrsqrt.f32 %v4316_v5  ;;  %v4790_v54 = vsel %vm1031_vm0, %v14341_v23, 0.0  ;;  %v4793_v33 = vsel %vm1031_vm0, %v14346_v50, 0.0  ;;  %v4787_v62 = vsel %vm1031_vm0, %v14349_v26, 0.0  ;;  %v14450_v57 = vld [vmem:[%s14333_s27 + $0xb0] sm:$0xff] }
 0x61f   : > { %v10192_v34 = vpop.eup %10191  ;;  %v4426_v31 = vpack.c.bf16 %v4407_v24, %v4406_v63  ;;  %v4796_v11 = vsel %vm1031_vm0, %v14356_v45, 0.0  ;;  %v4799_v20 = vsel %vm1031_vm0, %v14359_v53, 0.0  ;;  %v4802_v3 = vsel %vm1031_vm0, %v14366_v4, 0.0  ;;  %v14417_v24 = vld [vmem:[%s14333_s27 + $0x80] sm:$0xff]  ;;  %v14421_v63 = vld [vmem:[%s14333_s27 + $0x88] sm:$0xff] }
 0x620   : > { %v10194_v15 = vpop.eup %10193  ;;  %v4409_v22 = vmul.f32 %v10192_v34, %v4377_v49  ;;  %v4805_v29 = vsel %vm1031_vm0, %v14369_v17, 0.0  ;;  %v4808_v30 = vsel %vm1031_vm0, %v14376_v8, 0.0  ;;  %v4811_v25 = vsel %vm1031_vm0, %v14379_v32, 0.0  ;;  %18107 = vst [vmem:[#allocation92_spill] sm:$0xff] %v14417_v24  ;;  %v14428_v34 = vld [vmem:[%s14333_s27 + $0x90] sm:$0xff] }
 0x621   : > { %4479 = vrot.lane.b32.xlu0 %v4426_v31, %s10724_s16  ;;  %v4408_v47 = vmul.f32 %v10194_v15, %v4376_v42  ;;  %v4814_v7 = vsel %vm1031_vm0, %v14386_v37, 0.0  ;;  %v4817_v58 = vsel %vm1031_vm0, %v14389_v38, 0.0  ;;  %v4820_v21 = vsel %vm1031_vm0, %v14396_v14, 0.0 }
 0x622   : > { %v4823_v39 = vsel %vm1031_vm0, %v14399_v6, 0.0  ;;  %v4826_v55 = vsel %vm1031_vm0, %v14407_v16, 0.0  ;;  %v4829_v5 = vsel %vm1031_vm0, %v14410_v40, 0.0  ;;  %v4832_v61 = vsel %vm1031_vm0, %v14417_v24, 0.0 }
 0x623   : > { %v10196_v59 = vpop.eup %10195  ;;  %v4427_v46 = vpack.c.bf16 %v4409_v22, %v4408_v47  ;;  %v4835_v49 = vsel %vm1031_vm0, %v14421_v63, 0.0  ;;  %v4838_v31 = vsel %vm1031_vm0, %v14428_v34, 0.0  ;;  %v4841_v15 = vsel %vm1031_vm0, %v14431_v52, 0.0  ;;  %v14439_v22 = vld [vmem:[%s14333_s27 + $0xa0] sm:$0xff]  ;;  %v14442_v47 = vld [vmem:[%s14333_s27 + $0xa8] sm:$0xff] }
 0x624   : > { %v10198_v51 = vpop.eup %10197  ;;  %v4411_v43 = vmul.f32 %v10196_v59, %v4379_v44  ;;  %18108 = vst [vmem:[#allocation28_spill] sm:$0xff] %v14442_v47  ;;  %v4844_v44 = vsel %vm1031_vm0, %v14439_v22, 0.0  ;;  %v4847_v59 = vsel %vm1031_vm0, %v14442_v47, 0.0  ;;  %v4859_v0 = vsel %vm1031_vm0, %v14464_v60, 0.0 }
 0x625   : > { %4481 = vrot.lane.b32.xlu1 %v4427_v46, %s10724_s16  ;;  %v4410_v13 = vmul.f32 %v10198_v51, %v4378_v35  ;;  %v14453_v35 = vld [vmem:[%s14333_s27 + $0xb8] sm:$0xff]  ;;  %v4850_v51 = vsel %vm1031_vm0, %v14450_v57, 0.0 }
 0x627   : > { %v10200_v1 = vpop.eup %10199  ;;  %v4428_v56 = vpack.c.bf16 %v4411_v43, %v4410_v13  ;;  %v4853_v43 = vsel %vm1031_vm0, %v14453_v35, 0.0  ;;  %v14461_v13 = vld [vmem:[%s14333_s27 + $0xc0] sm:$0xff] }
 0x628   : > { %v10202_v2 = vpop.eup %10201  ;;  %v4413_v36 = vmul.f32 %v10200_v1, %v4381_v27  ;;  %v4856_v1 = vsel %vm1031_vm0, %v14461_v13, 0.0 }
 0x629   : > { %4483 = vrot.lane.b32.xlu0 %v4428_v56, %s10724_s16  ;;  %v4412_v48 = vmul.f32 %v10202_v2, %v4380_v12  ;;  %v14472_v12 = vld [vmem:[%s14333_s27 + $0xd0] sm:$0xff]  ;;  %v14475_v56 = vld [vmem:[%s14333_s27 + $0xd8] sm:$0xff] }
 0x62b   : > { %v4429_v19 = vpack.c.bf16 %v4413_v36, %v4412_v48  ;;  %v4862_v36 = vsel %vm1031_vm0, %v14472_v12, 0.0  ;;  %v4865_v48 = vsel %vm1031_vm0, %v14475_v56, 0.0 }
 0x62d   : > { %4485 = vrot.lane.b32.xlu1 %v4429_v19, %s10724_s16  ;;  %v14483_v19 = vld [vmem:[%s14333_s27 + $0xe0] sm:$0xff] }
 0x648   : > { %4785 = vadd.xlane.f32.xlu0 %v4784_v41  ;;  %v14486_v41 = vld [vmem:[%s14333_s27 + $0xe8] sm:$0xff] }
 0x64c   : > { %4791 = vadd.xlane.f32.xlu0 %v4790_v54 }
 0x650   : > { %4794 = vadd.xlane.f32.xlu0 %v4793_v33  ;;  %v4868_v33 = vsel %vm1031_vm0, %v14483_v19, 0.0 }
 0x651   : > { %4788 = vadd.xlane.f32.xlu1 %v4787_v62  ;;  %v4871_v62 = vsel %vm1031_vm0, %v14486_v41, 0.0 }
 0x654   : > { %4797 = vadd.xlane.f32.xlu0 %v4796_v11  ;;  %v14494_v11 = vld [vmem:[%s14333_s27 + $0xf0] sm:$0xff] }
 0x655   : > { %4800 = vadd.xlane.f32.xlu1 %v4799_v20  ;;  %v14497_v20 = vld [vmem:[%s14333_s27 + $0xf8] sm:$0xff] }
 0x658   : > { %4803 = vadd.xlane.f32.xlu0 %v4802_v3 }
 0x659   : > { %4806 = vadd.xlane.f32.xlu1 %v4805_v29  ;;  %v4874_v29 = vsel %vm1031_vm0, %v14494_v11, 0.0 }
 0x65c   : > { %4809 = vadd.xlane.f32.xlu0 %v4808_v30  ;;  %v14504_v30 = vmul.f32 %v14336_v9, %v14336_v9 }
 0x65d   : > { %4812 = vadd.xlane.f32.xlu1 %v4811_v25  ;;  %v4456_v18 = vpop.permute.xlu0 %4455  ;;  %v4877_v25 = vsel %vm1031_vm0, %v14497_v20, 0.0 }
 0x65e   : > { %9441 = vmatprep.mubr.msk.bf16.mxu1 %vm1031_vm0, %v4456_v18  ;;  %18109 = vst [vmem:[#allocation30_spill] sm:$0xff] %v14504_v30  ;;  %v4944_v18 = vsel %vm1031_vm0, %v14504_v30, 0.0 }
 0x660   : > { %4815 = vadd.xlane.f32.xlu0 %v4814_v7  ;;  %v14510_v7 = vmul.f32 %v14349_v26, %v14349_v26 }
 0x661   : > { %4818 = vadd.xlane.f32.xlu1 %v4817_v58 }
 0x662   : > { %18110 = vst [vmem:[#allocation49_spill] sm:$0xff] %v14510_v7 }
 0x664   : > { %4821 = vadd.xlane.f32.xlu0 %v4820_v21  ;;  %v4458_v28 = vpop.permute.xlu1 %4457  ;;  %v14517_v21 = vmul.f32 %v14341_v23, %v14341_v23 }
 0x665   : > { %4824 = vadd.xlane.f32.xlu1 %v4823_v39  ;;  %9442 = vmatmul.mubr.msk.bf16.vlgmr.msra.gmra.mrb[0].mxu1 %vm1031_vm0, %v4458_v28  ;;  %v4947_v39 = vsel %vm1031_vm0, %v14510_v7, 0.0 }
 0x666   : > { %18111 = vst [vmem:[#allocation31_spill] sm:$0xff] %v14517_v21 }
 0x668   : > { %4827 = vadd.xlane.f32.xlu0 %v4826_v55  ;;  %v14523_v55 = vmul.f32 %v14346_v50, %v14346_v50 }
 0x669   : > { %4830 = vadd.xlane.f32.xlu1 %v4829_v5  ;;  %v4950_v5 = vsel %vm1031_vm0, %v14517_v21, 0.0 }
 0x66a   : > { %v4460_v42 = vpop.permute.xlu1 %4459  ;;  %18112 = vst [vmem:[#allocation94_spill] sm:$0xff] %v14523_v55 }
 0x66b   : > { %9445 = vmatprep.mubr.msk.bf16.mxu1 %vm1031_vm0, %v4460_v42  ;;  %v14536_v42 = vmul.f32 %v14359_v53, %v14359_v53 }
 0x66c   : > { %4833 = vadd.xlane.f32.xlu0 %v4832_v61  ;;  %v14530_v61 = vmul.f32 %v14356_v45, %v14356_v45 }
 0x66d   : > { %4836 = vadd.xlane.f32.xlu1 %v4835_v49  ;;  %v4953_v49 = vsel %vm1031_vm0, %v14523_v55, 0.0  ;;  %18114 = vst [vmem:[#allocation78_spill] sm:$0xff] %v14536_v42 }
 0x66e   : > { %18113 = vst [vmem:[#allocation48_spill] sm:$0xff] %v14530_v61 }
 0x670   : > { %v4462_v10 = vpop.permute.xlu1 %4461  ;;  %4839 = vadd.xlane.f32.xlu0 %v4838_v31 }
 0x671   : > { %9446 = vmatmul.mubr.msk.bf16.gmra.mrb[4].mxu1 %vm1031_vm0, %v4462_v10  ;;  %4842 = vadd.xlane.f32.xlu1 %v4841_v15  ;;  %v4956_v15 = vsel %vm1031_vm0, %v14530_v61, 0.0  ;;  %v14543_v10 = vmul.f32 %v14366_v4, %v14366_v4 }
 0x673   : > { %18115 = vst [vmem:[#allocation79_spill] sm:$0xff] %v14543_v10 }
 0x674   : > { %v4464_v46 = vpop.permute.xlu0 %4463  ;;  %4845 = vadd.xlane.f32.xlu0 %v4844_v44  ;;  %v4959_v44 = vsel %vm1031_vm0, %v14536_v42, 0.0 }
 0x675   : > { %9449 = vmatprep.mubr.msk.bf16.mxu1 %vm1031_vm0, %v4464_v46  ;;  %4848 = vadd.xlane.f32.xlu1 %v4847_v59  ;;  %v14549_v59 = vmul.f32 %v14369_v17, %v14369_v17 }
 0x677   : > { %18116 = vst [vmem:[#allocation33_spill] sm:$0xff] %v14549_v59 }
 0x678   : > { %4851 = vadd.xlane.f32.xlu0 %v4850_v51  ;;  %v4962_v51 = vsel %vm1031_vm0, %v14543_v10, 0.0 }
 0x679   : > { %v4466_v27 = vpop.permute.xlu1 %4465  ;;  %4854 = vadd.xlane.f32.xlu1 %v4853_v43  ;;  %v14556_v43 = vmul.f32 %v14376_v8, %v14376_v8 }
 0x67a   : > { %9450 = vmatmul.mubr.msk.bf16.gmra.mrb[8].mxu1 %vm1031_vm0, %v4466_v27  ;;  %v4965_v27 = vsel %vm1031_vm0, %v14549_v59, 0.0 }
 0x67b   : > { %18117 = vst [vmem:[#allocation51_spill] sm:$0xff] %v14556_v43 }
 0x67c   : > { %4857 = vadd.xlane.f32.xlu0 %v4856_v1  ;;  %v14562_v1 = vmul.f32 %v14379_v32, %v14379_v32 }
 0x67d   : > { %v4468_v2 = vpop.permute.xlu0 %4467  ;;  %4860 = vadd.xlane.f32.xlu1 %v4859_v0 }
 0x67e   : > { %9453 = vmatprep.mubr.msk.bf16.mxu1 %vm1031_vm0, %v4468_v2  ;;  %18118 = vst [vmem:[#allocation34_spill] sm:$0xff] %v14562_v1  ;;  %v4968_v2 = vsel %vm1031_vm0, %v14556_v43, 0.0 }
 0x680   : > { %4863 = vadd.xlane.f32.xlu0 %v4862_v36  ;;  %v14569_v36 = vmul.f32 %v14386_v37, %v14386_v37 }
 0x681   : > { %4866 = vadd.xlane.f32.xlu1 %v4865_v48  ;;  %v4971_v48 = vsel %vm1031_vm0, %v14562_v1, 0.0 }
 0x682   : > { %v4470_v54 = vpop.permute.xlu1 %4469  ;;  %18119 = vst [vmem:[#allocation95_spill] sm:$0xff] %v14569_v36 }
 0x683   : > { %9454 = vmatmul.mubr.msk.bf16.gmra.mrb[12].mxu1 %vm1031_vm0, %v4470_v54  ;;  %v14575_v54 = vmul.f32 %v14389_v38, %v14389_v38 }
 0x684   : > { %4869 = vadd.xlane.f32.xlu0 %v4868_v33 }
 0x685   : > { %4872 = vadd.xlane.f32.xlu1 %v4871_v62  ;;  %18120 = vst [vmem:[#allocation32_spill] sm:$0xff] %v14575_v54  ;;  %v4974_v62 = vsel %vm1031_vm0, %v14569_v36, 0.0 }
 0x686   : > { %v4472_v3 = vpop.permute.xlu0 %4471 }
 0x687   : > { %9457 = vmatprep.mubr.msk.bf16.mxu1 %vm1031_vm0, %v4472_v3  ;;  %v14582_v3 = vmul.f32 %v14396_v14, %v14396_v14 }
 0x688   : > { %4875 = vadd.xlane.f32.xlu0 %v4874_v29  ;;  %v4977_v29 = vsel %vm1031_vm0, %v14575_v54, 0.0 }
 0x689   : > { %v4474_v58 = vpop.permute.xlu1 %4473  ;;  %4878 = vadd.xlane.f32.xlu1 %v4877_v25  ;;  %18121 = vst [vmem:[#allocation96_spill] sm:$0xff] %v14582_v3  ;;  %v14588_v25 = vmul.f32 %v14399_v6, %v14399_v6 }
 0x68b   : > { %9458 = vmatmul.mubr.msk.bf16.gmra.mrb[16].mxu1 %vm1031_vm0, %v4474_v58  ;;  %18122 = vst [vmem:[#allocation50_spill] sm:$0xff] %v14588_v25 }
 0x68c   : > { %4945 = vadd.xlane.f32.xlu0 %v4944_v18  ;;  %v4980_v18 = vsel %vm1031_vm0, %v14582_v3, 0.0 }
 0x68d   : > { %v4476_v28 = vpop.permute.xlu0 %4475  ;;  %4948 = vadd.xlane.f32.xlu1 %v4947_v39  ;;  %v14595_v39 = vmul.f32 %v14407_v16, %v14407_v16 }
 0x68e   : > { %9461 = vmatprep.mubr.msk.bf16.mxu1 %vm1031_vm0, %v4476_v28  ;;  %v4983_v28 = vsel %vm1031_vm0, %v14588_v25, 0.0 }
 0x68f   : > { %v4478_v31 = vpop.permute.xlu1 %4477  ;;  %18123 = vst [vmem:[#allocation35_spill] sm:$0xff] %v14595_v39 }
 0x690   : > { %4951 = vadd.xlane.f32.xlu0 %v4950_v5  ;;  %v14601_v5 = vmul.f32 %v14410_v40, %v14410_v40 }
 0x691   : > { %4954 = vadd.xlane.f32.xlu1 %v4953_v49  ;;  %v4986_v49 = vsel %vm1031_vm0, %v14595_v39, 0.0 }
 0x692   : > { %18124 = vst [vmem:[#allocation52_spill] sm:$0xff] %v14601_v5 }
 0x693   : > { %9462 = vmatmul.mubr.msk.bf16.gmra.mrb[20].mxu1 %vm1031_vm0, %v4478_v31  ;;  %v4480_v46 = vpop.permute.xlu0 %4479  ;;  %v14607_v31 = vmul.f32 %v14417_v24, %v14417_v24 }
 0x694   : > { %4957 = vadd.xlane.f32.xlu0 %v4956_v15  ;;  %9465 = vmatprep.mubr.msk.bf16.mxu1 %vm1031_vm0, %v4480_v46  ;;  %v9931_v15 = vld [vmem:[%s17429_s4 + $0x80] sm:$0xff]   ;;  %v14616_v46 = vmul.f32 %v14421_v63, %v14421_v63 }
 0x695   : > { %4960 = vadd.xlane.f32.xlu1 %v4959_v44  ;;  %18125 = vst [vmem:[#allocation53_spill] sm:$0xff] %v14607_v31  ;;  %v4989_v44 = vsel %vm1031_vm0, %v14601_v5, 0.0  ;;  %9473 = vmatprep.subr.bf16.mxu0 %v9931_v15 }
 0x696   : > { %18126 = vst [vmem:[#allocation55_spill] sm:$0xff] %v14616_v46  ;;  %9474 = vmatpush3.bf16.msra.mxu0 %v9931_v15  ;;  %v9934_v15 = vld [vmem:[%s17429_s4 + $0x98] sm:$0xff]  }
 0x697   : > { %v4482_v0 = vpop.permute.xlu1 %4481 }
 0x698   : > { %4963 = vadd.xlane.f32.xlu0 %v4962_v51  ;;  %v4992_v51 = vsel %vm1031_vm0, %v14607_v31, 0.0 }
 0x699   : > { %4966 = vadd.xlane.f32.xlu1 %v4965_v27  ;;  %v14622_v27 = vmul.f32 %v14428_v34, %v14428_v34 }
 0x69b   : > { %9466 = vmatmul.mubr.msk.bf16.gmra.mrb[24].mxu1 %vm1031_vm0, %v4482_v0  ;;  %v4484_v33 = vpop.permute.xlu0 %4483  ;;  %18127 = vst [vmem:[#allocation41_spill] sm:$0xff] %v14622_v27  ;;  %v9932_v0 = vld [vmem:[%s17429_s4 + $0x88] sm:$0xff]  }
 0x69c   : > { %4969 = vadd.xlane.f32.xlu0 %v4968_v2  ;;  %9469 = vmatprep.mubr.msk.bf16.mxu1 %vm1031_vm0, %v4484_v33  ;;  %v4995_v2 = vsel %vm1031_vm0, %v14616_v46, 0.0  ;;  %v4998_v33 = vsel %vm1031_vm0, %v14622_v27, 0.0 }
 0x69d   : > { %4972 = vadd.xlane.f32.xlu1 %v4971_v48  ;;  %v14631_v48 = vmul.f32 %v14431_v52, %v14431_v52  ;;  %9475 = vmatprep.subr.bf16.mxu0 %v9932_v0 }
 0x69e   : > { %9476 = vmatpush3.bf16.msra.mxu0 %v9932_v0 }
 0x69f   : > { %v4486_v58 = vpop.permute.xlu1 %4485  ;;  %18128 = vst [vmem:[#allocation56_spill] sm:$0xff] %v14631_v48 }
 0x6a0   : > { %4975 = vadd.xlane.f32.xlu0 %v4974_v62  ;;  %v14637_v62 = vmul.f32 %v14439_v22, %v14439_v22 }
 0x6a1   : > { %4978 = vadd.xlane.f32.xlu1 %v4977_v29  ;;  %v9933_v29 = vld [vmem:[%s17429_s4 + $0x90] sm:$0xff]  }
 0x6a2   : > { %18129 = vst [vmem:[#allocation9_spill] sm:$0xff] %v14637_v62  ;;  %9477 = vmatprep.subr.bf16.mxu0 %v9933_v29 }
 0x6a3   : > { %9470 = vmatmul.mubr.msk.bf16.gmra.mrb[28].mxu1 %vm1031_vm0, %v4486_v58  ;;  %v5001_v58 = vsel %vm1031_vm0, %v14631_v48, 0.0  ;;  %9478 = vmatpush3.bf16.msra.mxu0 %v9933_v29  ;;  %v14673_v29 = vmul.f32 %v14464_v60, %v14464_v60 }
 0x6a4   : > { %4981 = vadd.xlane.f32.xlu0 %v4980_v18  ;;  %v14646_v18 = vmul.f32 %v14442_v47, %v14442_v47  ;;  %9479 = vmatprep.subr.bf16.mxu0 %v9934_v15 }
 0x6a5   : > { %4984 = vadd.xlane.f32.xlu1 %v4983_v28  ;;  %v5004_v28 = vsel %vm1031_vm0, %v14637_v62, 0.0  ;;  %18134 = vst [vmem:[#allocation19_spill] sm:$0xff] %v14673_v29 }
 0x6a6   : > { %18130 = vst [vmem:[#allocation86_spill] sm:$0xff] %v14646_v18 }
 0x6a7   : > { %9480 = vmatpush3.bf16.msra.mxu0 %v9934_v15  ;;  %v5019_v15 = vsel %vm1031_vm0, %v14673_v29, 0.0  ;;  %v14709_v29 = vmul.f32 %v14497_v20, %v14497_v20 }
 0x6a8   : > { %4987 = vadd.xlane.f32.xlu0 %v4986_v49  ;;  %v14652_v49 = vmul.f32 %v14450_v57, %v14450_v57 }
 0x6a9   : > { %4990 = vadd.xlane.f32.xlu1 %v4989_v44  ;;  %v5007_v44 = vsel %vm1031_vm0, %v14646_v18, 0.0  ;;  %18140 = vst [vmem:[#allocation15_spill] sm:$0xff] %v14709_v29 }
 0x6aa   : > { %18131 = vst [vmem:[#allocation87_spill] sm:$0xff] %v14652_v49  ;;  %v5010_v0 = vsel %vm1031_vm0, %v14652_v49, 0.0 }
 0x6ac   : > { %4993 = vadd.xlane.f32.xlu0 %v4992_v51  ;;  %v14661_v51 = vmul.f32 %v14453_v35, %v14453_v35 }
 0x6ad   : > { %4996 = vadd.xlane.f32.xlu1 %v4995_v2  ;;  %v14667_v2 = vmul.f32 %v14461_v13, %v14461_v13 }
 0x6ae   : > { %18132 = vst [vmem:[#allocation81_spill] sm:$0xff] %v14661_v51 }
 0x6af   : > { %18133 = vst [vmem:[#allocation23_spill] sm:$0xff] %v14667_v2 }
 0x6b0   : > { %4999 = vadd.xlane.f32.xlu0 %v4998_v33  ;;  %v5013_v33 = vsel %vm1031_vm0, %v14661_v51, 0.0  ;;  %v14697_v51 = vmul.f32 %v14486_v41, %v14486_v41 }
 0x6b1   : > { %5002 = vadd.xlane.f32.xlu1 %v5001_v58  ;;  %v5016_v58 = vsel %vm1031_vm0, %v14667_v2, 0.0 }
 0x6b2   : > { %18138 = vst [vmem:[#allocation71_spill] sm:$0xff] %v14697_v51 }
 0x6b4   : > { %5005 = vadd.xlane.f32.xlu0 %v5004_v28  ;;  %v14679_v28 = vmul.f32 %v14472_v12, %v14472_v12 }
 0x6b5   : > { %5008 = vadd.xlane.f32.xlu1 %v5007_v44  ;;  %v14685_v44 = vmul.f32 %v14475_v56, %v14475_v56 }
 0x6b6   : > { %18135 = vst [vmem:[#allocation17_spill] sm:$0xff] %v14679_v28 }
 0x6b7   : > { %18136 = vst [vmem:[#allocation89_spill] sm:$0xff] %v14685_v44  ;;  %v5025_v2 = vsel %vm1031_vm0, %v14685_v44, 0.0 }
 0x6b8   : > { %5011 = vadd.xlane.f32.xlu0 %v5010_v0  ;;  %v5022_v0 = vsel %vm1031_vm0, %v14679_v28, 0.0  ;;  %v5031_v28 = vsel %vm1031_vm0, %v14697_v51, 0.0 }
 0x6b9   : > { %5014 = vadd.xlane.f32.xlu1 %v5013_v33  ;;  %v14691_v33 = vmul.f32 %v14483_v19, %v14483_v19 }
 0x6bb   : > { %18137 = vst [vmem:[#allocation70_spill] sm:$0xff] %v14691_v33 }
 0x6bc   : > { %5017 = vadd.xlane.f32.xlu0 %v5016_v58  ;;  %v5028_v58 = vsel %vm1031_vm0, %v14691_v33, 0.0 }
 0x6bd   : > { %5020 = vadd.xlane.f32.xlu1 %v5019_v15  ;;  %v14703_v15 = vmul.f32 %v14494_v11, %v14494_v11 }
 0x6bf   : > { %18139 = vst [vmem:[#allocation85_spill] sm:$0xff] %v14703_v15 }
 0x6c0   : > { %5023 = vadd.xlane.f32.xlu0 %v5022_v0  ;;  %v5034_v0 = vsel %vm1031_vm0, %v14703_v15, 0.0 }
 0x6c1   : > { %5026 = vadd.xlane.f32.xlu1 %v5025_v2  ;;  %v5037_v2 = vsel %vm1031_vm0, %v14709_v29, 0.0 }
 0x6c4   : > { %5029 = vadd.xlane.f32.xlu0 %v5028_v58 }
 0x6c5   : > { %5032 = vadd.xlane.f32.xlu1 %v5031_v28 }
 0x6c8   : > { %5035 = vadd.xlane.f32.xlu0 %v5034_v0 }
 0x6c9   : > { %5038 = vadd.xlane.f32.xlu1 %v5037_v2 }
 0x6d5   : > { %v4786_v33 = vpop.xlane.xlu0 %4785 }
 0x6d6   : > { %v14813_v55 = vmul.f32 0.015625, %v4786_v33 }
 0x6d8   : > { %v5072_v33 = vmul.f32 %v14813_v55, %v14813_v55 }
 0x6d9   : > { %v4792_v44 = vpop.xlane.xlu0 %4791 }
 0x6da   : > { %5620 = vrot.lane.b32.xlu1 %v14349_v26, %s10724_s16 }
 0x6dd   : > { %v4795_v51 = vpop.xlane.xlu0 %4794 }
 0x6de   : > { %v4789_v49 = vpop.xlane.xlu1 %4788  ;;  %5618 = vrot.lane.b32.xlu0 %v14336_v9, %s10724_s16  ;;  %5622 = vrot.lane.b32.xlu1 %v14341_v23, %s10724_s16 }
 0x6e1   : > { %v4798_v28 = vpop.xlane.xlu0 %4797 }
 0x6e2   : > { %v4801_v58 = vpop.xlane.xlu1 %4800  ;;  %5624 = vrot.lane.b32.xlu1 %v14346_v50, %s10724_s16  ;;  %5626 = vrot.lane.b32.xlu0 %v14356_v45, %s10724_s16  ;;  %v14827_v21 = vmul.f32 0.015625, %v4798_v28 }
 0x6e3   : > { %v14833_v7 = vmul.f32 0.015625, %v4801_v58 }
 0x6e5   : > { %v4804_v0 = vpop.xlane.xlu0 %4803 }
 0x6e6   : > { %v14725_v2 = vpop.xlane.xlu1 %4806  ;;  %5628 = vrot.lane.b32.xlu1 %v14359_v53, %s10724_s16  ;;  %5630 = vrot.lane.b32.xlu0 %v14366_v4, %s10724_s16 }
 0x6e7   : > { %v14856_v28 = vmul.f32 0.015625, %v14725_v2 }
 0x6e9   : > { %v14731_v29 = vpop.xlane.xlu0 %4809 }
 0x6ea   : > { %v14733_v15 = vpop.xlane.xlu1 %4812  ;;  %5632 = vrot.lane.b32.xlu1 %v14369_v17, %s10724_s16  ;;  %5634 = vrot.lane.b32.xlu0 %v14376_v8, %s10724_s16 }
 0x6ed   : > { %v14739_v18 = vpop.xlane.xlu0 %4815 }
 0x6ee   : > { %v14741_v62 = vpop.xlane.xlu1 %4818  ;;  %5636 = vrot.lane.b32.xlu1 %v14379_v32, %s10724_s16  ;;  %5638 = vrot.lane.b32.xlu0 %v14386_v37, %s10724_s16 }
 0x6f1   : > { %v14747_v48 = vpop.xlane.xlu0 %4821 }
 0x6f2   : > { %v14749_v27 = vpop.xlane.xlu1 %4824  ;;  %5640 = vrot.lane.b32.xlu1 %v14389_v38, %s10724_s16  ;;  %5642 = vrot.lane.b32.xlu0 %v14396_v14, %s10724_s16 }
 0x6f5   : > { %v14755_v46 = vpop.xlane.xlu0 %4827 }
 0x6f6   : > { %v14757_v31 = vpop.xlane.xlu1 %4830  ;;  %5644 = vrot.lane.b32.xlu1 %v14399_v6, %s10724_s16  ;;  %5646 = vrot.lane.b32.xlu0 %v14407_v16, %s10724_s16 }
 0x6f9   : > { %v14763_v5 = vpop.xlane.xlu0 %4833 }
 0x6fa   : > { %v14765_v39 = vpop.xlane.xlu1 %4836  ;;  %5648 = vrot.lane.b32.xlu1 %v14410_v40, %s10724_s16  ;;  %5650 = vrot.lane.b32.xlu0 %v14417_v24, %s10724_s16 }
 0x6fd   : > { %v14771_v25 = vpop.xlane.xlu0 %4839 }
 0x6fe   : > { %v14773_v3 = vpop.xlane.xlu1 %4842  ;;  %5652 = vrot.lane.b32.xlu1 %v14421_v63, %s10724_s16  ;;  %5654 = vrot.lane.b32.xlu0 %v14428_v34, %s10724_s16 }
 0x701   : > { %v14779_v54 = vpop.xlane.xlu0 %4845 }
 0x702   : > { %v14781_v36 = vpop.xlane.xlu1 %4848  ;;  %5656 = vrot.lane.b32.xlu1 %v14431_v52, %s10724_s16  ;;  %5658 = vrot.lane.b32.xlu0 %v14439_v22, %s10724_s16 }
 0x705   : > { %v14787_v1 = vpop.xlane.xlu0 %4851 }
 0x706   : > { %v14789_v43 = vpop.xlane.xlu1 %4854  ;;  %5660 = vrot.lane.b32.xlu1 %v14442_v47, %s10724_s16  ;;  %5662 = vrot.lane.b32.xlu0 %v14450_v57, %s10724_s16 }
 0x707   : > { %18141 = vst [vmem:[#allocation72_spill] sm:$0xff] %v14789_v43 }
 0x709   : > { %v14795_v59 = vpop.xlane.xlu0 %4857 }
 0x70a   : > { %18142 = vst [vmem:[#allocation10_spill] sm:$0xff] %v14795_v59  ;;  %v14797_v10 = vpop.xlane.xlu1 %4860  ;;  %5664 = vrot.lane.b32.xlu1 %v14453_v35, %s10724_s16  ;;  %5666 = vrot.lane.b32.xlu0 %v14461_v13, %s10724_s16  ;;  %v14821_v35 = vmul.f32 0.015625, %v4792_v44  ;;  %v14823_v13 = vmul.f32 0.015625, %v4795_v51  ;;  %v14847_v51 = vmul.f32 0.015625, %v4804_v0 }
 0x70b   : > { %18143 = vst [vmem:[#allocation69_spill] sm:$0xff] %v14797_v10 }
 0x70c   : > { %v5075_v44 = vmul.f32 %v14823_v13, %v14823_v13  ;;  %v14878_v0 = vmul.f32 %v14847_v51, %v14847_v51 }
 0x70d   : > { %v14803_v42 = vpop.xlane.xlu0 %4863 }
 0x70e   : > { %18144 = vst [vmem:[#allocation20_spill] sm:$0xff] %v14803_v42  ;;  %v14805_v61 = vpop.xlane.xlu1 %4866  ;;  %5668 = vrot.lane.b32.xlu1 %v14464_v60, %s10724_s16  ;;  %5670 = vrot.lane.b32.xlu0 %v14472_v12, %s10724_s16  ;;  %v14825_v60 = vmul.f32 0.015625, %v4789_v49  ;;  %v5076_v49 = vmul.f32 %v14827_v21, %v14827_v21 }
 0x70f   : > { %18145 = vst [vmem:[#allocation73_spill] sm:$0xff] %v14805_v61  ;;  %v14883_v61 = vmul.f32 0.015625, %v14739_v18 }
 0x711   : > { %v14811_v57 = vpop.xlane.xlu0 %4869  ;;  %18152 = vst [vmem:[#allocation38_spill] sm:$0xff] %v14883_v61  ;;  %v14911_v47 = vmul.f32 %v14883_v61, %v14883_v61 }
 0x712   : > { %18146 = vst [vmem:[#allocation16_spill] sm:$0xff] %v14811_v57  ;;  %v14815_v30 = vpop.xlane.xlu1 %4872  ;;  %5672 = vrot.lane.b32.xlu1 %v14475_v56, %s10724_s16  ;;  %5674 = vrot.lane.b32.xlu0 %v14483_v19, %s10724_s16  ;;  %v5074_v19 = vmul.f32 %v14821_v35, %v14821_v35  ;;  %v14865_v56 = vmul.f32 0.015625, %v14731_v29 }
 0x713   : > { %18147 = vst [vmem:[#allocation84_spill] sm:$0xff] %v14815_v30 }
 0x714   : > { %18150 = vst [vmem:[#allocation21_spill] sm:$0xff] %v14865_v56  ;;  %v14896_v10 = vmul.f32 %v14865_v56, %v14865_v56  ;;  %v14920_v56 = vmul.f32 0.015625, %v14749_v27 }
 0x715   : > { %v14829_v12 = vpop.xlane.xlu0 %4875 }
 0x716   : > { %18148 = vst [vmem:[#allocation88_spill] sm:$0xff] %v14829_v12  ;;  %v14835_v30 = vpop.xlane.xlu1 %4878  ;;  %5676 = vrot.lane.b32.xlu1 %v14486_v41, %s10724_s16  ;;  %5678 = vrot.lane.b32.xlu0 %v14494_v11, %s10724_s16  ;;  %v5073_v11 = vmul.f32 %v14825_v60, %v14825_v60  ;;  %v5077_v41 = vmul.f32 %v14833_v7, %v14833_v7  ;;  %v14872_v12 = vmul.f32 0.015625, %v14733_v15 }
 0x717   : > { %18149 = vst [vmem:[#allocation11_spill] sm:$0xff] %v14835_v30  ;;  %v14887_v15 = vmul.f32 %v14856_v28, %v14856_v28 }
 0x718   : > { %18151 = vst [vmem:[#allocation37_spill] sm:$0xff] %v14872_v12  ;;  %v14905_v43 = vmul.f32 %v14872_v12, %v14872_v12 }
 0x719   : > { %v4946_v30 = vpop.xlane.xlu0 %4945 }
 0x71a   : > { %v5040_v58 = vmul.f32 0.015625, %v4946_v30  ;;  %v4949_v57 = vpop.xlane.xlu1 %4948  ;;  %5680 = vrot.lane.b32.xlu1 %v14497_v20, %s10724_s16  ;;  %v14892_v20 = vmul.f32 0.015625, %v14741_v62 }
 0x71b   : > { %v5041_v42 = vmul.f32 0.015625, %v4949_v57  ;;  %v14901_v57 = vmul.f32 0.015625, %v14747_v48 }
 0x71c   : > { %v5104_v2 = vsub.f32 %v5040_v58, %v5072_v33 }
 0x71d   : > { %v5105_v29 = vsub.f32 %v5041_v42, %v5073_v11  ;;  %v4952_v59 = vpop.xlane.xlu0 %4951  ;;  %v14917_v11 = vmul.f32 %v14892_v20, %v14892_v20  ;;  %v14926_v12 = vmul.f32 %v14901_v57, %v14901_v57 }
 0x71e   : > { %v5136_v33 = vmax.f32 %v5104_v2, 0.0  ;;  %v5042_v58 = vmul.f32 0.015625, %v4952_v59  ;;  %v4955_v30 = vpop.xlane.xlu1 %4954  ;;  %v14935_v59 = vmul.f32 %v14920_v56, %v14920_v56 }
 0x71f   : > { %v5137_v18 = vmax.f32 %v5105_v29, 0.0  ;;  %v5043_v42 = vmul.f32 0.015625, %v4955_v30  ;;  %v14929_v30 = vmul.f32 0.015625, %v14755_v46 }
 0x720   : > { %v5168_v62 = vadd.f32 1e-05, %v5136_v33  ;;  %v5106_v2 = vsub.f32 %v5042_v58, %v5074_v19 }
 0x721   : > { %v5169_v32 = vadd.f32 1e-05, %v5137_v18  ;;  %v5107_v48 = vsub.f32 %v5043_v42, %v5075_v44  ;;  %v4958_v29 = vpop.xlane.xlu0 %4957  ;;  %v14938_v44 = vmul.f32 0.015625, %v14757_v31  ;;  %v14943_v42 = vmul.f32 0.015625, %v14763_v5 }
 0x722   : > { %10203 = vrsqrt.f32 %v5168_v62  ;;  %v5138_v61 = vmax.f32 %v5106_v2, 0.0  ;;  %v5044_v37 = vmul.f32 0.015625, %v4958_v29  ;;  %v4961_v27 = vpop.xlane.xlu1 %4960 }
 0x723   : > { %10205 = vrsqrt.f32 %v5169_v32  ;;  %v5139_v33 = vmax.f32 %v5107_v48, 0.0  ;;  %v5045_v58 = vmul.f32 0.015625, %v4961_v27  ;;  %18153 = vst [vmem:[#allocation36_spill] sm:$0xff] %v14938_v44  ;;  %18154 = vst [vmem:[#allocation54_spill] sm:$0xff] %v14943_v42  ;;  %v14947_v48 = vmul.f32 %v14929_v30, %v14929_v30 }
 0x724   : > { %v5170_v18 = vadd.f32 1e-05, %v5138_v61  ;;  %v5108_v46 = vsub.f32 %v5044_v37, %v5076_v49  ;;  %v14953_v5 = vmul.f32 %v14938_v44, %v14938_v44 }
 0x725   : > { %v5171_v2 = vadd.f32 1e-05, %v5139_v33  ;;  %v5109_v29 = vsub.f32 %v5045_v58, %v5077_v41  ;;  %v4964_v32 = vpop.xlane.xlu0 %4963  ;;  %v14956_v41 = vmul.f32 0.015625, %v14765_v39 }
 0x726   : > { %10207 = vrsqrt.f32 %v5170_v18  ;;  %v5140_v27 = vmax.f32 %v5108_v46, 0.0  ;;  %v5046_v19 = vmul.f32 0.015625, %v4964_v32  ;;  %v4967_v31 = vpop.xlane.xlu1 %4966  ;;  %v14963_v46 = vmul.f32 %v14943_v42, %v14943_v42 }
 0x727   : > { %10209 = vrsqrt.f32 %v5171_v2  ;;  %v5141_v61 = vmax.f32 %v5109_v29, 0.0  ;;  %v5047_v49 = vmul.f32 0.015625, %v4967_v31 }
 0x728   : > { %v5172_v33 = vadd.f32 1e-05, %v5140_v27  ;;  %v5110_v58 = vsub.f32 %v5046_v19, %v14878_v0  ;;  %v14969_v0 = vmul.f32 0.015625, %v14771_v25 }
 0x729   : > { %v5173_v2 = vadd.f32 1e-05, %v5141_v61  ;;  %v5111_v29 = vsub.f32 %v5047_v49, %v14887_v15  ;;  %v4970_v32 = vpop.xlane.xlu0 %4969  ;;  %v14973_v61 = vmul.f32 %v14956_v41, %v14956_v41  ;;  %v5249_v15 = vsub.f32 %v14421_v63, %v14956_v41 }
 0x72a   : > { %10211 = vrsqrt.f32 %v5172_v33  ;;  %v5142_v39 = vmax.f32 %v5110_v58, 0.0  ;;  %v5048_v37 = vmul.f32 0.015625, %v4970_v32  ;;  %v4973_v27 = vpop.xlane.xlu1 %4972  ;;  %v14979_v32 = vmul.f32 0.015625, %v14773_v3 }
 0x72b   : > { %10213 = vrsqrt.f32 %v5173_v2  ;;  %v5143_v19 = vmax.f32 %v5111_v29, 0.0  ;;  %v5049_v18 = vmul.f32 0.015625, %v4973_v27  ;;  %v18155_v27 = vsub.f32 %v14336_v9, %v14813_v55 }
 0x72c   : > { %v10204_v62 = vpop.eup %10203  ;;  %v5174_v49 = vadd.f32 1e-05, %v5142_v39  ;;  %v5112_v33 = vsub.f32 %v5048_v37, %v14896_v10  ;;  %v18156_v39 = vsub.f32 %v14349_v26, %v14825_v60  ;;  %v14990_v3 = vmul.f32 %v14969_v0, %v14969_v0 }
 0x72d   : > { %v10206_v58 = vpop.eup %10205  ;;  %v5175_v25 = vadd.f32 1e-05, %v5143_v19  ;;  %v5113_v2 = vsub.f32 %v5049_v18, %v14905_v43  ;;  %v4976_v29 = vpop.xlane.xlu0 %4975  ;;  %v5264_v31 = vmul.f32 %v10204_v62, %v18155_v27  ;;  %v5250_v9 = vsub.f32 %v14428_v34, %v14969_v0 }
 0x72e   : > { %10215 = vrsqrt.f32 %v5174_v49  ;;  %v5144_v42 = vmax.f32 %v5112_v33, 0.0  ;;  %v5050_v24 = vmul.f32 0.015625, %v4976_v29  ;;  %v4979_v44 = vpop.xlane.xlu1 %4978  ;;  %v5265_v10 = vmul.f32 %v10206_v58, %v18156_v39 }
 0x72f   : > { %10217 = vrsqrt.f32 %v5175_v25  ;;  %v5145_v37 = vmax.f32 %v5113_v2, 0.0  ;;  %v5051_v43 = vmul.f32 0.015625, %v4979_v44  ;;  %v14997_v26 = vmul.f32 %v14979_v32, %v14979_v32 }
 0x730   : > { %v10208_v18 = vpop.eup %10207  ;;  %v5176_v55 = vadd.f32 1e-05, %v5144_v42  ;;  %v5114_v62 = vsub.f32 %v5050_v24, %v14911_v47  ;;  %v5296_v19 = vpack.c.bf16 %v5265_v10, %v5264_v31  ;;  %v18157_v44 = vsub.f32 %v14341_v23, %v14821_v35 }
 0x731   : > { %v10210_v49 = vpop.eup %10209  ;;  %v5177_v60 = vadd.f32 1e-05, %v5145_v37  ;;  %v5115_v33 = vsub.f32 %v5051_v43, %v14917_v11  ;;  %v4982_v58 = vpop.xlane.xlu0 %4981  ;;  %v18158_v24 = vsub.f32 %v14346_v50, %v14823_v13  ;;  %v15008_v31 = vmul.f32 0.015625, %v14779_v54 }
 0x732   : > { %v5266_v25 = vmul.f32 %v10208_v18, %v18157_v44  ;;  %10219 = vrsqrt.f32 %v5176_v55  ;;  %v5146_v2 = vmax.f32 %v5114_v62, 0.0  ;;  %v5052_v29 = vmul.f32 0.015625, %v4982_v58  ;;  %v4985_v42 = vpop.xlane.xlu1 %4984  ;;  %9481 = vmatprep.mubr.msk.bf16.mxu0 %vm1031_vm0, %v5296_v19 }
 0x733   : > { %v5267_v47 = vmul.f32 %v10210_v49, %v18158_v24  ;;  %10221 = vrsqrt.f32 %v5177_v60  ;;  %v5147_v11 = vmax.f32 %v5115_v33, 0.0  ;;  %v5053_v27 = vmul.f32 0.015625, %v4985_v42 }
 0x734   : > { %v10212_v39 = vpop.eup %10211  ;;  %v5251_v23 = vsub.f32 %v14431_v52, %v14979_v32  ;;  %v5178_v35 = vadd.f32 1e-05, %v5146_v2  ;;  %v5116_v10 = vsub.f32 %v5052_v29, %v14926_v12  ;;  %v15014_v18 = vmul.f32 0.015625, %v14781_v36 }
 0x735   : > { %v5297_v37 = vpack.c.bf16 %v5267_v47, %v5266_v25  ;;  %v10214_v43 = vpop.eup %10213  ;;  %v5179_v50 = vadd.f32 1e-05, %v5147_v11  ;;  %v5117_v13 = vsub.f32 %v5053_v27, %v14935_v59  ;;  %v4988_v54 = vpop.xlane.xlu0 %4987  ;;  %v18159_v55 = vsub.f32 %v14356_v45, %v14827_v21 }
 0x736   : > { %10223 = vrsqrt.f32 %v5178_v35  ;;  %v5148_v19 = vmax.f32 %v5116_v10, 0.0  ;;  %v5054_v49 = vmul.f32 0.015625, %v4988_v54  ;;  %v4991_v60 = vpop.xlane.xlu1 %4990  ;;  %v18160_v12 = vsub.f32 %v14359_v53, %v14833_v7 }
 0x737   : > { %v5268_v62 = vmul.f32 %v10212_v39, %v18159_v55  ;;  %9482 = vmatmul.mubr.msk.bf16.vlgmr.msra.gmra.mrb[0].mxu0 %vm1031_vm0, %v5297_v37  ;;  %v15026_v36 = vmul.f32 %v15008_v31, %v15008_v31  ;;  %10225 = vrsqrt.f32 %v5179_v50  ;;  %v5149_v59 = vmax.f32 %v5117_v13, 0.0  ;;  %v18165_v13 = vld [vmem:[#allocation28_spill] sm:$0xff] }
 0x738   : > { %v5269_v33 = vmul.f32 %v10214_v43, %v18160_v12  ;;  %v5055_v58 = vmul.f32 0.015625, %v4991_v60  ;;  %v10216_v44 = vpop.eup %10215  ;;  %v5252_v45 = vsub.f32 %v14439_v22, %v15008_v31  ;;  %v5180_v21 = vadd.f32 1e-05, %v5148_v19 }
 0x739   : > { %v5118_v25 = vsub.f32 %v5054_v49, %v14947_v48  ;;  %v10218_v29 = vpop.eup %10217  ;;  %v15033_v53 = vmul.f32 %v15014_v18, %v15014_v18  ;;  %v5181_v7 = vadd.f32 1e-05, %v5149_v59  ;;  %v4994_v24 = vpop.xlane.xlu0 %4993  ;;  %v18161_v47 = vsub.f32 %v14366_v4, %v14847_v51 }
 0x73a   : > { %v5298_v2 = vpack.c.bf16 %v5269_v33, %v5268_v62  ;;  %v5119_v42 = vsub.f32 %v5055_v58, %v14953_v5  ;;  %10227 = vrsqrt.f32 %v5180_v21  ;;  %v5056_v39 = vmul.f32 0.015625, %v4994_v24  ;;  %v4997_v35 = vpop.xlane.xlu1 %4996  ;;  %v15040_v48 = vpop.f32.mrb[0].mxu1  ;;  %v18169_v58 = vld [vmem:[#allocation21_spill] sm:$0xff] }
 0x73b   : > { %v5270_v11 = vmul.f32 %v10216_v44, %v18161_v47  ;;  %v5150_v27 = vmax.f32 %v5118_v25, 0.0  ;;  %18162 = vst [vmem:[#allocation39_spill] sm:$0xff] %v15040_v48  ;;  %v18163_v10 = vsub.f32 %v14369_v17, %v14856_v28  ;;  %v15046_v43 = vmul.f32 0.015625, %v14787_v1  ;;  %v15048_v4 = vpop.f32.mrb[1].mxu1  ;;  %v18167_v28 = vld [vmem:[#allocation72_spill] sm:$0xff] }
 0x73c   : > { %9485 = vmatprep.mubr.msk.bf16.mxu0 %vm1031_vm0, %v5298_v2  ;;  %10229 = vrsqrt.f32 %v5181_v7  ;;  %v5151_v5 = vmax.f32 %v5119_v42, 0.0  ;;  %v5057_v50 = vmul.f32 0.015625, %v4997_v35  ;;  %18164 = vst [vmem:[#allocation40_spill] sm:$0xff] %v15048_v4  ;;  %v10220_v51 = vpop.eup %10219  ;;  %v5253_v54 = vsub.f32 %v18165_v13, %v15014_v18  ;;  %v15053_v19 = vpop.f32.mrb[2].mxu1  ;;  %v18172_v7 = vld [vmem:[#allocation37_spill] sm:$0xff] }
 0x73d   : > { %v5271_v37 = vmul.f32 %v10218_v29, %v18163_v10  ;;  %v5182_v55 = vadd.f32 1e-05, %v5150_v27  ;;  %v5120_v62 = vsub.f32 %v5056_v39, %v14963_v46  ;;  %18166 = vst [vmem:[#allocation42_spill] sm:$0xff] %v15053_v19  ;;  %v10222_v17 = vpop.eup %10221  ;;  %v15056_v60 = vmul.f32 0.015625, %v18167_v28  ;;  %v5000_v33 = vpop.xlane.xlu0 %4999  ;;  %v18171_v29 = vld [vmem:[#allocation93_spill] sm:$0xff]  ;;  %v18174_v39 = vld [vmem:[#allocation10_spill] sm:$0xff] }
 0x73e   : > { %v5183_v1 = vadd.f32 1e-05, %v5151_v5  ;;  %v5121_v12 = vsub.f32 %v5057_v50, %v14973_v61  ;;  %v15059_v59 = vpop.f32.mrb[3].mxu1  ;;  %v18170_v44 = vsub.f32 %v14376_v8, %v18169_v58  ;;  %v5058_v46 = vmul.f32 0.015625, %v5000_v33  ;;  %v5003_v2 = vpop.xlane.xlu1 %5002 }
 0x73f   : > { %v5299_v49 = vpack.c.bf16 %v5271_v37, %v5270_v11  ;;  %18168 = vst [vmem:[#allocation57_spill] sm:$0xff] %v15059_v59  ;;  %10231 = vrsqrt.f32 %v5182_v55  ;;  %v5152_v25 = vmax.f32 %v5120_v62, 0.0  ;;  %v18173_v42 = vsub.f32 %v18171_v29, %v18172_v7 }
 0x740   : > { %v5272_v21 = vmul.f32 %v10220_v51, %v18170_v44  ;;  %v5094_v61 = vmul.f32 %v15046_v43, %v15046_v43  ;;  %10233 = vrsqrt.f32 %v5183_v1  ;;  %v5153_v47 = vmax.f32 %v5121_v12, 0.0  ;;  %v10224_v27 = vpop.eup %10223 }
 0x741   : > { %9486 = vmatmul.mubr.msk.bf16.gmra.mrb[4].mxu0 %vm1031_vm0, %v5299_v49  ;;  %v5273_v24 = vmul.f32 %v10222_v17, %v18173_v42  ;;  %v5059_v11 = vmul.f32 0.015625, %v5003_v2  ;;  %v15071_v8 = vmul.f32 0.015625, %v18174_v39  ;;  %v5184_v35 = vadd.f32 1e-05, %v5152_v25  ;;  %v10226_v5 = vpop.eup %10225  ;;  %v5006_v62 = vpop.xlane.xlu0 %5005  ;;  %v18175_v49 = vld [vmem:[#allocation29_spill] sm:$0xff]  ;;  %v18176_v17 = vld [vmem:[#allocation38_spill] sm:$0xff] }
 0x742   : > { %v5122_v10 = vsub.f32 %v5058_v46, %v14990_v3  ;;  %v5095_v50 = vmul.f32 %v15056_v60, %v15056_v60  ;;  %v5185_v51 = vadd.f32 1e-05, %v5153_v47  ;;  %v18177_v28 = vsub.f32 %v18175_v49, %v18176_v17  ;;  %v5009_v58 = vpop.xlane.xlu1 %5008 }
 0x743   : > { %v5300_v37 = vpack.c.bf16 %v5273_v24, %v5272_v21  ;;  %v5123_v55 = vsub.f32 %v5059_v11, %v14997_v26  ;;  %10235 = vrsqrt.f32 %v5184_v35  ;;  %v5060_v33 = vmul.f32 0.015625, %v5006_v62  ;;  %v18179_v21 = vld [vmem:[#allocation69_spill] sm:$0xff] }
 0x744   : > { %v5274_v1 = vmul.f32 %v10224_v27, %v18177_v28  ;;  %v5154_v12 = vmax.f32 %v5122_v10, 0.0  ;;  %v18178_v3 = vsub.f32 %v14389_v38, %v14892_v20  ;;  %v15085_v25 = vmul.f32 0.015625, %v18179_v21  ;;  %v10228_v2 = vpop.eup %10227  ;;  %v15090_v24 = vpop.f32.mrb[4].mxu1  ;;  %v18181_v27 = vld [vmem:[#allocation20_spill] sm:$0xff] }
 0x745   : > { %9489 = vmatprep.mubr.msk.bf16.mxu0 %vm1031_vm0, %v5300_v37  ;;  %10237 = vrsqrt.f32 %v5185_v51  ;;  %v5155_v26 = vmax.f32 %v5123_v55, 0.0  ;;  %v5061_v46 = vmul.f32 0.015625, %v5009_v58  ;;  %v5096_v29 = vmul.f32 %v15071_v8, %v15071_v8  ;;  %18180 = vst [vmem:[#allocation43_spill] sm:$0xff] %v15090_v24  ;;  %v15096_v35 = vpop.f32.mrb[5].mxu1  ;;  %v5012_v10 = vpop.xlane.xlu0 %5011  ;;  %v15569_v24 = vld [vmem:[%s14333_s27 + $0x50] sm:$0xff] }
 0x746   : > { %v5275_v44 = vmul.f32 %v10226_v5, %v18178_v3  ;;  %v5186_v7 = vadd.f32 1e-05, %v5154_v12  ;;  %v5124_v42 = vsub.f32 %v5060_v33, %v15026_v36  ;;  %v10230_v11 = vpop.eup %10229  ;;  %v15093_v38 = vmul.f32 0.015625, %v18181_v27  ;;  %18182 = vst [vmem:[#allocation44_spill] sm:$0xff] %v15096_v35  ;;  %v15101_v36 = vpop.f32.mrb[6].mxu1  ;;  %v18187_v12 = vld [vmem:[#allocation73_spill] sm:$0xff] }
 0x747   : > { %v5187_v20 = vadd.f32 1e-05, %v5155_v26  ;;  %v5125_v39 = vsub.f32 %v5061_v46, %v15033_v53  ;;  %v18183_v37 = vsub.f32 %v14396_v14, %v14901_v57  ;;  %18184 = vst [vmem:[#allocation58_spill] sm:$0xff] %v15101_v36  ;;  %v5062_v55 = vmul.f32 0.015625, %v5012_v10  ;;  %v5015_v62 = vpop.xlane.xlu1 %5014  ;;  %v15109_v14 = vpop.f32.mrb[7].mxu1 }
 0x748   : > { %v5301_v47 = vpack.c.bf16 %v5275_v44, %v5274_v1  ;;  %10239 = vrsqrt.f32 %v5186_v7  ;;  %v5156_v51 = vmax.f32 %v5124_v42, 0.0  ;;  %v18185_v49 = vsub.f32 %v14399_v6, %v14920_v56  ;;  %18186 = vst [vmem:[#allocation45_spill] sm:$0xff] %v15109_v14 }
 0x749   : > { %v5276_v5 = vmul.f32 %v10228_v2, %v18183_v37  ;;  %v5097_v53 = vmul.f32 %v15085_v25, %v15085_v25  ;;  %10241 = vrsqrt.f32 %v5187_v20  ;;  %v5157_v28 = vmax.f32 %v5125_v39, 0.0  ;;  %v10232_v57 = vpop.eup %10231  ;;  %v5018_v46 = vpop.xlane.xlu0 %5017  ;;  %v18191_v39 = vld [vmem:[#allocation16_spill] sm:$0xff] }
 0x74a   : > { %9490 = vmatmul.mubr.msk.bf16.gmra.mrb[8].mxu0 %vm1031_vm0, %v5301_v47  ;;  %v5277_v17 = vmul.f32 %v10230_v11, %v18185_v49  ;;  %v5063_v1 = vmul.f32 0.015625, %v5015_v62  ;;  %v15112_v33 = vmul.f32 0.015625, %v18187_v12  ;;  %v5188_v58 = vadd.f32 1e-05, %v5156_v51  ;;  %v10234_v21 = vpop.eup %10233  ;;  %v18192_v51 = vld [vmem:[#allocation84_spill] sm:$0xff] }
 0x74b   : > { %v5126_v3 = vsub.f32 %v5062_v55, %v5094_v61  ;;  %v5098_v6 = vmul.f32 %v15093_v38, %v15093_v38  ;;  %v5189_v56 = vadd.f32 1e-05, %v5157_v28  ;;  %v18188_v2 = vsub.f32 %v14407_v16, %v14929_v30  ;;  %v5021_v11 = vpop.xlane.xlu1 %5020  ;;  %v18189_v61 = vld [vmem:[#allocation36_spill] sm:$0xff] }
 0x74c   : > { %v5302_v44 = vpack.c.bf16 %v5277_v17, %v5276_v5  ;;  %v5127_v26 = vsub.f32 %v5063_v1, %v5095_v50  ;;  %10243 = vrsqrt.f32 %v5188_v58  ;;  %v5064_v47 = vmul.f32 0.015625, %v5018_v46  ;;  %v18195_v58 = vld [vmem:[#allocation92_spill] sm:$0xff] }
 0x74d   : > { %v5278_v7 = vmul.f32 %v10232_v57, %v18188_v2  ;;  %v5158_v42 = vmax.f32 %v5126_v3, 0.0  ;;  %v18190_v27 = vsub.f32 %v14410_v40, %v18189_v61  ;;  %v15124_v10 = vmul.f32 0.015625, %v18191_v39  ;;  %v10236_v5 = vpop.eup %10235  ;;  %v15129_v62 = vpop.f32.mrb[8].mxu1  ;;  %v18196_v3 = vld [vmem:[#allocation54_spill] sm:$0xff] }
 0x74e   : > { %9493 = vmatprep.mubr.msk.bf16.mxu0 %vm1031_vm0, %v5302_v44  ;;  %10245 = vrsqrt.f32 %v5189_v56  ;;  %v5159_v50 = vmax.f32 %v5127_v26, 0.0  ;;  %v5065_v37 = vmul.f32 0.015625, %v5021_v11  ;;  %v15127_v16 = vmul.f32 0.015625, %v18192_v51  ;;  %18193 = vst [vmem:[#allocation59_spill] sm:$0xff] %v15129_v62  ;;  %v15133_v57 = vpop.f32.mrb[9].mxu1  ;;  %v5024_v12 = vpop.xlane.xlu0 %5023  ;;  %v15535_v62 = vld [vmem:[%s14333_s27 + $0x48] sm:$0xff] }
 0x74f   : > { %v5279_v20 = vmul.f32 %v10234_v21, %v18190_v27  ;;  %v5190_v30 = vadd.f32 1e-05, %v5158_v42  ;;  %v5128_v55 = vsub.f32 %v5064_v47, %v5096_v29  ;;  %v10238_v17 = vpop.eup %10237  ;;  %v5099_v40 = vmul.f32 %v15112_v33, %v15112_v33  ;;  %18194 = vst [vmem:[#allocation60_spill] sm:$0xff] %v15133_v57  ;;  %v15138_v26 = vpop.f32.mrb[10].mxu1 }
 0x750   : > { %v5191_v28 = vadd.f32 1e-05, %v5159_v50  ;;  %v5129_v1 = vsub.f32 %v5065_v37, %v5097_v53  ;;  %v18197_v44 = vsub.f32 %v18195_v58, %v18196_v3  ;;  %18198 = vst [vmem:[#allocation61_spill] sm:$0xff] %v15138_v26  ;;  %v5066_v29 = vmul.f32 0.015625, %v5024_v12  ;;  %v5027_v46 = vpop.xlane.xlu1 %5026  ;;  %v15146_v47 = vpop.f32.mrb[11].mxu1  ;;  %v18200_v37 = vld [vmem:[#allocation88_spill] sm:$0xff] }
 0x751   : > { %v5303_v49 = vpack.c.bf16 %v5279_v20, %v5278_v7  ;;  %10247 = vrsqrt.f32 %v5190_v30  ;;  %v5160_v56 = vmax.f32 %v5128_v55, 0.0  ;;  %v5281_v2 = vmul.f32 %v10238_v17, %v5249_v15  ;;  %18199 = vst [vmem:[#allocation46_spill] sm:$0xff] %v15146_v47  ;;  %v18201_v17 = vld [vmem:[#allocation11_spill] sm:$0xff] }
 0x752   : > { %v5280_v21 = vmul.f32 %v10236_v5, %v18197_v44  ;;  %v5100_v53 = vmul.f32 %v15124_v10, %v15124_v10  ;;  %10249 = vrsqrt.f32 %v5191_v28  ;;  %v5161_v7 = vmax.f32 %v5129_v1, 0.0  ;;  %v10240_v11 = vpop.eup %10239  ;;  %v5030_v15 = vpop.xlane.xlu0 %5029  ;;  %v10567_v58 = vld [vmem:[%s14333_s27 + $0xb0] sm:$0xff] }
 0x753   : > { %9494 = vmatmul.mubr.msk.bf16.gmra.mrb[12].mxu0 %vm1031_vm0, %v5303_v49  ;;  %v5067_v42 = vmul.f32 0.015625, %v5027_v46  ;;  %v5101_v61 = vmul.f32 %v15127_v16, %v15127_v16  ;;  %v5192_v27 = vadd.f32 1e-05, %v5160_v56  ;;  %v5130_v20 = vsub.f32 %v5066_v29, %v5098_v6  ;;  %v10242_v50 = vpop.eup %10241 }
 0x754   : > { %v5304_v39 = vpack.c.bf16 %v5281_v2, %v5280_v21  ;;  %v15151_v5 = vmul.f32 0.015625, %v18200_v37  ;;  %v5193_v63 = vadd.f32 1e-05, %v5161_v7  ;;  %v5282_v51 = vmul.f32 %v10240_v11, %v5250_v9  ;;  %v5033_v49 = vpop.xlane.xlu1 %5032 }
 0x755   : > { %v5131_v41 = vsub.f32 %v5067_v42, %v5099_v40  ;;  %10251 = vrsqrt.f32 %v5192_v27  ;;  %v5162_v30 = vmax.f32 %v5130_v20, 0.0  ;;  %v5068_v55 = vmul.f32 0.015625, %v5030_v15 }
 0x756   : > { %9497 = vmatprep.mubr.msk.bf16.mxu0 %vm1031_vm0, %v5304_v39  ;;  %v5283_v6 = vmul.f32 %v10242_v50, %v5251_v23  ;;  %v15161_v28 = vmul.f32 0.015625, %v18201_v17  ;;  %10253 = vrsqrt.f32 %v5193_v63  ;;  %v5069_v1 = vmul.f32 0.015625, %v5033_v49  ;;  %v10244_v12 = vpop.eup %10243  ;;  %v15165_v3 = vpop.f32.mrb[12].mxu1  ;;  %v10569_v49 = vld [vmem:[%s14333_s27 + $0xc0] sm:$0xff] }
 0x757   : > { %v5163_v40 = vmax.f32 %v5131_v41, 0.0  ;;  %v5254_v34 = vsub.f32 %v10567_v58, %v15046_v43  ;;  %v5194_v0 = vadd.f32 1e-05, %v5162_v30  ;;  %v5132_v9 = vsub.f32 %v5068_v55, %v5100_v53  ;;  %18202 = vst [vmem:[#allocation47_spill] sm:$0xff] %v15165_v3  ;;  %v15169_v56 = vpop.f32.mrb[13].mxu1  ;;  %v5036_v29 = vpop.xlane.xlu0 %5035 }
 0x758   : > { %v5305_v44 = vpack.c.bf16 %v5283_v6, %v5282_v51  ;;  %v10246_v21 = vpop.eup %10245  ;;  %v5102_v52 = vmul.f32 %v15151_v5, %v15151_v5  ;;  %v5133_v23 = vsub.f32 %v5069_v1, %v5101_v61  ;;  %18203 = vst [vmem:[#allocation62_spill] sm:$0xff] %v15169_v56  ;;  %v5284_v46 = vmul.f32 %v10244_v12, %v5252_v45  ;;  %v15174_v2 = vpop.f32.mrb[14].mxu1  ;;  %v10568_v45 = vld [vmem:[%s14333_s27 + $0xb8] sm:$0xff]  ;;  %v10570_v1 = vld [vmem:[%s14333_s27 + $0xc8] sm:$0xff] }
 0x759   : > { %v5195_v32 = vadd.f32 1e-05, %v5163_v40  ;;  %10255 = vrsqrt.f32 %v5194_v0  ;;  %v5164_v43 = vmax.f32 %v5132_v9, 0.0  ;;  %18204 = vst [vmem:[#allocation63_spill] sm:$0xff] %v15174_v2  ;;  %v5070_v53 = vmul.f32 0.015625, %v5036_v29  ;;  %v5039_v7 = vpop.xlane.xlu1 %5038  ;;  %v15182_v22 = vpop.f32.mrb[15].mxu1 }
 0x75a   : > { %v5285_v42 = vmul.f32 %v10246_v21, %v5253_v54  ;;  %v5103_v11 = vmul.f32 %v15161_v28, %v15161_v28  ;;  %v5165_v61 = vmax.f32 %v5133_v23, 0.0  ;;  %v5071_v27 = vmul.f32 0.015625, %v5039_v7  ;;  %18205 = vst [vmem:[#allocation64_spill] sm:$0xff] %v15182_v22  ;;  %v9937_v22 = vld [vmem:[%s17429_s4 + $0xb0] sm:$0xff]   ;;  %v15513_v56 = vld [vmem:[%s14333_s27 + $0x38] sm:$0xff] }
 0x75b   : > { %9498 = vmatmul.mubr.msk.bf16.gmra.mrb[16].mxu0 %vm1031_vm0, %v5305_v44  ;;  %10257 = vrsqrt.f32 %v5195_v32  ;;  %v10248_v31 = vpop.eup %10247  ;;  %v5255_v20 = vsub.f32 %v10568_v45, %v15056_v60  ;;  %v5196_v39 = vadd.f32 1e-05, %v5164_v43  ;;  %v5134_v50 = vsub.f32 %v5070_v53, %v5102_v52  ;;  %v5619_v13 = vpop.permute.xlu0 %5618 }
 0x75c   : > { %v5306_v37 = vpack.c.bf16 %v5285_v42, %v5284_v46  ;;  %v10250_v63 = vpop.eup %10249  ;;  %v5197_v41 = vadd.f32 1e-05, %v5165_v61  ;;  %v5135_v18 = vsub.f32 %v5071_v27, %v5103_v11  ;;  %v5286_v54 = vmul.f32 %v10248_v31, %v5254_v34  ;;  %v10572_v42 = vld [vmem:[%s14333_s27 + $0xd8] sm:$0xff] }
 0x75d   : > { %10259 = vrsqrt.f32 %v5196_v39  ;;  %v5166_v15 = vmax.f32 %v5134_v50, 0.0  ;;  %v5621_v51 = vpop.permute.xlu1 %5620  ;;  %v5714_v30 = vsel %vm1031_vm0, %v5619_v13, 0.0  ;;  %v5287_v55 = vmul.f32 %v10250_v63, %v5255_v20 }
 0x75e   : > { %9501 = vmatprep.mubr.msk.bf16.mxu0 %vm1031_vm0, %v5306_v37  ;;  %v5256_v60 = vsub.f32 %v10569_v49, %v15071_v8  ;;  %10261 = vrsqrt.f32 %v5197_v41  ;;  %v5167_v6 = vmax.f32 %v5135_v18, 0.0  ;;  %v5717_v17 = vsel %vm1031_vm0, %v5621_v51, 0.0  ;;  %5715 = vadd.xlane.f32.xlu0 %v5714_v30  ;;  %v15193_v34 = vpop.f32.mrb[16].mxu1  ;;  %v10574_v41 = vld [vmem:[%s14333_s27 + $0xe8] sm:$0xff] }
 0x75f   : > { %v10252_v40 = vpop.eup %10251  ;;  %v5257_v12 = vsub.f32 %v10570_v1, %v15085_v25  ;;  %v5198_v58 = vadd.f32 1e-05, %v5166_v15  ;;  %18206 = vst [vmem:[#allocation65_spill] sm:$0xff] %v15193_v34  ;;  %5718 = vadd.xlane.f32.xlu1 %v5717_v17  ;;  %v5307_v0 = vpack.c.bf16 %v5287_v55, %v5286_v54  ;;  %v15195_v21 = vpop.f32.mrb[17].mxu1  ;;  %v10571_v25 = vld [vmem:[%s14333_s27 + $0xd0] sm:$0xff]  ;;  %v5259_v11 = vsub.f32 %v10572_v42, %v15112_v33  ;;  %v15483_v34 = vld [vmem:[%s14333_s27 + $0x18] sm:$0xff] }
 0x760   : > { %v10254_v9 = vpop.eup %10253  ;;  %v5199_v44 = vadd.f32 1e-05, %v5167_v6  ;;  %18207 = vst [vmem:[#allocation80_spill] sm:$0xff] %v15195_v21  ;;  %v5288_v8 = vmul.f32 %v10252_v40, %v5256_v60  ;;  %v5627_v52 = vpop.permute.xlu0 %5626  ;;  %v5258_v46 = vsub.f32 %v10571_v25, %v15093_v38  ;;  %v10573_v38 = vld [vmem:[%s14333_s27 + $0xe0] sm:$0xff]  ;;  %v5261_v18 = vsub.f32 %v10574_v41, %v15127_v16  ;;  %v10575_v6 = vld [vmem:[%s14333_s27 + $0xf0] sm:$0xff] }
 0x761   : > { %10263 = vrsqrt.f32 %v5198_v58  ;;  %v15197_v32 = vpop.f32.mrb[18].mxu1  ;;  %v5623_v23 = vpop.permute.xlu1 %5622  ;;  %v5289_v29 = vmul.f32 %v10254_v9, %v5257_v12  ;;  %v5260_v50 = vsub.f32 %v10573_v38, %v15124_v10  ;;  %v5726_v51 = vsel %vm1031_vm0, %v5627_v52, 0.0  ;;  %v10576_v12 = vld [vmem:[%s14333_s27 + $0xf8] sm:$0xff]  ;;  %v15476_v21 = vld [vmem:[%s14333_s27 + $0x10] sm:$0xff] }
 0x762   : > { %18208 = vst [vmem:[#allocation12_spill] sm:$0xff] %v15197_v32  ;;  %10265 = vrsqrt.f32 %v5199_v44  ;;  %v15202_v43 = vpop.f32.mrb[19].mxu1  ;;  %v5720_v53 = vsel %vm1031_vm0, %v5623_v23, 0.0  ;;  %v5262_v16 = vsub.f32 %v10575_v6, %v15151_v5  ;;  %v5263_v58 = vsub.f32 %v10576_v12, %v15161_v28 }
 0x763   : > { %9502 = vmatmul.mubr.msk.bf16.gmra.mrb[20].mxu0 %vm1031_vm0, %v5307_v0  ;;  %18209 = vst [vmem:[#allocation14_spill] sm:$0xff] %v15202_v43  ;;  %v10256_v7 = vpop.eup %10255  ;;  %5721 = vadd.xlane.f32.xlu0 %v5720_v53  ;;  %v5308_v61 = vpack.c.bf16 %v5289_v29, %v5288_v8 }
 0x764   : > { %v5290_v31 = vmul.f32 %v10256_v7, %v5258_v46  ;;  %v5631_v45 = vpop.permute.xlu0 %5630 }
 0x765   : > { %v10258_v27 = vpop.eup %10257  ;;  %v5625_v20 = vpop.permute.xlu1 %5624  ;;  %9505 = vmatprep.mubr.msk.bf16.mxu0 %vm1031_vm0, %v5308_v61  ;;  %v5732_v44 = vsel %vm1031_vm0, %v5631_v45, 0.0 }
 0x766   : > { %v5291_v39 = vmul.f32 %v10258_v27, %v5259_v11  ;;  %v5723_v37 = vsel %vm1031_vm0, %v5625_v20, 0.0  ;;  %v15213_v33 = vpop.f32.mrb[20].mxu1 }
 0x767   : > { %v10260_v63 = vpop.eup %10259  ;;  %18210 = vst [vmem:[#allocation13_spill] sm:$0xff] %v15213_v33  ;;  %5724 = vadd.xlane.f32.xlu0 %v5723_v37  ;;  %v15215_v15 = vpop.f32.mrb[21].mxu1 }
 0x768   : > { %v5309_v13 = vpack.c.bf16 %v5291_v39, %v5290_v31  ;;  %v10262_v54 = vpop.eup %10261  ;;  %18211 = vst [vmem:[#allocation66_spill] sm:$0xff] %v15215_v15  ;;  %v5292_v30 = vmul.f32 %v10260_v63, %v5260_v50  ;;  %v5635_v55 = vpop.permute.xlu0 %5634 }
 0x769   : > { %v15218_v10 = vpop.f32.mrb[22].mxu1  ;;  %v5629_v49 = vpop.permute.xlu1 %5628  ;;  %v5293_v60 = vmul.f32 %v10262_v54, %v5261_v18  ;;  %v5738_v53 = vsel %vm1031_vm0, %v5635_v55, 0.0 }
 0x76a   : > { %18212 = vst [vmem:[#allocation67_spill] sm:$0xff] %v15218_v10  ;;  %v15223_v17 = vpop.f32.mrb[23].mxu1  ;;  %v5729_v40 = vsel %vm1031_vm0, %v5629_v49, 0.0 }
 0x76b   : > { %9506 = vmatmul.mubr.msk.bf16.gmra.mrb[24].mxu0 %vm1031_vm0, %v5309_v13  ;;  %18213 = vst [vmem:[#allocation83_spill] sm:$0xff] %v15223_v17  ;;  %v10264_v1 = vpop.eup %10263  ;;  %5730 = vadd.xlane.f32.xlu1 %v5729_v40  ;;  %v5310_v0 = vpack.c.bf16 %v5293_v60, %v5292_v30 }
 0x76c   : > { %5727 = vadd.xlane.f32.xlu0 %v5726_v51  ;;  %v10266_v9 = vpop.eup %10265  ;;  %v5294_v8 = vmul.f32 %v10264_v1, %v5262_v16  ;;  %v5639_v52 = vpop.permute.xlu0 %5638 }
 0x76d   : > { %v5633_v23 = vpop.permute.xlu1 %5632  ;;  %9509 = vmatprep.mubr.msk.bf16.mxu0 %vm1031_vm0, %v5310_v0  ;;  %v5295_v5 = vmul.f32 %v10266_v9, %v5263_v58  ;;  %v5744_v31 = vsel %vm1031_vm0, %v5639_v52, 0.0 }
 0x76e   : > { %v5735_v29 = vsel %vm1031_vm0, %v5633_v23, 0.0  ;;  %v15231_v25 = vpop.f32.mrb[24].mxu1 }
 0x76f   : > { %18214 = vst [vmem:[#allocation91_spill] sm:$0xff] %v15231_v25  ;;  %5736 = vadd.xlane.f32.xlu1 %v5735_v29  ;;  %v5311_v46 = vpack.c.bf16 %v5295_v5, %v5294_v8  ;;  %v15233_v28 = vpop.f32.mrb[25].mxu1 }
 0x770   : > { %5733 = vadd.xlane.f32.xlu0 %v5732_v44  ;;  %18215 = vst [vmem:[#allocation68_spill] sm:$0xff] %v15233_v28  ;;  %v5643_v7 = vpop.permute.xlu0 %5642  ;;  %v15236_v42 = vpop.f32.mrb[26].mxu1 }
 0x771   : > { %18216 = vst [vmem:[#allocation82_spill] sm:$0xff] %v15236_v42  ;;  %v5637_v11 = vpop.permute.xlu1 %5636  ;;  %v15239_v61 = vpop.f32.mrb[27].mxu1  ;;  %v5750_v37 = vsel %vm1031_vm0, %v5643_v7, 0.0 }
 0x772   : > { %18217 = vst [vmem:[#allocation18_spill] sm:$0xff] %v15239_v61  ;;  %v5741_v27 = vsel %vm1031_vm0, %v5637_v11, 0.0 }
 0x773   : > { %9510 = vmatmul.mubr.msk.bf16.gmra.mrb[28].mxu0 %vm1031_vm0, %v5311_v46  ;;  %5742 = vadd.xlane.f32.xlu1 %v5741_v27 }
 0x774   : > { %5739 = vadd.xlane.f32.xlu0 %v5738_v53  ;;  %v5647_v45 = vpop.permute.xlu0 %5646 }
 0x775   : > { %v5641_v20 = vpop.permute.xlu1 %5640  ;;  %v5756_v51 = vsel %vm1031_vm0, %v5647_v45, 0.0 }
 0x776   : > { %v5747_v39 = vsel %vm1031_vm0, %v5641_v20, 0.0  ;;  %v15244_v38 = vpop.f32.mrb[28].mxu1 }
 0x777   : > { %18218 = vst [vmem:[#allocation75_spill] sm:$0xff] %v15244_v38  ;;  %5748 = vadd.xlane.f32.xlu1 %v5747_v39  ;;  %v15246_v50 = vpop.f32.mrb[29].mxu1 }
 0x778   : > { %5745 = vadd.xlane.f32.xlu0 %v5744_v31  ;;  %18219 = vst [vmem:[#allocation77_spill] sm:$0xff] %v15246_v50  ;;  %v5651_v63 = vpop.permute.xlu0 %5650  ;;  %v15249_v41 = vpop.f32.mrb[30].mxu1 }
 0x779   : > { %18220 = vst [vmem:[#allocation76_spill] sm:$0xff] %v15249_v41  ;;  %v5645_v18 = vpop.permute.xlu1 %5644  ;;  %v15251_v13 = vpop.f32.mrb[31].mxu1  ;;  %v5762_v60 = vsel %vm1031_vm0, %v5651_v63, 0.0 }
 0x77a   : > { %18221 = vst [vmem:[#allocation22_spill] sm:$0xff] %v15251_v13  ;;  %v5753_v54 = vsel %vm1031_vm0, %v5645_v18, 0.0 }
 0x77b   : > { %5754 = vadd.xlane.f32.xlu1 %v5753_v54 }
 0x77c   : > { %5751 = vadd.xlane.f32.xlu0 %v5750_v37  ;;  %v5655_v30 = vpop.permute.xlu0 %5654 }
 0x77d   : > { %v5649_v55 = vpop.permute.xlu1 %5648  ;;  %v5768_v1 = vsel %vm1031_vm0, %v5655_v30, 0.0 }
 0x77e   : > { %v5759_v49 = vsel %vm1031_vm0, %v5649_v55, 0.0  ;;  %v18222_v55 = vld [vmem:[#allocation49_spill] sm:$0xff] }
 0x77f   : > { %5760 = vadd.xlane.f32.xlu1 %v5759_v49  ;;  %v18223_v49 = vld [vmem:[#allocation31_spill] sm:$0xff] }
 0x780   : > { %5757 = vadd.xlane.f32.xlu0 %v5756_v51  ;;  %v5659_v6 = vpop.permute.xlu0 %5658 }
 0x781   : > { %v5653_v16 = vpop.permute.xlu1 %5652  ;;  %v5774_v9 = vsel %vm1031_vm0, %v5659_v6, 0.0  ;;  %v18225_v6 = vld [vmem:[#allocation94_spill] sm:$0xff] }
 0x782   : > { %v5765_v40 = vsel %vm1031_vm0, %v5653_v16, 0.0  ;;  %v18226_v16 = vld [vmem:[#allocation48_spill] sm:$0xff] }
 0x783   : > { %5766 = vadd.xlane.f32.xlu1 %v5765_v40  ;;  %v18227_v40 = vld [vmem:[#allocation78_spill] sm:$0xff] }
 0x784   : > { %5763 = vadd.xlane.f32.xlu0 %v5762_v60  ;;  %v5663_v12 = vpop.permute.xlu0 %5662  ;;  %v18224_v60 = vld [vmem:[#allocation30_spill] sm:$0xff] }
 0x785   : > { %v5657_v58 = vpop.permute.xlu1 %5656  ;;  %v5780_v23 = vsel %vm1031_vm0, %v5663_v12, 0.0  ;;  %v18229_v12 = vld [vmem:[#allocation33_spill] sm:$0xff] }
 0x786   : > { %v5771_v0 = vsel %vm1031_vm0, %v5657_v58, 0.0  ;;  %v18230_v58 = vld [vmem:[#allocation51_spill] sm:$0xff] }
 0x787   : > { %5772 = vadd.xlane.f32.xlu1 %v5771_v0  ;;  %v18231_v0 = vld [vmem:[#allocation34_spill] sm:$0xff] }
 0x788   : > { %5769 = vadd.xlane.f32.xlu0 %v5768_v1  ;;  %v5667_v44 = vpop.permute.xlu0 %5666  ;;  %v18228_v1 = vld [vmem:[#allocation79_spill] sm:$0xff] }
 0x789   : > { %v5661_v8 = vpop.permute.xlu1 %5660  ;;  %v5786_v53 = vsel %vm1031_vm0, %v5667_v44, 0.0  ;;  %v18233_v44 = vld [vmem:[#allocation32_spill] sm:$0xff] }
 0x78a   : > { %v5777_v52 = vsel %vm1031_vm0, %v5661_v8, 0.0  ;;  %v18234_v8 = vld [vmem:[#allocation96_spill] sm:$0xff] }
 0x78b   : > { %5778 = vadd.xlane.f32.xlu1 %v5777_v52  ;;  %v18235_v52 = vld [vmem:[#allocation50_spill] sm:$0xff] }
 0x78c   : > { %5775 = vadd.xlane.f32.xlu0 %v5774_v9  ;;  %v5671_v29 = vpop.permute.xlu0 %5670  ;;  %v18232_v9 = vld [vmem:[#allocation95_spill] sm:$0xff] }
 0x78d   : > { %v5665_v5 = vpop.permute.xlu1 %5664  ;;  %v5792_v31 = vsel %vm1031_vm0, %v5671_v29, 0.0  ;;  %v18238_v29 = vld [vmem:[#allocation53_spill] sm:$0xff] }
 0x78e   : > { %v5783_v46 = vsel %vm1031_vm0, %v5665_v5, 0.0  ;;  %v18237_v5 = vld [vmem:[#allocation52_spill] sm:$0xff] }
 0x78f   : > { %5784 = vadd.xlane.f32.xlu1 %v5783_v46  ;;  %v18239_v46 = vld [vmem:[#allocation55_spill] sm:$0xff] }
 0x790   : > { %5781 = vadd.xlane.f32.xlu0 %v5780_v23  ;;  %v5675_v27 = vpop.permute.xlu0 %5674  ;;  %v18236_v23 = vld [vmem:[#allocation35_spill] sm:$0xff] }
 0x791   : > { %v5669_v7 = vpop.permute.xlu1 %5668  ;;  %v5798_v39 = vsel %vm1031_vm0, %v5675_v27, 0.0  ;;  %v18243_v27 = vld [vmem:[#allocation86_spill] sm:$0xff] }
 0x792   : > { %v5789_v11 = vsel %vm1031_vm0, %v5669_v7, 0.0  ;;  %v18241_v7 = vld [vmem:[#allocation56_spill] sm:$0xff] }
 0x793   : > { %5790 = vadd.xlane.f32.xlu1 %v5789_v11  ;;  %v18242_v11 = vld [vmem:[#allocation9_spill] sm:$0xff] }
 0x794   : > { %5787 = vadd.xlane.f32.xlu0 %v5786_v53  ;;  %v5679_v63 = vpop.permute.xlu0 %5678  ;;  %v18240_v53 = vld [vmem:[#allocation41_spill] sm:$0xff] }
 0x795   : > { %v5673_v45 = vpop.permute.xlu1 %5672  ;;  %v5804_v54 = vsel %vm1031_vm0, %v5679_v63, 0.0  ;;  %v18249_v63 = vld [vmem:[#allocation89_spill] sm:$0xff] }
 0x796   : > { %v5795_v20 = vsel %vm1031_vm0, %v5673_v45, 0.0  ;;  %v18245_v45 = vld [vmem:[#allocation81_spill] sm:$0xff] }
 0x797   : > { %5796 = vadd.xlane.f32.xlu1 %v5795_v20  ;;  %v18246_v20 = vld [vmem:[#allocation23_spill] sm:$0xff] }
 0x798   : > { %5793 = vadd.xlane.f32.xlu0 %v5792_v31  ;;  %v18244_v31 = vld [vmem:[#allocation87_spill] sm:$0xff] }
 0x799   : > { %v5677_v37 = vpop.permute.xlu1 %5676 }
 0x79a   : > { %v5801_v18 = vsel %vm1031_vm0, %v5677_v37, 0.0  ;;  %v18248_v37 = vld [vmem:[#allocation17_spill] sm:$0xff] }
 0x79b   : > { %5802 = vadd.xlane.f32.xlu1 %v5801_v18  ;;  %v18250_v18 = vld [vmem:[#allocation70_spill] sm:$0xff] }
 0x79c   : > { %5799 = vadd.xlane.f32.xlu0 %v5798_v39  ;;  %v18247_v39 = vld [vmem:[#allocation19_spill] sm:$0xff] }
 0x79d   : > { %v5681_v51 = vpop.permute.xlu1 %5680 }
 0x79e   : > { %v5807_v30 = vsel %vm1031_vm0, %v5681_v51, 0.0  ;;  %v18251_v51 = vld [vmem:[#allocation71_spill] sm:$0xff] }
 0x79f   : > { %5808 = vadd.xlane.f32.xlu1 %v5807_v30  ;;  %v18252_v30 = vld [vmem:[#allocation85_spill] sm:$0xff] }
 0x7a0   : > { %5805 = vadd.xlane.f32.xlu0 %v5804_v54 }
 0x7b0   : > { %5876 = vrot.lane.b32.xlu1 %v18222_v55, %s10724_s16 }
 0x7b4   : > { %5878 = vrot.lane.b32.xlu1 %v18223_v49, %s10724_s16  ;;  %v18253_v49 = vld [vmem:[#allocation15_spill] sm:$0xff] }
 0x7b6   : > { %5874 = vrot.lane.b32.xlu0 %v18224_v60, %s10724_s16 }
 0x7b8   : > { %5880 = vrot.lane.b32.xlu1 %v18225_v6, %s10724_s16 }
 0x7ba   : > { %5882 = vrot.lane.b32.xlu0 %v18226_v16, %s10724_s16 }
 0x7bc   : > { %5884 = vrot.lane.b32.xlu1 %v18227_v40, %s10724_s16 }
 0x7be   : > { %5886 = vrot.lane.b32.xlu0 %v18228_v1, %s10724_s16 }
 0x7c0   : > { %5888 = vrot.lane.b32.xlu1 %v18229_v12, %s10724_s16 }
 0x7c2   : > { %5890 = vrot.lane.b32.xlu0 %v18230_v58, %s10724_s16 }
 0x7c4   : > { %5892 = vrot.lane.b32.xlu1 %v18231_v0, %s10724_s16 }
 0x7c6   : > { %5894 = vrot.lane.b32.xlu0 %v18232_v9, %s10724_s16 }
 0x7c8   : > { %5896 = vrot.lane.b32.xlu1 %v18233_v44, %s10724_s16 }
 0x7ca   : > { %5898 = vrot.lane.b32.xlu0 %v18234_v8, %s10724_s16 }
 0x7cc   : > { %5900 = vrot.lane.b32.xlu1 %v18235_v52, %s10724_s16 }
 0x7ce   : > { %5902 = vrot.lane.b32.xlu0 %v18236_v23, %s10724_s16 }
 0x7d0   : > { %5904 = vrot.lane.b32.xlu1 %v18237_v5, %s10724_s16 }
 0x7d2   : > { %5906 = vrot.lane.b32.xlu0 %v18238_v29, %s10724_s16 }
 0x7d4   : > { %5908 = vrot.lane.b32.xlu1 %v18239_v46, %s10724_s16 }
 0x7d6   : > { %5910 = vrot.lane.b32.xlu0 %v18240_v53, %s10724_s16 }
 0x7d8   : > { %5912 = vrot.lane.b32.xlu1 %v18241_v7, %s10724_s16 }
 0x7da   : > { %5914 = vrot.lane.b32.xlu0 %v18242_v11, %s10724_s16 }
 0x7dc   : > { %5916 = vrot.lane.b32.xlu1 %v18243_v27, %s10724_s16 }
 0x7de   : > { %5918 = vrot.lane.b32.xlu0 %v18244_v31, %s10724_s16 }
 0x7e0   : > { %5920 = vrot.lane.b32.xlu1 %v18245_v45, %s10724_s16 }
 0x7e2   : > { %5922 = vrot.lane.b32.xlu0 %v18246_v20, %s10724_s16 }
 0x7e4   : > { %5924 = vrot.lane.b32.xlu1 %v18247_v39, %s10724_s16 }
 0x7e6   : > { %5926 = vrot.lane.b32.xlu0 %v18248_v37, %s10724_s16 }
 0x7e8   : > { %5928 = vrot.lane.b32.xlu1 %v18249_v63, %s10724_s16 }
 0x7ea   : > { %5930 = vrot.lane.b32.xlu0 %v18250_v18, %s10724_s16 }
 0x7eb   : > { %v15330_v54 = vpop.xlane.xlu0 %5715 }
 0x7ec   : > { %5932 = vrot.lane.b32.xlu1 %v18251_v51, %s10724_s16  ;;  %v15340_v60 = vpop.xlane.xlu1 %5718 }
 0x7ee   : > { %5934 = vrot.lane.b32.xlu0 %v18252_v30, %s10724_s16 }
 0x7f0   : > { %v15336_v55 = vpop.xlane.xlu0 %5721  ;;  %5936 = vrot.lane.b32.xlu1 %v18253_v49, %s10724_s16 }
 0x7f4   : > { %v15342_v6 = vpop.xlane.xlu0 %5724 }
 0x7f8   : > { %v15344_v16 = vpop.xlane.xlu1 %5730 }
 0x7f9   : > { %v15346_v40 = vpop.xlane.xlu0 %5727 }
 0x7fc   : > { %v15348_v1 = vpop.xlane.xlu1 %5736 }
 0x7fd   : > { %v15350_v12 = vpop.xlane.xlu0 %5733 }
 0x800   : > { %v15352_v58 = vpop.xlane.xlu1 %5742 }
 0x801   : > { %v15354_v0 = vpop.xlane.xlu0 %5739 }
 0x804   : > { %v15356_v9 = vpop.xlane.xlu1 %5748 }
 0x805   : > { %v15358_v44 = vpop.xlane.xlu0 %5745  ;;  %v15523_v3 = vmul.f32 0.015625, %v15356_v9  ;;  %v15551_v9 = vld [vmem:[%s14333_s27 + $0x40] sm:$0xff] }
 0x806   : > { %v15540_v14 = vmul.f32 0.015625, %v15358_v44 }
 0x808   : > { %v15360_v8 = vpop.xlane.xlu1 %5754  ;;  %v15566_v44 = vmul.f32 %v15540_v14, %v15540_v14 }
 0x809   : > { %v15362_v52 = vpop.xlane.xlu0 %5751  ;;  %v15543_v47 = vmul.f32 0.015625, %v15360_v8  ;;  %v15560_v8 = vld [vmem:[%s14333_s27 + $0x58] sm:$0xff] }
 0x80a   : > { %v15574_v19 = vmul.f32 0.015625, %v15362_v52 }
 0x80c   : > { %v15364_v23 = vpop.xlane.xlu1 %5760 }
 0x80d   : > { %v15366_v5 = vpop.xlane.xlu0 %5757  ;;  %v15586_v59 = vmul.f32 0.015625, %v15364_v23 }
 0x810   : > { %v15368_v29 = vpop.xlane.xlu1 %5766 }
 0x811   : > { %v15370_v46 = vpop.xlane.xlu0 %5763 }
 0x814   : > { %v15372_v53 = vpop.xlane.xlu1 %5772 }
 0x815   : > { %v15374_v7 = vpop.xlane.xlu0 %5769 }
 0x818   : > { %v15376_v11 = vpop.xlane.xlu1 %5778 }
 0x819   : > { %v15378_v27 = vpop.xlane.xlu0 %5775 }
 0x81c   : > { %v15380_v31 = vpop.xlane.xlu1 %5784 }
 0x81d   : > { %v15382_v45 = vpop.xlane.xlu0 %5781 }
 0x820   : > { %v15384_v20 = vpop.xlane.xlu1 %5790 }
 0x821   : > { %v15386_v39 = vpop.xlane.xlu0 %5787 }
 0x824   : > { %v15388_v37 = vpop.xlane.xlu1 %5796 }
 0x825   : > { %v15390_v63 = vpop.xlane.xlu0 %5793 }
 0x826   : > { %18254 = vst [vmem:[#allocation27_spill] sm:$0xff] %v15390_v63 }
 0x828   : > { %v15392_v18 = vpop.xlane.xlu1 %5802 }
 0x829   : > { %18255 = vst [vmem:[#allocation25_spill] sm:$0xff] %v15392_v18  ;;  %v15394_v51 = vpop.xlane.xlu0 %5799 }
 0x82a   : > { %18256 = vst [vmem:[#allocation26_spill] sm:$0xff] %v15394_v51 }
 0x82c   : > { %v15396_v30 = vpop.xlane.xlu1 %5808 }
 0x82d   : > { %18257 = vst [vmem:[#allocation74_spill] sm:$0xff] %v15396_v30  ;;  %v15398_v49 = vpop.xlane.xlu0 %5805 }
 0x82e   : > { %18258 = vst [vmem:[#allocation90_spill] sm:$0xff] %v15398_v49  ;;  %v15581_v49 = vld [vmem:[%s14333_s27 + $0x68] sm:$0xff] }
 0x830   : > { %v5877_v13 = vpop.permute.xlu1 %5876 }
 0x831   : > { %v5875_v41 = vpop.permute.xlu0 %5874  ;;  %v5973_v50 = vsel %vm1031_vm0, %v5877_v13, 0.0 }
 0x832   : > { %v5970_v38 = vsel %vm1031_vm0, %v5875_v41, 0.0  ;;  %5974 = vadd.xlane.f32.xlu1 %v5973_v50 }
 0x833   : > { %5971 = vadd.xlane.f32.xlu0 %v5970_v38 }
 0x834   : > { %v5879_v61 = vpop.permute.xlu1 %5878 }
 0x835   : > { %v5883_v42 = vpop.permute.xlu0 %5882  ;;  %v5976_v28 = vsel %vm1031_vm0, %v5879_v61, 0.0 }
 0x836   : > { %v5982_v15 = vsel %vm1031_vm0, %v5883_v42, 0.0 }
 0x837   : > { %5977 = vadd.xlane.f32.xlu0 %v5976_v28 }
 0x838   : > { %v5881_v25 = vpop.permute.xlu1 %5880 }
 0x839   : > { %v5887_v17 = vpop.permute.xlu0 %5886  ;;  %v5979_v10 = vsel %vm1031_vm0, %v5881_v25, 0.0 }
 0x83a   : > { %v5988_v38 = vsel %vm1031_vm0, %v5887_v17, 0.0 }
 0x83b   : > { %5980 = vadd.xlane.f32.xlu0 %v5979_v10 }
 0x83c   : > { %v5885_v33 = vpop.permute.xlu1 %5884 }
 0x83d   : > { %v5891_v43 = vpop.permute.xlu0 %5890  ;;  %v5985_v13 = vsel %vm1031_vm0, %v5885_v33, 0.0 }
 0x83e   : > { %5986 = vadd.xlane.f32.xlu1 %v5985_v13  ;;  %v5994_v28 = vsel %vm1031_vm0, %v5891_v43, 0.0 }
 0x83f   : > { %5983 = vadd.xlane.f32.xlu0 %v5982_v15 }
 0x840   : > { %v5889_v50 = vpop.permute.xlu1 %5888 }
 0x841   : > { %v5895_v41 = vpop.permute.xlu0 %5894  ;;  %v5991_v61 = vsel %vm1031_vm0, %v5889_v50, 0.0 }
 0x842   : > { %5992 = vadd.xlane.f32.xlu1 %v5991_v61  ;;  %v6000_v33 = vsel %vm1031_vm0, %v5895_v41, 0.0 }
 0x843   : > { %5989 = vadd.xlane.f32.xlu0 %v5988_v38 }
 0x844   : > { %v5893_v25 = vpop.permute.xlu1 %5892 }
 0x845   : > { %v5899_v10 = vpop.permute.xlu0 %5898  ;;  %v5997_v42 = vsel %vm1031_vm0, %v5893_v25, 0.0 }
 0x846   : > { %5998 = vadd.xlane.f32.xlu1 %v5997_v42  ;;  %v6006_v50 = vsel %vm1031_vm0, %v5899_v10, 0.0 }
 0x847   : > { %5995 = vadd.xlane.f32.xlu0 %v5994_v28 }
 0x848   : > { %v5897_v13 = vpop.permute.xlu1 %5896 }
 0x849   : > { %v5903_v15 = vpop.permute.xlu0 %5902  ;;  %v6003_v17 = vsel %vm1031_vm0, %v5897_v13, 0.0 }
 0x84a   : > { %6004 = vadd.xlane.f32.xlu1 %v6003_v17  ;;  %v6012_v25 = vsel %vm1031_vm0, %v5903_v15, 0.0 }
 0x84b   : > { %6001 = vadd.xlane.f32.xlu0 %v6000_v33 }
 0x84c   : > { %v5901_v61 = vpop.permute.xlu1 %5900 }
 0x84d   : > { %v5907_v38 = vpop.permute.xlu0 %5906  ;;  %v6009_v43 = vsel %vm1031_vm0, %v5901_v61, 0.0 }
 0x84e   : > { %6010 = vadd.xlane.f32.xlu1 %v6009_v43  ;;  %v6018_v13 = vsel %vm1031_vm0, %v5907_v38, 0.0 }
 0x84f   : > { %6007 = vadd.xlane.f32.xlu0 %v6006_v50 }
 0x850   : > { %v5905_v42 = vpop.permute.xlu1 %5904 }
 0x851   : > { %v5911_v28 = vpop.permute.xlu0 %5910  ;;  %v6015_v41 = vsel %vm1031_vm0, %v5905_v42, 0.0 }
 0x852   : > { %6016 = vadd.xlane.f32.xlu1 %v6015_v41  ;;  %v6024_v61 = vsel %vm1031_vm0, %v5911_v28, 0.0 }
 0x853   : > { %6013 = vadd.xlane.f32.xlu0 %v6012_v25 }
 0x854   : > { %v5909_v17 = vpop.permute.xlu1 %5908 }
 0x855   : > { %v5915_v33 = vpop.permute.xlu0 %5914  ;;  %v6021_v10 = vsel %vm1031_vm0, %v5909_v17, 0.0 }
 0x856   : > { %6022 = vadd.xlane.f32.xlu1 %v6021_v10  ;;  %v6030_v42 = vsel %vm1031_vm0, %v5915_v33, 0.0 }
 0x857   : > { %6019 = vadd.xlane.f32.xlu0 %v6018_v13 }
 0x858   : > { %v5913_v43 = vpop.permute.xlu1 %5912 }
 0x859   : > { %v5919_v50 = vpop.permute.xlu0 %5918  ;;  %v6027_v15 = vsel %vm1031_vm0, %v5913_v43, 0.0 }
 0x85a   : > { %6028 = vadd.xlane.f32.xlu1 %v6027_v15  ;;  %v6036_v17 = vsel %vm1031_vm0, %v5919_v50, 0.0 }
 0x85b   : > { %6025 = vadd.xlane.f32.xlu0 %v6024_v61 }
 0x85c   : > { %v5917_v41 = vpop.permute.xlu1 %5916 }
 0x85d   : > { %v5923_v25 = vpop.permute.xlu0 %5922  ;;  %v6033_v38 = vsel %vm1031_vm0, %v5917_v41, 0.0 }
 0x85e   : > { %6034 = vadd.xlane.f32.xlu1 %v6033_v38  ;;  %v6042_v43 = vsel %vm1031_vm0, %v5923_v25, 0.0 }
 0x85f   : > { %6031 = vadd.xlane.f32.xlu0 %v6030_v42 }
 0x860   : > { %v5921_v10 = vpop.permute.xlu1 %5920 }
 0x861   : > { %v5927_v13 = vpop.permute.xlu0 %5926  ;;  %v6039_v28 = vsel %vm1031_vm0, %v5921_v10, 0.0 }
 0x862   : > { %6040 = vadd.xlane.f32.xlu1 %v6039_v28  ;;  %v6048_v41 = vsel %vm1031_vm0, %v5927_v13, 0.0  ;;  %v15433_v13 = vmul.f32 0.015625, %v15340_v60 }
 0x863   : > { %6037 = vadd.xlane.f32.xlu0 %v6036_v17 }
 0x864   : > { %v5925_v15 = vpop.permute.xlu1 %5924 }
 0x865   : > { %v6045_v61 = vsel %vm1031_vm0, %v5925_v15, 0.0  ;;  %v5931_v33 = vpop.permute.xlu0 %5930 }
 0x866   : > { %6046 = vadd.xlane.f32.xlu1 %v6045_v61  ;;  %v6054_v50 = vsel %vm1031_vm0, %v5931_v33, 0.0  ;;  %v15436_v61 = vmul.f32 0.015625, %v15330_v54  ;;  %v15439_v33 = vmul.f32 0.015625, %v15336_v55  ;;  %v9935_v54 = vld [vmem:[%s17429_s4 + $0xa0] sm:$0xff]  }
 0x867   : > { %6043 = vadd.xlane.f32.xlu0 %v6042_v43  ;;  %9513 = vmatprep.subr.bf16.mxu0 %v9935_v54 }
 0x868   : > { %v5929_v38 = vpop.permute.xlu1 %5928  ;;  %v6100_v55 = vmul.f32 %v15439_v33, %v15439_v33  ;;  %9514 = vmatpush3.bf16.msra.mxu0 %v9935_v54  ;;  %v15473_v54 = vmul.f32 0.015625, %v15348_v1  ;;  %v15488_v1 = vmul.f32 0.015625, %v15350_v12  ;;  %v15500_v12 = vmul.f32 0.015625, %v15352_v58 }
 0x869   : > { %v6051_v42 = vsel %vm1031_vm0, %v5929_v38, 0.0  ;;  %v5935_v28 = vpop.permute.xlu0 %5934 }
 0x86a   : > { %6052 = vadd.xlane.f32.xlu1 %v6051_v42  ;;  %v6060_v25 = vsel %vm1031_vm0, %v5935_v28, 0.0  ;;  %v6099_v42 = vmul.f32 %v15433_v13, %v15433_v13 }
 0x86b   : > { %6049 = vadd.xlane.f32.xlu0 %v6048_v41 }
 0x86c   : > { %v5933_v10 = vpop.permute.xlu1 %5932 }
 0x86d   : > { %v6057_v17 = vsel %vm1031_vm0, %v5933_v10, 0.0 }
 0x86e   : > { %6058 = vadd.xlane.f32.xlu1 %v6057_v17 }
 0x86f   : > { %6055 = vadd.xlane.f32.xlu0 %v6054_v50  ;;  %v6098_v50 = vmul.f32 %v15436_v61, %v15436_v61 }
 0x870   : > { %v5937_v15 = vpop.permute.xlu1 %5936 }
 0x871   : > { %v6063_v43 = vsel %vm1031_vm0, %v5937_v15, 0.0 }
 0x872   : > { %6064 = vadd.xlane.f32.xlu1 %v6063_v43  ;;  %v15454_v43 = vmul.f32 0.015625, %v15344_v16  ;;  %v15470_v16 = vmul.f32 0.015625, %v15346_v40 }
 0x873   : > { %6061 = vadd.xlane.f32.xlu0 %v6060_v25  ;;  %v15451_v25 = vmul.f32 0.015625, %v15342_v6  ;;  %v15493_v6 = vld [vmem:[%s14333_s27 + $0x28] sm:$0xff] }
 0x874   : > { %v6102_v40 = vmul.f32 %v15470_v16, %v15470_v16 }
 0x8bf   : > { %v5975_v41 = vpop.xlane.xlu1 %5974 }
 0x8c0   : > { %v5972_v38 = vpop.xlane.xlu0 %5971  ;;  %v6067_v10 = vmul.f32 0.015625, %v5975_v41 }
 0x8c1   : > { %v6066_v28 = vmul.f32 0.015625, %v5972_v38 }
 0x8c2   : > { %v6131_v60 = vsub.f32 %v6067_v10, %v6099_v42  ;;  %v9936_v42 = vld [vmem:[%s17429_s4 + $0xa8] sm:$0xff]   ;;  %v15465_v10 = vld [vmem:[%s14333_s27] sm:$0xff] }
 0x8c3   : > { %v6130_v17 = vsub.f32 %v6066_v28, %v6098_v50  ;;  %v15460_v50 = vld [vmem:[%s14333_s27 + $0x8] sm:$0xff]  ;;  %9515 = vmatprep.subr.bf16.mxu0 %v9936_v42  ;;  %v6101_v28 = vmul.f32 %v15451_v25, %v15451_v25  ;;  %v18260_v23 = vsub.f32 %v15465_v10, %v15436_v61 }
 0x8c4   : > { %v5978_v15 = vpop.xlane.xlu0 %5977  ;;  %v6163_v41 = vmax.f32 %v6131_v60, 0.0  ;;  %9516 = vmatpush3.bf16.msra.mxu0 %v9936_v42  ;;  %v15503_v42 = vld [vmem:[%s14333_s27 + $0x20] sm:$0xff]  ;;  %v18259_v51 = vsub.f32 %v15460_v50, %v15433_v13  ;;  %v15607_v50 = vmul.f32 %v15586_v59, %v15586_v59 }
 0x8c5   : > { %v6162_v38 = vmax.f32 %v6130_v17, 0.0  ;;  %v6068_v32 = vmul.f32 0.015625, %v5978_v15  ;;  %9517 = vmatprep.subr.bf16.mxu0 %v9937_v22  ;;  %v15601_v13 = vld [vmem:[%s14333_s27 + $0x60] sm:$0xff] }
 0x8c6   : > { %v6195_v60 = vadd.f32 1e-05, %v6163_v41 }
 0x8c7   : > { %v6194_v17 = vadd.f32 1e-05, %v6162_v38  ;;  %v6132_v15 = vsub.f32 %v6068_v32, %v6100_v55  ;;  %v6103_v32 = vmul.f32 %v15454_v43, %v15454_v43 }
 0x8c8   : > { %v5981_v41 = vpop.xlane.xlu0 %5980  ;;  %10267 = vrsqrt.f32 %v6195_v60  ;;  %v15520_v60 = vmul.f32 0.015625, %v15354_v0  ;;  %v15532_v0 = vmul.f32 %v15500_v12, %v15500_v12  ;;  %9518 = vmatpush3.bf16.msra.mxu0 %v9937_v22  ;;  %v15557_v22 = vmul.f32 %v15523_v3, %v15523_v3 }
 0x8c9   : > { %v6164_v55 = vmax.f32 %v6132_v15, 0.0  ;;  %v6069_v38 = vmul.f32 0.015625, %v5981_v41  ;;  %10269 = vrsqrt.f32 %v6194_v17  ;;  %v6105_v15 = vmul.f32 %v15473_v54, %v15473_v54 }
 0x8ca   : > { %v6104_v17 = vmul.f32 %v15488_v1, %v15488_v1  ;;  %v6106_v35 = vmul.f32 %v15520_v60, %v15520_v60 }
 0x8cb   : > { %v6196_v41 = vadd.f32 1e-05, %v6164_v55  ;;  %v6133_v2 = vsub.f32 %v6069_v38, %v6101_v28  ;;  %v5987_v28 = vpop.xlane.xlu1 %5986  ;;  %v15526_v38 = vld [vmem:[%s14333_s27 + $0x30] sm:$0xff] }
 0x8cc   : > { %v5984_v55 = vpop.xlane.xlu0 %5983  ;;  %v6071_v57 = vmul.f32 0.015625, %v5987_v28 }
 0x8cd   : > { %v6165_v26 = vmax.f32 %v6133_v2, 0.0  ;;  %v6070_v58 = vmul.f32 0.015625, %v5984_v55  ;;  %v9938_v2 = vld [vmem:[%s17429_s4 + $0xb8] sm:$0xff]   ;;  %10271 = vrsqrt.f32 %v6196_v41 }
 0x8ce   : > { %v6135_v55 = vsub.f32 %v6071_v57, %v6103_v32  ;;  %9519 = vmatprep.subr.bf16.mxu0 %v9938_v2 }
 0x8cf   : > { %v6197_v28 = vadd.f32 1e-05, %v6165_v26  ;;  %v6134_v36 = vsub.f32 %v6070_v58, %v6102_v40  ;;  %v5993_v57 = vpop.xlane.xlu1 %5992  ;;  %9520 = vmatpush3.bf16.msra.mxu0 %v9938_v2 }
 0x8d0   : > { %v5990_v32 = vpop.xlane.xlu0 %5989  ;;  %v6167_v40 = vmax.f32 %v6135_v55, 0.0  ;;  %v6073_v58 = vmul.f32 0.015625, %v5993_v57 }
 0x8d1   : > { %10273 = vrsqrt.f32 %v6197_v28  ;;  %v6166_v41 = vmax.f32 %v6134_v36, 0.0  ;;  %v6072_v26 = vmul.f32 0.015625, %v5990_v32  ;;  %v15578_v28 = vmul.f32 %v15543_v47, %v15543_v47 }
 0x8d2   : > { %v10268_v4 = vpop.eup %10267  ;;  %v6199_v36 = vadd.f32 1e-05, %v6167_v40  ;;  %v6137_v57 = vsub.f32 %v6073_v58, %v6105_v15  ;;  %v15592_v58 = vmul.f32 0.015625, %v15366_v5  ;;  %v6270_v5 = vsub.f32 %v15601_v13, %v15574_v19 }
 0x8d3   : > { %v6198_v55 = vadd.f32 1e-05, %v6166_v41  ;;  %v10270_v48 = vpop.eup %10269  ;;  %v6136_v52 = vsub.f32 %v6072_v26, %v6104_v17  ;;  %v5999_v2 = vpop.xlane.xlu1 %5998  ;;  %v6291_v18 = vmul.f32 %v10268_v4, %v18259_v51  ;;  %v6110_v26 = vmul.f32 %v15574_v19, %v15574_v19 }
 0x8d4   : > { %v5996_v32 = vpop.xlane.xlu0 %5995  ;;  %10275 = vrsqrt.f32 %v6199_v36  ;;  %v6169_v40 = vmax.f32 %v6137_v57, 0.0  ;;  %v6075_v15 = vmul.f32 0.015625, %v5999_v2  ;;  %v6290_v17 = vmul.f32 %v10270_v48, %v18260_v23 }
 0x8d5   : > { %v6074_v41 = vmul.f32 0.015625, %v5996_v32  ;;  %10277 = vrsqrt.f32 %v6198_v55  ;;  %v6168_v30 = vmax.f32 %v6136_v52, 0.0  ;;  %v15616_v32 = vmul.f32 %v15592_v58, %v15592_v58 }
 0x8d6   : > { %v6201_v63 = vadd.f32 1e-05, %v6169_v40  ;;  %v6139_v4 = vsub.f32 %v6075_v15, %v15532_v0  ;;  %v6322_v48 = vpack.c.bf16 %v6291_v18, %v6290_v17  ;;  %v15610_v0 = vld [vmem:[%s14333_s27 + $0x78] sm:$0xff]  ;;  %v15624_v23 = vmul.f32 0.015625, %v15370_v46 }
 0x8d7   : > { %v6138_v51 = vsub.f32 %v6074_v41, %v6106_v35  ;;  %v6200_v36 = vadd.f32 1e-05, %v6168_v30  ;;  %v6005_v61 = vpop.xlane.xlu1 %6004  ;;  %v10272_v55 = vpop.eup %10271  ;;  %v6273_v35 = vsub.f32 %v15610_v0, %v15586_v59 }
 0x8d8   : > { %v6002_v10 = vpop.xlane.xlu0 %6001  ;;  %10279 = vrsqrt.f32 %v6201_v63  ;;  %v6171_v57 = vmax.f32 %v6139_v4, 0.0  ;;  %v6077_v2 = vmul.f32 0.015625, %v6005_v61  ;;  %6363 = vrot.lane.b32.xlu0 %v6322_v48, %s10724_s16  ;;  %v15620_v63 = vmul.f32 0.015625, %v15368_v29 }
 0x8d9   : > { %v6170_v52 = vmax.f32 %v6138_v51, 0.0  ;;  %10281 = vrsqrt.f32 %v6200_v36  ;;  %v6076_v30 = vmul.f32 0.015625, %v6002_v10  ;;  %v18261_v36 = vsub.f32 %v15476_v21, %v15439_v33 }
 0x8da   : > { %v6203_v40 = vadd.f32 1e-05, %v6171_v57  ;;  %v6141_v41 = vsub.f32 %v6077_v2, %v15557_v22  ;;  %v18262_v48 = vsub.f32 %v15483_v34, %v15451_v25  ;;  %v15634_v22 = vld [vmem:[%s14333_s27 + $0x70] sm:$0xff]  ;;  %v15639_v21 = vmul.f32 0.015625, %v15372_v53 }
 0x8db   : > { %v10274_v18 = vpop.eup %10273  ;;  %v6202_v15 = vadd.f32 1e-05, %v6170_v52  ;;  %v6140_v17 = vsub.f32 %v6076_v30, %v15566_v44  ;;  %v6011_v4 = vpop.xlane.xlu1 %6010  ;;  %v6292_v61 = vmul.f32 %v10272_v55, %v18261_v36  ;;  %v6272_v46 = vsub.f32 %v15634_v22, %v15592_v58 }
 0x8dc   : > { %v6008_v51 = vpop.xlane.xlu0 %6007  ;;  %v6293_v29 = vmul.f32 %v10274_v18, %v18262_v48  ;;  %10283 = vrsqrt.f32 %v6203_v40  ;;  %v6173_v10 = vmax.f32 %v6141_v41, 0.0  ;;  %v6079_v57 = vmul.f32 0.015625, %v6011_v4 }
 0x8dd   : > { %v6078_v52 = vmul.f32 0.015625, %v6008_v51  ;;  %10285 = vrsqrt.f32 %v6202_v15  ;;  %v6172_v44 = vmax.f32 %v6140_v17, 0.0  ;;  %v6115_v18 = vmul.f32 %v15620_v63, %v15620_v63 }
 0x8de   : > { %v6323_v2 = vpack.c.bf16 %v6293_v29, %v6292_v61  ;;  %v10276_v30 = vpop.eup %10275  ;;  %v6205_v33 = vadd.f32 1e-05, %v6173_v10  ;;  %v6143_v34 = vsub.f32 %v6079_v57, %v15578_v28  ;;  %v6114_v40 = vmul.f32 %v15624_v23, %v15624_v23 }
 0x8df   : > { %v6142_v25 = vsub.f32 %v6078_v52, %v6110_v26  ;;  %v10278_v55 = vpop.eup %10277  ;;  %v6204_v41 = vadd.f32 1e-05, %v6172_v44  ;;  %v6017_v4 = vpop.xlane.xlu1 %6016  ;;  %v18263_v53 = vsub.f32 %v15493_v6, %v15454_v43  ;;  %v15651_v36 = vmul.f32 0.015625, %v15374_v7 }
 0x8e0   : > { %6365 = vrot.lane.b32.xlu1 %v6323_v2, %s10724_s16  ;;  %v6014_v15 = vpop.xlane.xlu0 %6013  ;;  %10287 = vrsqrt.f32 %v6205_v33  ;;  %v6175_v51 = vmax.f32 %v6143_v34, 0.0  ;;  %v6081_v26 = vmul.f32 0.015625, %v6017_v4  ;;  %v18264_v48 = vsub.f32 %v15503_v42, %v15470_v16 }
 0x8e1   : > { %v6295_v17 = vmul.f32 %v10276_v30, %v18263_v53  ;;  %v6174_v28 = vmax.f32 %v6142_v25, 0.0  ;;  %10289 = vrsqrt.f32 %v6204_v41  ;;  %v6080_v61 = vmul.f32 0.015625, %v6014_v15 }
 0x8e2   : > { %v6294_v29 = vmul.f32 %v10278_v55, %v18264_v48  ;;  %v10280_v10 = vpop.eup %10279  ;;  %v6117_v57 = vmul.f32 %v15639_v21, %v15639_v21  ;;  %v6207_v52 = vadd.f32 1e-05, %v6175_v51  ;;  %v6145_v6 = vsub.f32 %v6081_v26, %v15607_v50 }
 0x8e3   : > { %v6206_v43 = vadd.f32 1e-05, %v6174_v28  ;;  %v10282_v44 = vpop.eup %10281  ;;  %v15660_v2 = vmul.f32 0.015625, %v15376_v11  ;;  %v6144_v7 = vsub.f32 %v6080_v61, %v15616_v32  ;;  %v6023_v30 = vpop.xlane.xlu1 %6022  ;;  %v18265_v16 = vsub.f32 %v15513_v56, %v15473_v54 }
 0x8e4   : > { %v6324_v33 = vpack.c.bf16 %v6295_v17, %v6294_v29  ;;  %v6020_v34 = vpop.xlane.xlu0 %6019  ;;  %10291 = vrsqrt.f32 %v6207_v52  ;;  %v6177_v25 = vmax.f32 %v6145_v6, 0.0  ;;  %v6083_v55 = vmul.f32 0.015625, %v6023_v30 }
 0x8e5   : > { %v6297_v42 = vmul.f32 %v10280_v10, %v18265_v16  ;;  %v6082_v41 = vmul.f32 0.015625, %v6020_v34  ;;  %v6116_v50 = vmul.f32 %v15651_v36, %v15651_v36  ;;  %10293 = vrsqrt.f32 %v6206_v43 }
 0x8e6   : > { %v6176_v4 = vmax.f32 %v6144_v7, 0.0  ;;  %6367 = vrot.lane.b32.xlu1 %v6324_v33, %s10724_s16  ;;  %v18266_v11 = vsub.f32 %v15526_v38, %v15488_v1  ;;  %v10284_v15 = vpop.eup %10283  ;;  %v15673_v53 = vmul.f32 0.015625, %v15378_v27  ;;  %v6209_v56 = vadd.f32 1e-05, %v6177_v25 }
 0x8e7   : > { %v6147_v54 = vsub.f32 %v6083_v55, %v6115_v18  ;;  %v6146_v17 = vsub.f32 %v6082_v41, %v6114_v40  ;;  %v10286_v51 = vpop.eup %10285  ;;  %v6119_v28 = vmul.f32 %v15660_v2, %v15660_v2  ;;  %v6029_v61 = vpop.xlane.xlu1 %6028  ;;  %v18267_v10 = vsub.f32 %v15535_v62, %v15500_v12 }
 0x8e8   : > { %v6296_v32 = vmul.f32 %v10282_v44, %v18266_v11  ;;  %v6208_v26 = vadd.f32 1e-05, %v6176_v4  ;;  %v6026_v29 = vpop.xlane.xlu0 %6025  ;;  %10295 = vrsqrt.f32 %v6209_v56  ;;  %v6085_v27 = vmul.f32 0.015625, %v6029_v61 }
 0x8e9   : > { %v6299_v1 = vmul.f32 %v10284_v15, %v18267_v10  ;;  %v6179_v38 = vmax.f32 %v6147_v54, 0.0  ;;  %v6178_v52 = vmax.f32 %v6146_v17, 0.0  ;;  %v15681_v43 = vmul.f32 0.015625, %v15380_v31 }
 0x8ea   : > { %v6325_v48 = vpack.c.bf16 %v6297_v42, %v6296_v32  ;;  %10297 = vrsqrt.f32 %v6208_v26  ;;  %v6084_v18 = vmul.f32 0.015625, %v6026_v29  ;;  %v18268_v40 = vsub.f32 %v15551_v9, %v15520_v60  ;;  %v10288_v44 = vpop.eup %10287 }
 0x8eb   : > { %v6118_v62 = vmul.f32 %v15673_v53, %v15673_v53  ;;  %v6211_v12 = vadd.f32 1e-05, %v6179_v38  ;;  %v6210_v7 = vadd.f32 1e-05, %v6178_v52  ;;  %v6149_v30 = vsub.f32 %v6085_v27, %v6117_v57  ;;  %v10290_v33 = vpop.eup %10289  ;;  %v6035_v16 = vpop.xlane.xlu1 %6034 }
 0x8ec   : > { %6369 = vrot.lane.b32.xlu1 %v6325_v48, %s10724_s16  ;;  %v6298_v6 = vmul.f32 %v10286_v51, %v18268_v40  ;;  %v15690_v34 = vmul.f32 0.015625, %v15382_v45  ;;  %v6148_v31 = vsub.f32 %v6084_v18, %v6116_v50  ;;  %v6032_v25 = vpop.xlane.xlu0 %6031  ;;  %v18269_v55 = vsub.f32 %v15560_v8, %v15523_v3 }
 0x8ed   : > { %10299 = vrsqrt.f32 %v6211_v12  ;;  %v6181_v9 = vmax.f32 %v6149_v30, 0.0  ;;  %v6087_v41 = vmul.f32 0.015625, %v6035_v16  ;;  %v6086_v4 = vmul.f32 0.015625, %v6032_v25  ;;  %v10593_v30 = vld [vmem:[%s14333_s27 + $0x88] sm:$0xff] }
 0x8ee   : > { %v6326_v42 = vpack.c.bf16 %v6299_v1, %v6298_v6  ;;  %v6301_v60 = vmul.f32 %v10288_v44, %v18269_v55  ;;  %v6121_v11 = vmul.f32 %v15681_v43, %v15681_v43  ;;  %10301 = vrsqrt.f32 %v6210_v7  ;;  %v10292_v32 = vpop.eup %10291  ;;  %v10594_v55 = vld [vmem:[%s14333_s27 + $0x80] sm:$0xff] }
 0x8ef   : > { %v6180_v57 = vmax.f32 %v6148_v31, 0.0  ;;  %v18270_v45 = vsub.f32 %v15569_v24, %v15540_v14  ;;  %v15702_v15 = vmul.f32 0.015625, %v15384_v20  ;;  %v6213_v3 = vadd.f32 1e-05, %v6181_v9  ;;  %v10294_v54 = vpop.eup %10293  ;;  %v6041_v26 = vpop.xlane.xlu1 %6040 }
 0x8f0   : > { %6371 = vrot.lane.b32.xlu0 %v6326_v42, %s10724_s16  ;;  %v6151_v8 = vsub.f32 %v6087_v41, %v6119_v28  ;;  %v6150_v56 = vsub.f32 %v6086_v4, %v6118_v62  ;;  %v15705_v17 = vmul.f32 0.015625, %v15386_v39  ;;  %v6038_v48 = vpop.xlane.xlu0 %6037  ;;  %v18271_v29 = vsub.f32 %v15581_v49, %v15543_v47 }
 0x8f1   : > { %v6300_v50 = vmul.f32 %v10290_v33, %v18270_v45  ;;  %v6212_v51 = vadd.f32 1e-05, %v6180_v57  ;;  %10303 = vrsqrt.f32 %v6213_v3  ;;  %v6089_v20 = vmul.f32 0.015625, %v6041_v26  ;;  %v10595_v57 = vld [vmem:[%s14333_s27 + $0x98] sm:$0xff] }
 0x8f2   : > { %v6303_v24 = vmul.f32 %v10292_v32, %v18271_v29  ;;  %v6183_v14 = vmax.f32 %v6151_v8, 0.0  ;;  %v6182_v10 = vmax.f32 %v6150_v56, 0.0  ;;  %v6120_v28 = vmul.f32 %v15690_v34, %v15690_v34  ;;  %v10296_v38 = vpop.eup %10295  ;;  %v10596_v32 = vld [vmem:[%s14333_s27 + $0x90] sm:$0xff] }
 0x8f3   : > { %v6327_v61 = vpack.c.bf16 %v6301_v60, %v6300_v50  ;;  %10305 = vrsqrt.f32 %v6212_v51  ;;  %v6088_v39 = vmul.f32 0.015625, %v6038_v48  ;;  %v6302_v1 = vmul.f32 %v10294_v54, %v6270_v5  ;;  %v6047_v44 = vpop.xlane.xlu1 %6046  ;;  %v10597_v54 = vld [vmem:[%s14333_s27 + $0xa8] sm:$0xff]  ;;  %v10598_v48 = vld [vmem:[%s14333_s27 + $0xa0] sm:$0xff] }
 0x8f4   : > { %v6123_v47 = vmul.f32 %v15702_v15, %v15702_v15  ;;  %v6215_v49 = vadd.f32 1e-05, %v6183_v14  ;;  %v6214_v52 = vadd.f32 1e-05, %v6182_v10  ;;  %v6153_v27 = vsub.f32 %v6089_v20, %v6121_v11  ;;  %v10298_v18 = vpop.eup %10297  ;;  %v6044_v12 = vpop.xlane.xlu0 %6043 }
 0x8f5   : > { %6373 = vrot.lane.b32.xlu1 %v6327_v61, %s10724_s16  ;;  %v6122_v40 = vmul.f32 %v15705_v17, %v15705_v17  ;;  %v6152_v6 = vsub.f32 %v6088_v39, %v6120_v28  ;;  %v6328_v62 = vpack.c.bf16 %v6303_v24, %v6302_v1  ;;  %v6305_v19 = vmul.f32 %v10296_v38, %v6273_v35  ;;  %v10600_v28 = vld [vmem:[%s14333_s27 + $0xb0] sm:$0xff] }
 0x8f6   : > { %10307 = vrsqrt.f32 %v6215_v49  ;;  %v6185_v13 = vmax.f32 %v6153_v27, 0.0  ;;  %v6091_v5 = vmul.f32 0.015625, %v6047_v44  ;;  %v6090_v7 = vmul.f32 0.015625, %v6044_v12  ;;  %v15765_v12 = vld [vmem:[%s15753_s7 + $0x8] sm:$0xff] }
 0x8f7   : > { %v6275_v33 = vsub.f32 %v10593_v30, %v15620_v63  ;;  %10309 = vrsqrt.f32 %v6214_v52  ;;  %v6184_v31 = vmax.f32 %v6152_v6, 0.0  ;;  %6375 = vrot.lane.b32.xlu0 %v6328_v62, %s10724_s16  ;;  %v6304_v16 = vmul.f32 %v10298_v18, %v6272_v46  ;;  %v10300_v42 = vpop.eup %10299  ;;  %v10601_v52 = vld [vmem:[%s14333_s27 + $0xc8] sm:$0xff]  ;;  %v10602_v18 = vld [vmem:[%s14333_s27 + $0xc0] sm:$0xff] }
 0x8f8   : > { %v6217_v59 = vadd.f32 1e-05, %v6185_v13  ;;  %v6155_v0 = vsub.f32 %v6091_v5, %v6123_v47  ;;  %v6154_v35 = vsub.f32 %v6090_v7, %v6122_v40  ;;  %v10302_v25 = vpop.eup %10301  ;;  %v6274_v60 = vsub.f32 %v10594_v55, %v15624_v23  ;;  %v15756_v62 = vld [vmem:[%s15753_s7] sm:$0xff]  ;;  %v15776_v13 = vld [vmem:[%s15753_s7 + $0x18] sm:$0xff] }
 0x8f9   : > { %v6216_v9 = vadd.f32 1e-05, %v6184_v31  ;;  %v6329_v63 = vpack.c.bf16 %v6305_v19, %v6304_v16  ;;  %v6307_v41 = vmul.f32 %v10300_v42, %v6275_v33  ;;  %v6277_v58 = vsub.f32 %v10595_v57, %v15639_v21  ;;  %v15799_v33 = vld [vmem:[%s15753_s7 + $0x20] sm:$0xff]  ;;  %v15806_v31 = vld [vmem:[%s15753_s7 + $0x30] sm:$0xff]  ;;  %v15809_v16 = vld [vmem:[%s15753_s7 + $0x28] sm:$0xff] }
 0x8fa   : > { %10311 = vrsqrt.f32 %v6217_v59  ;;  %v6187_v4 = vmax.f32 %v6155_v0, 0.0  ;;  %v6186_v11 = vmax.f32 %v6154_v35, 0.0  ;;  %v6306_v22 = vmul.f32 %v10302_v25, %v6274_v60  ;;  %v15820_v59 = vld [vmem:[%s15753_s7 + $0x38] sm:$0xff]  ;;  %v15843_v55 = vld [vmem:[%s15753_s7 + $0x40] sm:$0xff]  ;;  %v15850_v60 = vld [vmem:[%s15753_s7 + $0x50] sm:$0xff] }
 0x8fb   : > { %10313 = vrsqrt.f32 %v6216_v9  ;;  %6377 = vrot.lane.b32.xlu1 %v6329_v63, %s10724_s16  ;;  %v10304_v46 = vpop.eup %10303  ;;  %v6276_v3 = vsub.f32 %v10596_v32, %v15651_v36  ;;  %v6279_v21 = vsub.f32 %v10597_v54, %v15660_v2  ;;  %v6278_v29 = vsub.f32 %v10598_v48, %v15673_v53  ;;  %v10599_v36 = vld [vmem:[%s14333_s27 + $0xb8] sm:$0xff]  ;;  %v15853_v9 = vld [vmem:[%s15753_s7 + $0x48] sm:$0xff] }
 0x8fc   : > { %v6219_v45 = vadd.f32 1e-05, %v6187_v4  ;;  %v6218_v50 = vadd.f32 1e-05, %v6186_v11  ;;  %v6330_v8 = vpack.c.bf16 %v6307_v41, %v6306_v22  ;;  %v6309_v56 = vmul.f32 %v10304_v46, %v6277_v58  ;;  %v15864_v41 = vld [vmem:[%s15753_s7 + $0x58] sm:$0xff]  ;;  %v15887_v58 = vld [vmem:[%s15753_s7 + $0x60] sm:$0xff]  ;;  %v15889_v22 = vpop.xlane.xlu0 %6049 }
 0x8fd   : > { %v10306_v23 = vpop.eup %10305  ;;  %v6281_v10 = vsub.f32 %v10599_v36, %v15681_v43  ;;  %v6280_v39 = vsub.f32 %v10600_v28, %v15690_v34  ;;  %v6283_v53 = vsub.f32 %v10601_v52, %v15702_v15  ;;  %v6282_v43 = vsub.f32 %v10602_v18, %v15705_v17  ;;  %v15762_v17 = vld [vmem:[%s15753_s7 + $0x10] sm:$0xff] }
 0x8fe   : > { %10315 = vrsqrt.f32 %v6219_v45  ;;  %6379 = vrot.lane.b32.xlu0 %v6330_v8, %s10724_s16  ;;  %v6308_v51 = vmul.f32 %v10306_v23, %v6276_v3  ;;  %v15773_v19 = vmul.f32 %v15756_v62, %v15756_v62  ;;  %v15784_v5 = vmul.f32 %v15762_v17, %v15762_v17  ;;  %v15896_v46 = vld [vmem:[%s15753_s7 + $0x70] sm:$0xff]  ;;  %v15899_v45 = vld [vmem:[%s15753_s7 + $0x68] sm:$0xff]  ;;  %v15909_v23 = vpop.xlane.xlu1 %6052  ;;  %v15914_v3 = vld [vmem:[%s15753_s7 + $0x78] sm:$0xff] }
 0x8ff   : > { %10317 = vrsqrt.f32 %v6218_v50  ;;  %v15788_v7 = vmul.f32 %v15765_v12, %v15765_v12  ;;  %v15796_v30 = vmul.f32 %v15776_v13, %v15776_v13  ;;  %v15817_v42 = vmul.f32 %v15799_v33, %v15799_v33 }
 0x900   : > { %v10308_v26 = vpop.eup %10307  ;;  %v6331_v24 = vpack.c.bf16 %v6309_v56, %v6308_v51  ;;  %v15828_v0 = vmul.f32 %v15806_v31, %v15806_v31  ;;  %v15832_v35 = vmul.f32 %v15809_v16, %v15809_v16  ;;  %v15840_v25 = vmul.f32 %v15820_v59, %v15820_v59  ;;  %v15911_v32 = vpop.xlane.xlu0 %6055  ;;  %v15937_v51 = vld [vmem:[%s15753_s7 + $0x80] sm:$0xff] }
 0x901   : > { %v10310_v61 = vpop.eup %10309  ;;  %v6311_v14 = vmul.f32 %v10308_v26, %v6279_v21  ;;  %v15861_v63 = vmul.f32 %v15843_v55, %v15843_v55  ;;  %v15872_v4 = vmul.f32 %v15850_v60, %v15850_v60  ;;  %v15876_v11 = vmul.f32 %v15853_v9, %v15853_v9 }
 0x902   : > { %6381 = vrot.lane.b32.xlu1 %v6331_v24, %s10724_s16  ;;  %v6310_v20 = vmul.f32 %v10310_v61, %v6278_v29  ;;  %v15884_v57 = vmul.f32 %v15864_v41, %v15864_v41  ;;  %v15907_v50 = vmul.f32 %v15887_v58, %v15887_v58  ;;  %v15922_v8 = vmul.f32 %v15896_v46, %v15896_v46  ;;  %v15928_v54 = vpop.xlane.xlu1 %6058  ;;  %v15951_v29 = vld [vmem:[%s15753_s7 + $0x90] sm:$0xff]  ;;  %v15954_v24 = vld [vmem:[%s15753_s7 + $0x88] sm:$0xff] }
 0x903   : > { %v15926_v56 = vmul.f32 %v15899_v45, %v15899_v45  ;;  %v15941_v26 = vmul.f32 %v15914_v3, %v15914_v3  ;;  %18272 = vst [vmem:[#allocation24_spill] sm:$0xff] %v15954_v24 }
 0x904   : > { %v10312_v2 = vpop.eup %10311  ;;  %v6332_v38 = vpack.c.bf16 %v6311_v14, %v6310_v20  ;;  %v15930_v21 = vpop.xlane.xlu0 %6061  ;;  %v15960_v14 = vmul.f32 %v15937_v51, %v15937_v51  ;;  %v15972_v20 = vmul.f32 %v15951_v29, %v15951_v29 }
 0x905   : > { %v10314_v1 = vpop.eup %10313  ;;  %v6313_v47 = vmul.f32 %v10312_v2, %v6281_v10  ;;  %v15966_v10 = vld [vmem:[%s15753_s7 + $0x98] sm:$0xff]  ;;  %v15978_v2 = vmul.f32 %v15954_v24, %v15954_v24 }
 0x906   : > { %v6312_v49 = vmul.f32 %v10314_v1, %v6280_v39  ;;  %6383 = vrot.lane.b32.xlu0 %v6332_v38, %s10724_s16  ;;  %v15946_v48 = vpop.xlane.xlu1 %6064  ;;  %18273 = vst [vmem:[#allocation28_spill] sm:$0xff] %v15960_v14  ;;  %18274 = vst [vmem:[#allocation72_spill] sm:$0xff] %v15966_v10  ;;  %v15986_v39 = vld [vmem:[%s15753_s7 + $0xa0] sm:$0xff]  ;;  %v15990_v1 = vmul.f32 %v15966_v10, %v15966_v10 }
 0x907   : > { %18275 = vst [vmem:[#allocation21_spill] sm:$0xff] %v15972_v20  ;;  %18276 = vst [vmem:[#allocation93_spill] sm:$0xff] %v15978_v2 }
 0x908   : > { %v10316_v27 = vpop.eup %10315  ;;  %v6333_v40 = vpack.c.bf16 %v6313_v47, %v6312_v49  ;;  %18277 = vst [vmem:[#allocation37_spill] sm:$0xff] %v15986_v39  ;;  %18278 = vst [vmem:[#allocation10_spill] sm:$0xff] %v15990_v1  ;;  %v15998_v47 = vld [vmem:[%s15753_s7 + $0xb0] sm:$0xff]  ;;  %v16001_v49 = vld [vmem:[%s15753_s7 + $0xa8] sm:$0xff] }
 0x909   : > { %v10318_v6 = vpop.eup %10317  ;;  %v6315_v44 = vmul.f32 %v10316_v27, %v6283_v53  ;;  %18279 = vst [vmem:[#allocation29_spill] sm:$0xff] %v15998_v47  ;;  %18280 = vst [vmem:[#allocation38_spill] sm:$0xff] %v16001_v49  ;;  %v16008_v53 = vmul.f32 %v15986_v39, %v15986_v39  ;;  %v16013_v27 = vld [vmem:[%s15753_s7 + $0xb8] sm:$0xff] }
 0x90a   : > { %6385 = vrot.lane.b32.xlu1 %v6333_v40, %s10724_s16  ;;  %v6314_v34 = vmul.f32 %v10318_v6, %v6282_v43  ;;  %18282 = vst [vmem:[#allocation20_spill] sm:$0xff] %v16013_v27  ;;  %v16020_v43 = vmul.f32 %v15998_v47, %v15998_v47  ;;  %v16026_v40 = vmul.f32 %v16001_v49, %v16001_v49 }
 0x90b   : > { %18281 = vst [vmem:[#allocation69_spill] sm:$0xff] %v16008_v53 }
 0x90c   : > { %v6334_v15 = vpack.c.bf16 %v6315_v44, %v6314_v34  ;;  %18283 = vst [vmem:[#allocation73_spill] sm:$0xff] %v16020_v43  ;;  %18284 = vst [vmem:[#allocation36_spill] sm:$0xff] %v16026_v40  ;;  %v16034_v44 = vld [vmem:[%s15753_s7 + $0xc0] sm:$0xff]  ;;  %v16038_v34 = vmul.f32 %v16013_v27, %v16013_v27 }
 0x90d   : > { %18285 = vst [vmem:[#allocation16_spill] sm:$0xff] %v16034_v44 }
 0x90e   : > { %7526 = vrot.lane.b32.xlu1 %v15756_v62, %s10724_s16  ;;  %6387 = vrot.lane.b32.xlu0 %v6334_v15, %s10724_s16  ;;  %18286 = vst [vmem:[#allocation84_spill] sm:$0xff] %v16038_v34 }
 0x912   : > { %7530 = vrot.lane.b32.xlu1 %v15762_v17, %s10724_s16  ;;  %7528 = vrot.lane.b32.xlu0 %v15765_v12, %s10724_s16 }
 0x916   : > { %7782 = vrot.lane.b32.xlu1 %v15773_v19, %s10724_s16  ;;  %7532 = vrot.lane.b32.xlu0 %v15776_v13, %s10724_s16 }
 0x91a   : > { %7786 = vrot.lane.b32.xlu1 %v15784_v5, %s10724_s16  ;;  %7784 = vrot.lane.b32.xlu0 %v15788_v7, %s10724_s16 }
 0x91e   : > { %7534 = vrot.lane.b32.xlu1 %v15799_v33, %s10724_s16  ;;  %7788 = vrot.lane.b32.xlu0 %v15796_v30, %s10724_s16 }
 0x922   : > { %7538 = vrot.lane.b32.xlu1 %v15806_v31, %s10724_s16  ;;  %7536 = vrot.lane.b32.xlu0 %v15809_v16, %s10724_s16 }
 0x926   : > { %7790 = vrot.lane.b32.xlu1 %v15817_v42, %s10724_s16  ;;  %7540 = vrot.lane.b32.xlu0 %v15820_v59, %s10724_s16 }
 0x92a   : > { %7794 = vrot.lane.b32.xlu1 %v15828_v0, %s10724_s16  ;;  %7792 = vrot.lane.b32.xlu0 %v15832_v35, %s10724_s16 }
 0x92e   : > { %7542 = vrot.lane.b32.xlu1 %v15843_v55, %s10724_s16  ;;  %7796 = vrot.lane.b32.xlu0 %v15840_v25, %s10724_s16 }
 0x932   : > { %7546 = vrot.lane.b32.xlu1 %v15850_v60, %s10724_s16  ;;  %7544 = vrot.lane.b32.xlu0 %v15853_v9, %s10724_s16 }
 0x936   : > { %7798 = vrot.lane.b32.xlu1 %v15861_v63, %s10724_s16  ;;  %7548 = vrot.lane.b32.xlu0 %v15864_v41, %s10724_s16 }
 0x93a   : > { %7802 = vrot.lane.b32.xlu1 %v15872_v4, %s10724_s16  ;;  %7800 = vrot.lane.b32.xlu0 %v15876_v11, %s10724_s16 }
 0x93e   : > { %7550 = vrot.lane.b32.xlu1 %v15887_v58, %s10724_s16  ;;  %7804 = vrot.lane.b32.xlu0 %v15884_v57, %s10724_s16 }
 0x942   : > { %7554 = vrot.lane.b32.xlu1 %v15896_v46, %s10724_s16  ;;  %7552 = vrot.lane.b32.xlu0 %v15899_v45, %s10724_s16 }
 0x946   : > { %7806 = vrot.lane.b32.xlu1 %v15907_v50, %s10724_s16  ;;  %7556 = vrot.lane.b32.xlu0 %v15914_v3, %s10724_s16 }
 0x94a   : > { %7810 = vrot.lane.b32.xlu1 %v15922_v8, %s10724_s16  ;;  %7808 = vrot.lane.b32.xlu0 %v15926_v56, %s10724_s16  ;;  %v6364_v61 = vpop.permute.xlu0 %6363 }
 0x94b   : > { %9521 = vmatprep.mubr.msk.bf16.mxu0 %vm1031_vm0, %v6364_v61  ;;  %v16046_v61 = vld [vmem:[%s15753_s7 + $0xd0] sm:$0xff] }
 0x94c   : > { %18287 = vst [vmem:[#allocation92_spill] sm:$0xff] %v16046_v61 }
 0x94e   : > { %7558 = vrot.lane.b32.xlu1 %v15937_v51, %s10724_s16  ;;  %7812 = vrot.lane.b32.xlu0 %v15941_v26, %s10724_s16 }
 0x952   : > { %7562 = vrot.lane.b32.xlu1 %v15951_v29, %s10724_s16  ;;  %7560 = vrot.lane.b32.xlu0 %v15954_v24, %s10724_s16  ;;  %v6366_v36 = vpop.permute.xlu1 %6365  ;;  %v6707_v24 = vsel %vm1031_vm0, %v15809_v16, 0.0  ;;  %v6864_v16 = vsel %vm1031_vm0, %v15817_v42, 0.0  ;;  %v6867_v42 = vsel %vm1031_vm0, %v15832_v35, 0.0 }
 0x953   : > { %9522 = vmatmul.mubr.msk.bf16.vlgmr.msra.gmra.mrb[0].mxu0 %vm1031_vm0, %v6366_v36  ;;  %v16049_v36 = vld [vmem:[%s15753_s7 + $0xc8] sm:$0xff] }
 0x954   : > { %18288 = vst [vmem:[#allocation54_spill] sm:$0xff] %v16049_v36 }
 0x956   : > { %7814 = vrot.lane.b32.xlu1 %v15960_v14, %s10724_s16  ;;  %7564 = vrot.lane.b32.xlu0 %v15966_v10, %s10724_s16 }
 0x958   : > { %v6368_v28 = vpop.permute.xlu1 %6367 }
 0x959   : > { %9525 = vmatprep.mubr.msk.bf16.mxu0 %vm1031_vm0, %v6368_v28 }
 0x95a   : > { %7818 = vrot.lane.b32.xlu1 %v15972_v20, %s10724_s16  ;;  %7816 = vrot.lane.b32.xlu0 %v15978_v2, %s10724_s16  ;;  %v6704_v2 = vsel %vm1031_vm0, %v15799_v33, 0.0 }
 0x95e   : > { %v6370_v38 = vpop.permute.xlu1 %6369  ;;  %7566 = vrot.lane.b32.xlu1 %v15986_v39, %s10724_s16  ;;  %7820 = vrot.lane.b32.xlu0 %v15990_v1, %s10724_s16 }
 0x95f   : > { %9526 = vmatmul.mubr.msk.bf16.gmra.mrb[4].mxu0 %vm1031_vm0, %v6370_v38  ;;  %v16056_v38 = vmul.f32 %v16034_v44, %v16034_v44 }
 0x961   : > { %18289 = vst [vmem:[#allocation88_spill] sm:$0xff] %v16056_v38 }
 0x962   : > { %v6372_v52 = vpop.permute.xlu0 %6371  ;;  %7570 = vrot.lane.b32.xlu1 %v15998_v47, %s10724_s16  ;;  %7568 = vrot.lane.b32.xlu0 %v16001_v49, %s10724_s16 }
 0x963   : > { %9529 = vmatprep.mubr.msk.bf16.mxu0 %vm1031_vm0, %v6372_v52  ;;  %v16061_v52 = vld [vmem:[%s15753_s7 + $0xd8] sm:$0xff] }
 0x964   : > { %18290 = vst [vmem:[#allocation11_spill] sm:$0xff] %v16061_v52 }
 0x966   : > { %7822 = vrot.lane.b32.xlu1 %v16008_v53, %s10724_s16  ;;  %7572 = vrot.lane.b32.xlu0 %v16013_v27, %s10724_s16 }
 0x967   : > { %v6374_v18 = vpop.permute.xlu1 %6373 }
 0x968   : > { %9530 = vmatmul.mubr.msk.bf16.gmra.mrb[8].mxu0 %vm1031_vm0, %v6374_v18 }
 0x969   : > { %v6376_v6 = vpop.permute.xlu0 %6375 }
 0x96a   : > { %9533 = vmatprep.mubr.msk.bf16.mxu0 %vm1031_vm0, %v6376_v6  ;;  %7826 = vrot.lane.b32.xlu1 %v16020_v43, %s10724_s16  ;;  %v16068_v6 = vmul.f32 %v16046_v61, %v16046_v61 }
 0x96b   : > { %7824 = vrot.lane.b32.xlu0 %v16026_v40, %s10724_s16 }
 0x96c   : > { %18291 = vst [vmem:[#allocation49_spill] sm:$0xff] %v16068_v6 }
 0x96d   : > { %v6378_v15 = vpop.permute.xlu1 %6377 }
 0x96e   : > { %7574 = vrot.lane.b32.xlu1 %v16034_v44, %s10724_s16 }
 0x96f   : > { %7828 = vrot.lane.b32.xlu0 %v16038_v34, %s10724_s16 }
 0x970   : > { %9534 = vmatmul.mubr.msk.bf16.gmra.mrb[12].mxu0 %vm1031_vm0, %v6378_v15  ;;  %v6380_v28 = vpop.permute.xlu0 %6379  ;;  %v16074_v15 = vmul.f32 %v16049_v36, %v16049_v36 }
 0x971   : > { %9537 = vmatprep.mubr.msk.bf16.mxu0 %vm1031_vm0, %v6380_v28 }
 0x972   : > { %7578 = vrot.lane.b32.xlu1 %v16046_v61, %s10724_s16  ;;  %18292 = vst [vmem:[#allocation31_spill] sm:$0xff] %v16074_v15 }
 0x973   : > { %7576 = vrot.lane.b32.xlu0 %v16049_v36, %s10724_s16 }
 0x974   : > { %v6382_v18 = vpop.permute.xlu1 %6381 }
 0x976   : > { %7830 = vrot.lane.b32.xlu1 %v16056_v38, %s10724_s16 }
 0x977   : > { %7580 = vrot.lane.b32.xlu0 %v16061_v52, %s10724_s16 }
 0x978   : > { %9538 = vmatmul.mubr.msk.bf16.gmra.mrb[16].mxu0 %vm1031_vm0, %v6382_v18  ;;  %v6384_v28 = vpop.permute.xlu0 %6383  ;;  %v16083_v18 = vmul.f32 %v16061_v52, %v16061_v52 }
 0x979   : > { %9541 = vmatprep.mubr.msk.bf16.mxu0 %vm1031_vm0, %v6384_v28  ;;  %v6695_v28 = vsel %vm1031_vm0, %v15765_v12, 0.0  ;;  %v6701_v12 = vsel %vm1031_vm0, %v15776_v13, 0.0  ;;  %v6691_v13 = vld [vmem:[%s15753_s7 + $0xf8] sm:$0xff] }
 0x97a   : > { %7834 = vrot.lane.b32.xlu1 %v16068_v6, %s10724_s16  ;;  %18293 = vst [vmem:[#allocation30_spill] sm:$0xff] %v16083_v18  ;;  %v6698_v6 = vsel %vm1031_vm0, %v15762_v17, 0.0  ;;  %v6861_v17 = vsel %vm1031_vm0, %v15796_v30, 0.0  ;;  %v16132_v44 = vmul.f32 %v6691_v13, %v6691_v13 }
 0x97b   : > { %7832 = vrot.lane.b32.xlu0 %v16074_v15, %s10724_s16  ;;  %v6692_v15 = vsel %vm1031_vm0, %v15756_v62, 0.0  ;;  %v6855_v62 = vsel %vm1031_vm0, %v15788_v7, 0.0  ;;  %v6689_v7 = vld [vmem:[%s15753_s7 + $0xe8] sm:$0xff] }
 0x97c   : > { %v6386_v38 = vpop.permute.xlu1 %6385  ;;  %v16122_v30 = vmul.f32 %v6689_v7, %v6689_v7  ;;  %18297 = vst [vmem:[#allocation79_spill] sm:$0xff] %v16132_v44 }
 0x97e   : > { %18296 = vst [vmem:[#allocation78_spill] sm:$0xff] %v16122_v30 }
 0x97f   : > { %7836 = vrot.lane.b32.xlu0 %v16083_v18, %s10724_s16 }
 0x980   : > { %9542 = vmatmul.mubr.msk.bf16.gmra.mrb[20].mxu0 %vm1031_vm0, %v6386_v38  ;;  %v6388_v61 = vpop.permute.xlu0 %6387  ;;  %v6852_v38 = vsel %vm1031_vm0, %v15773_v19, 0.0  ;;  %v16106_v19 = vld [vmem:[%s15753_s7 + $0xe0] sm:$0xff] }
 0x981   : > { %9545 = vmatprep.mubr.msk.bf16.mxu0 %vm1031_vm0, %v6388_v61  ;;  %v6858_v61 = vsel %vm1031_vm0, %v15784_v5, 0.0  ;;  %18294 = vst [vmem:[#allocation94_spill] sm:$0xff] %v16106_v19  ;;  %v16116_v5 = vmul.f32 %v16106_v19, %v16106_v19 }
 0x983   : > { %18295 = vst [vmem:[#allocation48_spill] sm:$0xff] %v16116_v5 }
 0x99e   : > { %6696 = vadd.xlane.f32.xlu0 %v6695_v28  ;;  %6693 = vadd.xlane.f32.xlu1 %v6692_v15  ;;  %v7529_v15 = vpop.permute.xlu0 %7528  ;;  %v7527_v28 = vpop.permute.xlu1 %7526 }
 0x99f   : > { %v7625_v18 = vsel %vm1031_vm0, %v7529_v15, 0.0  ;;  %v7622_v52 = vsel %vm1031_vm0, %v7527_v28, 0.0 }
 0x9a2   : > { %6699 = vadd.xlane.f32.xlu0 %v6698_v6  ;;  %6853 = vadd.xlane.f32.xlu1 %v6852_v38  ;;  %v6690_v6 = vld [vmem:[%s15753_s7 + $0xf0] sm:$0xff]  ;;  %v7533_v38 = vpop.permute.xlu0 %7532 }
 0x9a3   : > { %v16140_v15 = vmul.f32 %v6690_v6, %v6690_v6 }
 0x9a5   : > { %18298 = vst [vmem:[#allocation33_spill] sm:$0xff] %v16140_v15 }
 0x9a6   : > { %6702 = vadd.xlane.f32.xlu0 %v6701_v12  ;;  %6859 = vadd.xlane.f32.xlu1 %v6858_v61  ;;  %v7531_v12 = vpop.permute.xlu1 %7530  ;;  %v7785_v61 = vpop.permute.xlu0 %7784 }
 0x9a7   : > { %v7628_v1 = vsel %vm1031_vm0, %v7531_v12, 0.0  ;;  %v7881_v33 = vsel %vm1031_vm0, %v7785_v61, 0.0 }
 0x9aa   : > { %6856 = vadd.xlane.f32.xlu0 %v6855_v62  ;;  %v7783_v62 = vpop.permute.xlu1 %7782 }
 0x9ab   : > { %v7878_v10 = vsel %vm1031_vm0, %v7783_v62, 0.0 }
 0x9ae   : > { %6862 = vadd.xlane.f32.xlu0 %v6861_v17  ;;  %v7789_v17 = vpop.permute.xlu0 %7788 }
 0x9af   : > { %v7887_v61 = vsel %vm1031_vm0, %v7789_v17, 0.0 }
 0x9b7   : > { %7582 = vrot.lane.b32.xlu1 %v16106_v19, %s10724_s16  ;;  %v7787_v19 = vpop.permute.xlu1 %7786 }
 0x9bb   : > { %7586 = vrot.lane.b32.xlu1 %v6690_v6, %s10724_s16 }
 0x9bf   : > { %7588 = vrot.lane.b32.xlu1 %v6691_v13, %s10724_s16 }
 0x9c3   : > { %7838 = vrot.lane.b32.xlu1 %v16116_v5, %s10724_s16  ;;  %v16128_v5 = vpop.permute.xlu0 %7536 }
 0x9c4   : > { %7584 = vrot.lane.b32.xlu0 %v6689_v7, %s10724_s16  ;;  %v7535_v7 = vpop.permute.xlu1 %7534  ;;  %v7637_v35 = vsel %vm1031_vm0, %v16128_v5, 0.0  ;;  %v6722_v5 = vsel %vm1031_vm0, %v15850_v60, 0.0 }
 0x9c7   : > { %v16130_v36 = vpop.permute.xlu0 %7540 }
 0x9c8   : > { %7840 = vrot.lane.b32.xlu0 %v16122_v30, %s10724_s16  ;;  %v7539_v30 = vpop.permute.xlu1 %7538 }
 0x9c9   : > { %v7640_v17 = vsel %vm1031_vm0, %v7539_v30, 0.0 }
 0x9cb   : > { %v16134_v34 = vpop.permute.xlu0 %7792 }
 0x9cc   : > { %v16136_v40 = vpop.permute.xlu1 %7790 }
 0x9cd   : > { %v7890_v30 = vsel %vm1031_vm0, %v16136_v40, 0.0  ;;  %v6093_v40 = vmul.f32 0.015625, %v15909_v23  ;;  %v6725_v23 = vsel %vm1031_vm0, %v15864_v41, 0.0 }
 0x9cf   : > { %v16142_v28 = vpop.permute.xlu0 %7796 }
 0x9e7   : > { %7626 = vadd.xlane.f32.xlu0 %v7625_v18  ;;  %7623 = vadd.xlane.f32.xlu1 %v7622_v52  ;;  %v16144_v52 = vpop.permute.xlu1 %7794  ;;  %v16148_v18 = vpop.permute.xlu0 %7544 }
 0x9e8   : > { %v7896_v60 = vsel %vm1031_vm0, %v16144_v52, 0.0  ;;  %v6882_v52 = vsel %vm1031_vm0, %v15872_v4, 0.0 }
 0x9eb   : > { %v16150_v13 = vpop.permute.xlu1 %7542  ;;  %v16152_v43 = vpop.permute.xlu0 %7548 }
 0x9ef   : > { %v16154_v53 = vpop.permute.xlu1 %7546  ;;  %v16156_v27 = vpop.permute.xlu0 %7800 }
 0x9f3   : > { %v16160_v6 = vpop.permute.xlu0 %7804 }
 0x9f7   : > { %v16164_v49 = vpop.permute.xlu0 %7552 }
 0x9f8   : > { %7844 = vrot.lane.b32.xlu1 %v16132_v44, %s10724_s16  ;;  %v16158_v44 = vpop.permute.xlu1 %7798 }
 0x9fb   : > { %v16172_v20 = vpop.permute.xlu0 %7556 }
 0x9fc   : > { %v16162_v47 = vpop.permute.xlu1 %7802 }
 0x9fd   : > { %7842 = vrot.lane.b32.xlu0 %v16140_v15, %s10724_s16  ;;  %v7631_v15 = vsel %vm1031_vm0, %v7533_v38, 0.0  ;;  %v6710_v38 = vsel %vm1031_vm0, %v15806_v31, 0.0 }
 0xa00   : > { %v16166_v39 = vpop.permute.xlu1 %7550 }
 0xa04   : > { %v16174_v14 = vpop.permute.xlu1 %7554 }
 0xa08   : > { %v16183_v12 = vpop.permute.xlu1 %7806 }
 0xa0c   : > { %v16193_v31 = vpop.permute.xlu1 %7810 }
 0xa10   : > { %v16200_v62 = vpop.permute.xlu1 %7558 }
 0xa1c   : > { %7632 = vadd.xlane.f32.xlu0 %v7631_v15  ;;  %7629 = vadd.xlane.f32.xlu1 %v7628_v1  ;;  %v16181_v1 = vpop.permute.xlu0 %7808  ;;  %v7884_v15 = vsel %vm1031_vm0, %v7787_v19, 0.0 }
 0xa20   : > { %6705 = vadd.xlane.f32.xlu0 %v6704_v2  ;;  %7879 = vadd.xlane.f32.xlu1 %v7878_v10  ;;  %v6713_v10 = vsel %vm1031_vm0, %v15820_v59, 0.0  ;;  %v16191_v2 = vpop.permute.xlu0 %7812  ;;  %v7634_v59 = vsel %vm1031_vm0, %v7535_v7, 0.0 }
 0xa24   : > { %6708 = vadd.xlane.f32.xlu0 %v6707_v24  ;;  %6711 = vadd.xlane.f32.xlu1 %v6710_v38  ;;  %v6870_v24 = vsel %vm1031_vm0, %v15828_v0, 0.0  ;;  %v16198_v19 = vpop.permute.xlu0 %7560  ;;  %v6873_v38 = vsel %vm1031_vm0, %v15840_v25, 0.0  ;;  %v16209_v0 = vpop.permute.xlu1 %7562  ;;  %v7643_v25 = vsel %vm1031_vm0, %v16130_v36, 0.0  ;;  %v6092_v36 = vmul.f32 0.015625, %v15889_v22 }
 0xa25   : > { %v6876_v22 = vsel %vm1031_vm0, %v15861_v63, 0.0  ;;  %v6879_v63 = vsel %vm1031_vm0, %v15876_v11, 0.0  ;;  %v7652_v11 = vsel %vm1031_vm0, %v16154_v53, 0.0 }
 0xa28   : > { %7882 = vadd.xlane.f32.xlu0 %v7881_v33  ;;  %7885 = vadd.xlane.f32.xlu1 %v7884_v15  ;;  %v16207_v33 = vpop.permute.xlu0 %7564  ;;  %v6716_v15 = vsel %vm1031_vm0, %v15843_v55, 0.0  ;;  %v6719_v55 = vsel %vm1031_vm0, %v15853_v9, 0.0  ;;  %v7893_v9 = vsel %vm1031_vm0, %v16134_v34, 0.0 }
 0xa2c   : > { %6714 = vadd.xlane.f32.xlu0 %v6713_v10  ;;  %6865 = vadd.xlane.f32.xlu1 %v6864_v16  ;;  %v16216_v7 = vpop.permute.xlu0 %7816  ;;  %v16218_v10 = vpop.permute.xlu1 %7814  ;;  %v5837_v16 = vmul.f32 0.015625, %v15388_v37 }
 0xa30   : > { %7888 = vadd.xlane.f32.xlu0 %v7887_v61  ;;  %6871 = vadd.xlane.f32.xlu1 %v6870_v24  ;;  %v16229_v24 = vpop.permute.xlu0 %7820  ;;  %v16231_v61 = vpop.permute.xlu1 %7818 }
 0xa34   : > { %6868 = vadd.xlane.f32.xlu0 %v6867_v42  ;;  %7635 = vadd.xlane.f32.xlu1 %v7634_v59  ;;  %v18299_v42 = vld [vmem:[#allocation27_spill] sm:$0xff] }
 0xa35   : > { %v5836_v59 = vmul.f32 0.015625, %v18299_v42  ;;  %v7899_v42 = vsel %vm1031_vm0, %v16142_v28, 0.0  ;;  %v6885_v28 = vsel %vm1031_vm0, %v15884_v57, 0.0  ;;  %v10603_v57 = vld [vmem:[%s14333_s27 + $0xd8] sm:$0xff] }
 0xa37   : > { %v6124_v37 = vmul.f32 %v5836_v59, %v5836_v59 }
 0xa38   : > { %6874 = vadd.xlane.f32.xlu0 %v6873_v38  ;;  %7641 = vadd.xlane.f32.xlu1 %v7640_v17  ;;  %v6125_v38 = vmul.f32 %v5837_v16, %v5837_v16 }
 0xa3a   : > { %v6157_v17 = vsub.f32 %v6093_v40, %v6125_v38 }
 0xa3c   : > { %7638 = vadd.xlane.f32.xlu0 %v7637_v35  ;;  %6717 = vadd.xlane.f32.xlu1 %v6716_v15  ;;  %v16240_v15 = vpop.permute.xlu0 %7568  ;;  %v16242_v35 = vpop.permute.xlu1 %7566  ;;  %v6189_v34 = vmax.f32 %v6157_v17, 0.0  ;;  %v7655_v17 = vsel %vm1031_vm0, %v16152_v43, 0.0 }
 0xa3e   : > { %v6221_v41 = vadd.f32 1e-05, %v6189_v34 }
 0xa40   : > { %7644 = vadd.xlane.f32.xlu0 %v7643_v25  ;;  %7891 = vadd.xlane.f32.xlu1 %v7890_v30  ;;  %v6156_v25 = vsub.f32 %v6092_v36, %v6124_v37  ;;  %v7646_v36 = vsel %vm1031_vm0, %v16150_v13, 0.0  ;;  %10319 = vrsqrt.f32 %v6221_v41  ;;  %v6731_v41 = vsel %vm1031_vm0, %v15899_v45, 0.0 }
 0xa41   : > { %v6737_v45 = vsel %vm1031_vm0, %v15914_v3, 0.0  ;;  %v6094_v3 = vmul.f32 0.015625, %v15911_v32 }
 0xa42   : > { %v6188_v30 = vmax.f32 %v6156_v25, 0.0  ;;  %v10604_v25 = vld [vmem:[%s14333_s27 + $0xd0] sm:$0xff] }
 0xa43   : > { %v6284_v53 = vsub.f32 %v10604_v25, %v5836_v59  ;;  %v7902_v59 = vsel %vm1031_vm0, %v16158_v44, 0.0  ;;  %v7911_v25 = vsel %vm1031_vm0, %v16160_v6, 0.0 }
 0xa44   : > { %6720 = vadd.xlane.f32.xlu0 %v6719_v55  ;;  %6723 = vadd.xlane.f32.xlu1 %v6722_v5  ;;  %v16250_v55 = vpop.permute.xlu0 %7572  ;;  %v16252_v5 = vpop.permute.xlu1 %7570  ;;  %v6220_v40 = vadd.f32 1e-05, %v6188_v30  ;;  %v6728_v30 = vsel %vm1031_vm0, %v15887_v58, 0.0 }
 0xa46   : > { %10321 = vrsqrt.f32 %v6220_v40 }
 0xa48   : > { %7894 = vadd.xlane.f32.xlu0 %v7893_v9  ;;  %7897 = vadd.xlane.f32.xlu1 %v7896_v60  ;;  %v16260_v4 = vpop.permute.xlu0 %7824  ;;  %v16262_v38 = vpop.permute.xlu1 %7822  ;;  %v7649_v60 = vsel %vm1031_vm0, %v16148_v18, 0.0 }
 0xa4a   : > { %v10320_v37 = vpop.eup %10319 }
 0xa4c   : > { %6726 = vadd.xlane.f32.xlu0 %v6725_v23  ;;  %6877 = vadd.xlane.f32.xlu1 %v6876_v22  ;;  %v16268_v9 = vpop.permute.xlu0 %7828  ;;  %v16270_v13 = vpop.permute.xlu1 %7826  ;;  %v6285_v22 = vsub.f32 %v10603_v57, %v5837_v16 }
 0xa4e   : > { %v6317_v18 = vmul.f32 %v10320_v37, %v6285_v22  ;;  %v7908_v37 = vsel %vm1031_vm0, %v16162_v47, 0.0  ;;  %v6095_v22 = vmul.f32 0.015625, %v15928_v54  ;;  %v6888_v47 = vsel %vm1031_vm0, %v15907_v50, 0.0 }
 0xa4f   : > { %v6891_v54 = vsel %vm1031_vm0, %v15926_v56, 0.0  ;;  %v6897_v56 = vsel %vm1031_vm0, %v15941_v26, 0.0 }
 0xa50   : > { %7900 = vadd.xlane.f32.xlu0 %v7899_v42  ;;  %6883 = vadd.xlane.f32.xlu1 %v6882_v52  ;;  %v10322_v23 = vpop.eup %10321  ;;  %v16278_v34 = vpop.permute.xlu0 %7576 }
 0xa51   : > { %v16280_v52 = vpop.permute.xlu1 %7574  ;;  %v6316_v42 = vmul.f32 %v10322_v23, %v6284_v53 }
 0xa53   : > { %v6335_v16 = vpack.c.bf16 %v6317_v18, %v6316_v42 }
 0xa54   : > { %6880 = vadd.xlane.f32.xlu0 %v6879_v63  ;;  %7647 = vadd.xlane.f32.xlu1 %v7646_v36  ;;  %v16286_v43 = vpop.permute.xlu0 %7580  ;;  %v7905_v36 = vsel %vm1031_vm0, %v16156_v27, 0.0  ;;  %v18301_v27 = vld [vmem:[#allocation26_spill] sm:$0xff] }
 0xa55   : > { %v16288_v63 = vpop.permute.xlu1 %7578  ;;  %v5838_v57 = vmul.f32 0.015625, %v18301_v27 }
 0xa58   : > { %6886 = vadd.xlane.f32.xlu0 %v6885_v28  ;;  %7653 = vadd.xlane.f32.xlu1 %v7652_v11  ;;  %v16293_v40 = vpop.permute.xlu0 %7832 }
 0xa59   : > { %v16295_v58 = vpop.permute.xlu1 %7830 }
 0xa5c   : > { %7650 = vadd.xlane.f32.xlu0 %v7649_v60  ;;  %v16301_v28 = vpop.permute.xlu0 %7836 }
 0xa5d   : > { %v16303_v11 = vpop.permute.xlu1 %7834 }
 0xa60   : > { %7656 = vadd.xlane.f32.xlu0 %v7655_v17  ;;  %v16305_v60 = vpop.xlane.xlu0 %6696  ;;  %v18300_v17 = vld [vmem:[#allocation25_spill] sm:$0xff] }
 0xa61   : > { %v16307_v44 = vpop.xlane.xlu1 %6693  ;;  %v5839_v23 = vmul.f32 0.015625, %v18300_v17 }
 0xa63   : > { %v6127_v53 = vmul.f32 %v5839_v23, %v5839_v23 }
 0xa64   : > { %6729 = vadd.xlane.f32.xlu0 %v6728_v30  ;;  %v6126_v30 = vmul.f32 %v5838_v57, %v5838_v57  ;;  %v16317_v42 = vpop.xlane.xlu0 %6699 }
 0xa65   : > { %v16319_v18 = vpop.xlane.xlu1 %6853 }
 0xa68   : > { %6732 = vadd.xlane.f32.xlu0 %v6731_v41  ;;  %v6159_v41 = vsub.f32 %v6095_v22, %v6127_v53  ;;  %v6734_v22 = vsel %vm1031_vm0, %v15896_v46, 0.0  ;;  %v18303_v53 = vld [vmem:[#allocation90_spill] sm:$0xff]  ;;  %v7658_v46 = vsel %vm1031_vm0, %v16166_v39, 0.0 }
 0xa69   : > { %6389 = vrot.lane.b32.xlu1 %v6335_v16, %s10724_s16  ;;  %v6158_v16 = vsub.f32 %v6094_v3, %v6126_v30  ;;  %v16327_v6 = vpop.xlane.xlu1 %6859  ;;  %v18302_v3 = vld [vmem:[#allocation74_spill] sm:$0xff]  ;;  %v6097_v30 = vmul.f32 0.015625, %v15946_v48 }
 0xa6a   : > { %v6191_v32 = vmax.f32 %v6159_v41, 0.0 }
 0xa6c   : > { %7903 = vadd.xlane.f32.xlu0 %v7902_v59  ;;  %v6190_v59 = vmax.f32 %v6158_v16, 0.0 }
 0xa6d   : > { %v16333_v27 = vpop.permute.xlu1 %7582 }
 0xa6e   : > { %v6222_v17 = vadd.f32 1e-05, %v6190_v59 }
 0xa70   : > { %7906 = vadd.xlane.f32.xlu0 %v7905_v36  ;;  %v16325_v36 = vpop.xlane.xlu0 %6702 }
 0xa71   : > { %v16345_v26 = vpop.permute.xlu1 %7586 }
 0xa72   : > { %18304 = vst [vmem:[#allocation51_spill] sm:$0xff] %v16345_v26 }
 0xa74   : > { %6738 = vadd.xlane.f32.xlu0 %v6737_v45  ;;  %v6894_v45 = vsel %vm1031_vm0, %v15922_v8, 0.0  ;;  %v16331_v50 = vpop.xlane.xlu0 %6856  ;;  %v5840_v8 = vmul.f32 0.015625, %v18303_v53 }
 0xa78   : > { %7909 = vadd.xlane.f32.xlu0 %v7908_v37  ;;  %v6223_v37 = vadd.f32 1e-05, %v6191_v32  ;;  %v16343_v41 = vpop.xlane.xlu0 %6862 }
 0xa7a   : > { %10323 = vrsqrt.f32 %v6223_v37 }
 0xa7b   : > { %10325 = vrsqrt.f32 %v6222_v17  ;;  %v16353_v17 = vpop.permute.xlu1 %7588 }
 0xa7c   : > { %7912 = vadd.xlane.f32.xlu0 %v7911_v25  ;;  %v5841_v25 = vmul.f32 0.015625, %v18302_v3  ;;  %18305 = vst [vmem:[#allocation34_spill] sm:$0xff] %v16353_v17  ;;  %v10606_v3 = vld [vmem:[%s14333_s27 + $0xe0] sm:$0xff]  ;;  %v7667_v17 = vsel %vm1031_vm0, %v16172_v20, 0.0 }
 0xa7d   : > { %v6286_v53 = vsub.f32 %v10606_v3, %v5838_v57 }
 0xa7e   : > { %v6129_v16 = vmul.f32 %v5841_v25, %v5841_v25 }
 0xa80   : > { %6889 = vadd.xlane.f32.xlu0 %v6888_v47  ;;  %v6096_v47 = vmul.f32 0.015625, %v15930_v21  ;;  %v6161_v32 = vsub.f32 %v6097_v30, %v6129_v16  ;;  %v16351_v21 = vpop.permute.xlu0 %7584  ;;  %v7664_v30 = vsel %vm1031_vm0, %v16174_v14, 0.0 }
 0xa82   : > { %v6193_v39 = vmax.f32 %v6161_v32, 0.0 }
 0xa84   : > { %6892 = vadd.xlane.f32.xlu0 %v6891_v54  ;;  %v6128_v54 = vmul.f32 %v5840_v8, %v5840_v8  ;;  %v10324_v48 = vpop.eup %10323 }
 0xa85   : > { %v10326_v37 = vpop.eup %10325 }
 0xa86   : > { %v6160_v59 = vsub.f32 %v6096_v47, %v6128_v54  ;;  %v6318_v47 = vmul.f32 %v10326_v37, %v6286_v53  ;;  %v16359_v54 = vpop.permute.xlu0 %7840  ;;  %v10608_v53 = vld [vmem:[%s14333_s27 + $0xf0] sm:$0xff] }
 0xa87   : > { %18306 = vst [vmem:[#allocation95_spill] sm:$0xff] %v16359_v54 }
 0xa88   : > { %6895 = vadd.xlane.f32.xlu0 %v6894_v45  ;;  %v7661_v45 = vsel %vm1031_vm0, %v16164_v49, 0.0  ;;  %v6192_v26 = vmax.f32 %v6160_v59, 0.0  ;;  %v6225_v49 = vadd.f32 1e-05, %v6193_v39  ;;  %v6288_v39 = vsub.f32 %v10608_v53, %v5840_v8 }
 0xa8a   : > { %v6224_v16 = vadd.f32 1e-05, %v6192_v26  ;;  %10327 = vrsqrt.f32 %v6225_v49  ;;  %v16366_v14 = vpop.xlane.xlu0 %7626  ;;  %v9939_v26 = vld [vmem:[%s17429_s4 + $0xc0] sm:$0xff]  }
 0xa8b   : > { %9553 = vmatprep.subr.bf16.mxu0 %v9939_v26 }
 0xa8c   : > { %6898 = vadd.xlane.f32.xlu0 %v6897_v56  ;;  %v10605_v56 = vld [vmem:[%s14333_s27 + $0xe8] sm:$0xff]  ;;  %10329 = vrsqrt.f32 %v6224_v16  ;;  %9554 = vmatpush3.bf16.msra.mxu0 %v9939_v26 }
 0xa8d   : > { %6735 = vadd.xlane.f32.xlu1 %v6734_v22  ;;  %v6287_v22 = vsub.f32 %v10605_v56, %v5839_v23 }
 0xa8e   : > { %v16373_v32 = vpop.permute.xlu0 %7842 }
 0xa8f   : > { %18307 = vst [vmem:[#allocation32_spill] sm:$0xff] %v16373_v32  ;;  %v18318_v32 = vld [vmem:[#allocation28_spill] sm:$0xff] }
 0xa90   : > { %7659 = vadd.xlane.f32.xlu0 %v7658_v46  ;;  %v6319_v46 = vmul.f32 %v10324_v48, %v6287_v22  ;;  %v9940_v48 = vld [vmem:[%s17429_s4 + $0xc8] sm:$0xff]   ;;  %v10607_v22 = vld [vmem:[%s14333_s27 + $0xf8] sm:$0xff] }
 0xa91   : > { %v6289_v3 = vsub.f32 %v10607_v22, %v5841_v25  ;;  %9555 = vmatprep.subr.bf16.mxu0 %v9940_v48  ;;  %v9942_v25 = vld [vmem:[%s17429_s4 + $0xd8] sm:$0xff]  }
 0xa92   : > { %v6336_v23 = vpack.c.bf16 %v6319_v46, %v6318_v47  ;;  %9556 = vmatpush3.bf16.msra.mxu0 %v9940_v48  ;;  %v9941_v46 = vld [vmem:[%s17429_s4 + $0xd0] sm:$0xff]  }
 0xa93   : > { %9557 = vmatprep.subr.bf16.mxu0 %v9941_v46 }
 0xa94   : > { %7662 = vadd.xlane.f32.xlu0 %v7661_v45  ;;  %v16361_v45 = vpop.permute.xlu1 %7838  ;;  %v10328_v20 = vpop.eup %10327 }
 0xa95   : > { %v6321_v47 = vmul.f32 %v10328_v20, %v6289_v3 }
 0xa96   : > { %v10330_v37 = vpop.eup %10329  ;;  %9558 = vmatpush3.bf16.msra.mxu0 %v9941_v46 }
 0xa97   : > { %9559 = vmatprep.subr.bf16.mxu0 %v9942_v25 }
 0xa98   : > { %7665 = vadd.xlane.f32.xlu0 %v7664_v30  ;;  %v16368_v57 = vpop.xlane.xlu1 %7623  ;;  %v6320_v30 = vmul.f32 %v10330_v37, %v6288_v39  ;;  %v6740_v39 = vsel %vm1031_vm0, %v15937_v51, 0.0  ;;  %v7917_v51 = vsel %vm1031_vm0, %v16181_v1, 0.0  ;;  %v7920_v1 = vsel %vm1031_vm0, %v16193_v31, 0.0 }
 0xa9a   : > { %9560 = vmatpush3.bf16.msra.mxu0 %v9942_v25  ;;  %v7914_v25 = vsel %vm1031_vm0, %v16183_v12, 0.0 }
 0xa9c   : > { %7668 = vadd.xlane.f32.xlu0 %v7667_v17  ;;  %v16375_v59 = vpop.permute.xlu1 %7844 }
 0xa9d   : > { %18308 = vst [vmem:[#allocation96_spill] sm:$0xff] %v16375_v59 }
 0xa9e   : > { %6391 = vrot.lane.b32.xlu1 %v6336_v23, %s10724_s16  ;;  %v6337_v23 = vpack.c.bf16 %v6321_v47, %v6320_v30 }
 0xaa9   : > { %v16380_v17 = vpop.xlane.xlu0 %7632  ;;  %v16382_v56 = vpop.xlane.xlu1 %7629 }
 0xaad   : > { %v16389_v49 = vpop.xlane.xlu0 %6705  ;;  %v16391_v16 = vpop.xlane.xlu1 %7879 }
 0xab1   : > { %v16396_v8 = vpop.xlane.xlu0 %6708  ;;  %v16398_v26 = vpop.xlane.xlu1 %6711 }
 0xab2   : > { %6393 = vrot.lane.b32.xlu0 %v6337_v23, %s10724_s16 }
 0xab5   : > { %v16401_v20 = vpop.xlane.xlu0 %7882  ;;  %v16403_v48 = vpop.xlane.xlu1 %7885 }
 0xab6   : > { %18309 = vst [vmem:[#allocation50_spill] sm:$0xff] %v16403_v48  ;;  %v6746_v48 = vsel %vm1031_vm0, %v15951_v29, 0.0 }
 0xab9   : > { %v16405_v37 = vpop.xlane.xlu0 %6714  ;;  %v16407_v22 = vpop.xlane.xlu1 %6865 }
 0xabd   : > { %v16409_v3 = vpop.xlane.xlu0 %7888  ;;  %v16411_v53 = vpop.xlane.xlu1 %6871 }
 0xabe   : > { %18310 = vst [vmem:[#allocation35_spill] sm:$0xff] %v16409_v3 }
 0xac1   : > { %v16415_v30 = vpop.xlane.xlu0 %6868  ;;  %v16417_v47 = vpop.xlane.xlu1 %7635 }
 0xac2   : > { %18311 = vst [vmem:[#allocation52_spill] sm:$0xff] %v16417_v47  ;;  %6741 = vadd.xlane.f32.xlu1 %v6740_v39 }
 0xac5   : > { %v16419_v46 = vpop.xlane.xlu0 %6874  ;;  %v16421_v23 = vpop.xlane.xlu1 %7641 }
 0xac6   : > { %18312 = vst [vmem:[#allocation53_spill] sm:$0xff] %v16421_v23  ;;  %7915 = vadd.xlane.f32.xlu1 %v7914_v25  ;;  %v18316_v23 = vld [vmem:[#allocation24_spill] sm:$0xff] }
 0xac7   : > { %v6743_v12 = vsel %vm1031_vm0, %v18316_v23, 0.0  ;;  %v18321_v23 = vld [vmem:[#allocation21_spill] sm:$0xff] }
 0xac9   : > { %v16425_v59 = vpop.xlane.xlu0 %7638  ;;  %v16427_v54 = vpop.xlane.xlu1 %6717 }
 0xaca   : > { %18313 = vst [vmem:[#allocation55_spill] sm:$0xff] %v16425_v59  ;;  %7918 = vadd.xlane.f32.xlu1 %v7917_v51  ;;  %v18317_v51 = vld [vmem:[#allocation72_spill] sm:$0xff]  ;;  %v7923_v59 = vsel %vm1031_vm0, %v16191_v2, 0.0 }
 0xacb   : > { %v6749_v29 = vsel %vm1031_vm0, %v18317_v51, 0.0  ;;  %v18322_v51 = vld [vmem:[#allocation93_spill] sm:$0xff] }
 0xacd   : > { %v16433_v39 = vpop.xlane.xlu0 %7644  ;;  %v16435_v3 = vpop.xlane.xlu1 %7891 }
 0xace   : > { %18314 = vst [vmem:[#allocation41_spill] sm:$0xff] %v16433_v39  ;;  %18315 = vst [vmem:[#allocation56_spill] sm:$0xff] %v16435_v3  ;;  %6747 = vadd.xlane.f32.xlu1 %v6746_v48  ;;  %v6900_v39 = vsel %vm1031_vm0, %v18318_v32, 0.0  ;;  %v6903_v32 = vsel %vm1031_vm0, %v18322_v51, 0.0  ;;  %v18326_v51 = vld [vmem:[#allocation37_spill] sm:$0xff] }
 0xad1   : > { %6744 = vadd.xlane.f32.xlu0 %v6743_v12  ;;  %v16439_v25 = vpop.xlane.xlu0 %6720  ;;  %v16441_v47 = vpop.xlane.xlu1 %6723  ;;  %v6906_v12 = vsel %vm1031_vm0, %v18321_v23, 0.0  ;;  %v18324_v23 = vld [vmem:[#allocation10_spill] sm:$0xff] }
 0xad2   : > { %7921 = vadd.xlane.f32.xlu1 %v7920_v1  ;;  %v6909_v2 = vsel %vm1031_vm0, %v18324_v23, 0.0  ;;  %v7679_v23 = vsel %vm1031_vm0, %v16207_v33, 0.0  ;;  %v7929_v33 = vsel %vm1031_vm0, %v16216_v7, 0.0 }
 0xad5   : > { %6750 = vadd.xlane.f32.xlu0 %v6749_v29  ;;  %v16449_v48 = vpop.xlane.xlu0 %7894  ;;  %v16451_v3 = vpop.xlane.xlu1 %7897 }
 0xad6   : > { %18319 = vst [vmem:[#allocation9_spill] sm:$0xff] %v16449_v48  ;;  %18320 = vst [vmem:[#allocation86_spill] sm:$0xff] %v16451_v3  ;;  %6901 = vadd.xlane.f32.xlu1 %v6900_v39  ;;  %v7670_v39 = vsel %vm1031_vm0, %v16200_v62, 0.0 }
 0xad9   : > { %7924 = vadd.xlane.f32.xlu0 %v7923_v59  ;;  %v16457_v31 = vpop.xlane.xlu0 %6726  ;;  %v16459_v1 = vpop.xlane.xlu1 %6877 }
 0xada   : > { %6907 = vadd.xlane.f32.xlu1 %v6906_v12  ;;  %v7676_v12 = vsel %vm1031_vm0, %v16209_v0, 0.0 }
 0xadd   : > { %6904 = vadd.xlane.f32.xlu0 %v6903_v32  ;;  %v16463_v29 = vpop.xlane.xlu0 %7900  ;;  %v16465_v3 = vpop.xlane.xlu1 %6883  ;;  %v6752_v32 = vsel %vm1031_vm0, %v18326_v51, 0.0  ;;  %v18329_v51 = vld [vmem:[#allocation29_spill] sm:$0xff] }
 0xade   : > { %18323 = vst [vmem:[#allocation87_spill] sm:$0xff] %v16463_v29  ;;  %7671 = vadd.xlane.f32.xlu1 %v7670_v39  ;;  %v7673_v29 = vsel %vm1031_vm0, %v16198_v19, 0.0  ;;  %v18328_v19 = vld [vmem:[#allocation38_spill] sm:$0xff] }
 0xae1   : > { %6910 = vadd.xlane.f32.xlu0 %v6909_v2  ;;  %v16471_v59 = vpop.xlane.xlu0 %6880  ;;  %v16473_v48 = vpop.xlane.xlu1 %7647 }
 0xae2   : > { %18325 = vst [vmem:[#allocation81_spill] sm:$0xff] %v16473_v48  ;;  %7677 = vadd.xlane.f32.xlu1 %v7676_v12  ;;  %v7926_v12 = vsel %vm1031_vm0, %v16218_v10, 0.0  ;;  %v6758_v48 = vsel %vm1031_vm0, %v18329_v51, 0.0  ;;  %v7932_v10 = vsel %vm1031_vm0, %v16231_v61, 0.0  ;;  %v18334_v61 = vld [vmem:[#allocation36_spill] sm:$0xff] }
 0xae5   : > { %7674 = vadd.xlane.f32.xlu0 %v7673_v29  ;;  %v16481_v62 = vpop.xlane.xlu0 %6886  ;;  %v16483_v39 = vpop.xlane.xlu1 %7653  ;;  %v6755_v29 = vsel %vm1031_vm0, %v18328_v19, 0.0  ;;  %v18331_v19 = vld [vmem:[#allocation69_spill] sm:$0xff] }
 0xae6   : > { %6753 = vadd.xlane.f32.xlu1 %v6752_v32  ;;  %v6912_v51 = vsel %vm1031_vm0, %v18331_v19, 0.0  ;;  %v18336_v19 = vld [vmem:[#allocation84_spill] sm:$0xff] }
 0xae9   : > { %7680 = vadd.xlane.f32.xlu0 %v7679_v23  ;;  %v16487_v2 = vpop.xlane.xlu0 %7650  ;;  %v6390_v0 = vpop.permute.xlu1 %6389 }
 0xaea   : > { %18327 = vst [vmem:[#allocation23_spill] sm:$0xff] %v16487_v2  ;;  %9546 = vmatmul.mubr.msk.bf16.gmra.mrb[24].mxu0 %vm1031_vm0, %v6390_v0  ;;  %7927 = vadd.xlane.f32.xlu1 %v7926_v12  ;;  %v18330_v0 = vld [vmem:[#allocation20_spill] sm:$0xff] }
 0xaeb   : > { %v6761_v12 = vsel %vm1031_vm0, %v18330_v0, 0.0 }
 0xaed   : > { %6756 = vadd.xlane.f32.xlu0 %v6755_v29  ;;  %v16496_v32 = vpop.xlane.xlu0 %7656 }
 0xaee   : > { %6759 = vadd.xlane.f32.xlu1 %v6758_v48  ;;  %v18332_v48 = vld [vmem:[#allocation73_spill] sm:$0xff] }
 0xaef   : > { %v6918_v7 = vsel %vm1031_vm0, %v18332_v48, 0.0 }
 0xaf1   : > { %7930 = vadd.xlane.f32.xlu0 %v7929_v33  ;;  %v16500_v23 = vpop.xlane.xlu0 %6729  ;;  %v7935_v33 = vsel %vm1031_vm0, %v16229_v24, 0.0  ;;  %v7688_v24 = vsel %vm1031_vm0, %v16252_v5, 0.0 }
 0xaf2   : > { %7933 = vadd.xlane.f32.xlu1 %v7932_v10  ;;  %v6915_v10 = vsel %vm1031_vm0, %v18334_v61, 0.0  ;;  %v7685_v61 = vsel %vm1031_vm0, %v16240_v15, 0.0  ;;  %v18339_v15 = vld [vmem:[#allocation54_spill] sm:$0xff] }
 0xaf5   : > { %6762 = vadd.xlane.f32.xlu0 %v6761_v12  ;;  %v16508_v29 = vpop.xlane.xlu0 %6732  ;;  %v7682_v12 = vsel %vm1031_vm0, %v16242_v35, 0.0  ;;  %v16535_v35 = vmul.f32 0.015625, %v16307_v44  ;;  %v18340_v44 = vld [vmem:[#allocation92_spill] sm:$0xff] }
 0xaf6   : > { %6913 = vadd.xlane.f32.xlu1 %v6912_v51  ;;  %v6921_v51 = vsel %vm1031_vm0, %v18336_v19, 0.0  ;;  %v16540_v19 = vmul.f32 0.015625, %v16305_v60  ;;  %v6948_v60 = vmul.f32 0.015625, %v16319_v18  ;;  %v6950_v18 = vmul.f32 0.015625, %v16327_v6 }
 0xaf9   : > { %7936 = vadd.xlane.f32.xlu0 %v7935_v33  ;;  %v16514_v2 = vpop.xlane.xlu0 %7903 }
 0xafa   : > { %18333 = vst [vmem:[#allocation19_spill] sm:$0xff] %v16514_v2  ;;  %6919 = vadd.xlane.f32.xlu1 %v6918_v7  ;;  %v18337_v7 = vld [vmem:[#allocation16_spill] sm:$0xff]  ;;  %v6951_v2 = vmul.f32 0.015625, %v16343_v41 }
 0xafb   : > { %v6764_v33 = vsel %vm1031_vm0, %v18337_v7, 0.0  ;;  %v6949_v7 = vmul.f32 0.015625, %v16331_v50  ;;  %v16562_v50 = vmul.f32 0.015625, %v16325_v36  ;;  %v18341_v36 = vld [vmem:[#allocation11_spill] sm:$0xff] }
 0xafd   : > { %6916 = vadd.xlane.f32.xlu0 %v6915_v10  ;;  %v16518_v0 = vpop.xlane.xlu0 %7906  ;;  %v6983_v6 = vmul.f32 %v16562_v50, %v16562_v50 }
 0xafe   : > { %18335 = vst [vmem:[#allocation17_spill] sm:$0xff] %v16518_v0  ;;  %7683 = vadd.xlane.f32.xlu1 %v7682_v12  ;;  %v7691_v12 = vsel %vm1031_vm0, %v16250_v55, 0.0  ;;  %v6980_v55 = vmul.f32 %v16535_v35, %v16535_v35  ;;  %v7694_v0 = vsel %vm1031_vm0, %v16280_v52, 0.0  ;;  %v16604_v52 = vsel %vm1031_vm0, %v16278_v34, 0.0 }
 0xb01   : > { %6922 = vadd.xlane.f32.xlu0 %v6921_v51  ;;  %v16524_v48 = vpop.xlane.xlu0 %6738  ;;  %v7938_v51 = vsel %vm1031_vm0, %v16262_v38, 0.0  ;;  %v16559_v38 = vmul.f32 0.015625, %v16317_v42  ;;  %v16573_v42 = vmul.f32 0.015625, %v16396_v8  ;;  %v6953_v8 = vmul.f32 0.015625, %v16415_v30 }
 0xb02   : > { %7689 = vadd.xlane.f32.xlu1 %v7688_v24  ;;  %v6767_v24 = vsel %vm1031_vm0, %v18339_v15, 0.0  ;;  %v7012_v15 = vsub.f32 %v6948_v60, %v6980_v55  ;;  %v18342_v55 = vld [vmem:[#allocation88_spill] sm:$0xff]  ;;  %v16598_v30 = vsel %vm1031_vm0, %v16288_v63, 0.0  ;;  %v16614_v63 = vsel %vm1031_vm0, %v16286_v43, 0.0  ;;  %v18344_v43 = vld [vmem:[#allocation31_spill] sm:$0xff] }
 0xb03   : > { %v6924_v60 = vsel %vm1031_vm0, %v18342_v55, 0.0  ;;  %v16617_v55 = vmul.f32 0.015625, %v16405_v37  ;;  %v16634_v37 = vsel %vm1031_vm0, %v16293_v40, 0.0  ;;  %v6957_v40 = vmul.f32 0.015625, %v16471_v59  ;;  %v18345_v59 = vld [vmem:[#allocation30_spill] sm:$0xff] }
 0xb05   : > { %7686 = vadd.xlane.f32.xlu0 %v7685_v61  ;;  %v16532_v10 = vpop.xlane.xlu0 %7909  ;;  %v6981_v61 = vmul.f32 %v16540_v19, %v16540_v19 }
 0xb06   : > { %18338 = vst [vmem:[#allocation89_spill] sm:$0xff] %v16532_v10  ;;  %6765 = vadd.xlane.f32.xlu1 %v6764_v33  ;;  %v6770_v33 = vsel %vm1031_vm0, %v18340_v44, 0.0  ;;  %v7941_v44 = vsel %vm1031_vm0, %v16260_v4, 0.0  ;;  %v6982_v4 = vmul.f32 %v16559_v38, %v16559_v38  ;;  %v6952_v10 = vmul.f32 0.015625, %v16407_v22 }
 0xb09   : > { %7692 = vadd.xlane.f32.xlu0 %v7691_v12  ;;  %v16542_v5 = vpop.xlane.xlu0 %7912 }
 0xb0a   : > { %7939 = vadd.xlane.f32.xlu1 %v7938_v51  ;;  %v7013_v51 = vsub.f32 %v6949_v7, %v6981_v61  ;;  %v6773_v7 = vsel %vm1031_vm0, %v18341_v36, 0.0  ;;  %v7044_v61 = vmax.f32 %v7012_v15, 0.0  ;;  %v18343_v15 = vld [vmem:[#allocation49_spill] sm:$0xff] }
 0xb0c   : > { %v7045_v41 = vmax.f32 %v7013_v51, 0.0  ;;  %v6985_v51 = vmul.f32 %v16573_v42, %v16573_v42  ;;  %v7076_v22 = vadd.f32 1e-05, %v7044_v61  ;;  %v16626_v61 = vmul.f32 0.015625, %v16439_v25 }
 0xb0d   : > { %6768 = vadd.xlane.f32.xlu0 %v6767_v24  ;;  %v16556_v12 = vpop.xlane.xlu0 %6889  ;;  %v16642_v25 = vsel %vm1031_vm0, %v16301_v28, 0.0 }
 0xb0e   : > { %6771 = vadd.xlane.f32.xlu1 %v6770_v33  ;;  %v7944_v33 = vsel %vm1031_vm0, %v16270_v13, 0.0  ;;  %v16584_v13 = vmul.f32 0.015625, %v16389_v49  ;;  %v7947_v49 = vsel %vm1031_vm0, %v16268_v9, 0.0 }
 0xb10   : > { %v6984_v9 = vmul.f32 %v16584_v13, %v16584_v13 }
 0xb11   : > { %7942 = vadd.xlane.f32.xlu0 %v7941_v44  ;;  %v16568_v24 = vpop.xlane.xlu0 %6892  ;;  %v7014_v44 = vsub.f32 %v6950_v18, %v6982_v4  ;;  %v6930_v18 = vsel %vm1031_vm0, %v18343_v15, 0.0  ;;  %v7017_v4 = vsub.f32 %v6953_v8, %v6985_v51  ;;  %v16645_v51 = vmul.f32 0.015625, %v16427_v54 }
 0xb12   : > { %7945 = vadd.xlane.f32.xlu1 %v7944_v33  ;;  %v7015_v33 = vsub.f32 %v6951_v2, %v6983_v6  ;;  %v7077_v2 = vadd.f32 1e-05, %v7045_v41  ;;  %v6956_v54 = vmul.f32 0.015625, %v16459_v1 }
 0xb13   : > { %v7046_v6 = vmax.f32 %v7014_v44, 0.0  ;;  %v6927_v44 = vsel %vm1031_vm0, %v18344_v43, 0.0  ;;  %v16689_v43 = vmul.f32 0.015625, %v16508_v29 }
 0xb14   : > { %v7047_v41 = vmax.f32 %v7015_v33, 0.0  ;;  %10331 = vrsqrt.f32 %v7077_v2  ;;  %v16637_v33 = vmul.f32 0.015625, %v16398_v26  ;;  %v6987_v26 = vmul.f32 %v16617_v55, %v16617_v55 }
 0xb15   : > { %6774 = vadd.xlane.f32.xlu0 %v6773_v7  ;;  %v16587_v36 = vpop.xlane.xlu0 %6895  ;;  %v16608_v7 = vsel %vm1031_vm0, %v16295_v58, 0.0  ;;  %v16623_v58 = vsel %vm1031_vm0, %v16303_v11, 0.0  ;;  %v6955_v11 = vmul.f32 0.015625, %v16419_v46  ;;  %10333 = vrsqrt.f32 %v7076_v22 }
 0xb16   : > { %6925 = vadd.xlane.f32.xlu1 %v6924_v60  ;;  %v7016_v60 = vsub.f32 %v6952_v10, %v6984_v9  ;;  %v7049_v10 = vmax.f32 %v7017_v4, 0.0  ;;  %v7079_v2 = vadd.f32 1e-05, %v7047_v41  ;;  %v6954_v46 = vmul.f32 0.015625, %v16411_v53  ;;  %v16659_v4 = vld [vmem:[%s15753_s7 + $0x8] sm:$0xff] }
 0xb17   : > { %v6933_v9 = vsel %vm1031_vm0, %v18345_v59, 0.0  ;;  %18346 = vst [vmem:[#allocation70_spill] sm:$0xff] %v16659_v4  ;;  %v7141_v53 = vsub.f32 %v16659_v4, %v16540_v19  ;;  %v7019_v1 = vsub.f32 %v6955_v11, %v6987_v26  ;;  %v6988_v19 = vmul.f32 %v16645_v51, %v16645_v51  ;;  %v16679_v4 = vld [vmem:[%s15753_s7 + $0x18] sm:$0xff] }
 0xb18   : > { %v7048_v15 = vmax.f32 %v7016_v60, 0.0  ;;  %v6986_v60 = vmul.f32 %v16637_v33, %v16637_v33  ;;  %v16684_v11 = vmul.f32 0.015625, %v16457_v31 }
 0xb19   : > { %7948 = vadd.xlane.f32.xlu0 %v7947_v49  ;;  %v16619_v34 = vpop.xlane.xlu0 %6898  ;;  %v7078_v49 = vadd.f32 1e-05, %v7046_v6  ;;  %v16664_v6 = vld [vmem:[%s15753_s7] sm:$0xff] }
 0xb1a   : > { %v16628_v8 = vpop.xlane.xlu1 %6735  ;;  %6931 = vadd.xlane.f32.xlu1 %v6930_v18  ;;  %v6989_v18 = vmul.f32 %v16626_v61, %v16626_v61  ;;  %18347 = vst [vmem:[#allocation71_spill] sm:$0xff] %v16664_v6  ;;  %v7140_v41 = vsub.f32 %v16664_v6, %v16535_v35  ;;  %v7018_v6 = vsub.f32 %v6954_v46, %v6986_v60  ;;  %v18348_v46 = vld [vmem:[#allocation94_spill] sm:$0xff]  ;;  %v16710_v60 = vsel %vm1031_vm0, %v16333_v27, 0.0 }
 0xb1b   : > { %10335 = vrsqrt.f32 %v7078_v49  ;;  %v6959_v49 = vmul.f32 0.015625, %v16481_v62  ;;  %v6776_v31 = vsel %vm1031_vm0, %v18348_v46, 0.0 }
 0xb1c   : > { %v7021_v59 = vsub.f32 %v6957_v40, %v6989_v18  ;;  %10337 = vrsqrt.f32 %v7079_v2  ;;  %v7051_v40 = vmax.f32 %v7019_v1, 0.0  ;;  %v16693_v18 = vmul.f32 0.015625, %v16441_v47 }
 0xb1d   : > { %6928 = vadd.xlane.f32.xlu0 %v6927_v44  ;;  %v16651_v28 = vpop.xlane.xlu0 %7659  ;;  %v7081_v44 = vadd.f32 1e-05, %v7049_v10  ;;  %v7020_v10 = vsub.f32 %v6956_v54, %v6988_v19  ;;  %v16699_v2 = vmul.f32 0.015625, %v16500_v23  ;;  %v7050_v54 = vmax.f32 %v7018_v6, 0.0 }
 0xb1e   : > { %v6392_v22 = vpop.permute.xlu1 %6391  ;;  %7695 = vadd.xlane.f32.xlu1 %v7694_v0  ;;  %v16672_v0 = vld [vmem:[%s15753_s7 + $0x10] sm:$0xff]  ;;  %v10332_v29 = vpop.eup %10331  ;;  %v6958_v47 = vmul.f32 0.015625, %v16465_v3  ;;  %v6960_v6 = vmul.f32 0.015625, %v16556_v12  ;;  %v6990_v3 = vmul.f32 %v16693_v18, %v16693_v18  ;;  %v16718_v19 = vmul.f32 0.015625, %v16628_v8 }
 0xb1f   : > { %9549 = vmatprep.mubr.msk.bf16.mxu0 %vm1031_vm0, %v6392_v22  ;;  %v7080_v22 = vadd.f32 1e-05, %v7048_v15  ;;  %10339 = vrsqrt.f32 %v7081_v44  ;;  %v6961_v15 = vmul.f32 0.015625, %v16568_v24  ;;  %v10334_v1 = vpop.eup %10333  ;;  %v7052_v23 = vmax.f32 %v7020_v10, 0.0 }
 0xb20   : > { %v6993_v24 = vmul.f32 %v16689_v43, %v16689_v43  ;;  %v7083_v44 = vadd.f32 1e-05, %v7051_v40  ;;  %v7173_v10 = vmul.f32 %v10332_v29, %v7141_v53  ;;  %v7082_v46 = vadd.f32 1e-05, %v7050_v54 }
 0xb21   : > { %6934 = vadd.xlane.f32.xlu0 %v6933_v9  ;;  %v16686_v26 = vpop.xlane.xlu0 %7662  ;;  %v7053_v9 = vmax.f32 %v7021_v59, 0.0  ;;  %10341 = vrsqrt.f32 %v7080_v22  ;;  %v6992_v59 = vmul.f32 %v16699_v2, %v16699_v2  ;;  %v7022_v35 = vsub.f32 %v6958_v47, %v6990_v3 }
 0xb22   : > { %7701 = vadd.xlane.f32.xlu1 %v16598_v30  ;;  %v6991_v30 = vmul.f32 %v16684_v11, %v16684_v11  ;;  %v7025_v22 = vsub.f32 %v6961_v15, %v6993_v24  ;;  %v7172_v40 = vmul.f32 %v10334_v1, %v7140_v41  ;;  %v7084_v8 = vadd.f32 1e-05, %v7052_v23  ;;  %v10614_v15 = vld [vmem:[%s15753_s7 + $0xf0] sm:$0xff] }
 0xb23   : > { %v7085_v27 = vadd.f32 1e-05, %v7053_v9  ;;  %v10613_v9 = vld [vmem:[%s15753_s7 + $0xe8] sm:$0xff]  ;;  %v6782_v53 = vsel %vm1031_vm0, %v10614_v15, 0.0  ;;  %10343 = vrsqrt.f32 %v7083_v44  ;;  %v16735_v54 = vmul.f32 0.015625, %v16524_v48 }
 0xb24   : > { %v6994_v41 = vmul.f32 %v16718_v19, %v16718_v19  ;;  %v7057_v1 = vmax.f32 %v7025_v22, 0.0  ;;  %v16741_v23 = vsel %vm1031_vm0, %v16351_v21, 0.0  ;;  %v7054_v24 = vmax.f32 %v7022_v35, 0.0  ;;  %v18352_v21 = vld [vmem:[#allocation34_spill] sm:$0xff] }
 0xb25   : > { %7698 = vadd.xlane.f32.xlu0 %v16604_v52  ;;  %v16706_v62 = vpop.xlane.xlu0 %7665  ;;  %v7023_v52 = vsub.f32 %v6959_v49, %v6991_v30  ;;  %v7024_v30 = vsub.f32 %v6960_v6, %v6992_v59  ;;  %v10336_v29 = vpop.eup %10335  ;;  %10345 = vrsqrt.f32 %v7085_v27  ;;  %v6962_v6 = vmul.f32 0.015625, %v16587_v36  ;;  %v16754_v36 = vld [vmem:[%s15753_s7 + $0x28] sm:$0xff] }
 0xb26   : > { %18349 = vst [vmem:[#allocation85_spill] sm:$0xff] %v16706_v62  ;;  %6777 = vadd.xlane.f32.xlu1 %v6776_v31  ;;  %v18350_v31 = vld [vmem:[#allocation51_spill] sm:$0xff]  ;;  %v6779_v62 = vsel %vm1031_vm0, %v10613_v9, 0.0  ;;  %v10338_v47 = vpop.eup %10337  ;;  %10347 = vrsqrt.f32 %v7082_v46  ;;  %v6963_v44 = vmul.f32 0.015625, %v16619_v34  ;;  %v16751_v35 = vsel %vm1031_vm0, %v18352_v21, 0.0 }
 0xb27   : > { %v16727_v49 = vsel %vm1031_vm0, %v18350_v31, 0.0  ;;  %10349 = vrsqrt.f32 %v7084_v8  ;;  %v7056_v59 = vmax.f32 %v7024_v30, 0.0  ;;  %v7145_v34 = vsub.f32 %v16754_v36, %v16573_v42  ;;  %v16771_v30 = vld [vmem:[%s15753_s7 + $0x20] sm:$0xff] }
 0xb28   : > { %v7026_v22 = vsub.f32 %v6962_v6, %v6994_v41  ;;  %v18353_v46 = vsub.f32 %v16679_v4, %v16562_v50  ;;  %v16765_v31 = vmul.f32 0.015625, %v16366_v14  ;;  %v16768_v8 = vmul.f32 0.015625, %v16368_v57  ;;  %v10617_v57 = vld [vmem:[%s15753_s7 + $0xf8] sm:$0xff] }
 0xb29   : > { %7704 = vadd.xlane.f32.xlu0 %v16614_v63  ;;  %v16723_v12 = vpop.xlane.xlu0 %7668  ;;  %v7055_v63 = vmax.f32 %v7023_v52, 0.0  ;;  %v10340_v3 = vpop.eup %10339  ;;  %v18351_v52 = vsub.f32 %v16672_v0, %v16559_v38  ;;  %v6995_v38 = vmul.f32 %v16735_v54, %v16735_v54  ;;  %v7089_v42 = vadd.f32 1e-05, %v7057_v1  ;;  %v18354_v1 = vld [vmem:[#allocation48_spill] sm:$0xff] }
 0xb2a   : > { %7951 = vadd.xlane.f32.xlu1 %v16608_v7  ;;  %v7204_v7 = vpack.c.bf16 %v7173_v10, %v7172_v40  ;;  %v7175_v40 = vmul.f32 %v10338_v47, %v18353_v46  ;;  %v7144_v9 = vsub.f32 %v16771_v30, %v16584_v13  ;;  %v7086_v15 = vadd.f32 1e-05, %v7054_v24 }
 0xb2b   : > { %v7174_v27 = vmul.f32 %v10336_v29, %v18351_v52  ;;  %v10342_v10 = vpop.eup %10341  ;;  %v7177_v29 = vmul.f32 %v10340_v3, %v7145_v34  ;;  %v7974_v50 = vmul.f32 0.015625, %v16391_v16  ;;  %v7088_v14 = vadd.f32 1e-05, %v7056_v59  ;;  %v16792_v59 = vld [vmem:[%s15753_s7 + $0x38] sm:$0xff] }
 0xb2c   : > { %v6785_v41 = vsel %vm1031_vm0, %v10617_v57, 0.0  ;;  %v7058_v47 = vmax.f32 %v7026_v22, 0.0  ;;  %v6936_v13 = vsel %vm1031_vm0, %v18354_v1, 0.0  ;;  %v8006_v16 = vmul.f32 %v16768_v8, %v16768_v8  ;;  %v18355_v22 = vld [vmem:[#allocation33_spill] sm:$0xff]  ;;  %v18359_v1 = vld [vmem:[#allocation52_spill] sm:$0xff] }
 0xb2d   : > { %6780 = vadd.xlane.f32.xlu0 %v6779_v62  ;;  %v6394_v48 = vpop.permute.xlu0 %6393  ;;  %v7087_v62 = vadd.f32 1e-05, %v7055_v63  ;;  %v7975_v63 = vmul.f32 0.015625, %v16401_v20  ;;  %v7205_v20 = vpack.c.bf16 %v7175_v40, %v7174_v27  ;;  %v10344_v24 = vpop.eup %10343  ;;  %v7147_v21 = vsub.f32 %v16792_v59, %v16617_v55  ;;  %v16812_v40 = vld [vmem:[%s15753_s7 + $0x30] sm:$0xff] }
 0xb2e   : > { %9550 = vmatmul.mubr.msk.bf16.gmra.mrb[28].mxu0 %vm1031_vm0, %v6394_v48  ;;  %6783 = vadd.xlane.f32.xlu1 %v6782_v53  ;;  %v7027_v53 = vsub.f32 %v6963_v44, %v6995_v38  ;;  %v16789_v44 = vsel %vm1031_vm0, %v16361_v45, 0.0  ;;  %v8038_v3 = vsub.f32 %v7974_v50, %v8006_v16  ;;  %v16798_v34 = vmul.f32 0.015625, %v16380_v17  ;;  %v16801_v45 = vld [vmem:[%s15753_s7 + $0x48] sm:$0xff] }
 0xb2f   : > { %9561 = vmatprep.mubr.msk.bf16.mxu0 %vm1031_vm0, %v7204_v7  ;;  %10351 = vrsqrt.f32 %v7087_v62  ;;  %v7176_v7 = vmul.f32 %v10342_v10, %v7144_v9  ;;  %v10346_v48 = vpop.eup %10345  ;;  %v7149_v62 = vsub.f32 %v16801_v45, %v16626_v61  ;;  %v7090_v38 = vadd.f32 1e-05, %v7058_v47  ;;  %v16820_v61 = vld [vmem:[%s15753_s7 + $0x40] sm:$0xff] }
 0xb30   : > { %10353 = vrsqrt.f32 %v7089_v42  ;;  %v10348_v27 = vpop.eup %10347  ;;  %v6942_v55 = vsel %vm1031_vm0, %v18355_v22, 0.0  ;;  %v16809_v46 = vmul.f32 0.015625, %v16382_v56  ;;  %v7146_v17 = vsub.f32 %v16812_v40, %v16637_v33  ;;  %v18356_v42 = vld [vmem:[#allocation55_spill] sm:$0xff]  ;;  %v18357_v56 = vld [vmem:[#allocation32_spill] sm:$0xff]  ;;  %v18358_v33 = vld [vmem:[#allocation78_spill] sm:$0xff] }
 0xb31   : > { %7954 = vadd.xlane.f32.xlu0 %v16634_v37  ;;  %v8007_v37 = vmul.f32 %v16765_v31, %v16765_v31  ;;  %10355 = vrsqrt.f32 %v7086_v15  ;;  %v7206_v6 = vpack.c.bf16 %v7177_v29, %v7176_v7  ;;  %v10350_v10 = vpop.eup %10349  ;;  %v16817_v9 = vmul.f32 0.015625, %v18356_v42  ;;  %v18360_v7 = vld [vmem:[#allocation9_spill] sm:$0xff]  ;;  %v16852_v22 = vld [vmem:[%s15753_s7 + $0x58] sm:$0xff] }
 0xb32   : > { %7957 = vadd.xlane.f32.xlu1 %v16623_v58  ;;  %v7059_v58 = vmax.f32 %v7027_v53, 0.0  ;;  %10357 = vrsqrt.f32 %v7088_v14  ;;  %v7179_v15 = vmul.f32 %v10344_v24, %v7147_v21  ;;  %v7148_v53 = vsub.f32 %v16820_v61, %v16645_v51 }
 0xb33   : > { %v8039_v52 = vsub.f32 %v7975_v63, %v8007_v37  ;;  %v7181_v50 = vmul.f32 %v10346_v48, %v7149_v62  ;;  %v16827_v63 = vsel %vm1031_vm0, %v18357_v56, 0.0  ;;  %v8070_v14 = vmax.f32 %v8038_v3, 0.0  ;;  %v18362_v3 = vld [vmem:[#allocation56_spill] sm:$0xff]  ;;  %v16864_v56 = vld [vmem:[%s15753_s7 + $0x68] sm:$0xff] }
 0xb34   : > { %v7091_v29 = vadd.f32 1e-05, %v7059_v58  ;;  %v7178_v47 = vmul.f32 %v10348_v27, %v7146_v17  ;;  %v7979_v51 = vmul.f32 0.015625, %v18360_v7  ;;  %10359 = vrsqrt.f32 %v7090_v38 }
 0xb35   : > { %6786 = vadd.xlane.f32.xlu0 %v6785_v41  ;;  %v8071_v57 = vmax.f32 %v8039_v52, 0.0  ;;  %v6939_v41 = vsel %vm1031_vm0, %v18358_v33, 0.0  ;;  %v16837_v37 = vmul.f32 %v16798_v34, %v16798_v34  ;;  %v16841_v16 = vmul.f32 %v16809_v46, %v16809_v46  ;;  %v18366_v33 = vld [vmem:[#allocation53_spill] sm:$0xff] }
 0xb36   : > { %9562 = vmatmul.mubr.msk.bf16.vlgmr.msra.gmra.mrb[0].mxu0 %vm1031_vm0, %v7205_v20  ;;  %6937 = vadd.xlane.f32.xlu1 %v6936_v13  ;;  %v16832_v13 = vmul.f32 0.015625, %v18359_v1  ;;  %v8011_v20 = vmul.f32 %v16817_v9, %v16817_v9  ;;  %v7207_v24 = vpack.c.bf16 %v7179_v15, %v7178_v47  ;;  %v7978_v52 = vmul.f32 0.015625, %v18362_v3  ;;  %v16874_v47 = vld [vmem:[%s15753_s7 + $0x50] sm:$0xff] }
 0xb37   : > { %9565 = vmatprep.mubr.msk.bf16.mxu0 %vm1031_vm0, %v7206_v6  ;;  %v18361_v6 = vld [vmem:[#allocation41_spill] sm:$0xff]  ;;  %10361 = vrsqrt.f32 %v7091_v29  ;;  %v16849_v62 = vadd.f32 1e-05, %v8070_v14  ;;  %v8103_v38 = vadd.f32 1e-05, %v8071_v57  ;;  %v18364_v29 = vld [vmem:[#allocation87_spill] sm:$0xff]  ;;  %v7150_v1 = vsub.f32 %v16874_v47, %v16693_v18 }
 0xb38   : > { %v16846_v48 = vmul.f32 0.015625, %v18361_v6  ;;  %v8010_v15 = vmul.f32 %v16832_v13, %v16832_v13  ;;  %v18367_v6 = vld [vmem:[#allocation50_spill] sm:$0xff] }
 0xb39   : > { %7960 = vadd.xlane.f32.xlu0 %v16642_v25  ;;  %v7180_v25 = vmul.f32 %v10350_v10, %v7148_v53  ;;  %v10352_v58 = vpop.eup %10351  ;;  %v18363_v10 = vld [vmem:[#allocation79_spill] sm:$0xff]  ;;  %v8043_v53 = vsub.f32 %v7979_v51, %v8011_v20  ;;  %v16881_v20 = vld [vmem:[%s15753_s7 + $0x60] sm:$0xff]  ;;  %v7976_v3 = vmul.f32 0.015625, %v18367_v6  ;;  %10363 = vrsqrt.f32 %v8103_v38 }
 0xb3a   : > { %6943 = vadd.xlane.f32.xlu1 %v6942_v55  ;;  %v10354_v27 = vpop.eup %10353  ;;  %v7151_v55 = vsub.f32 %v16852_v22, %v16684_v11  ;;  %v6945_v17 = vsel %vm1031_vm0, %v18363_v10, 0.0  ;;  %v7153_v11 = vsub.f32 %v16864_v56, %v16689_v43  ;;  %v8013_v51 = vmul.f32 %v16846_v48, %v16846_v48 }
 0xb3b   : > { %v7208_v21 = vpack.c.bf16 %v7181_v50, %v7180_v25  ;;  %v10356_v42 = vpop.eup %10355  ;;  %v7981_v50 = vmul.f32 0.015625, %v18364_v29  ;;  %v8042_v25 = vsub.f32 %v7978_v52, %v8010_v15  ;;  %v7152_v43 = vsub.f32 %v16881_v20, %v16699_v2 }
 0xb3c   : > { %v10358_v14 = vpop.eup %10357  ;;  %v7183_v7 = vmul.f32 %v10352_v58, %v7151_v55  ;;  %v16888_v29 = vmul.f32 0.015625, %v16496_v32  ;;  %v7182_v18 = vmul.f32 %v10356_v42, %v7150_v1  ;;  %v8075_v58 = vmax.f32 %v8043_v53, 0.0  ;;  %v18371_v1 = vld [vmem:[#allocation81_spill] sm:$0xff] }
 0xb3d   : > { %6940 = vadd.xlane.f32.xlu0 %v6939_v41  ;;  %v16871_v41 = vmul.f32 0.015625, %v18366_v33  ;;  %v8045_v52 = vsub.f32 %v7981_v50, %v8013_v51  ;;  %v7184_v55 = vmul.f32 %v10358_v14, %v7152_v43  ;;  %v16906_v33 = vld [vmem:[%s15753_s7 + $0x70] sm:$0xff]  ;;  %v18372_v51 = vld [vmem:[#allocation17_spill] sm:$0xff]  ;;  %10365 = vrsqrt.f32 %v16849_v62 }
 0xb3e   : > { %9566 = vmatmul.mubr.msk.bf16.gmra.mrb[4].mxu0 %vm1031_vm0, %v7207_v24  ;;  %7707 = vadd.xlane.f32.xlu1 %v16710_v60  ;;  %v18365_v60 = vld [vmem:[#allocation35_spill] sm:$0xff]  ;;  %v7185_v24 = vmul.f32 %v10354_v27, %v7153_v11  ;;  %v16894_v27 = vmul.f32 0.015625, %v16483_v39  ;;  %v7209_v15 = vpack.c.bf16 %v7183_v7, %v7182_v18  ;;  %v10360_v11 = vpop.eup %10359  ;;  %v8017_v50 = vmul.f32 %v16888_v29, %v16888_v29  ;;  %v18370_v39 = vld [vmem:[#allocation89_spill] sm:$0xff] }
 0xb3f   : > { %9569 = vmatprep.mubr.msk.bf16.mxu0 %vm1031_vm0, %v7208_v21  ;;  %v7977_v57 = vmul.f32 0.015625, %v18365_v60  ;;  %v18368_v21 = vld [vmem:[#allocation86_spill] sm:$0xff]  ;;  %v8012_v2 = vmul.f32 %v16871_v41, %v16871_v41  ;;  %v8074_v60 = vmax.f32 %v8042_v25, 0.0  ;;  %v7984_v14 = vmul.f32 0.015625, %v18370_v39 }
 0xb40   : > { %v7980_v10 = vmul.f32 0.015625, %v18368_v21  ;;  %v7210_v38 = vpack.c.bf16 %v7185_v24, %v7184_v55  ;;  %v16913_v7 = vmul.f32 0.015625, %v18371_v1  ;;  %v7983_v25 = vmul.f32 0.015625, %v18372_v51  ;;  %v16920_v24 = vld [vmem:[%s15753_s7 + $0x78] sm:$0xff] }
 0xb41   : > { %6946 = vadd.xlane.f32.xlu0 %v6945_v17  ;;  %v7985_v17 = vmul.f32 0.015625, %v16542_v5  ;;  %v8041_v32 = vsub.f32 %v7977_v57, %v16837_v37  ;;  %v7154_v5 = vsub.f32 %v16906_v33, %v16718_v19  ;;  %v10362_v37 = vpop.eup %10361  ;;  %v8107_v57 = vadd.f32 1e-05, %v8075_v58 }
 0xb42   : > { %7713 = vadd.xlane.f32.xlu1 %v16727_v49  ;;  %v18369_v49 = vld [vmem:[#allocation23_spill] sm:$0xff]  ;;  %v8044_v53 = vsub.f32 %v7980_v10, %v8012_v2  ;;  %v8016_v43 = vmul.f32 %v16894_v27, %v16894_v27  ;;  %v7155_v19 = vsub.f32 %v16920_v24, %v16735_v54  ;;  %v8040_v21 = vsub.f32 %v7976_v3, %v16841_v16 }
 0xb43   : > { %v16899_v42 = vmul.f32 0.015625, %v18369_v49  ;;  %v8049_v6 = vsub.f32 %v7985_v17, %v8017_v50  ;;  %v8106_v10 = vadd.f32 1e-05, %v8074_v60  ;;  %v8073_v54 = vmax.f32 %v8041_v32, 0.0 }
 0xb44   : > { %v8076_v58 = vmax.f32 %v8044_v53, 0.0  ;;  %v8048_v2 = vsub.f32 %v7984_v14, %v8016_v43  ;;  %10367 = vrsqrt.f32 %v8107_v57  ;;  %v8014_v3 = vmul.f32 %v16913_v7, %v16913_v7  ;;  %v18375_v57 = vld [vmem:[#allocation96_spill] sm:$0xff] }
 0xb45   : > { %7710 = vadd.xlane.f32.xlu0 %v16741_v23  ;;  %v8077_v23 = vmax.f32 %v8045_v52, 0.0  ;;  %v8015_v18 = vmul.f32 %v16899_v42, %v16899_v42  ;;  %v18373_v52 = vld [vmem:[#allocation19_spill] sm:$0xff]  ;;  %v8081_v60 = vmax.f32 %v8049_v6, 0.0  ;;  %10369 = vrsqrt.f32 %v8106_v10 }
 0xb46   : > { %9570 = vmatmul.mubr.msk.bf16.gmra.mrb[8].mxu0 %vm1031_vm0, %v7209_v15  ;;  %7963 = vadd.xlane.f32.xlu1 %v16789_v44  ;;  %v7186_v44 = vmul.f32 %v10360_v11, %v7154_v5  ;;  %v7982_v55 = vmul.f32 0.015625, %v18373_v52  ;;  %v7187_v15 = vmul.f32 %v10362_v37, %v7155_v19  ;;  %v18374_v11 = vld [vmem:[#allocation95_spill] sm:$0xff]  ;;  %v8108_v53 = vadd.f32 1e-05, %v8076_v58  ;;  %v18376_v19 = vld [vmem:[#allocation70_spill] sm:$0xff] }
 0xb47   : > { %9573 = vmatprep.mubr.msk.bf16.mxu0 %vm1031_vm0, %v7210_v38  ;;  %v8047_v17 = vsub.f32 %v7983_v25, %v8015_v18  ;;  %v7965_v62 = vsel %vm1031_vm0, %v18374_v11, 0.0  ;;  %v8109_v16 = vadd.f32 1e-05, %v8077_v23  ;;  %v8072_v38 = vmax.f32 %v8040_v21, 0.0  ;;  %v18377_v52 = vld [vmem:[#allocation71_spill] sm:$0xff] }
 0xb48   : > { %v7211_v49 = vpack.c.bf16 %v7187_v15, %v7186_v44  ;;  %v8046_v50 = vsub.f32 %v7982_v55, %v8014_v3  ;;  %v8080_v39 = vmax.f32 %v8048_v2, 0.0  ;;  %v8113_v5 = vadd.f32 1e-05, %v8081_v60 }
 0xb49   : > { %7716 = vadd.xlane.f32.xlu0 %v16751_v35  ;;  %v10364_v35 = vpop.eup %10363  ;;  %v8079_v32 = vmax.f32 %v8047_v17, 0.0  ;;  %10371 = vrsqrt.f32 %v8109_v16  ;;  %v16939_v37 = vmul.f32 0.015625, %v16651_v28  ;;  %v7971_v23 = vsel %vm1031_vm0, %v18375_v57, 0.0 }
 0xb4a   : > { %7969 = vadd.xlane.f32.xlu1 %v16827_v63  ;;  %v8105_v63 = vadd.f32 1e-05, %v8073_v54  ;;  %v8104_v1 = vadd.f32 1e-05, %v8072_v38  ;;  %10373 = vrsqrt.f32 %v8108_v53  ;;  %v8078_v51 = vmax.f32 %v8046_v50, 0.0  ;;  %v10366_v43 = vpop.eup %10365 }
 0xb4b   : > { %v8112_v25 = vadd.f32 1e-05, %v8080_v39  ;;  %v8167_v6 = vsub.f32 %v18376_v19, %v16765_v31  ;;  %v8111_v44 = vadd.f32 1e-05, %v8079_v32  ;;  %v8018_v28 = vmul.f32 %v16939_v37, %v16939_v37 }
 0xb4c   : > { %10375 = vrsqrt.f32 %v8105_v63  ;;  %v16948_v10 = vmul.f32 0.015625, %v16686_v26  ;;  %v8166_v55 = vsub.f32 %v18377_v52, %v16768_v8  ;;  %v8110_v15 = vadd.f32 1e-05, %v8078_v51  ;;  %v18378_v63 = vld [vmem:[#allocation85_spill] sm:$0xff] }
 0xb4d   : > { %7966 = vadd.xlane.f32.xlu0 %v7965_v62  ;;  %10377 = vrsqrt.f32 %v8113_v5  ;;  %v8199_v2 = vmul.f32 %v10364_v35, %v8167_v6  ;;  %v8171_v54 = vsub.f32 %v16754_v36, %v16817_v9  ;;  %v8170_v8 = vsub.f32 %v16771_v30, %v16832_v13 }
 0xb4e   : > { %9574 = vmatmul.mubr.msk.bf16.gmra.mrb[12].mxu0 %vm1031_vm0, %v7211_v49  ;;  %v10368_v58 = vpop.eup %10367  ;;  %10379 = vrsqrt.f32 %v8104_v1  ;;  %v8198_v11 = vmul.f32 %v10366_v43, %v8166_v55  ;;  %v8019_v26 = vmul.f32 %v16948_v10, %v16948_v10  ;;  %v8173_v36 = vsub.f32 %v16792_v59, %v16846_v48  ;;  %v9943_v1 = vld [vmem:[%s17429_s4 + $0xe0] sm:$0xff]  }
 0xb4f   : > { %v16936_v14 = vpop.xlane.xlu1 %6741  ;;  %10381 = vrsqrt.f32 %v8112_v25  ;;  %v10370_v62 = vpop.eup %10369  ;;  %v8203_v49 = vmul.f32 %v10368_v58, %v8171_v54  ;;  %v16962_v32 = vmul.f32 0.015625, %v18378_v63  ;;  %v8172_v30 = vsub.f32 %v16812_v40, %v16871_v41  ;;  %9593 = vmatprep.subr.bf16.mxu0 %v9943_v1 }
 0xb50   : > { %10383 = vrsqrt.f32 %v8111_v44  ;;  %v8230_v60 = vpack.c.bf16 %v8199_v2, %v8198_v11  ;;  %v8202_v50 = vmul.f32 %v10370_v62, %v8170_v8  ;;  %v8169_v48 = vsub.f32 %v16679_v4, %v16798_v34  ;;  %9594 = vmatpush3.bf16.msra.mxu0 %v9943_v1 }
 0xb51   : > { %7972 = vadd.xlane.f32.xlu0 %v7971_v23  ;;  %10385 = vrsqrt.f32 %v8110_v15  ;;  %v8168_v19 = vsub.f32 %v16672_v0, %v16809_v46  ;;  %v8177_v40 = vsub.f32 %v16852_v22, %v16888_v29  ;;  %v16979_v4 = vmul.f32 0.015625, %v16936_v14 }
 0xb52   : > { %v8232_v13 = vpack.c.bf16 %v8203_v49, %v8202_v50  ;;  %v8176_v0 = vsub.f32 %v16874_v47, %v16894_v27  ;;  %v8175_v14 = vsub.f32 %v16801_v45, %v16899_v42  ;;  %v16989_v55 = vmul.f32 0.015625, %v16723_v12 }
 0xb53   : > { %v7916_v21 = vpop.xlane.xlu1 %7915  ;;  %v10372_v35 = vpop.eup %10371  ;;  %v8174_v45 = vsub.f32 %v16820_v61, %v16913_v7  ;;  %v9946_v7 = vld [vmem:[%s17429_s4 + $0xf8] sm:$0xff]   ;;  %v8179_v63 = vsub.f32 %v16864_v56, %v16948_v10 }
 0xb54   : > { %v7986_v18 = vmul.f32 0.015625, %v7916_v21  ;;  %v10374_v39 = vpop.eup %10373  ;;  %v8205_v23 = vmul.f32 %v10372_v35, %v8173_v36  ;;  %v8020_v21 = vmul.f32 %v16962_v32, %v16962_v32 }
 0xb55   : > { %v8204_v6 = vmul.f32 %v10374_v39, %v8172_v30  ;;  %v8178_v39 = vsub.f32 %v16881_v20, %v16939_v37 }
 0xb56   : > { %v8050_v31 = vsub.f32 %v7986_v18, %v8018_v28  ;;  %v10376_v57 = vpop.eup %10375  ;;  %v9944_v28 = vld [vmem:[%s17429_s4 + $0xe8] sm:$0xff]  }
 0xb57   : > { %v7919_v17 = vpop.xlane.xlu1 %7918  ;;  %v10378_v59 = vpop.eup %10377  ;;  %v8233_v46 = vpack.c.bf16 %v8205_v23, %v8204_v6  ;;  %v8201_v22 = vmul.f32 %v10376_v57, %v8169_v48  ;;  %9595 = vmatprep.subr.bf16.mxu0 %v9944_v28 }
 0xb58   : > { %v8082_v16 = vmax.f32 %v8050_v31, 0.0  ;;  %v7987_v3 = vmul.f32 0.015625, %v7919_v17  ;;  %v10380_v43 = vpop.eup %10379  ;;  %v8209_v29 = vmul.f32 %v10378_v59, %v8177_v40  ;;  %v6996_v31 = vmul.f32 %v16979_v4, %v16979_v4  ;;  %9596 = vmatpush3.bf16.msra.mxu0 %v9944_v28 }
 0xb59   : > { %v10382_v44 = vpop.eup %10381  ;;  %v8200_v47 = vmul.f32 %v10380_v43, %v8168_v19 }
 0xb5a   : > { %v8114_v38 = vadd.f32 1e-05, %v8082_v16  ;;  %v8051_v53 = vsub.f32 %v7987_v3, %v8019_v26  ;;  %v10384_v18 = vpop.eup %10383  ;;  %v8208_v27 = vmul.f32 %v10382_v44, %v8176_v0  ;;  %v9945_v26 = vld [vmem:[%s17429_s4 + $0xf0] sm:$0xff]  }
 0xb5b   : > { %v6748_v9 = vpop.xlane.xlu1 %6747  ;;  %8271 = vrot.lane.b32.xlu1 %v8230_v60, %s10724_s16  ;;  %v10386_v15 = vpop.eup %10385  ;;  %v8231_v12 = vpack.c.bf16 %v8201_v22, %v8200_v47  ;;  %v8207_v62 = vmul.f32 %v10384_v18, %v8175_v14  ;;  %v8021_v60 = vmul.f32 %v16989_v55, %v16989_v55  ;;  %9597 = vmatprep.subr.bf16.mxu0 %v9945_v26 }
 0xb5c   : > { %v8083_v5 = vmax.f32 %v8051_v53, 0.0  ;;  %10387 = vrsqrt.f32 %v8114_v38  ;;  %v16994_v54 = vmul.f32 0.015625, %v6748_v9  ;;  %v8235_v42 = vpack.c.bf16 %v8209_v29, %v8208_v27  ;;  %9598 = vmatpush3.bf16.msra.mxu0 %v9945_v26 }
 0xb5d   : > { %v8206_v61 = vmul.f32 %v10386_v15, %v8174_v45  ;;  %9599 = vmatprep.subr.bf16.mxu0 %v9946_v7  ;;  %v8180_v27 = vsub.f32 %v16906_v33, %v16962_v32  ;;  %v8181_v15 = vsub.f32 %v16920_v24, %v16989_v55  ;;  %v17040_v24 = vld [vmem:[%s15753_s7 + $0x88] sm:$0xff] }
 0xb5e   : > { %v8115_v51 = vadd.f32 1e-05, %v8083_v5  ;;  %v6745_v25 = vpop.xlane.xlu0 %6744  ;;  %v6998_v53 = vmul.f32 %v16994_v54, %v16994_v54 }
 0xb5f   : > { %v7922_v41 = vpop.xlane.xlu1 %7921  ;;  %8275 = vrot.lane.b32.xlu1 %v8232_v13, %s10724_s16  ;;  %v17001_v16 = vmul.f32 0.015625, %v6745_v25  ;;  %v8234_v57 = vpack.c.bf16 %v8207_v62, %v8206_v61 }
 0xb60   : > { %10389 = vrsqrt.f32 %v8115_v51  ;;  %v7988_v34 = vmul.f32 0.015625, %v7922_v41  ;;  %9600 = vmatpush3.bf16.msra.mxu0 %v9946_v7 }
 0xb61   : > { %v6997_v13 = vmul.f32 %v17001_v16, %v17001_v16  ;;  %v7157_v32 = vsub.f32 %v17040_v24, %v17001_v16 }
 0xb62   : > { %v8052_v58 = vsub.f32 %v7988_v34, %v8020_v21  ;;  %v6751_v52 = vpop.xlane.xlu0 %6750 }
 0xb63   : > { %v6902_v2 = vpop.xlane.xlu1 %6901  ;;  %8277 = vrot.lane.b32.xlu1 %v8233_v46, %s10724_s16  ;;  %v17018_v23 = vmul.f32 0.015625, %v6751_v52 }
 0xb64   : > { %v8084_v17 = vmax.f32 %v8052_v58, 0.0  ;;  %v6964_v11 = vmul.f32 0.015625, %v6902_v2 }
 0xb65   : > { %v6999_v6 = vmul.f32 %v17018_v23, %v17018_v23 }
 0xb66   : > { %v7028_v3 = vsub.f32 %v6964_v11, %v6996_v31  ;;  %v7925_v8 = vpop.xlane.xlu0 %7924  ;;  %v10388_v38 = vpop.eup %10387  ;;  %v8116_v36 = vadd.f32 1e-05, %v8084_v17 }
 0xb67   : > { %v7989_v49 = vmul.f32 0.015625, %v7925_v8  ;;  %8273 = vrot.lane.b32.xlu0 %v8231_v12, %s10724_s16  ;;  %v6908_v35 = vpop.xlane.xlu1 %6907  ;;  %8281 = vrot.lane.b32.xlu1 %v8235_v42, %s10724_s16  ;;  %v8210_v37 = vmul.f32 %v10388_v38, %v8178_v39 }
 0xb68   : > { %v7060_v9 = vmax.f32 %v7028_v3, 0.0  ;;  %v6966_v50 = vmul.f32 0.015625, %v6908_v35  ;;  %10391 = vrsqrt.f32 %v8116_v36 }
 0xb69   : > { %v8053_v5 = vsub.f32 %v7989_v49, %v8021_v60  ;;  %v17035_v60 = vld [vmem:[%s15753_s7 + $0x80] sm:$0xff] }
 0xb6a   : > { %v10390_v30 = vpop.eup %10389  ;;  %v7030_v1 = vsub.f32 %v6966_v50, %v6998_v53  ;;  %v6905_v59 = vpop.xlane.xlu0 %6904  ;;  %v7092_v56 = vadd.f32 1e-05, %v7060_v9  ;;  %v7156_v33 = vsub.f32 %v17035_v60, %v16979_v4  ;;  %v17048_v9 = vld [vmem:[%s15753_s7 + $0x90] sm:$0xff] }
 0xb6b   : > { %v8085_v48 = vmax.f32 %v8053_v5, 0.0  ;;  %v6965_v51 = vmul.f32 0.015625, %v6905_v59  ;;  %8279 = vrot.lane.b32.xlu0 %v8234_v57, %s10724_s16  ;;  %v7672_v20 = vpop.xlane.xlu1 %7671  ;;  %v8211_v25 = vmul.f32 %v10390_v30, %v8179_v63  ;;  %v7158_v4 = vsub.f32 %v17048_v9, %v16994_v54  ;;  %v17057_v5 = vld [vmem:[%s15753_s7 + $0x98] sm:$0xff] }
 0xb6c   : > { %v7062_v43 = vmax.f32 %v7030_v1, 0.0  ;;  %v17024_v58 = vmul.f32 0.015625, %v7672_v20  ;;  %v7159_v57 = vsub.f32 %v17057_v5, %v17018_v23 }
 0xb6d   : > { %v8117_v10 = vadd.f32 1e-05, %v8085_v48  ;;  %v7029_v19 = vsub.f32 %v6965_v51, %v6997_v13  ;;  %v8236_v40 = vpack.c.bf16 %v8211_v25, %v8210_v37 }
 0xb6e   : > { %v6911_v41 = vpop.xlane.xlu0 %6910  ;;  %v7094_v0 = vadd.f32 1e-05, %v7062_v43  ;;  %v8022_v31 = vmul.f32 %v17024_v58, %v17024_v58 }
 0xb6f   : > { %10393 = vrsqrt.f32 %v8117_v10  ;;  %v7061_v44 = vmax.f32 %v7029_v19, 0.0  ;;  %v6967_v21 = vmul.f32 0.015625, %v6911_v41  ;;  %v7678_v34 = vpop.xlane.xlu1 %7677  ;;  %8283 = vrot.lane.b32.xlu0 %v8236_v40, %s10724_s16 }
 0xb70   : > { %10395 = vrsqrt.f32 %v7092_v56  ;;  %v17044_v55 = vmul.f32 0.015625, %v7678_v34 }
 0xb71   : > { %v7093_v46 = vadd.f32 1e-05, %v7061_v44  ;;  %v7031_v22 = vsub.f32 %v6967_v21, %v6999_v6 }
 0xb72   : > { %v7675_v29 = vpop.xlane.xlu0 %7674  ;;  %v10392_v14 = vpop.eup %10391  ;;  %v8024_v30 = vmul.f32 %v17044_v55, %v17044_v55 }
 0xb73   : > { %10397 = vrsqrt.f32 %v7093_v46  ;;  %v7063_v28 = vmax.f32 %v7031_v22, 0.0  ;;  %v6754_v18 = vpop.xlane.xlu1 %6753  ;;  %v8212_v42 = vmul.f32 %v10392_v14, %v8180_v27  ;;  %v17032_v3 = vmul.f32 0.015625, %v7675_v29 }
 0xb74   : > { %10399 = vrsqrt.f32 %v7094_v0  ;;  %v17054_v50 = vmul.f32 0.015625, %v6754_v18 }
 0xb75   : > { %v7095_v52 = vadd.f32 1e-05, %v7063_v28  ;;  %v8023_v16 = vmul.f32 %v17032_v3, %v17032_v3 }
 0xb76   : > { %v7681_v2 = vpop.xlane.xlu0 %7680  ;;  %v7000_v56 = vmul.f32 %v17054_v50, %v17054_v50 }
 0xb77   : > { %10401 = vrsqrt.f32 %v7095_v52  ;;  %v7928_v47 = vpop.xlane.xlu1 %7927  ;;  %v17066_v10 = vmul.f32 0.015625, %v7681_v2 }
 0xb78   : > { %v7990_v17 = vmul.f32 0.015625, %v7928_v47 }
 0xb79   : > { %v10394_v11 = vpop.eup %10393  ;;  %v8025_v0 = vmul.f32 %v17066_v10, %v17066_v10 }
 0xb7a   : > { %v8054_v45 = vsub.f32 %v7990_v17, %v8022_v31  ;;  %v6757_v12 = vpop.xlane.xlu0 %6756  ;;  %v8213_v62 = vmul.f32 %v10394_v11, %v8181_v15  ;;  %v10396_v26 = vpop.eup %10395 }
 0xb7b   : > { %v6760_v8 = vpop.xlane.xlu1 %6759  ;;  %v7188_v38 = vmul.f32 %v10396_v26, %v7156_v33  ;;  %v17073_v46 = vmul.f32 0.015625, %v6757_v12 }
 0xb7c   : > { %v8237_v49 = vpack.c.bf16 %v8213_v62, %v8212_v42  ;;  %v8086_v61 = vmax.f32 %v8054_v45, 0.0  ;;  %v17068_v19 = vmul.f32 0.015625, %v6760_v8 }
 0xb7d   : > { %v10398_v35 = vpop.eup %10397  ;;  %v7001_v15 = vmul.f32 %v17073_v46, %v17073_v46 }
 0xb7e   : > { %8285 = vrot.lane.b32.xlu1 %v8237_v49, %s10724_s16  ;;  %v7931_v7 = vpop.xlane.xlu0 %7930  ;;  %v7189_v53 = vmul.f32 %v10398_v35, %v7157_v32  ;;  %v10400_v36 = vpop.eup %10399  ;;  %v8118_v48 = vadd.f32 1e-05, %v8086_v61  ;;  %v7002_v28 = vmul.f32 %v17068_v19, %v17068_v19 }
 0xb7f   : > { %v7991_v39 = vmul.f32 0.015625, %v7931_v7  ;;  %v7934_v63 = vpop.xlane.xlu1 %7933  ;;  %v7190_v37 = vmul.f32 %v10400_v36, %v7158_v4  ;;  %v8182_v7 = vsub.f32 %v17035_v60, %v17024_v58 }
 0xb80   : > { %v7992_v13 = vmul.f32 0.015625, %v7934_v63  ;;  %v7212_v1 = vpack.c.bf16 %v7189_v53, %v7188_v38  ;;  %10403 = vrsqrt.f32 %v8118_v48  ;;  %v8183_v38 = vsub.f32 %v17040_v24, %v17032_v3 }
 0xb81   : > { %v10402_v59 = vpop.eup %10401  ;;  %v8055_v54 = vsub.f32 %v7991_v39, %v8023_v16  ;;  %v8184_v24 = vsub.f32 %v17048_v9, %v17044_v55  ;;  %v17104_v9 = vld [vmem:[%s15753_s7 + $0xa8] sm:$0xff] }
 0xb82   : > { %v8056_v51 = vsub.f32 %v7992_v13, %v8024_v30  ;;  %9577 = vmatprep.mubr.msk.bf16.mxu0 %vm1031_vm0, %v7212_v1  ;;  %v6763_v20 = vpop.xlane.xlu0 %6762  ;;  %v7191_v25 = vmul.f32 %v10402_v59, %v7159_v57 }
 0xb83   : > { %v8087_v23 = vmax.f32 %v8055_v54, 0.0  ;;  %v6914_v43 = vpop.xlane.xlu1 %6913  ;;  %v17079_v31 = vmul.f32 0.015625, %v6763_v20  ;;  %v8185_v54 = vsub.f32 %v17057_v5, %v17066_v10  ;;  %v7161_v5 = vsub.f32 %v17104_v9, %v17073_v46 }
 0xb84   : > { %v8088_v40 = vmax.f32 %v8056_v51, 0.0  ;;  %v6968_v41 = vmul.f32 0.015625, %v6914_v43  ;;  %v7213_v6 = vpack.c.bf16 %v7191_v25, %v7190_v37 }
 0xb85   : > { %v8119_v44 = vadd.f32 1e-05, %v8087_v23  ;;  %v7003_v32 = vmul.f32 %v17079_v31, %v17079_v31 }
 0xb86   : > { %v7032_v21 = vsub.f32 %v6968_v41, %v7000_v56  ;;  %9578 = vmatmul.mubr.msk.bf16.gmra.mrb[16].mxu0 %vm1031_vm0, %v7213_v6  ;;  %v7937_v34 = vpop.xlane.xlu0 %7936  ;;  %v8120_v18 = vadd.f32 1e-05, %v8088_v40 }
 0xb87   : > { %10405 = vrsqrt.f32 %v8119_v44  ;;  %v7993_v22 = vmul.f32 0.015625, %v7937_v34  ;;  %v6920_v29 = vpop.xlane.xlu1 %6919  ;;  %v17099_v44 = vld [vmem:[%s15753_s7 + $0xa0] sm:$0xff] }
 0xb88   : > { %v6970_v52 = vmul.f32 0.015625, %v6920_v29  ;;  %v7064_v14 = vmax.f32 %v7032_v21, 0.0  ;;  %10407 = vrsqrt.f32 %v8120_v18  ;;  %v7160_v55 = vsub.f32 %v17099_v44, %v17054_v50 }
 0xb89   : > { %v8057_v2 = vsub.f32 %v7993_v22, %v8025_v0 }
 0xb8a   : > { %v7034_v47 = vsub.f32 %v6970_v52, %v7002_v28  ;;  %v6917_v27 = vpop.xlane.xlu0 %6916  ;;  %v7096_v12 = vadd.f32 1e-05, %v7064_v14  ;;  %v10404_v33 = vpop.eup %10403  ;;  %v17112_v52 = vld [vmem:[%s15753_s7 + $0xb0] sm:$0xff] }
 0xb8b   : > { %v8089_v17 = vmax.f32 %v8057_v2, 0.0  ;;  %v6969_v11 = vmul.f32 0.015625, %v6917_v27  ;;  %v7684_v45 = vpop.xlane.xlu1 %7683  ;;  %v8214_v63 = vmul.f32 %v10404_v33, %v8182_v7  ;;  %v7162_v50 = vsub.f32 %v17112_v52, %v17068_v19  ;;  %v17121_v27 = vld [vmem:[%s15753_s7 + $0xb8] sm:$0xff] }
 0xb8c   : > { %v7066_v62 = vmax.f32 %v7034_v47, 0.0  ;;  %v17087_v1 = vmul.f32 0.015625, %v7684_v45 }
 0xb8d   : > { %v8121_v42 = vadd.f32 1e-05, %v8089_v17  ;;  %v7033_v26 = vsub.f32 %v6969_v11, %v7001_v15  ;;  %v7163_v15 = vsub.f32 %v17121_v27, %v17079_v31 }
 0xb8e   : > { %v6923_v8 = vpop.xlane.xlu0 %6922  ;;  %v7098_v36 = vadd.f32 1e-05, %v7066_v62  ;;  %v8026_v51 = vmul.f32 %v17087_v1, %v17087_v1 }
 0xb8f   : > { %10409 = vrsqrt.f32 %v8121_v42  ;;  %v7065_v49 = vmax.f32 %v7033_v26, 0.0  ;;  %v6971_v35 = vmul.f32 0.015625, %v6923_v8  ;;  %v7690_v61 = vpop.xlane.xlu1 %7689 }
 0xb90   : > { %10411 = vrsqrt.f32 %v7096_v12  ;;  %v17108_v10 = vmul.f32 0.015625, %v7690_v61 }
 0xb91   : > { %v10406_v53 = vpop.eup %10405  ;;  %v7097_v4 = vadd.f32 1e-05, %v7065_v49  ;;  %v7035_v16 = vsub.f32 %v6971_v35, %v7003_v32 }
 0xb92   : > { %v7687_v39 = vpop.xlane.xlu0 %7686  ;;  %v8215_v57 = vmul.f32 %v10406_v53, %v8183_v38  ;;  %v10408_v58 = vpop.eup %10407  ;;  %v8028_v17 = vmul.f32 %v17108_v10, %v17108_v10 }
 0xb93   : > { %10413 = vrsqrt.f32 %v7097_v4  ;;  %v7067_v30 = vmax.f32 %v7035_v16, 0.0  ;;  %v6766_v13 = vpop.xlane.xlu1 %6765  ;;  %v8216_v23 = vmul.f32 %v10408_v58, %v8184_v24  ;;  %v17096_v41 = vmul.f32 0.015625, %v7687_v39 }
 0xb94   : > { %v8238_v59 = vpack.c.bf16 %v8215_v57, %v8214_v63  ;;  %10415 = vrsqrt.f32 %v7098_v36  ;;  %v17118_v14 = vmul.f32 0.015625, %v6766_v13 }
 0xb95   : > { %v7099_v48 = vadd.f32 1e-05, %v7067_v30  ;;  %v8027_v46 = vmul.f32 %v17096_v41, %v17096_v41 }
 0xb96   : > { %8287 = vrot.lane.b32.xlu0 %v8238_v59, %s10724_s16  ;;  %v7693_v3 = vpop.xlane.xlu0 %7692  ;;  %v7004_v32 = vmul.f32 %v17118_v14, %v17118_v14 }
 0xb97   : > { %10417 = vrsqrt.f32 %v7099_v48  ;;  %v7940_v60 = vpop.xlane.xlu1 %7939  ;;  %v17130_v49 = vmul.f32 0.015625, %v7693_v3 }
 0xb98   : > { %v7994_v20 = vmul.f32 0.015625, %v7940_v60 }
 0xb99   : > { %v10410_v37 = vpop.eup %10409  ;;  %v8029_v39 = vmul.f32 %v17130_v49, %v17130_v49 }
 0xb9a   : > { %v8058_v25 = vsub.f32 %v7994_v20, %v8026_v51  ;;  %v6769_v56 = vpop.xlane.xlu0 %6768  ;;  %v8217_v43 = vmul.f32 %v10410_v37, %v8185_v54  ;;  %v10412_v40 = vpop.eup %10411 }
 0xb9b   : > { %v6772_v6 = vpop.xlane.xlu1 %6771  ;;  %v7192_v29 = vmul.f32 %v10412_v40, %v7160_v55  ;;  %v17137_v63 = vmul.f32 0.015625, %v6769_v56 }
 0xb9c   : > { %v8239_v21 = vpack.c.bf16 %v8217_v43, %v8216_v23  ;;  %v8090_v0 = vmax.f32 %v8058_v25, 0.0  ;;  %v17132_v61 = vmul.f32 0.015625, %v6772_v6 }
 0xb9d   : > { %v10414_v34 = vpop.eup %10413  ;;  %v7005_v54 = vmul.f32 %v17137_v63, %v17137_v63 }
 0xb9e   : > { %8289 = vrot.lane.b32.xlu1 %v8239_v21, %s10724_s16  ;;  %v7943_v22 = vpop.xlane.xlu0 %7942  ;;  %v7193_v28 = vmul.f32 %v10414_v34, %v7161_v5  ;;  %v10416_v18 = vpop.eup %10415  ;;  %v8122_v42 = vadd.f32 1e-05, %v8090_v0  ;;  %v7006_v13 = vmul.f32 %v17132_v61, %v17132_v61 }
 0xb9f   : > { %v7995_v2 = vmul.f32 0.015625, %v7943_v22  ;;  %v7946_v47 = vpop.xlane.xlu1 %7945  ;;  %v7194_v8 = vmul.f32 %v10416_v18, %v7162_v50  ;;  %v8186_v22 = vsub.f32 %v17099_v44, %v17087_v1 }
 0xba0   : > { %v7996_v11 = vmul.f32 0.015625, %v7946_v47  ;;  %v7214_v45 = vpack.c.bf16 %v7193_v28, %v7192_v29  ;;  %10419 = vrsqrt.f32 %v8122_v42  ;;  %v8187_v29 = vsub.f32 %v17104_v9, %v17096_v41 }
 0xba1   : > { %v10418_v12 = vpop.eup %10417  ;;  %v8059_v19 = vsub.f32 %v7995_v2, %v8027_v46  ;;  %v8188_v9 = vsub.f32 %v17112_v52, %v17108_v10  ;;  %v17168_v52 = vld [vmem:[%s15753_s7 + $0xc8] sm:$0xff] }
 0xba2   : > { %v8060_v62 = vsub.f32 %v7996_v11, %v8028_v17  ;;  %9581 = vmatprep.mubr.msk.bf16.mxu0 %vm1031_vm0, %v7214_v45  ;;  %v6775_v26 = vpop.xlane.xlu0 %6774  ;;  %v7195_v33 = vmul.f32 %v10418_v12, %v7163_v15 }
 0xba3   : > { %v8091_v31 = vmax.f32 %v8059_v19, 0.0  ;;  %v6926_v35 = vpop.xlane.xlu1 %6925  ;;  %v17143_v51 = vmul.f32 0.015625, %v6775_v26  ;;  %v8189_v19 = vsub.f32 %v17121_v27, %v17130_v49  ;;  %v7165_v27 = vsub.f32 %v17168_v52, %v17137_v63 }
 0xba4   : > { %v8092_v7 = vmax.f32 %v8060_v62, 0.0  ;;  %v6972_v38 = vmul.f32 0.015625, %v6926_v35  ;;  %v7215_v53 = vpack.c.bf16 %v7195_v33, %v7194_v8 }
 0xba5   : > { %v8123_v36 = vadd.f32 1e-05, %v8091_v31  ;;  %v7007_v5 = vmul.f32 %v17143_v51, %v17143_v51 }
 0xba6   : > { %v7036_v4 = vsub.f32 %v6972_v38, %v7004_v32  ;;  %9582 = vmatmul.mubr.msk.bf16.gmra.mrb[20].mxu0 %vm1031_vm0, %v7215_v53  ;;  %v7949_v16 = vpop.xlane.xlu0 %7948  ;;  %v8124_v59 = vadd.f32 1e-05, %v8092_v7 }
 0xba7   : > { %10421 = vrsqrt.f32 %v8123_v36  ;;  %v7997_v57 = vmul.f32 0.015625, %v7949_v16  ;;  %v6932_v30 = vpop.xlane.xlu1 %6931  ;;  %v17163_v36 = vld [vmem:[%s15753_s7 + $0xc0] sm:$0xff] }
 0xba8   : > { %v6974_v48 = vmul.f32 0.015625, %v6932_v30  ;;  %v7068_v58 = vmax.f32 %v7036_v4, 0.0  ;;  %10423 = vrsqrt.f32 %v8124_v59  ;;  %v7164_v10 = vsub.f32 %v17163_v36, %v17118_v14 }
 0xba9   : > { %v8061_v3 = vsub.f32 %v7997_v57, %v8029_v39 }
 0xbaa   : > { %v7038_v60 = vsub.f32 %v6974_v48, %v7006_v13  ;;  %v6929_v24 = vpop.xlane.xlu0 %6928  ;;  %v7100_v56 = vadd.f32 1e-05, %v7068_v58  ;;  %v10420_v55 = vpop.eup %10419  ;;  %v17176_v48 = vld [vmem:[%s15753_s7 + $0xd0] sm:$0xff] }
 0xbab   : > { %v8093_v20 = vmax.f32 %v8061_v3, 0.0  ;;  %v6973_v37 = vmul.f32 0.015625, %v6929_v24  ;;  %v7696_v25 = vpop.xlane.xlu1 %7695  ;;  %v8218_v47 = vmul.f32 %v10420_v55, %v8186_v22  ;;  %v7166_v14 = vsub.f32 %v17176_v48, %v17132_v61  ;;  %v17185_v24 = vld [vmem:[%s15753_s7 + $0xd8] sm:$0xff] }
 0xbac   : > { %v7070_v43 = vmax.f32 %v7038_v60, 0.0  ;;  %v17151_v45 = vmul.f32 0.015625, %v7696_v25 }
 0xbad   : > { %v8125_v23 = vadd.f32 1e-05, %v8093_v20  ;;  %v7037_v40 = vsub.f32 %v6973_v37, %v7005_v54  ;;  %v7167_v54 = vsub.f32 %v17185_v24, %v17143_v51 }
 0xbae   : > { %v6935_v6 = vpop.xlane.xlu0 %6934  ;;  %v7102_v18 = vadd.f32 1e-05, %v7070_v43  ;;  %v8030_v62 = vmul.f32 %v17151_v45, %v17151_v45 }
 0xbaf   : > { %10425 = vrsqrt.f32 %v8125_v23  ;;  %v7069_v21 = vmax.f32 %v7037_v40, 0.0  ;;  %v6975_v34 = vmul.f32 0.015625, %v6935_v6  ;;  %v7702_v0 = vpop.xlane.xlu1 %7701 }
 0xbb0   : > { %10427 = vrsqrt.f32 %v7100_v56  ;;  %v17172_v49 = vmul.f32 0.015625, %v7702_v0 }
 0xbb1   : > { %v10422_v28 = vpop.eup %10421  ;;  %v7101_v50 = vadd.f32 1e-05, %v7069_v21  ;;  %v7039_v46 = vsub.f32 %v6975_v34, %v7007_v5 }
 0xbb2   : > { %v7699_v2 = vpop.xlane.xlu0 %7698  ;;  %v8219_v15 = vmul.f32 %v10422_v28, %v8187_v29  ;;  %v10424_v1 = vpop.eup %10423  ;;  %v8032_v20 = vmul.f32 %v17172_v49, %v17172_v49 }
 0xbb3   : > { %10429 = vrsqrt.f32 %v7101_v50  ;;  %v7071_v17 = vmax.f32 %v7039_v46, 0.0  ;;  %v6778_v11 = vpop.xlane.xlu1 %6777  ;;  %v8220_v31 = vmul.f32 %v10424_v1, %v8188_v9  ;;  %v17160_v38 = vmul.f32 0.015625, %v7699_v2 }
 0xbb4   : > { %v8240_v12 = vpack.c.bf16 %v8219_v15, %v8218_v47  ;;  %10431 = vrsqrt.f32 %v7102_v18  ;;  %v17182_v58 = vmul.f32 0.015625, %v6778_v11 }
 0xbb5   : > { %v7103_v42 = vadd.f32 1e-05, %v7071_v17  ;;  %v8031_v63 = vmul.f32 %v17160_v38, %v17160_v38 }
 0xbb6   : > { %8291 = vrot.lane.b32.xlu0 %v8240_v12, %s10724_s16  ;;  %v7705_v41 = vpop.xlane.xlu0 %7704  ;;  %v7008_v5 = vmul.f32 %v17182_v58, %v17182_v58 }
 0xbb7   : > { %10433 = vrsqrt.f32 %v7103_v42  ;;  %v7952_v44 = vpop.xlane.xlu1 %7951  ;;  %v17194_v21 = vmul.f32 0.015625, %v7705_v41 }
 0xbb8   : > { %v7998_v26 = vmul.f32 0.015625, %v7952_v44 }
 0xbb9   : > { %v10426_v8 = vpop.eup %10425  ;;  %v8033_v2 = vmul.f32 %v17194_v21, %v17194_v21 }
 0xbba   : > { %v8062_v33 = vsub.f32 %v7998_v26, %v8030_v62  ;;  %v6781_v32 = vpop.xlane.xlu0 %6780  ;;  %v8221_v35 = vmul.f32 %v10426_v8, %v8189_v19  ;;  %v10428_v7 = vpop.eup %10427 }
 0xbbb   : > { %v6784_v53 = vpop.xlane.xlu1 %6783  ;;  %v7196_v30 = vmul.f32 %v10428_v7, %v7164_v10  ;;  %v17201_v47 = vmul.f32 0.015625, %v6781_v32 }
 0xbbc   : > { %v8241_v4 = vpack.c.bf16 %v8221_v35, %v8220_v31  ;;  %v8094_v39 = vmax.f32 %v8062_v33, 0.0  ;;  %v17196_v0 = vmul.f32 0.015625, %v6784_v53 }
 0xbbd   : > { %v10430_v16 = vpop.eup %10429  ;;  %v7009_v19 = vmul.f32 %v17201_v47, %v17201_v47 }
 0xbbe   : > { %8293 = vrot.lane.b32.xlu1 %v8241_v4, %s10724_s16  ;;  %v7955_v57 = vpop.xlane.xlu0 %7954  ;;  %v7197_v13 = vmul.f32 %v10430_v16, %v7165_v27  ;;  %v10432_v59 = vpop.eup %10431  ;;  %v8126_v23 = vadd.f32 1e-05, %v8094_v39  ;;  %v7010_v11 = vmul.f32 %v17196_v0, %v17196_v0 }
 0xbbf   : > { %v7999_v3 = vmul.f32 0.015625, %v7955_v57  ;;  %v7958_v60 = vpop.xlane.xlu1 %7957  ;;  %v7198_v6 = vmul.f32 %v10432_v59, %v7166_v14  ;;  %v8190_v57 = vsub.f32 %v17163_v36, %v17151_v45 }
 0xbc0   : > { %v8000_v37 = vmul.f32 0.015625, %v7958_v60  ;;  %v7216_v25 = vpack.c.bf16 %v7197_v13, %v7196_v30  ;;  %10435 = vrsqrt.f32 %v8126_v23  ;;  %v8191_v30 = vsub.f32 %v17168_v52, %v17160_v38 }
 0xbc1   : > { %v10434_v56 = vpop.eup %10433  ;;  %v8063_v61 = vsub.f32 %v7999_v3, %v8031_v63 }
 0xbc2   : > { %v8064_v43 = vsub.f32 %v8000_v37, %v8032_v20  ;;  %9585 = vmatprep.mubr.msk.bf16.mxu0 %vm1031_vm0, %v7216_v25  ;;  %v6787_v40 = vpop.xlane.xlu0 %6786  ;;  %v7199_v55 = vmul.f32 %v10434_v56, %v7167_v54 }
 0xbc3   : > { %v8095_v51 = vmax.f32 %v8063_v61, 0.0  ;;  %v6938_v34 = vpop.xlane.xlu1 %6937  ;;  %v17207_v62 = vmul.f32 0.015625, %v6787_v40 }
 0xbc4   : > { %v8096_v22 = vmax.f32 %v8064_v43, 0.0  ;;  %v6976_v29 = vmul.f32 0.015625, %v6938_v34  ;;  %v7217_v28 = vpack.c.bf16 %v7199_v55, %v7198_v6  ;;  %v8192_v55 = vsub.f32 %v17176_v48, %v17172_v49  ;;  %v10640_v48 = vld [vmem:[%s15753_s7 + $0xe0] sm:$0xff] }
 0xbc5   : > { %v8127_v18 = vadd.f32 1e-05, %v8095_v51  ;;  %v7011_v27 = vmul.f32 %v17207_v62, %v17207_v62 }
 0xbc6   : > { %v7040_v50 = vsub.f32 %v6976_v29, %v7008_v5  ;;  %9586 = vmatmul.mubr.msk.bf16.gmra.mrb[24].mxu0 %vm1031_vm0, %v7217_v28  ;;  %v7961_v46 = vpop.xlane.xlu0 %7960  ;;  %v8128_v12 = vadd.f32 1e-05, %v8096_v22  ;;  %v8193_v5 = vsub.f32 %v17185_v24, %v17194_v21  ;;  %v10641_v24 = vld [vmem:[%s15753_s7 + $0xe8] sm:$0xff] }
 0xbc7   : > { %10437 = vrsqrt.f32 %v8127_v18  ;;  %v8001_v15 = vmul.f32 0.015625, %v7961_v46  ;;  %v6944_v17 = vpop.xlane.xlu1 %6943  ;;  %v7169_v21 = vsub.f32 %v10641_v24, %v17201_v47 }
 0xbc8   : > { %v6978_v42 = vmul.f32 0.015625, %v6944_v17  ;;  %v7072_v1 = vmax.f32 %v7040_v50, 0.0  ;;  %10439 = vrsqrt.f32 %v8128_v12 }
 0xbc9   : > { %v8065_v41 = vsub.f32 %v8001_v15, %v8033_v2 }
 0xbca   : > { %v7042_v44 = vsub.f32 %v6978_v42, %v7010_v11  ;;  %v6941_v9 = vpop.xlane.xlu0 %6940  ;;  %v7104_v32 = vadd.f32 1e-05, %v7072_v1  ;;  %v10436_v10 = vpop.eup %10435  ;;  %v7168_v11 = vsub.f32 %v10640_v48, %v17182_v58  ;;  %v10642_v58 = vld [vmem:[%s15753_s7 + $0xf0] sm:$0xff] }
 0xbcb   : > { %v8097_v26 = vmax.f32 %v8065_v41, 0.0  ;;  %v6977_v8 = vmul.f32 0.015625, %v6941_v9  ;;  %v7708_v33 = vpop.xlane.xlu1 %7707  ;;  %v8222_v54 = vmul.f32 %v10436_v10, %v8190_v57 }
 0xbcc   : > { %v7074_v35 = vmax.f32 %v7042_v44, 0.0  ;;  %v17215_v13 = vmul.f32 0.015625, %v7708_v33 }
 0xbcd   : > { %v8129_v31 = vadd.f32 1e-05, %v8097_v26  ;;  %v7041_v7 = vsub.f32 %v6977_v8, %v7009_v19 }
 0xbce   : > { %v6947_v53 = vpop.xlane.xlu0 %6946  ;;  %v7106_v14 = vadd.f32 1e-05, %v7074_v35  ;;  %v8034_v56 = vmul.f32 %v17215_v13, %v17215_v13  ;;  %v7170_v35 = vsub.f32 %v10642_v58, %v17196_v0 }
 0xbcf   : > { %10441 = vrsqrt.f32 %v8129_v31  ;;  %v7073_v4 = vmax.f32 %v7041_v7, 0.0  ;;  %v6979_v16 = vmul.f32 0.015625, %v6947_v53  ;;  %v7714_v39 = vpop.xlane.xlu1 %7713  ;;  %v10643_v7 = vld [vmem:[%s15753_s7 + $0xf8] sm:$0xff] }
 0xbd0   : > { %10443 = vrsqrt.f32 %v7104_v32  ;;  %v17219_v45 = vmul.f32 0.015625, %v7714_v39  ;;  %v7171_v47 = vsub.f32 %v10643_v7, %v17207_v62  ;;  %v8194_v62 = vsub.f32 %v10640_v48, %v17215_v13 }
 0xbd1   : > { %v10438_v59 = vpop.eup %10437  ;;  %v7105_v63 = vadd.f32 1e-05, %v7073_v4  ;;  %v7043_v3 = vsub.f32 %v6979_v16, %v7011_v27 }
 0xbd2   : > { %v7711_v60 = vpop.xlane.xlu0 %7710  ;;  %v8223_v20 = vmul.f32 %v10438_v59, %v8191_v30  ;;  %v10440_v23 = vpop.eup %10439  ;;  %v8036_v51 = vmul.f32 %v17219_v45, %v17219_v45 }
 0xbd3   : > { %10445 = vrsqrt.f32 %v7105_v63  ;;  %v7075_v37 = vmax.f32 %v7043_v3, 0.0  ;;  %v7964_v25 = vpop.xlane.xlu1 %7963  ;;  %v17222_v40 = vmul.f32 0.015625, %v7711_v60  ;;  %v8224_v50 = vmul.f32 %v10440_v23, %v8192_v55 }
 0xbd4   : > { %v8002_v36 = vmul.f32 0.015625, %v7964_v25  ;;  %v8242_v38 = vpack.c.bf16 %v8223_v20, %v8222_v54  ;;  %10447 = vrsqrt.f32 %v7106_v14 }
 0xbd5   : > { %v7107_v52 = vadd.f32 1e-05, %v7075_v37  ;;  %v8035_v15 = vmul.f32 %v17222_v40, %v17222_v40  ;;  %v8195_v3 = vsub.f32 %v10641_v24, %v17222_v40 }
 0xbd6   : > { %v8066_v61 = vsub.f32 %v8002_v36, %v8034_v56  ;;  %8295 = vrot.lane.b32.xlu0 %v8242_v38, %s10724_s16  ;;  %v7717_v43 = vpop.xlane.xlu0 %7716  ;;  %v8196_v36 = vsub.f32 %v10642_v58, %v17219_v45 }
 0xbd7   : > { %10449 = vrsqrt.f32 %v7107_v52  ;;  %v7970_v6 = vpop.xlane.xlu1 %7969  ;;  %v7749_v17 = vmul.f32 0.015625, %v7717_v43 }
 0xbd8   : > { %v8004_v34 = vmul.f32 0.015625, %v7970_v6  ;;  %v8098_v29 = vmax.f32 %v8066_v61, 0.0 }
 0xbd9   : > { %v10442_v22 = vpop.eup %10441  ;;  %v8037_v33 = vmul.f32 %v7749_v17, %v7749_v17  ;;  %v8197_v38 = vsub.f32 %v10643_v7, %v7749_v17  ;;  %v18379_v17 = vld [vmem:[#allocation39_spill] sm:$0xff] }
 0xbda   : > { %v8068_v28 = vsub.f32 %v8004_v34, %v8036_v51  ;;  %v7967_v18 = vpop.xlane.xlu0 %7966  ;;  %v8225_v46 = vmul.f32 %v10442_v22, %v8193_v5  ;;  %v10444_v2 = vpop.eup %10443  ;;  %v8130_v1 = vadd.f32 1e-05, %v8098_v29 }
 0xbdb   : > { %v8003_v49 = vmul.f32 0.015625, %v7967_v18  ;;  %v7200_v19 = vmul.f32 %v10444_v2, %v7168_v11  ;;  %v8272_v63 = vpop.permute.xlu1 %8271  ;;  %v18380_v11 = vld [vmem:[#allocation40_spill] sm:$0xff] }
 0xbdc   : > { %v8243_v12 = vpack.c.bf16 %v8225_v46, %v8224_v50  ;;  %v8100_v41 = vmax.f32 %v8068_v28, 0.0  ;;  %10451 = vrsqrt.f32 %v8130_v1 }
 0xbdd   : > { %v10446_v42 = vpop.eup %10445  ;;  %v8067_v44 = vsub.f32 %v8003_v49, %v8035_v15  ;;  %v17267_v15 = vld [vmem:[%s17430_s5] ss:$0 sm:$0xff] }
 0xbde   : > { %8297 = vrot.lane.b32.xlu1 %v8243_v12, %s10724_s16  ;;  %v7973_v9 = vpop.xlane.xlu0 %7972  ;;  %v7201_v26 = vmul.f32 %v10446_v42, %v7169_v21  ;;  %v10448_v8 = vpop.eup %10447  ;;  %v8132_v27 = vadd.f32 1e-05, %v8100_v41  ;;  %v18381_v42 = vld [vmem:[#allocation42_spill] sm:$0xff] }
 0xbdf   : > { %v8099_v32 = vmax.f32 %v8067_v44, 0.0  ;;  %v8005_v31 = vmul.f32 0.015625, %v7973_v9  ;;  %v7202_v39 = vmul.f32 %v10448_v8, %v7170_v35  ;;  %v8276_v20 = vpop.permute.xlu1 %8275  ;;  %v18382_v9 = vld [vmem:[#allocation57_spill] sm:$0xff]  ;;  %v18384_v35 = vld [vmem:[#allocation44_spill] sm:$0xff] }
 0xbe0   : > { %v7218_v53 = vpack.c.bf16 %v7201_v26, %v7200_v19 }
 0xbe1   : > { %v10450_v10 = vpop.eup %10449  ;;  %v8131_v4 = vadd.f32 1e-05, %v8099_v32  ;;  %v8069_v16 = vsub.f32 %v8005_v31, %v8037_v33  ;;  %v18383_v32 = vld [vmem:[#allocation43_spill] sm:$0xff] }
 0xbe2   : > { %9589 = vmatprep.mubr.msk.bf16.mxu0 %vm1031_vm0, %v7218_v53  ;;  %v7203_v57 = vmul.f32 %v10450_v10, %v7171_v47  ;;  %v8274_v54 = vpop.permute.xlu0 %8273  ;;  %v18385_v10 = vld [vmem:[#allocation58_spill] sm:$0xff] }
 0xbe3   : > { %10453 = vrsqrt.f32 %v8131_v4  ;;  %v8101_v30 = vmax.f32 %v8069_v16, 0.0  ;;  %v8278_v40 = vpop.permute.xlu1 %8277 }
 0xbe4   : > { %v7219_v59 = vpack.c.bf16 %v7203_v57, %v7202_v39  ;;  %10455 = vrsqrt.f32 %v8132_v27  ;;  %v18386_v39 = vld [vmem:[#allocation45_spill] sm:$0xff] }
 0xbe5   : > { %v8133_v14 = vadd.f32 1e-05, %v8101_v30 }
 0xbe6   : > { %9590 = vmatmul.mubr.msk.bf16.gmra.mrb[28].mxu0 %vm1031_vm0, %v7219_v59  ;;  %v10452_v0 = vpop.eup %10451  ;;  %v8280_v6 = vpop.permute.xlu0 %8279 }
 0xbe7   : > { %10457 = vrsqrt.f32 %v8133_v14  ;;  %9601 = vmatprep.mubr.msk.bf16.mxu0 %vm1031_vm0, %v8272_v63  ;;  %v8226_v37 = vmul.f32 %v10452_v0, %v8194_v62  ;;  %v8282_v55 = vpop.permute.xlu1 %8281  ;;  %v18387_v63 = vld [vmem:[#allocation59_spill] sm:$0xff] }
 0xbea   : > { %v8284_v5 = vpop.permute.xlu0 %8283 }
 0xbed   : > { %v10454_v60 = vpop.eup %10453 }
 0xbee   : > { %9602 = vmatmul.mubr.msk.bf16.vlgmr.msra.gmra.mrb[0].mxu0 %vm1031_vm0, %v8274_v54  ;;  %v8227_v25 = vmul.f32 %v10454_v60, %v8195_v3  ;;  %v10456_v56 = vpop.eup %10455  ;;  %v18388_v3 = vld [vmem:[#allocation60_spill] sm:$0xff] }
 0xbef   : > { %9605 = vmatprep.mubr.msk.bf16.mxu0 %vm1031_vm0, %v8276_v20  ;;  %v8228_v13 = vmul.f32 %v10456_v56, %v8196_v36 }
 0xbf0   : > { %v8244_v52 = vpack.c.bf16 %v8227_v25, %v8226_v37  ;;  %v8286_v45 = vpop.permute.xlu1 %8285  ;;  %v18389_v37 = vld [vmem:[#allocation61_spill] sm:$0xff] }
 0xbf1   : > { %v10458_v23 = vpop.eup %10457 }
 0xbf2   : > { %8299 = vrot.lane.b32.xlu0 %v8244_v52, %s10724_s16  ;;  %v8229_v61 = vmul.f32 %v10458_v23, %v8197_v38  ;;  %v18390_v38 = vld [vmem:[#allocation46_spill] sm:$0xff] }
 0xbf4   : > { %v8245_v43 = vpack.c.bf16 %v8229_v61, %v8228_v13 }
 0xbf6   : > { %8301 = vrot.lane.b32.xlu1 %v8245_v43, %s10724_s16  ;;  %9606 = vmatmul.mubr.msk.bf16.gmra.mrb[4].mxu0 %vm1031_vm0, %v8278_v40  ;;  %v18391_v43 = vld [vmem:[#allocation47_spill] sm:$0xff] }
 0xbf7   : > { %9609 = vmatprep.mubr.msk.bf16.mxu0 %vm1031_vm0, %v8280_v6 }
 0xbfe   : > { %9610 = vmatmul.mubr.msk.bf16.gmra.mrb[8].mxu0 %vm1031_vm0, %v8282_v55  ;;  %v18392_v55 = vld [vmem:[#allocation62_spill] sm:$0xff] }
 0xbff   : > { %9613 = vmatprep.mubr.msk.bf16.mxu0 %vm1031_vm0, %v8284_v5 }
 0xc06   : > { %9614 = vmatmul.mubr.msk.bf16.gmra.mrb[12].mxu0 %vm1031_vm0, %v8286_v45 }
 0xc08   : > { %v8288_v51 = vpop.permute.xlu0 %8287 }
 0xc09   : > { %9617 = vmatprep.mubr.msk.bf16.mxu0 %vm1031_vm0, %v8288_v51 }
 0xc10   : > { %v8290_v34 = vpop.permute.xlu1 %8289 }
 0xc11   : > { %9618 = vmatmul.mubr.msk.bf16.gmra.mrb[16].mxu0 %vm1031_vm0, %v8290_v34  ;;  %v18393_v34 = vld [vmem:[#allocation63_spill] sm:$0xff] }
 0xc28   : > { %v8292_v22 = vpop.permute.xlu0 %8291 }
 0xc29   : > { %9621 = vmatprep.mubr.msk.bf16.mxu0 %vm1031_vm0, %v8292_v22 }
 0xc30   : > { %v8294_v29 = vpop.permute.xlu1 %8293 }
 0xc31   : > { %9622 = vmatmul.mubr.msk.bf16.gmra.mrb[20].mxu0 %vm1031_vm0, %v8294_v29 }
 0xc48   : > { %v8296_v28 = vpop.permute.xlu0 %8295 }
 0xc49   : > { %9625 = vmatprep.mubr.msk.bf16.mxu0 %vm1031_vm0, %v8296_v28 }
 0xc50   : > { %v8298_v18 = vpop.permute.xlu1 %8297 }
 0xc51   : > { %9626 = vmatmul.mubr.msk.bf16.gmra.mrb[24].mxu0 %vm1031_vm0, %v8298_v18  ;;  %v18394_v18 = vld [vmem:[#allocation64_spill] sm:$0xff] }
 0xc64   : > { %v8300_v50 = vpop.permute.xlu0 %8299 }
 0xc65   : > { %9629 = vmatprep.mubr.msk.bf16.mxu0 %vm1031_vm0, %v8300_v50 }
 0xc68   : > { %v8302_v46 = vpop.permute.xlu1 %8301 }
 0xc69   : > { %9630 = vmatmul.mubr.msk.bf16.gmra.mrb[28].mxu0 %vm1031_vm0, %v8302_v46 }
 0xcc1   : > { %v9603_v2 = vpop.f32.mrb[0].mxu0 }
 0xcc2   : > { %v9633_v49 = vadd.f32 %v9603_v2, %v18379_v17  ;;  %v8409_v48 = vpop.f32.mrb[1].mxu0 }
 0xcc3   : > { %v9634_v24 = vadd.f32 %v8409_v48, %v18380_v11  ;;  %v9604_v21 = vpop.f32.mrb[2].mxu0 }
 0xcc4   : > { %v8577_v12 = vadd.f32 %v9633_v49, %v17267_v15  ;;  %v9635_v1 = vadd.f32 %v9604_v21, %v18381_v42  ;;  %v8412_v41 = vpop.f32.mrb[3].mxu0  ;;  %v18395_v49 = vld [vmem:[#allocation65_spill] sm:$0xff] }
 0xcc5   : > { %v8575_v44 = vadd.f32 %v9634_v24, %v17267_v15  ;;  %v9636_v19 = vadd.f32 %v8412_v41, %v18382_v9  ;;  %v18396_v24 = vld [vmem:[#allocation80_spill] sm:$0xff] }
 0xcc6   : > { %8609 = vst [vmem:[%s17276_s30 + $0x10] sm:$0xff] %v8577_v12  ;;  %v8578_v26 = vadd.f32 %v9635_v1, %v17267_v15  ;;  %v18397_v1 = vld [vmem:[#allocation12_spill] sm:$0xff] }
 0xcc7   : > { %8607 = vst [vmem:[%s17276_s30] sm:$0xff] %v8575_v44  ;;  %v8576_v8 = vadd.f32 %v9636_v19, %v17267_v15  ;;  %v18398_v19 = vld [vmem:[#allocation14_spill] sm:$0xff] }
 0xcc8   : > { %8610 = vst [vmem:[%s17276_s30 + $0x18] sm:$0xff] %v8578_v26 }
 0xcc9   : > { %8608 = vst [vmem:[%s17276_s30 + $0x8] sm:$0xff] %v8576_v8  ;;  %v9607_v33 = vpop.f32.mrb[4].mxu0 }
 0xcca   : > { %v9637_v31 = vadd.f32 %v9607_v33, %v18383_v32  ;;  %v8425_v58 = vpop.f32.mrb[5].mxu0 }
 0xccb   : > { %v9638_v7 = vadd.f32 %v8425_v58, %v18384_v35  ;;  %v9608_v47 = vpop.f32.mrb[6].mxu0 }
 0xccc   : > { %v8581_v53 = vadd.f32 %v9637_v31, %v17267_v15  ;;  %v9639_v27 = vadd.f32 %v9608_v47, %v18385_v10  ;;  %v8428_v4 = vpop.f32.mrb[7].mxu0  ;;  %v18399_v31 = vld [vmem:[#allocation13_spill] sm:$0xff] }
 0xccd   : > { %v8579_v16 = vadd.f32 %v9638_v7, %v17267_v15  ;;  %v9640_v57 = vadd.f32 %v8428_v4, %v18386_v39  ;;  %v18400_v7 = vld [vmem:[#allocation66_spill] sm:$0xff] }
 0xcce   : > { %8613 = vst [vmem:[%s17276_s30 + $0x30] sm:$0xff] %v8581_v53  ;;  %v8582_v30 = vadd.f32 %v9639_v27, %v17267_v15  ;;  %v18401_v27 = vld [vmem:[#allocation67_spill] sm:$0xff] }
 0xccf   : > { %8611 = vst [vmem:[%s17276_s30 + $0x20] sm:$0xff] %v8579_v16  ;;  %v8580_v59 = vadd.f32 %v9640_v57, %v17267_v15  ;;  %v18402_v57 = vld [vmem:[#allocation83_spill] sm:$0xff] }
 0xcd0   : > { %8614 = vst [vmem:[%s17276_s30 + $0x38] sm:$0xff] %v8582_v30 }
 0xcd1   : > { %8612 = vst [vmem:[%s17276_s30 + $0x28] sm:$0xff] %v8580_v59  ;;  %v9611_v14 = vpop.f32.mrb[8].mxu0 }
 0xcd2   : > { %v9641_v0 = vadd.f32 %v9611_v14, %v18387_v63  ;;  %v8441_v62 = vpop.f32.mrb[9].mxu0 }
 0xcd3   : > { %v9642_v60 = vadd.f32 %v8441_v62, %v18388_v3  ;;  %v9612_v54 = vpop.f32.mrb[10].mxu0 }
 0xcd4   : > { %v8585_v20 = vadd.f32 %v9641_v0, %v17267_v15  ;;  %v9643_v25 = vadd.f32 %v9612_v54, %v18389_v37  ;;  %v8444_v56 = vpop.f32.mrb[11].mxu0  ;;  %v18403_v0 = vld [vmem:[#allocation91_spill] sm:$0xff] }
 0xcd5   : > { %v8583_v36 = vadd.f32 %v9642_v60, %v17267_v15  ;;  %v9644_v52 = vadd.f32 %v8444_v56, %v18390_v38  ;;  %v18404_v60 = vld [vmem:[#allocation68_spill] sm:$0xff] }
 0xcd6   : > { %8617 = vst [vmem:[%s17276_s30 + $0x50] sm:$0xff] %v8585_v20  ;;  %v8586_v23 = vadd.f32 %v9643_v25, %v17267_v15  ;;  %v18405_v25 = vld [vmem:[#allocation82_spill] sm:$0xff] }
 0xcd7   : > { %8615 = vst [vmem:[%s17276_s30 + $0x40] sm:$0xff] %v8583_v36  ;;  %v8584_v13 = vadd.f32 %v9644_v52, %v17267_v15  ;;  %v18406_v52 = vld [vmem:[#allocation18_spill] sm:$0xff] }
 0xcd8   : > { %8618 = vst [vmem:[%s17276_s30 + $0x58] sm:$0xff] %v8586_v23 }
 0xcd9   : > { %8616 = vst [vmem:[%s17276_s30 + $0x48] sm:$0xff] %v8584_v13  ;;  %v9615_v61 = vpop.f32.mrb[12].mxu0 }
 0xcda   : > { %v9645_v40 = vadd.f32 %v9615_v61, %v18391_v43  ;;  %v8457_v6 = vpop.f32.mrb[13].mxu0 }
 0xcdb   : > { %v9646_v5 = vadd.f32 %v8457_v6, %v18392_v55  ;;  %v9616_v45 = vpop.f32.mrb[14].mxu0 }
 0xcdc   : > { %v8589_v51 = vadd.f32 %v9645_v40, %v17267_v15  ;;  %v9647_v22 = vadd.f32 %v9616_v45, %v18393_v34  ;;  %v8460_v29 = vpop.f32.mrb[15].mxu0  ;;  %v18407_v40 = vld [vmem:[#allocation75_spill] sm:$0xff] }
 0xcdd   : > { %v8587_v28 = vadd.f32 %v9646_v5, %v17267_v15  ;;  %v9648_v50 = vadd.f32 %v8460_v29, %v18394_v18  ;;  %v18408_v5 = vld [vmem:[#allocation77_spill] sm:$0xff] }
 0xcde   : > { %8621 = vst [vmem:[%s17276_s30 + $0x70] sm:$0xff] %v8589_v51  ;;  %v8590_v46 = vadd.f32 %v9647_v22, %v17267_v15  ;;  %v18409_v22 = vld [vmem:[#allocation76_spill] sm:$0xff] }
 0xcdf   : > { %8619 = vst [vmem:[%s17276_s30 + $0x60] sm:$0xff] %v8587_v28  ;;  %v8588_v2 = vadd.f32 %v9648_v50, %v17267_v15  ;;  %v18410_v50 = vld [vmem:[#allocation22_spill] sm:$0xff] }
 0xce0   : > { %8622 = vst [vmem:[%s17276_s30 + $0x78] sm:$0xff] %v8590_v46 }
 0xce1   : > { %8620 = vst [vmem:[%s17276_s30 + $0x68] sm:$0xff] %v8588_v2 }
 0xce4   : > { %v9619_v17 = vpop.f32.mrb[16].mxu0 }
 0xce5   : > { %v9649_v48 = vadd.f32 %v9619_v17, %v18395_v49  ;;  %v8473_v11 = vpop.f32.mrb[17].mxu0 }
 0xce6   : > { %v9650_v21 = vadd.f32 %v8473_v11, %v18396_v24  ;;  %v9620_v12 = vpop.f32.mrb[18].mxu0 }
 0xce7   : > { %v8593_v42 = vadd.f32 %v9649_v48, %v17267_v15  ;;  %v9651_v41 = vadd.f32 %v9620_v12, %v18397_v1  ;;  %v8476_v44 = vpop.f32.mrb[19].mxu0 }
 0xce8   : > { %v8591_v9 = vadd.f32 %v9650_v21, %v17267_v15  ;;  %v9652_v26 = vadd.f32 %v8476_v44, %v18398_v19 }
 0xce9   : > { %8625 = vst [vmem:[%s17276_s30 + $0x90] sm:$0xff] %v8593_v42  ;;  %v8594_v8 = vadd.f32 %v9651_v41, %v17267_v15 }
 0xcea   : > { %8623 = vst [vmem:[%s17276_s30 + $0x80] sm:$0xff] %v8591_v9  ;;  %v8592_v33 = vadd.f32 %v9652_v26, %v17267_v15 }
 0xceb   : > { %8626 = vst [vmem:[%s17276_s30 + $0x98] sm:$0xff] %v8594_v8 }
 0xcec   : > { %8624 = vst [vmem:[%s17276_s30 + $0x88] sm:$0xff] %v8592_v33 }
 0xd04   : > { %v9623_v32 = vpop.f32.mrb[20].mxu0 }
 0xd05   : > { %v9653_v58 = vadd.f32 %v9623_v32, %v18399_v31  ;;  %v8489_v35 = vpop.f32.mrb[21].mxu0 }
 0xd06   : > { %v9654_v47 = vadd.f32 %v8489_v35, %v18400_v7  ;;  %v9624_v53 = vpop.f32.mrb[22].mxu0 }
 0xd07   : > { %v8597_v10 = vadd.f32 %v9653_v58, %v17267_v15  ;;  %v9655_v4 = vadd.f32 %v9624_v53, %v18401_v27  ;;  %v8492_v16 = vpop.f32.mrb[23].mxu0 }
 0xd08   : > { %v8595_v39 = vadd.f32 %v9654_v47, %v17267_v15  ;;  %v9656_v30 = vadd.f32 %v8492_v16, %v18402_v57 }
 0xd09   : > { %8629 = vst [vmem:[%s17276_s30 + $0xb0] sm:$0xff] %v8597_v10  ;;  %v8598_v59 = vadd.f32 %v9655_v4, %v17267_v15 }
 0xd0a   : > { %8627 = vst [vmem:[%s17276_s30 + $0xa0] sm:$0xff] %v8595_v39  ;;  %v8596_v14 = vadd.f32 %v9656_v30, %v17267_v15 }
 0xd0b   : > { %8630 = vst [vmem:[%s17276_s30 + $0xb8] sm:$0xff] %v8598_v59 }
 0xd0c   : > { %8628 = vst [vmem:[%s17276_s30 + $0xa8] sm:$0xff] %v8596_v14 }
 0xd24   : > { %v9627_v63 = vpop.f32.mrb[24].mxu0 }
 0xd25   : > { %v9657_v62 = vadd.f32 %v9627_v63, %v18403_v0  ;;  %v8505_v3 = vpop.f32.mrb[25].mxu0 }
 0xd26   : > { %v9658_v54 = vadd.f32 %v8505_v3, %v18404_v60  ;;  %v9628_v20 = vpop.f32.mrb[26].mxu0 }
 0xd27   : > { %v8601_v37 = vadd.f32 %v9657_v62, %v17267_v15  ;;  %v9659_v56 = vadd.f32 %v9628_v20, %v18405_v25  ;;  %v8508_v36 = vpop.f32.mrb[27].mxu0 }
 0xd28   : > { %v8599_v38 = vadd.f32 %v9658_v54, %v17267_v15  ;;  %v9660_v23 = vadd.f32 %v8508_v36, %v18406_v52 }
 0xd29   : > { %8633 = vst [vmem:[%s17276_s30 + $0xd0] sm:$0xff] %v8601_v37  ;;  %v8602_v13 = vadd.f32 %v9659_v56, %v17267_v15 }
 0xd2a   : > { %8631 = vst [vmem:[%s17276_s30 + $0xc0] sm:$0xff] %v8599_v38  ;;  %v8600_v61 = vadd.f32 %v9660_v23, %v17267_v15 }
 0xd2b   : > { %8634 = vst [vmem:[%s17276_s30 + $0xd8] sm:$0xff] %v8602_v13 }
 0xd2c   : > { %8632 = vst [vmem:[%s17276_s30 + $0xc8] sm:$0xff] %v8600_v61 }
 0xd3c   : > { %v9631_v43 = vpop.f32.mrb[28].mxu0 }
 0xd3d   : > { %v9661_v6 = vadd.f32 %v9631_v43, %v18407_v40  ;;  %v8521_v55 = vpop.f32.mrb[29].mxu0 }
 0xd3e   : > { %v9662_v45 = vadd.f32 %v8521_v55, %v18408_v5  ;;  %v9632_v51 = vpop.f32.mrb[30].mxu0 }
 0xd3f   : > { %v8605_v34 = vadd.f32 %v9661_v6, %v17267_v15  ;;  %v9663_v29 = vadd.f32 %v9632_v51, %v18409_v22  ;;  %v8524_v28 = vpop.f32.mrb[31].mxu0 }
 0xd40   : > { %v8603_v18 = vadd.f32 %v9662_v45, %v17267_v15  ;;  %v9664_v46 = vadd.f32 %v8524_v28, %v18410_v50 }
 0xd41   : > { %8637 = vst [vmem:[%s17276_s30 + $0xf0] sm:$0xff] %v8605_v34  ;;  %v8606_v2 = vadd.f32 %v9663_v29, %v17267_v15 }
 0xd42   : > { %8635 = vst [vmem:[%s17276_s30 + $0xe0] sm:$0xff] %v8603_v18  ;;  %v8604_v17 = vadd.f32 %v9664_v46, %v17267_v15 }
 0xd43   : > { %8638 = vst [vmem:[%s17276_s30 + $0xf8] sm:$0xff] %v8606_v2 }
 0xd44   : > { %8636 = vst [vmem:[%s17276_s30 + $0xe8] sm:$0xff] %v8604_v17 }
 0xd45   : > { %10657 = shalt.err (!%p10654_p7)
}
 0xd46   : > { %s10658_s13 = scalar_lea.hbm %s17369_s18, 4096  ;;  %s10662_s7 = scalar_lea.hbm %s17431_s6, 32768 }
 0xd47   : > { %p10659_p8 = scmp.ne.s32.totalorder %s17369_s18, %s10658_s13  ;;  %p10663_p12 = scmp.lt.u32.totalorder %s17369_s18, %s17431_s6 }
 0xd48   : > { %p10664_p13 = scmp.lt.u32.totalorder %s10662_s7, %s10658_s13  ;;  %p10666_p1 = scmp.lt.u32.totalorder %s10658_s13, %s17369_s18 }
 0xd49   : > { %p10660_p10 = pnand %p10659_p8, %p10806_p5 }
 0xd4a   : > { %p10665_p0 = por %p10664_p13, %p10663_p12 }
 0xd4b   : > { %p10661_p11 = pneg %p10660_p10 }
 0xd4c   : > { %p10667_p2 = por %p10666_p1, %p10665_p0 }
 0xd4e   : > { %p10668_p3 = pnand %p10667_p2, %p10661_p11 }
 0xd50   : > { %10671 = shalt.err (!%p10668_p3)
}
 0xd51   : > { %s10726_s27 = smov 128   ;;  %s10727_s12 = smov 8  }
 0xd52   : > { %9857 = dma.vmem_to_hbm [thread:$0]  (%p10806_p5), %s17371_s9, 4096, %s17369_s18, %s17379_s24, %s10726_s27, %s10726_s27, %s10727_s12  }
 0xd53 PF: > { %p9863_p4 = scmp.ge.s32.totalorder %s10722_s26, 2  ;;  %s8671_s19 = sand.u32 1, %s10702_s21  }
 0xd54   : > { %s8672_s20 = scalar_lea.sflag [#allocation7], %s8671_s19 }
 0xd55   : > { %p9860_p6 = pnand %p9863_p4, %p10817_p9 }
 0xd57   : > { %10697 = dma.done.wait (!%p9860_p6), %s8672_s20, 4096  }
 0xd58   : > { %10699 = vsyncadd (!%p9860_p6), %s8672_s20, 4294963200  ;;  %s19_s26 = sadd.s32 1, %s10722_s26   ;;  %s18411_s21 = smov %s10706_s22 }
 0xd59   : > { %p16_p7 = scmp.ge.s32.totalorder %s19_s26, 10   ;;  %s18412_s22 = smov %s10710_s23 }
 0xd5a   : > { %s18413_s23 = smov %s10815_s10  ;;  %s18414_s24 = smov %s10718_s25 }
 0xd5b   : > { %s18415_s25 = smov %s18417_s29  ;;  %18 = sbr.rel (!%p16_p7) target bundleno = 4 (0x4), region = 267 }
 0xd62   :  { %8677 = vsyncpa [#allocation7], 1 }
 0xd63   :  { %8679 = vsyncpa [#allocation7 + $0x1], 1 }

</bundles_post_ra>
